<compile_context>
chip_gen: v5e
topology: v5e:2x2
jax: 0.10.0
libtpu: 0.0.40
codegen_flags: <defaults>
</compile_context>

<pallas_src>
import numpy as np
import jax
import jax.numpy as jnp
from jax import lax
from jax.experimental import pallas as pl
from jax.experimental.pallas import tpu as pltpu


# ---------- host helpers ----------

def _interp_matrix(in_size: int, out_size: int) -> np.ndarray:
    """Linear interpolation matrix (out_size, in_size), align_corners=True."""
    if in_size == 1:
        return np.ones((out_size, 1), np.float32)
    if out_size == 1:
        m = np.zeros((1, in_size), np.float32)
        m[0, 0] = 1.0
        return m
    src = np.arange(out_size, dtype=np.float64) * (in_size - 1) / (out_size - 1)
    lo = np.clip(np.floor(src).astype(np.int64), 0, in_size - 2)
    frac = (src - lo).astype(np.float32)
    m = np.zeros((out_size, in_size), np.float32)
    rows = np.arange(out_size)
    m[rows, lo] = 1.0 - frac
    m[rows, lo + 1] = frac
    return m


def _row_chunk(dp: int, cap: int = 8) -> int:
    """Largest divisor of dp that is <= cap (bounds the per-chunk accumulator)."""
    for t in range(min(dp, cap), 0, -1):
        if dp % t == 0:
            return t
    return 1


# ---------- fused pallas kernel ----------

def _fused_up_conv(x1d, x2t, mH, w1a, w1b, w2, scale1, shift1, scale2, shift2):
    """x1d: (B, Dp, C1, H)   D-upsampled x1, channels in the middle, H last
       x2t: (B, Dp, Hp, C2)  skip connection, channels-last
       mH : (Hp, H)          H-axis interpolation matrix
       w1a: (9, C2, Cout)    conv1 taps for the x2 channel group   (kd*3+kh major)
       w1b: (9, C1, Cout)    conv1 taps for the up(x1) channel group
       w2 : (9, Cout, Cout)  conv2 taps
       returns (B, Dp*Hp, Cout) channels-last flattened pixels."""
    B, Dp, C1, H = x1d.shape
    _, Dp2, Hp, C2 = x2t.shape
    Ho = mH.shape[0]
    Cout = w1a.shape[-1]
    assert Dp2 == Dp and Ho == Hp
    td = _row_chunk(Dp)

    def kernel(x1_ref, x2_ref, mh_ref, w1a_ref, w1b_ref, w2_ref,
               s1_ref, b1_ref, s2_ref, b2_ref, o_ref,
               xp2_scr, xp1_scr, xpy_scr):
        # --- zero the 1-pixel halo borders of the padded VMEM scratches ---
        for ref in (xp2_scr, xp1_scr, xpy_scr):
            Dr, Hr, Cr = ref.shape
            z_row = jnp.zeros((1, Hr, Cr), jnp.float32)
            z_col = jnp.zeros((Dr, 1, Cr), jnp.float32)
            ref[0:1, :, :] = z_row
            ref[Dr - 1:Dr, :, :] = z_row
            ref[:, 0:1, :] = z_col
            ref[:, Hr - 1:Hr, :] = z_col

        # --- in-kernel H-axis upsample of the (already D-upsampled) x1 slab ---
        # batched matmul, batch = output D rows; result is channels-last.
        x1b = x1_ref[0]                                            # (Dp, C1, H)
        mhb = jnp.broadcast_to(mh_ref[...][None, :, :], (Dp, Hp, H))
        u = lax.dot_general(
            mhb, x1b,
            dimension_numbers=(((2,), (2,)), ((0,), (0,))),
            preferred_element_type=jnp.float32)                    # (Dp, Hp, C1)

        # concat-free channel grouping: x2 and up(x1) live in separate padded
        # scratches; conv1 simply accumulates over both K-groups.
        xp1_scr[1:Dp + 1, 1:Hp + 1, :] = u
        xp2_scr[1:Dp + 1, 1:Hp + 1, :] = x2_ref[0]

        def conv(groups, s_ref, b_ref, write):
            scale = s_ref[...]                                     # (1, Cout)
            shift = b_ref[...]
            for d0 in range(0, Dp, td):                            # D-row chunks
                acc = jnp.zeros((td * Hp, Cout), jnp.float32)
                for xp, wr in groups:
                    Cg = xp.shape[2]
                    for kd in range(3):
                        for kh in range(3):
                            blk = xp[d0 + kd:d0 + kd + td,
                                     kh:kh + Hp, :].reshape(td * Hp, Cg)
                            acc = acc + jnp.dot(
                                blk, wr[kd * 3 + kh],
                                preferred_element_type=jnp.float32)
                y = jnp.maximum(acc * scale + shift, 0.0)          # (td*Hp, Cout)
                write(d0, y)

        def write_mid(d0, y):
            xpy_scr[1 + d0:1 + d0 + td, 1:Hp + 1, :] = y.reshape(td, Hp, Cout)

        def write_out(d0, y):
            o_ref[:, d0 * Hp:(d0 + td) * Hp, :] = y[None, :, :]

        conv([(xp2_scr, w1a_ref), (xp1_scr, w1b_ref)], s1_ref, b1_ref, write_mid)
        conv([(xpy_scr, w2_ref)], s2_ref, b2_ref, write_out)

    return pl.pallas_call(
        kernel,
        out_shape=jax.ShapeDtypeStruct((B, Dp * Hp, Cout), jnp.float32),
        grid=(B,),
        in_specs=[
            pl.BlockSpec((1, Dp, C1, H), lambda b: (b, 0, 0, 0)),
            pl.BlockSpec((1, Dp, Hp, C2), lambda b: (b, 0, 0, 0)),
            pl.BlockSpec((Ho, H), lambda b: (0, 0)),
            pl.BlockSpec((9, C2, Cout), lambda b: (0, 0, 0)),
            pl.BlockSpec((9, C1, Cout), lambda b: (0, 0, 0)),
            pl.BlockSpec((9, Cout, Cout), lambda b: (0, 0, 0)),
            pl.BlockSpec((1, Cout), lambda b: (0, 0)),
            pl.BlockSpec((1, Cout), lambda b: (0, 0)),
            pl.BlockSpec((1, Cout), lambda b: (0, 0)),
            pl.BlockSpec((1, Cout), lambda b: (0, 0)),
        ],
        out_specs=pl.BlockSpec((1, Dp * Hp, Cout), lambda b: (b, 0, 0)),
        scratch_shapes=[
            pltpu.VMEM((Dp + 2, Hp + 2, C2), jnp.float32),   # padded x2 group
            pltpu.VMEM((Dp + 2, Hp + 2, C1), jnp.float32),   # padded up(x1) group
            pltpu.VMEM((Dp + 2, Hp + 2, Cout), jnp.float32),  # padded conv1 output
        ],
        compiler_params=pltpu.CompilerParams(
            dimension_semantics=("parallel",),
            vmem_limit_bytes=48 * 1024 * 1024),
    )(x1d, x2t, mH, w1a, w1b, w2,
      scale1.reshape(1, Cout), shift1.reshape(1, Cout),
      scale2.reshape(1, Cout), shift2.reshape(1, Cout))


class UpPallas:
    """Pallas equivalent of the PyTorch `Up` block (inference semantics)."""

    def __init__(self, in_channels, out_channels, dropout_probability, key):
        self.in_channels = in_channels
        self.out_channels = out_channels
        # TODO(synk): Dropout is identity at inference; training-mode masking not implemented.
        self.dropout_probability = dropout_probability
        eps = 1e-5
        ks = jax.random.split(key, 12)

        def p(k, shape, s=0.1):
            return s * jax.random.normal(k, shape, jnp.float32)

        # conv1: PyTorch weight (Cout, Cin, 3, 3, 1) stored here as (3, 3, Cin, Cout)
        self.w1 = p(ks[0], (3, 3, in_channels, out_channels))
        b1 = p(ks[1], (out_channels,))
        g1 = 1.0 + p(ks[2], (out_channels,))
        be1 = p(ks[3], (out_channels,))
        m1 = p(ks[4], (out_channels,))
        v1 = 0.5 + jnp.abs(p(ks[5], (out_channels,)))
        self.scale1 = g1 / jnp.sqrt(v1 + eps)
        self.shift1 = (b1 - m1) * self.scale1 + be1
        # conv2
        self.w2 = p(ks[6], (3, 3, out_channels, out_channels))
        b2 = p(ks[7], (out_channels,))
        g2 = 1.0 + p(ks[8], (out_channels,))
        be2 = p(ks[9], (out_channels,))
        m2 = p(ks[10], (out_channels,))
        v2 = 0.5 + jnp.abs(p(ks[11], (out_channels,)))
        self.scale2 = g2 / jnp.sqrt(v2 + eps)
        self.shift2 = (b2 - m2) * self.scale2 + be2

    def __call__(self, x1, x2):
        # x1: (N, C1, D, H, W), x2: (N, C2, 2D, 2H, W), C1 + C2 == in_channels
        N, C1, D, H, W = x1.shape
        C2 = x2.shape[1]
        assert C1 + C2 == self.in_channels
        Dp, Hp = 2 * D, 2 * H
        Cout = self.out_channels

        mD = jnp.asarray(_interp_matrix(D, Dp))          # (Dp, D)
        mH = jnp.asarray(_interp_matrix(H, Hp))          # (Hp, H)

        # D-axis half of the upsample fused into the layout einsum on the SMALL
        # pre-upsample x1 (one cheap XLA pass); H-axis half runs inside the kernel.
        x1d = jnp.einsum('ncdhw,Dd->nwDch', x1, mD).reshape(N * W, Dp, C1, H)
        # skip connection -> channels-last merged batch (W behaves like batch).
        x2t = jnp.transpose(x2, (0, 4, 2, 3, 1)).reshape(N * W, Dp, Hp, C2)

        # weight groups: PyTorch cat order is [x2 | up(x1)] along input channels.
        w1a = self.w1[:, :, :C2, :].reshape(9, C2, Cout)
        w1b = self.w1[:, :, C2:, :].reshape(9, C1, Cout)
        w2r = self.w2.reshape(9, Cout, Cout)

        out = _fused_up_conv(x1d, x2t, mH, w1a, w1b, w2r,
                             self.scale1, self.shift1, self.scale2, self.shift2)
        out = out.reshape(N, W, Dp, Hp, Cout)
        return jnp.transpose(out, (0, 4, 2, 3, 1))       # (N, Cout, Dp, Hp, W)


# ---------- pure-JAX reference (correctness check) ----------

def _reference(up, x1, x2):
    N, C1, D, H, W = x1.shape
    mD = jnp.asarray(_interp_matrix(D, 2 * D))
    mH = jnp.asarray(_interp_matrix(H, 2 * H))
    x1u = jnp.einsum('ncdhw,Dd,Hh->ncDHw', x1, mD, mH)
    x = jnp.concatenate([x2, x1u], axis=1)
    N, C, Dp, Hp, W = x.shape
    x = jnp.transpose(x, (0, 4, 2, 3, 1)).reshape(N * W, Dp, Hp, C)

    def block(v, w, s, t):
        y = lax.conv_general_dilated(v, w, (1, 1), 'SAME',
                                     dimension_numbers=('NHWC', 'HWIO', 'NHWC'))
        return jnp.maximum(y * s[None, None, None, :] + t[None, None, None, :], 0.0)

    y = block(x, up.w1, up.scale1, up.shift1)
    y = block(y, up.w2, up.scale2, up.shift2)
    y = y.reshape(N, W, Dp, Hp, -1)
    return jnp.transpose(y, (0, 4, 2, 3, 1))


if __name__ == "__main__":
    N, C1, C2, D, H, W = 2, 4, 4, 8, 8, 4
    in_channels, out_channels = C1 + C2, 4
    key = jax.random.PRNGKey(0)
    kp, kx1, kx2 = jax.random.split(key, 3)
    up = UpPallas(in_channels, out_channels, dropout_probability=0.1, key=kp)
    x1 = jax.random.normal(kx1, (N, C1, D, H, W), jnp.float32)
    x2 = jax.random.normal(kx2, (N, C2, 2 * D, 2 * H, W), jnp.float32)

    out = jax.block_until_ready(up(x1, x2))
    assert out.shape == (N, out_channels, 2 * D, 2 * H, W), out.shape

    ref = jax.block_until_ready(_reference(up, x1, x2))
    np.testing.assert_allclose(np.asarray(out), np.asarray(ref),
                               atol=2e-3, rtol=2e-3)
    print("KERNEL_OK")
</pallas_src>

<mosaic_0001>
module attributes {stable_mosaic.version = 11 : i64} {
  func.func @kernel(%arg0: i32, %arg1: memref<1x16x4x8xf32, #tpu.memory_space<vmem>>, %arg2: memref<1x16x16x4xf32, #tpu.memory_space<vmem>>, %arg3: memref<16x8xf32, #tpu.memory_space<vmem>>, %arg4: memref<9x4x4xf32, #tpu.memory_space<vmem>>, %arg5: memref<9x4x4xf32, #tpu.memory_space<vmem>>, %arg6: memref<9x4x4xf32, #tpu.memory_space<vmem>>, %arg7: memref<1x4xf32, #tpu.memory_space<vmem>>, %arg8: memref<1x4xf32, #tpu.memory_space<vmem>>, %arg9: memref<1x4xf32, #tpu.memory_space<vmem>>, %arg10: memref<1x4xf32, #tpu.memory_space<vmem>>, %arg11: memref<1x256x4xf32, #tpu.memory_space<vmem>>, %arg12: memref<18x18x4xf32, #tpu.memory_space<vmem>>, %arg13: memref<18x18x4xf32, #tpu.memory_space<vmem>>, %arg14: memref<18x18x4xf32, #tpu.memory_space<vmem>>) attributes {dimension_semantics = [#tpu.dimension_semantics<parallel>], iteration_bounds = array<i64: 8>, scalar_prefetch = 0 : i64, scratch_operands = 3 : i64, tpu.core_type = #tpu.core_type<tc>, window_params = [{transform_indices = @transform_0, window_bounds = array<i64: 1, 16, 4, 8>}, {transform_indices = @transform_1, window_bounds = array<i64: 1, 16, 16, 4>}, {pipeline_mode = #tpu.pipeline_mode<synchronous>, transform_indices = @transform_2, window_bounds = array<i64: 16, 8>}, {pipeline_mode = #tpu.pipeline_mode<synchronous>, transform_indices = @transform_3, window_bounds = array<i64: 9, 4, 4>}, {pipeline_mode = #tpu.pipeline_mode<synchronous>, transform_indices = @transform_4, window_bounds = array<i64: 9, 4, 4>}, {pipeline_mode = #tpu.pipeline_mode<synchronous>, transform_indices = @transform_5, window_bounds = array<i64: 9, 4, 4>}, {pipeline_mode = #tpu.pipeline_mode<synchronous>, transform_indices = @transform_6, window_bounds = array<i64: 1, 4>}, {pipeline_mode = #tpu.pipeline_mode<synchronous>, transform_indices = @transform_7, window_bounds = array<i64: 1, 4>}, {pipeline_mode = #tpu.pipeline_mode<synchronous>, transform_indices = @transform_8, window_bounds = array<i64: 1, 4>}, {pipeline_mode = #tpu.pipeline_mode<synchronous>, transform_indices = @transform_9, window_bounds = array<i64: 1, 4>}, {transform_indices = @transform_10, window_bounds = array<i64: 1, 256, 4>}]} {
    %cst = arith.constant 0.000000e+00 : f32
    %0 = vector.broadcast %cst : f32 to vector<1x18x4xf32>
    %cst_0 = arith.constant 0.000000e+00 : f32
    %1 = vector.broadcast %cst_0 : f32 to vector<18x1x4xf32>
    %c0 = arith.constant 0 : index
    %c0_1 = arith.constant 0 : index
    %c0_2 = arith.constant 0 : index
    %2 = vector.load %arg12[%c0, %c0_1, %c0_2] : memref<18x18x4xf32, #tpu.memory_space<vmem>>, vector<1x18x4xf32>
    tpu.vector_store %arg12[%c0, %c0_1, %c0_2], %0 {strides = array<i32>} : memref<18x18x4xf32, #tpu.memory_space<vmem>>, vector<1x18x4xf32>,
    %c17 = arith.constant 17 : index
    %c0_3 = arith.constant 0 : index
    %c0_4 = arith.constant 0 : index
    %3 = vector.load %arg12[%c17, %c0_3, %c0_4] : memref<18x18x4xf32, #tpu.memory_space<vmem>>, vector<1x18x4xf32>
    tpu.vector_store %arg12[%c17, %c0_3, %c0_4], %0 {strides = array<i32>} : memref<18x18x4xf32, #tpu.memory_space<vmem>>, vector<1x18x4xf32>,
    %c0_5 = arith.constant 0 : index
    %c0_6 = arith.constant 0 : index
    %c0_7 = arith.constant 0 : index
    %4 = vector.load %arg12[%c0_5, %c0_6, %c0_7] : memref<18x18x4xf32, #tpu.memory_space<vmem>>, vector<18x1x4xf32>
    tpu.vector_store %arg12[%c0_5, %c0_6, %c0_7], %1 {strides = array<i32>} : memref<18x18x4xf32, #tpu.memory_space<vmem>>, vector<18x1x4xf32>,
    %c0_8 = arith.constant 0 : index
    %c17_9 = arith.constant 17 : index
    %c0_10 = arith.constant 0 : index
    %5 = vector.load %arg12[%c0_8, %c17_9, %c0_10] : memref<18x18x4xf32, #tpu.memory_space<vmem>>, vector<18x1x4xf32>
    tpu.vector_store %arg12[%c0_8, %c17_9, %c0_10], %1 {strides = array<i32>} : memref<18x18x4xf32, #tpu.memory_space<vmem>>, vector<18x1x4xf32>,
    %cst_11 = arith.constant 0.000000e+00 : f32
    %6 = vector.broadcast %cst_11 : f32 to vector<1x18x4xf32>
    %cst_12 = arith.constant 0.000000e+00 : f32
    %7 = vector.broadcast %cst_12 : f32 to vector<18x1x4xf32>
    %c0_13 = arith.constant 0 : index
    %c0_14 = arith.constant 0 : index
    %c0_15 = arith.constant 0 : index
    %8 = vector.load %arg13[%c0_13, %c0_14, %c0_15] : memref<18x18x4xf32, #tpu.memory_space<vmem>>, vector<1x18x4xf32>
    tpu.vector_store %arg13[%c0_13, %c0_14, %c0_15], %6 {strides = array<i32>} : memref<18x18x4xf32, #tpu.memory_space<vmem>>, vector<1x18x4xf32>,
    %c17_16 = arith.constant 17 : index
    %c0_17 = arith.constant 0 : index
    %c0_18 = arith.constant 0 : index
    %9 = vector.load %arg13[%c17_16, %c0_17, %c0_18] : memref<18x18x4xf32, #tpu.memory_space<vmem>>, vector<1x18x4xf32>
    tpu.vector_store %arg13[%c17_16, %c0_17, %c0_18], %6 {strides = array<i32>} : memref<18x18x4xf32, #tpu.memory_space<vmem>>, vector<1x18x4xf32>,
    %c0_19 = arith.constant 0 : index
    %c0_20 = arith.constant 0 : index
    %c0_21 = arith.constant 0 : index
    %10 = vector.load %arg13[%c0_19, %c0_20, %c0_21] : memref<18x18x4xf32, #tpu.memory_space<vmem>>, vector<18x1x4xf32>
    tpu.vector_store %arg13[%c0_19, %c0_20, %c0_21], %7 {strides = array<i32>} : memref<18x18x4xf32, #tpu.memory_space<vmem>>, vector<18x1x4xf32>,
    %c0_22 = arith.constant 0 : index
    %c17_23 = arith.constant 17 : index
    %c0_24 = arith.constant 0 : index
    %11 = vector.load %arg13[%c0_22, %c17_23, %c0_24] : memref<18x18x4xf32, #tpu.memory_space<vmem>>, vector<18x1x4xf32>
    tpu.vector_store %arg13[%c0_22, %c17_23, %c0_24], %7 {strides = array<i32>} : memref<18x18x4xf32, #tpu.memory_space<vmem>>, vector<18x1x4xf32>,
    %cst_25 = arith.constant 0.000000e+00 : f32
    %12 = vector.broadcast %cst_25 : f32 to vector<1x18x4xf32>
    %cst_26 = arith.constant 0.000000e+00 : f32
    %13 = vector.broadcast %cst_26 : f32 to vector<18x1x4xf32>
    %c0_27 = arith.constant 0 : index
    %c0_28 = arith.constant 0 : index
    %c0_29 = arith.constant 0 : index
    %14 = vector.load %arg14[%c0_27, %c0_28, %c0_29] : memref<18x18x4xf32, #tpu.memory_space<vmem>>, vector<1x18x4xf32>
    tpu.vector_store %arg14[%c0_27, %c0_28, %c0_29], %12 {strides = array<i32>} : memref<18x18x4xf32, #tpu.memory_space<vmem>>, vector<1x18x4xf32>,
    %c17_30 = arith.constant 17 : index
    %c0_31 = arith.constant 0 : index
    %c0_32 = arith.constant 0 : index
    %15 = vector.load %arg14[%c17_30, %c0_31, %c0_32] : memref<18x18x4xf32, #tpu.memory_space<vmem>>, vector<1x18x4xf32>
    tpu.vector_store %arg14[%c17_30, %c0_31, %c0_32], %12 {strides = array<i32>} : memref<18x18x4xf32, #tpu.memory_space<vmem>>, vector<1x18x4xf32>,
    %c0_33 = arith.constant 0 : index
    %c0_34 = arith.constant 0 : index
    %c0_35 = arith.constant 0 : index
    %16 = vector.load %arg14[%c0_33, %c0_34, %c0_35] : memref<18x18x4xf32, #tpu.memory_space<vmem>>, vector<18x1x4xf32>
    tpu.vector_store %arg14[%c0_33, %c0_34, %c0_35], %13 {strides = array<i32>} : memref<18x18x4xf32, #tpu.memory_space<vmem>>, vector<18x1x4xf32>,
    %c0_36 = arith.constant 0 : index
    %c17_37 = arith.constant 17 : index
    %c0_38 = arith.constant 0 : index
    %17 = vector.load %arg14[%c0_36, %c17_37, %c0_38] : memref<18x18x4xf32, #tpu.memory_space<vmem>>, vector<18x1x4xf32>
    tpu.vector_store %arg14[%c0_36, %c17_37, %c0_38], %13 {strides = array<i32>} : memref<18x18x4xf32, #tpu.memory_space<vmem>>, vector<18x1x4xf32>,
    %c0_39 = arith.constant 0 : index
    %c0_40 = arith.constant 0 : index
    %c0_41 = arith.constant 0 : index
    %c0_42 = arith.constant 0 : index
    %18 = vector.load %arg1[%c0_39, %c0_40, %c0_41, %c0_42] : memref<1x16x4x8xf32, #tpu.memory_space<vmem>>, vector<1x16x4x8xf32>
    %19 = vector.shape_cast %18 : vector<1x16x4x8xf32> to vector<16x4x8xf32>
    %c0_43 = arith.constant 0 : index
    %c0_44 = arith.constant 0 : index
    %20 = vector.load %arg3[%c0_43, %c0_44] : memref<16x8xf32, #tpu.memory_space<vmem>>, vector<16x8xf32>
    %21 = vector.shape_cast %20 : vector<16x8xf32> to vector<1x16x8xf32>
    %22 = vector.shape_cast %21 : vector<1x16x8xf32> to vector<1x16x8xf32>
    %23 = vector.broadcast %22 : vector<1x16x8xf32> to vector<16x16x8xf32>
    %cst_45 = arith.constant dense<0.000000e+00> : vector<16x16x4xf32>
    %24 = tpu.matmul %23, %19, %cst_45 {dimension_numbers = #tpu.dot_dimension_numbers<[2], [2], [1], [1], [0, 0, 0, 1, 1, 1], [0], [0]>} : vector<16x16x8xf32>, vector<16x4x8xf32>, vector<16x16x4xf32> -> vector<16x16x4xf32>
    %c1 = arith.constant 1 : index
    %c1_46 = arith.constant 1 : index
    %c0_47 = arith.constant 0 : index
    %25 = vector.load %arg13[%c1, %c1_46, %c0_47] : memref<18x18x4xf32, #tpu.memory_space<vmem>>, vector<16x16x4xf32>
    tpu.vector_store %arg13[%c1, %c1_46, %c0_47], %24 {strides = array<i32>} : memref<18x18x4xf32, #tpu.memory_space<vmem>>, vector<16x16x4xf32>,
    %c0_48 = arith.constant 0 : index
    %c0_49 = arith.constant 0 : index
    %c0_50 = arith.constant 0 : index
    %c0_51 = arith.constant 0 : index
    %26 = vector.load %arg2[%c0_48, %c0_49, %c0_50, %c0_51] : memref<1x16x16x4xf32, #tpu.memory_space<vmem>>, vector<1x16x16x4xf32>
    %27 = vector.shape_cast %26 : vector<1x16x16x4xf32> to vector<16x16x4xf32>
    %c1_52 = arith.constant 1 : index
    %c1_53 = arith.constant 1 : index
    %c0_54 = arith.constant 0 : index
    %28 = vector.load %arg12[%c1_52, %c1_53, %c0_54] : memref<18x18x4xf32, #tpu.memory_space<vmem>>, vector<16x16x4xf32>
    tpu.vector_store %arg12[%c1_52, %c1_53, %c0_54], %27 {strides = array<i32>} : memref<18x18x4xf32, #tpu.memory_space<vmem>>, vector<16x16x4xf32>,
    %c0_55 = arith.constant 0 : index
    %c0_56 = arith.constant 0 : index
    %29 = vector.load %arg7[%c0_55, %c0_56] : memref<1x4xf32, #tpu.memory_space<vmem>>, vector<1x4xf32>
    %c0_57 = arith.constant 0 : index
    %c0_58 = arith.constant 0 : index
    %30 = vector.load %arg8[%c0_57, %c0_58] : memref<1x4xf32, #tpu.memory_space<vmem>>, vector<1x4xf32>
    %cst_59 = arith.constant 0.000000e+00 : f32
    %31 = vector.broadcast %cst_59 : f32 to vector<128x4xf32>
    %c0_60 = arith.constant 0 : index
    %c0_61 = arith.constant 0 : index
    %c0_62 = arith.constant 0 : index
    %32 = vector.load %arg12[%c0_60, %c0_61, %c0_62] : memref<18x18x4xf32, #tpu.memory_space<vmem>>, vector<8x16x4xf32>
    %33 = vector.shape_cast %32 : vector<8x16x4xf32> to vector<128x4xf32>
    %c0_63 = arith.constant 0 : index
    %c0_64 = arith.constant 0 : index
    %c0_65 = arith.constant 0 : index
    %34 = vector.load %arg4[%c0_63, %c0_64, %c0_65] : memref<9x4x4xf32, #tpu.memory_space<vmem>>, vector<1x4x4xf32>
    %35 = vector.shape_cast %34 : vector<1x4x4xf32> to vector<4x4xf32>
    %cst_66 = arith.constant dense<0.000000e+00> : vector<128x4xf32>
    %36 = tpu.matmul %33, %35, %cst_66 {dimension_numbers = #tpu.dot_dimension_numbers<[1], [0], [0], [1], [0, 0, 1, 1], [], []>} : vector<128x4xf32>, vector<4x4xf32>, vector<128x4xf32> -> vector<128x4xf32>
    %37 = arith.addf %31, %36 : vector<128x4xf32>
    %c0_67 = arith.constant 0 : index
    %c1_68 = arith.constant 1 : index
    %c0_69 = arith.constant 0 : index
    %38 = vector.load %arg12[%c0_67, %c1_68, %c0_69] : memref<18x18x4xf32, #tpu.memory_space<vmem>>, vector<8x16x4xf32>
    %39 = vector.shape_cast %38 : vector<8x16x4xf32> to vector<128x4xf32>
    %c1_70 = arith.constant 1 : index
    %c0_71 = arith.constant 0 : index
    %c0_72 = arith.constant 0 : index
    %40 = vector.load %arg4[%c1_70, %c0_71, %c0_72] : memref<9x4x4xf32, #tpu.memory_space<vmem>>, vector<1x4x4xf32>
    %41 = vector.shape_cast %40 : vector<1x4x4xf32> to vector<4x4xf32>
    %cst_73 = arith.constant dense<0.000000e+00> : vector<128x4xf32>
    %42 = tpu.matmul %39, %41, %cst_73 {dimension_numbers = #tpu.dot_dimension_numbers<[1], [0], [0], [1], [0, 0, 1, 1], [], []>} : vector<128x4xf32>, vector<4x4xf32>, vector<128x4xf32> -> vector<128x4xf32>
    %43 = arith.addf %37, %42 : vector<128x4xf32>
    %c0_74 = arith.constant 0 : index
    %c2 = arith.constant 2 : index
    %c0_75 = arith.constant 0 : index
    %44 = vector.load %arg12[%c0_74, %c2, %c0_75] : memref<18x18x4xf32, #tpu.memory_space<vmem>>, vector<8x16x4xf32>
    %45 = vector.shape_cast %44 : vector<8x16x4xf32> to vector<128x4xf32>
    %c2_76 = arith.constant 2 : index
    %c0_77 = arith.constant 0 : index
    %c0_78 = arith.constant 0 : index
    %46 = vector.load %arg4[%c2_76, %c0_77, %c0_78] : memref<9x4x4xf32, #tpu.memory_space<vmem>>, vector<1x4x4xf32>
    %47 = vector.shape_cast %46 : vector<1x4x4xf32> to vector<4x4xf32>
    %cst_79 = arith.constant dense<0.000000e+00> : vector<128x4xf32>
    %48 = tpu.matmul %45, %47, %cst_79 {dimension_numbers = #tpu.dot_dimension_numbers<[1], [0], [0], [1], [0, 0, 1, 1], [], []>} : vector<128x4xf32>, vector<4x4xf32>, vector<128x4xf32> -> vector<128x4xf32>
    %49 = arith.addf %43, %48 : vector<128x4xf32>
    %c1_80 = arith.constant 1 : index
    %c0_81 = arith.constant 0 : index
    %c0_82 = arith.constant 0 : index
    %50 = vector.load %arg12[%c1_80, %c0_81, %c0_82] : memref<18x18x4xf32, #tpu.memory_space<vmem>>, vector<8x16x4xf32>
    %51 = vector.shape_cast %50 : vector<8x16x4xf32> to vector<128x4xf32>
    %c3 = arith.constant 3 : index
    %c0_83 = arith.constant 0 : index
    %c0_84 = arith.constant 0 : index
    %52 = vector.load %arg4[%c3, %c0_83, %c0_84] : memref<9x4x4xf32, #tpu.memory_space<vmem>>, vector<1x4x4xf32>
    %53 = vector.shape_cast %52 : vector<1x4x4xf32> to vector<4x4xf32>
    %cst_85 = arith.constant dense<0.000000e+00> : vector<128x4xf32>
    %54 = tpu.matmul %51, %53, %cst_85 {dimension_numbers = #tpu.dot_dimension_numbers<[1], [0], [0], [1], [0, 0, 1, 1], [], []>} : vector<128x4xf32>, vector<4x4xf32>, vector<128x4xf32> -> vector<128x4xf32>
    %55 = arith.addf %49, %54 : vector<128x4xf32>
    %c1_86 = arith.constant 1 : index
    %c1_87 = arith.constant 1 : index
    %c0_88 = arith.constant 0 : index
    %56 = vector.load %arg12[%c1_86, %c1_87, %c0_88] : memref<18x18x4xf32, #tpu.memory_space<vmem>>, vector<8x16x4xf32>
    %57 = vector.shape_cast %56 : vector<8x16x4xf32> to vector<128x4xf32>
    %c4 = arith.constant 4 : index
    %c0_89 = arith.constant 0 : index
    %c0_90 = arith.constant 0 : index
    %58 = vector.load %arg4[%c4, %c0_89, %c0_90] : memref<9x4x4xf32, #tpu.memory_space<vmem>>, vector<1x4x4xf32>
    %59 = vector.shape_cast %58 : vector<1x4x4xf32> to vector<4x4xf32>
    %cst_91 = arith.constant dense<0.000000e+00> : vector<128x4xf32>
    %60 = tpu.matmul %57, %59, %cst_91 {dimension_numbers = #tpu.dot_dimension_numbers<[1], [0], [0], [1], [0, 0, 1, 1], [], []>} : vector<128x4xf32>, vector<4x4xf32>, vector<128x4xf32> -> vector<128x4xf32>
    %61 = arith.addf %55, %60 : vector<128x4xf32>
    %c1_92 = arith.constant 1 : index
    %c2_93 = arith.constant 2 : index
    %c0_94 = arith.constant 0 : index
    %62 = vector.load %arg12[%c1_92, %c2_93, %c0_94] : memref<18x18x4xf32, #tpu.memory_space<vmem>>, vector<8x16x4xf32>
    %63 = vector.shape_cast %62 : vector<8x16x4xf32> to vector<128x4xf32>
    %c5 = arith.constant 5 : index
    %c0_95 = arith.constant 0 : index
    %c0_96 = arith.constant 0 : index
    %64 = vector.load %arg4[%c5, %c0_95, %c0_96] : memref<9x4x4xf32, #tpu.memory_space<vmem>>, vector<1x4x4xf32>
    %65 = vector.shape_cast %64 : vector<1x4x4xf32> to vector<4x4xf32>
    %cst_97 = arith.constant dense<0.000000e+00> : vector<128x4xf32>
    %66 = tpu.matmul %63, %65, %cst_97 {dimension_numbers = #tpu.dot_dimension_numbers<[1], [0], [0], [1], [0, 0, 1, 1], [], []>} : vector<128x4xf32>, vector<4x4xf32>, vector<128x4xf32> -> vector<128x4xf32>
    %67 = arith.addf %61, %66 : vector<128x4xf32>
    %c2_98 = arith.constant 2 : index
    %c0_99 = arith.constant 0 : index
    %c0_100 = arith.constant 0 : index
    %68 = vector.load %arg12[%c2_98, %c0_99, %c0_100] : memref<18x18x4xf32, #tpu.memory_space<vmem>>, vector<8x16x4xf32>
    %69 = vector.shape_cast %68 : vector<8x16x4xf32> to vector<128x4xf32>
    %c6 = arith.constant 6 : index
    %c0_101 = arith.constant 0 : index
    %c0_102 = arith.constant 0 : index
    %70 = vector.load %arg4[%c6, %c0_101, %c0_102] : memref<9x4x4xf32, #tpu.memory_space<vmem>>, vector<1x4x4xf32>
    %71 = vector.shape_cast %70 : vector<1x4x4xf32> to vector<4x4xf32>
    %cst_103 = arith.constant dense<0.000000e+00> : vector<128x4xf32>
    %72 = tpu.matmul %69, %71, %cst_103 {dimension_numbers = #tpu.dot_dimension_numbers<[1], [0], [0], [1], [0, 0, 1, 1], [], []>} : vector<128x4xf32>, vector<4x4xf32>, vector<128x4xf32> -> vector<128x4xf32>
    %73 = arith.addf %67, %72 : vector<128x4xf32>
    %c2_104 = arith.constant 2 : index
    %c1_105 = arith.constant 1 : index
    %c0_106 = arith.constant 0 : index
    %74 = vector.load %arg12[%c2_104, %c1_105, %c0_106] : memref<18x18x4xf32, #tpu.memory_space<vmem>>, vector<8x16x4xf32>
    %75 = vector.shape_cast %74 : vector<8x16x4xf32> to vector<128x4xf32>
    %c7 = arith.constant 7 : index
    %c0_107 = arith.constant 0 : index
    %c0_108 = arith.constant 0 : index
    %76 = vector.load %arg4[%c7, %c0_107, %c0_108] : memref<9x4x4xf32, #tpu.memory_space<vmem>>, vector<1x4x4xf32>
    %77 = vector.shape_cast %76 : vector<1x4x4xf32> to vector<4x4xf32>
    %cst_109 = arith.constant dense<0.000000e+00> : vector<128x4xf32>
    %78 = tpu.matmul %75, %77, %cst_109 {dimension_numbers = #tpu.dot_dimension_numbers<[1], [0], [0], [1], [0, 0, 1, 1], [], []>} : vector<128x4xf32>, vector<4x4xf32>, vector<128x4xf32> -> vector<128x4xf32>
    %79 = arith.addf %73, %78 : vector<128x4xf32>
    %c2_110 = arith.constant 2 : index
    %c2_111 = arith.constant 2 : index
    %c0_112 = arith.constant 0 : index
    %80 = vector.load %arg12[%c2_110, %c2_111, %c0_112] : memref<18x18x4xf32, #tpu.memory_space<vmem>>, vector<8x16x4xf32>
    %81 = vector.shape_cast %80 : vector<8x16x4xf32> to vector<128x4xf32>
    %c8 = arith.constant 8 : index
    %c0_113 = arith.constant 0 : index
    %c0_114 = arith.constant 0 : index
    %82 = vector.load %arg4[%c8, %c0_113, %c0_114] : memref<9x4x4xf32, #tpu.memory_space<vmem>>, vector<1x4x4xf32>
    %83 = vector.shape_cast %82 : vector<1x4x4xf32> to vector<4x4xf32>
    %cst_115 = arith.constant dense<0.000000e+00> : vector<128x4xf32>
    %84 = tpu.matmul %81, %83, %cst_115 {dimension_numbers = #tpu.dot_dimension_numbers<[1], [0], [0], [1], [0, 0, 1, 1], [], []>} : vector<128x4xf32>, vector<4x4xf32>, vector<128x4xf32> -> vector<128x4xf32>
    %85 = arith.addf %79, %84 : vector<128x4xf32>
    %c0_116 = arith.constant 0 : index
    %c0_117 = arith.constant 0 : index
    %c0_118 = arith.constant 0 : index
    %86 = vector.load %arg13[%c0_116, %c0_117, %c0_118] : memref<18x18x4xf32, #tpu.memory_space<vmem>>, vector<8x16x4xf32>
    %87 = vector.shape_cast %86 : vector<8x16x4xf32> to vector<128x4xf32>
    %c0_119 = arith.constant 0 : index
    %c0_120 = arith.constant 0 : index
    %c0_121 = arith.constant 0 : index
    %88 = vector.load %arg5[%c0_119, %c0_120, %c0_121] : memref<9x4x4xf32, #tpu.memory_space<vmem>>, vector<1x4x4xf32>
    %89 = vector.shape_cast %88 : vector<1x4x4xf32> to vector<4x4xf32>
    %cst_122 = arith.constant dense<0.000000e+00> : vector<128x4xf32>
    %90 = tpu.matmul %87, %89, %cst_122 {dimension_numbers = #tpu.dot_dimension_numbers<[1], [0], [0], [1], [0, 0, 1, 1], [], []>} : vector<128x4xf32>, vector<4x4xf32>, vector<128x4xf32> -> vector<128x4xf32>
    %91 = arith.addf %85, %90 : vector<128x4xf32>
    %c0_123 = arith.constant 0 : index
    %c1_124 = arith.constant 1 : index
    %c0_125 = arith.constant 0 : index
    %92 = vector.load %arg13[%c0_123, %c1_124, %c0_125] : memref<18x18x4xf32, #tpu.memory_space<vmem>>, vector<8x16x4xf32>
    %93 = vector.shape_cast %92 : vector<8x16x4xf32> to vector<128x4xf32>
    %c1_126 = arith.constant 1 : index
    %c0_127 = arith.constant 0 : index
    %c0_128 = arith.constant 0 : index
    %94 = vector.load %arg5[%c1_126, %c0_127, %c0_128] : memref<9x4x4xf32, #tpu.memory_space<vmem>>, vector<1x4x4xf32>
    %95 = vector.shape_cast %94 : vector<1x4x4xf32> to vector<4x4xf32>
    %cst_129 = arith.constant dense<0.000000e+00> : vector<128x4xf32>
    %96 = tpu.matmul %93, %95, %cst_129 {dimension_numbers = #tpu.dot_dimension_numbers<[1], [0], [0], [1], [0, 0, 1, 1], [], []>} : vector<128x4xf32>, vector<4x4xf32>, vector<128x4xf32> -> vector<128x4xf32>
    %97 = arith.addf %91, %96 : vector<128x4xf32>
    %c0_130 = arith.constant 0 : index
    %c2_131 = arith.constant 2 : index
    %c0_132 = arith.constant 0 : index
    %98 = vector.load %arg13[%c0_130, %c2_131, %c0_132] : memref<18x18x4xf32, #tpu.memory_space<vmem>>, vector<8x16x4xf32>
    %99 = vector.shape_cast %98 : vector<8x16x4xf32> to vector<128x4xf32>
    %c2_133 = arith.constant 2 : index
    %c0_134 = arith.constant 0 : index
    %c0_135 = arith.constant 0 : index
    %100 = vector.load %arg5[%c2_133, %c0_134, %c0_135] : memref<9x4x4xf32, #tpu.memory_space<vmem>>, vector<1x4x4xf32>
    %101 = vector.shape_cast %100 : vector<1x4x4xf32> to vector<4x4xf32>
    %cst_136 = arith.constant dense<0.000000e+00> : vector<128x4xf32>
    %102 = tpu.matmul %99, %101, %cst_136 {dimension_numbers = #tpu.dot_dimension_numbers<[1], [0], [0], [1], [0, 0, 1, 1], [], []>} : vector<128x4xf32>, vector<4x4xf32>, vector<128x4xf32> -> vector<128x4xf32>
    %103 = arith.addf %97, %102 : vector<128x4xf32>
    %c1_137 = arith.constant 1 : index
    %c0_138 = arith.constant 0 : index
    %c0_139 = arith.constant 0 : index
    %104 = vector.load %arg13[%c1_137, %c0_138, %c0_139] : memref<18x18x4xf32, #tpu.memory_space<vmem>>, vector<8x16x4xf32>
    %105 = vector.shape_cast %104 : vector<8x16x4xf32> to vector<128x4xf32>
    %c3_140 = arith.constant 3 : index
    %c0_141 = arith.constant 0 : index
    %c0_142 = arith.constant 0 : index
    %106 = vector.load %arg5[%c3_140, %c0_141, %c0_142] : memref<9x4x4xf32, #tpu.memory_space<vmem>>, vector<1x4x4xf32>
    %107 = vector.shape_cast %106 : vector<1x4x4xf32> to vector<4x4xf32>
    %cst_143 = arith.constant dense<0.000000e+00> : vector<128x4xf32>
    %108 = tpu.matmul %105, %107, %cst_143 {dimension_numbers = #tpu.dot_dimension_numbers<[1], [0], [0], [1], [0, 0, 1, 1], [], []>} : vector<128x4xf32>, vector<4x4xf32>, vector<128x4xf32> -> vector<128x4xf32>
    %109 = arith.addf %103, %108 : vector<128x4xf32>
    %c1_144 = arith.constant 1 : index
    %c1_145 = arith.constant 1 : index
    %c0_146 = arith.constant 0 : index
    %110 = vector.load %arg13[%c1_144, %c1_145, %c0_146] : memref<18x18x4xf32, #tpu.memory_space<vmem>>, vector<8x16x4xf32>
    %111 = vector.shape_cast %110 : vector<8x16x4xf32> to vector<128x4xf32>
    %c4_147 = arith.constant 4 : index
    %c0_148 = arith.constant 0 : index
    %c0_149 = arith.constant 0 : index
    %112 = vector.load %arg5[%c4_147, %c0_148, %c0_149] : memref<9x4x4xf32, #tpu.memory_space<vmem>>, vector<1x4x4xf32>
    %113 = vector.shape_cast %112 : vector<1x4x4xf32> to vector<4x4xf32>
    %cst_150 = arith.constant dense<0.000000e+00> : vector<128x4xf32>
    %114 = tpu.matmul %111, %113, %cst_150 {dimension_numbers = #tpu.dot_dimension_numbers<[1], [0], [0], [1], [0, 0, 1, 1], [], []>} : vector<128x4xf32>, vector<4x4xf32>, vector<128x4xf32> -> vector<128x4xf32>
    %115 = arith.addf %109, %114 : vector<128x4xf32>
    %c1_151 = arith.constant 1 : index
    %c2_152 = arith.constant 2 : index
    %c0_153 = arith.constant 0 : index
    %116 = vector.load %arg13[%c1_151, %c2_152, %c0_153] : memref<18x18x4xf32, #tpu.memory_space<vmem>>, vector<8x16x4xf32>
    %117 = vector.shape_cast %116 : vector<8x16x4xf32> to vector<128x4xf32>
    %c5_154 = arith.constant 5 : index
    %c0_155 = arith.constant 0 : index
    %c0_156 = arith.constant 0 : index
    %118 = vector.load %arg5[%c5_154, %c0_155, %c0_156] : memref<9x4x4xf32, #tpu.memory_space<vmem>>, vector<1x4x4xf32>
    %119 = vector.shape_cast %118 : vector<1x4x4xf32> to vector<4x4xf32>
    %cst_157 = arith.constant dense<0.000000e+00> : vector<128x4xf32>
    %120 = tpu.matmul %117, %119, %cst_157 {dimension_numbers = #tpu.dot_dimension_numbers<[1], [0], [0], [1], [0, 0, 1, 1], [], []>} : vector<128x4xf32>, vector<4x4xf32>, vector<128x4xf32> -> vector<128x4xf32>
    %121 = arith.addf %115, %120 : vector<128x4xf32>
    %c2_158 = arith.constant 2 : index
    %c0_159 = arith.constant 0 : index
    %c0_160 = arith.constant 0 : index
    %122 = vector.load %arg13[%c2_158, %c0_159, %c0_160] : memref<18x18x4xf32, #tpu.memory_space<vmem>>, vector<8x16x4xf32>
    %123 = vector.shape_cast %122 : vector<8x16x4xf32> to vector<128x4xf32>
    %c6_161 = arith.constant 6 : index
    %c0_162 = arith.constant 0 : index
    %c0_163 = arith.constant 0 : index
    %124 = vector.load %arg5[%c6_161, %c0_162, %c0_163] : memref<9x4x4xf32, #tpu.memory_space<vmem>>, vector<1x4x4xf32>
    %125 = vector.shape_cast %124 : vector<1x4x4xf32> to vector<4x4xf32>
    %cst_164 = arith.constant dense<0.000000e+00> : vector<128x4xf32>
    %126 = tpu.matmul %123, %125, %cst_164 {dimension_numbers = #tpu.dot_dimension_numbers<[1], [0], [0], [1], [0, 0, 1, 1], [], []>} : vector<128x4xf32>, vector<4x4xf32>, vector<128x4xf32> -> vector<128x4xf32>
    %127 = arith.addf %121, %126 : vector<128x4xf32>
    %c2_165 = arith.constant 2 : index
    %c1_166 = arith.constant 1 : index
    %c0_167 = arith.constant 0 : index
    %128 = vector.load %arg13[%c2_165, %c1_166, %c0_167] : memref<18x18x4xf32, #tpu.memory_space<vmem>>, vector<8x16x4xf32>
    %129 = vector.shape_cast %128 : vector<8x16x4xf32> to vector<128x4xf32>
    %c7_168 = arith.constant 7 : index
    %c0_169 = arith.constant 0 : index
    %c0_170 = arith.constant 0 : index
    %130 = vector.load %arg5[%c7_168, %c0_169, %c0_170] : memref<9x4x4xf32, #tpu.memory_space<vmem>>, vector<1x4x4xf32>
    %131 = vector.shape_cast %130 : vector<1x4x4xf32> to vector<4x4xf32>
    %cst_171 = arith.constant dense<0.000000e+00> : vector<128x4xf32>
    %132 = tpu.matmul %129, %131, %cst_171 {dimension_numbers = #tpu.dot_dimension_numbers<[1], [0], [0], [1], [0, 0, 1, 1], [], []>} : vector<128x4xf32>, vector<4x4xf32>, vector<128x4xf32> -> vector<128x4xf32>
    %133 = arith.addf %127, %132 : vector<128x4xf32>
    %c2_172 = arith.constant 2 : index
    %c2_173 = arith.constant 2 : index
    %c0_174 = arith.constant 0 : index
    %134 = vector.load %arg13[%c2_172, %c2_173, %c0_174] : memref<18x18x4xf32, #tpu.memory_space<vmem>>, vector<8x16x4xf32>
    %135 = vector.shape_cast %134 : vector<8x16x4xf32> to vector<128x4xf32>
    %c8_175 = arith.constant 8 : index
    %c0_176 = arith.constant 0 : index
    %c0_177 = arith.constant 0 : index
    %136 = vector.load %arg5[%c8_175, %c0_176, %c0_177] : memref<9x4x4xf32, #tpu.memory_space<vmem>>, vector<1x4x4xf32>
    %137 = vector.shape_cast %136 : vector<1x4x4xf32> to vector<4x4xf32>
    %cst_178 = arith.constant dense<0.000000e+00> : vector<128x4xf32>
    %138 = tpu.matmul %135, %137, %cst_178 {dimension_numbers = #tpu.dot_dimension_numbers<[1], [0], [0], [1], [0, 0, 1, 1], [], []>} : vector<128x4xf32>, vector<4x4xf32>, vector<128x4xf32> -> vector<128x4xf32>
    %139 = arith.addf %133, %138 : vector<128x4xf32>
    %140 = vector.broadcast %29 : vector<1x4xf32> to vector<128x4xf32>
    %141 = arith.mulf %139, %140 : vector<128x4xf32>
    %142 = vector.broadcast %30 : vector<1x4xf32> to vector<128x4xf32>
    %143 = arith.addf %141, %142 : vector<128x4xf32>
    %cst_179 = arith.constant 0.000000e+00 : f32
    %144 = vector.broadcast %cst_179 : f32 to vector<128x4xf32>
    %145 = arith.maximumf %143, %144 : vector<128x4xf32>
    %146 = vector.shape_cast %145 : vector<128x4xf32> to vector<8x16x4xf32>
    %c1_180 = arith.constant 1 : index
    %c1_181 = arith.constant 1 : index
    %c0_182 = arith.constant 0 : index
    %147 = vector.load %arg14[%c1_180, %c1_181, %c0_182] : memref<18x18x4xf32, #tpu.memory_space<vmem>>, vector<8x16x4xf32>
    tpu.vector_store %arg14[%c1_180, %c1_181, %c0_182], %146 {strides = array<i32>} : memref<18x18x4xf32, #tpu.memory_space<vmem>>, vector<8x16x4xf32>,
    %cst_183 = arith.constant 0.000000e+00 : f32
    %148 = vector.broadcast %cst_183 : f32 to vector<128x4xf32>
    %c8_184 = arith.constant 8 : index
    %c0_185 = arith.constant 0 : index
    %c0_186 = arith.constant 0 : index
    %149 = vector.load %arg12[%c8_184, %c0_185, %c0_186] : memref<18x18x4xf32, #tpu.memory_space<vmem>>, vector<8x16x4xf32>
    %150 = vector.shape_cast %149 : vector<8x16x4xf32> to vector<128x4xf32>
    %c0_187 = arith.constant 0 : index
    %c0_188 = arith.constant 0 : index
    %c0_189 = arith.constant 0 : index
    %151 = vector.load %arg4[%c0_187, %c0_188, %c0_189] : memref<9x4x4xf32, #tpu.memory_space<vmem>>, vector<1x4x4xf32>
    %152 = vector.shape_cast %151 : vector<1x4x4xf32> to vector<4x4xf32>
    %cst_190 = arith.constant dense<0.000000e+00> : vector<128x4xf32>
    %153 = tpu.matmul %150, %152, %cst_190 {dimension_numbers = #tpu.dot_dimension_numbers<[1], [0], [0], [1], [0, 0, 1, 1], [], []>} : vector<128x4xf32>, vector<4x4xf32>, vector<128x4xf32> -> vector<128x4xf32>
    %154 = arith.addf %148, %153 : vector<128x4xf32>
    %c8_191 = arith.constant 8 : index
    %c1_192 = arith.constant 1 : index
    %c0_193 = arith.constant 0 : index
    %155 = vector.load %arg12[%c8_191, %c1_192, %c0_193] : memref<18x18x4xf32, #tpu.memory_space<vmem>>, vector<8x16x4xf32>
    %156 = vector.shape_cast %155 : vector<8x16x4xf32> to vector<128x4xf32>
    %c1_194 = arith.constant 1 : index
    %c0_195 = arith.constant 0 : index
    %c0_196 = arith.constant 0 : index
    %157 = vector.load %arg4[%c1_194, %c0_195, %c0_196] : memref<9x4x4xf32, #tpu.memory_space<vmem>>, vector<1x4x4xf32>
    %158 = vector.shape_cast %157 : vector<1x4x4xf32> to vector<4x4xf32>
    %cst_197 = arith.constant dense<0.000000e+00> : vector<128x4xf32>
    %159 = tpu.matmul %156, %158, %cst_197 {dimension_numbers = #tpu.dot_dimension_numbers<[1], [0], [0], [1], [0, 0, 1, 1], [], []>} : vector<128x4xf32>, vector<4x4xf32>, vector<128x4xf32> -> vector<128x4xf32>
    %160 = arith.addf %154, %159 : vector<128x4xf32>
    %c8_198 = arith.constant 8 : index
    %c2_199 = arith.constant 2 : index
    %c0_200 = arith.constant 0 : index
    %161 = vector.load %arg12[%c8_198, %c2_199, %c0_200] : memref<18x18x4xf32, #tpu.memory_space<vmem>>, vector<8x16x4xf32>
    %162 = vector.shape_cast %161 : vector<8x16x4xf32> to vector<128x4xf32>
    %c2_201 = arith.constant 2 : index
    %c0_202 = arith.constant 0 : index
    %c0_203 = arith.constant 0 : index
    %163 = vector.load %arg4[%c2_201, %c0_202, %c0_203] : memref<9x4x4xf32, #tpu.memory_space<vmem>>, vector<1x4x4xf32>
    %164 = vector.shape_cast %163 : vector<1x4x4xf32> to vector<4x4xf32>
    %cst_204 = arith.constant dense<0.000000e+00> : vector<128x4xf32>
    %165 = tpu.matmul %162, %164, %cst_204 {dimension_numbers = #tpu.dot_dimension_numbers<[1], [0], [0], [1], [0, 0, 1, 1], [], []>} : vector<128x4xf32>, vector<4x4xf32>, vector<128x4xf32> -> vector<128x4xf32>
    %166 = arith.addf %160, %165 : vector<128x4xf32>
    %c9 = arith.constant 9 : index
    %c0_205 = arith.constant 0 : index
    %c0_206 = arith.constant 0 : index
    %167 = vector.load %arg12[%c9, %c0_205, %c0_206] : memref<18x18x4xf32, #tpu.memory_space<vmem>>, vector<8x16x4xf32>
    %168 = vector.shape_cast %167 : vector<8x16x4xf32> to vector<128x4xf32>
    %c3_207 = arith.constant 3 : index
    %c0_208 = arith.constant 0 : index
    %c0_209 = arith.constant 0 : index
    %169 = vector.load %arg4[%c3_207, %c0_208, %c0_209] : memref<9x4x4xf32, #tpu.memory_space<vmem>>, vector<1x4x4xf32>
    %170 = vector.shape_cast %169 : vector<1x4x4xf32> to vector<4x4xf32>
    %cst_210 = arith.constant dense<0.000000e+00> : vector<128x4xf32>
    %171 = tpu.matmul %168, %170, %cst_210 {dimension_numbers = #tpu.dot_dimension_numbers<[1], [0], [0], [1], [0, 0, 1, 1], [], []>} : vector<128x4xf32>, vector<4x4xf32>, vector<128x4xf32> -> vector<128x4xf32>
    %172 = arith.addf %166, %171 : vector<128x4xf32>
    %c9_211 = arith.constant 9 : index
    %c1_212 = arith.constant 1 : index
    %c0_213 = arith.constant 0 : index
    %173 = vector.load %arg12[%c9_211, %c1_212, %c0_213] : memref<18x18x4xf32, #tpu.memory_space<vmem>>, vector<8x16x4xf32>
    %174 = vector.shape_cast %173 : vector<8x16x4xf32> to vector<128x4xf32>
    %c4_214 = arith.constant 4 : index
    %c0_215 = arith.constant 0 : index
    %c0_216 = arith.constant 0 : index
    %175 = vector.load %arg4[%c4_214, %c0_215, %c0_216] : memref<9x4x4xf32, #tpu.memory_space<vmem>>, vector<1x4x4xf32>
    %176 = vector.shape_cast %175 : vector<1x4x4xf32> to vector<4x4xf32>
    %cst_217 = arith.constant dense<0.000000e+00> : vector<128x4xf32>
    %177 = tpu.matmul %174, %176, %cst_217 {dimension_numbers = #tpu.dot_dimension_numbers<[1], [0], [0], [1], [0, 0, 1, 1], [], []>} : vector<128x4xf32>, vector<4x4xf32>, vector<128x4xf32> -> vector<128x4xf32>
    %178 = arith.addf %172, %177 : vector<128x4xf32>
    %c9_218 = arith.constant 9 : index
    %c2_219 = arith.constant 2 : index
    %c0_220 = arith.constant 0 : index
    %179 = vector.load %arg12[%c9_218, %c2_219, %c0_220] : memref<18x18x4xf32, #tpu.memory_space<vmem>>, vector<8x16x4xf32>
    %180 = vector.shape_cast %179 : vector<8x16x4xf32> to vector<128x4xf32>
    %c5_221 = arith.constant 5 : index
    %c0_222 = arith.constant 0 : index
    %c0_223 = arith.constant 0 : index
    %181 = vector.load %arg4[%c5_221, %c0_222, %c0_223] : memref<9x4x4xf32, #tpu.memory_space<vmem>>, vector<1x4x4xf32>
    %182 = vector.shape_cast %181 : vector<1x4x4xf32> to vector<4x4xf32>
    %cst_224 = arith.constant dense<0.000000e+00> : vector<128x4xf32>
    %183 = tpu.matmul %180, %182, %cst_224 {dimension_numbers = #tpu.dot_dimension_numbers<[1], [0], [0], [1], [0, 0, 1, 1], [], []>} : vector<128x4xf32>, vector<4x4xf32>, vector<128x4xf32> -> vector<128x4xf32>
    %184 = arith.addf %178, %183 : vector<128x4xf32>
    %c10 = arith.constant 10 : index
    %c0_225 = arith.constant 0 : index
    %c0_226 = arith.constant 0 : index
    %185 = vector.load %arg12[%c10, %c0_225, %c0_226] : memref<18x18x4xf32, #tpu.memory_space<vmem>>, vector<8x16x4xf32>
    %186 = vector.shape_cast %185 : vector<8x16x4xf32> to vector<128x4xf32>
    %c6_227 = arith.constant 6 : index
    %c0_228 = arith.constant 0 : index
    %c0_229 = arith.constant 0 : index
    %187 = vector.load %arg4[%c6_227, %c0_228, %c0_229] : memref<9x4x4xf32, #tpu.memory_space<vmem>>, vector<1x4x4xf32>
    %188 = vector.shape_cast %187 : vector<1x4x4xf32> to vector<4x4xf32>
    %cst_230 = arith.constant dense<0.000000e+00> : vector<128x4xf32>
    %189 = tpu.matmul %186, %188, %cst_230 {dimension_numbers = #tpu.dot_dimension_numbers<[1], [0], [0], [1], [0, 0, 1, 1], [], []>} : vector<128x4xf32>, vector<4x4xf32>, vector<128x4xf32> -> vector<128x4xf32>
    %190 = arith.addf %184, %189 : vector<128x4xf32>
    %c10_231 = arith.constant 10 : index
    %c1_232 = arith.constant 1 : index
    %c0_233 = arith.constant 0 : index
    %191 = vector.load %arg12[%c10_231, %c1_232, %c0_233] : memref<18x18x4xf32, #tpu.memory_space<vmem>>, vector<8x16x4xf32>
    %192 = vector.shape_cast %191 : vector<8x16x4xf32> to vector<128x4xf32>
    %c7_234 = arith.constant 7 : index
    %c0_235 = arith.constant 0 : index
    %c0_236 = arith.constant 0 : index
    %193 = vector.load %arg4[%c7_234, %c0_235, %c0_236] : memref<9x4x4xf32, #tpu.memory_space<vmem>>, vector<1x4x4xf32>
    %194 = vector.shape_cast %193 : vector<1x4x4xf32> to vector<4x4xf32>
    %cst_237 = arith.constant dense<0.000000e+00> : vector<128x4xf32>
    %195 = tpu.matmul %192, %194, %cst_237 {dimension_numbers = #tpu.dot_dimension_numbers<[1], [0], [0], [1], [0, 0, 1, 1], [], []>} : vector<128x4xf32>, vector<4x4xf32>, vector<128x4xf32> -> vector<128x4xf32>
    %196 = arith.addf %190, %195 : vector<128x4xf32>
    %c10_238 = arith.constant 10 : index
    %c2_239 = arith.constant 2 : index
    %c0_240 = arith.constant 0 : index
    %197 = vector.load %arg12[%c10_238, %c2_239, %c0_240] : memref<18x18x4xf32, #tpu.memory_space<vmem>>, vector<8x16x4xf32>
    %198 = vector.shape_cast %197 : vector<8x16x4xf32> to vector<128x4xf32>
    %c8_241 = arith.constant 8 : index
    %c0_242 = arith.constant 0 : index
    %c0_243 = arith.constant 0 : index
    %199 = vector.load %arg4[%c8_241, %c0_242, %c0_243] : memref<9x4x4xf32, #tpu.memory_space<vmem>>, vector<1x4x4xf32>
    %200 = vector.shape_cast %199 : vector<1x4x4xf32> to vector<4x4xf32>
    %cst_244 = arith.constant dense<0.000000e+00> : vector<128x4xf32>
    %201 = tpu.matmul %198, %200, %cst_244 {dimension_numbers = #tpu.dot_dimension_numbers<[1], [0], [0], [1], [0, 0, 1, 1], [], []>} : vector<128x4xf32>, vector<4x4xf32>, vector<128x4xf32> -> vector<128x4xf32>
    %202 = arith.addf %196, %201 : vector<128x4xf32>
    %c8_245 = arith.constant 8 : index
    %c0_246 = arith.constant 0 : index
    %c0_247 = arith.constant 0 : index
    %203 = vector.load %arg13[%c8_245, %c0_246, %c0_247] : memref<18x18x4xf32, #tpu.memory_space<vmem>>, vector<8x16x4xf32>
    %204 = vector.shape_cast %203 : vector<8x16x4xf32> to vector<128x4xf32>
    %c0_248 = arith.constant 0 : index
    %c0_249 = arith.constant 0 : index
    %c0_250 = arith.constant 0 : index
    %205 = vector.load %arg5[%c0_248, %c0_249, %c0_250] : memref<9x4x4xf32, #tpu.memory_space<vmem>>, vector<1x4x4xf32>
    %206 = vector.shape_cast %205 : vector<1x4x4xf32> to vector<4x4xf32>
    %cst_251 = arith.constant dense<0.000000e+00> : vector<128x4xf32>
    %207 = tpu.matmul %204, %206, %cst_251 {dimension_numbers = #tpu.dot_dimension_numbers<[1], [0], [0], [1], [0, 0, 1, 1], [], []>} : vector<128x4xf32>, vector<4x4xf32>, vector<128x4xf32> -> vector<128x4xf32>
    %208 = arith.addf %202, %207 : vector<128x4xf32>
    %c8_252 = arith.constant 8 : index
    %c1_253 = arith.constant 1 : index
    %c0_254 = arith.constant 0 : index
    %209 = vector.load %arg13[%c8_252, %c1_253, %c0_254] : memref<18x18x4xf32, #tpu.memory_space<vmem>>, vector<8x16x4xf32>
    %210 = vector.shape_cast %209 : vector<8x16x4xf32> to vector<128x4xf32>
    %c1_255 = arith.constant 1 : index
    %c0_256 = arith.constant 0 : index
    %c0_257 = arith.constant 0 : index
    %211 = vector.load %arg5[%c1_255, %c0_256, %c0_257] : memref<9x4x4xf32, #tpu.memory_space<vmem>>, vector<1x4x4xf32>
    %212 = vector.shape_cast %211 : vector<1x4x4xf32> to vector<4x4xf32>
    %cst_258 = arith.constant dense<0.000000e+00> : vector<128x4xf32>
    %213 = tpu.matmul %210, %212, %cst_258 {dimension_numbers = #tpu.dot_dimension_numbers<[1], [0], [0], [1], [0, 0, 1, 1], [], []>} : vector<128x4xf32>, vector<4x4xf32>, vector<128x4xf32> -> vector<128x4xf32>
    %214 = arith.addf %208, %213 : vector<128x4xf32>
    %c8_259 = arith.constant 8 : index
    %c2_260 = arith.constant 2 : index
    %c0_261 = arith.constant 0 : index
    %215 = vector.load %arg13[%c8_259, %c2_260, %c0_261] : memref<18x18x4xf32, #tpu.memory_space<vmem>>, vector<8x16x4xf32>
    %216 = vector.shape_cast %215 : vector<8x16x4xf32> to vector<128x4xf32>
    %c2_262 = arith.constant 2 : index
    %c0_263 = arith.constant 0 : index
    %c0_264 = arith.constant 0 : index
    %217 = vector.load %arg5[%c2_262, %c0_263, %c0_264] : memref<9x4x4xf32, #tpu.memory_space<vmem>>, vector<1x4x4xf32>
    %218 = vector.shape_cast %217 : vector<1x4x4xf32> to vector<4x4xf32>
    %cst_265 = arith.constant dense<0.000000e+00> : vector<128x4xf32>
    %219 = tpu.matmul %216, %218, %cst_265 {dimension_numbers = #tpu.dot_dimension_numbers<[1], [0], [0], [1], [0, 0, 1, 1], [], []>} : vector<128x4xf32>, vector<4x4xf32>, vector<128x4xf32> -> vector<128x4xf32>
    %220 = arith.addf %214, %219 : vector<128x4xf32>
    %c9_266 = arith.constant 9 : index
    %c0_267 = arith.constant 0 : index
    %c0_268 = arith.constant 0 : index
    %221 = vector.load %arg13[%c9_266, %c0_267, %c0_268] : memref<18x18x4xf32, #tpu.memory_space<vmem>>, vector<8x16x4xf32>
    %222 = vector.shape_cast %221 : vector<8x16x4xf32> to vector<128x4xf32>
    %c3_269 = arith.constant 3 : index
    %c0_270 = arith.constant 0 : index
    %c0_271 = arith.constant 0 : index
    %223 = vector.load %arg5[%c3_269, %c0_270, %c0_271] : memref<9x4x4xf32, #tpu.memory_space<vmem>>, vector<1x4x4xf32>
    %224 = vector.shape_cast %223 : vector<1x4x4xf32> to vector<4x4xf32>
    %cst_272 = arith.constant dense<0.000000e+00> : vector<128x4xf32>
    %225 = tpu.matmul %222, %224, %cst_272 {dimension_numbers = #tpu.dot_dimension_numbers<[1], [0], [0], [1], [0, 0, 1, 1], [], []>} : vector<128x4xf32>, vector<4x4xf32>, vector<128x4xf32> -> vector<128x4xf32>
    %226 = arith.addf %220, %225 : vector<128x4xf32>
    %c9_273 = arith.constant 9 : index
    %c1_274 = arith.constant 1 : index
    %c0_275 = arith.constant 0 : index
    %227 = vector.load %arg13[%c9_273, %c1_274, %c0_275] : memref<18x18x4xf32, #tpu.memory_space<vmem>>, vector<8x16x4xf32>
    %228 = vector.shape_cast %227 : vector<8x16x4xf32> to vector<128x4xf32>
    %c4_276 = arith.constant 4 : index
    %c0_277 = arith.constant 0 : index
    %c0_278 = arith.constant 0 : index
    %229 = vector.load %arg5[%c4_276, %c0_277, %c0_278] : memref<9x4x4xf32, #tpu.memory_space<vmem>>, vector<1x4x4xf32>
    %230 = vector.shape_cast %229 : vector<1x4x4xf32> to vector<4x4xf32>
    %cst_279 = arith.constant dense<0.000000e+00> : vector<128x4xf32>
    %231 = tpu.matmul %228, %230, %cst_279 {dimension_numbers = #tpu.dot_dimension_numbers<[1], [0], [0], [1], [0, 0, 1, 1], [], []>} : vector<128x4xf32>, vector<4x4xf32>, vector<128x4xf32> -> vector<128x4xf32>
    %232 = arith.addf %226, %231 : vector<128x4xf32>
    %c9_280 = arith.constant 9 : index
    %c2_281 = arith.constant 2 : index
    %c0_282 = arith.constant 0 : index
    %233 = vector.load %arg13[%c9_280, %c2_281, %c0_282] : memref<18x18x4xf32, #tpu.memory_space<vmem>>, vector<8x16x4xf32>
    %234 = vector.shape_cast %233 : vector<8x16x4xf32> to vector<128x4xf32>
    %c5_283 = arith.constant 5 : index
    %c0_284 = arith.constant 0 : index
    %c0_285 = arith.constant 0 : index
    %235 = vector.load %arg5[%c5_283, %c0_284, %c0_285] : memref<9x4x4xf32, #tpu.memory_space<vmem>>, vector<1x4x4xf32>
    %236 = vector.shape_cast %235 : vector<1x4x4xf32> to vector<4x4xf32>
    %cst_286 = arith.constant dense<0.000000e+00> : vector<128x4xf32>
    %237 = tpu.matmul %234, %236, %cst_286 {dimension_numbers = #tpu.dot_dimension_numbers<[1], [0], [0], [1], [0, 0, 1, 1], [], []>} : vector<128x4xf32>, vector<4x4xf32>, vector<128x4xf32> -> vector<128x4xf32>
    %238 = arith.addf %232, %237 : vector<128x4xf32>
    %c10_287 = arith.constant 10 : index
    %c0_288 = arith.constant 0 : index
    %c0_289 = arith.constant 0 : index
    %239 = vector.load %arg13[%c10_287, %c0_288, %c0_289] : memref<18x18x4xf32, #tpu.memory_space<vmem>>, vector<8x16x4xf32>
    %240 = vector.shape_cast %239 : vector<8x16x4xf32> to vector<128x4xf32>
    %c6_290 = arith.constant 6 : index
    %c0_291 = arith.constant 0 : index
    %c0_292 = arith.constant 0 : index
    %241 = vector.load %arg5[%c6_290, %c0_291, %c0_292] : memref<9x4x4xf32, #tpu.memory_space<vmem>>, vector<1x4x4xf32>
    %242 = vector.shape_cast %241 : vector<1x4x4xf32> to vector<4x4xf32>
    %cst_293 = arith.constant dense<0.000000e+00> : vector<128x4xf32>
    %243 = tpu.matmul %240, %242, %cst_293 {dimension_numbers = #tpu.dot_dimension_numbers<[1], [0], [0], [1], [0, 0, 1, 1], [], []>} : vector<128x4xf32>, vector<4x4xf32>, vector<128x4xf32> -> vector<128x4xf32>
    %244 = arith.addf %238, %243 : vector<128x4xf32>
    %c10_294 = arith.constant 10 : index
    %c1_295 = arith.constant 1 : index
    %c0_296 = arith.constant 0 : index
    %245 = vector.load %arg13[%c10_294, %c1_295, %c0_296] : memref<18x18x4xf32, #tpu.memory_space<vmem>>, vector<8x16x4xf32>
    %246 = vector.shape_cast %245 : vector<8x16x4xf32> to vector<128x4xf32>
    %c7_297 = arith.constant 7 : index
    %c0_298 = arith.constant 0 : index
    %c0_299 = arith.constant 0 : index
    %247 = vector.load %arg5[%c7_297, %c0_298, %c0_299] : memref<9x4x4xf32, #tpu.memory_space<vmem>>, vector<1x4x4xf32>
    %248 = vector.shape_cast %247 : vector<1x4x4xf32> to vector<4x4xf32>
    %cst_300 = arith.constant dense<0.000000e+00> : vector<128x4xf32>
    %249 = tpu.matmul %246, %248, %cst_300 {dimension_numbers = #tpu.dot_dimension_numbers<[1], [0], [0], [1], [0, 0, 1, 1], [], []>} : vector<128x4xf32>, vector<4x4xf32>, vector<128x4xf32> -> vector<128x4xf32>
    %250 = arith.addf %244, %249 : vector<128x4xf32>
    %c10_301 = arith.constant 10 : index
    %c2_302 = arith.constant 2 : index
    %c0_303 = arith.constant 0 : index
    %251 = vector.load %arg13[%c10_301, %c2_302, %c0_303] : memref<18x18x4xf32, #tpu.memory_space<vmem>>, vector<8x16x4xf32>
    %252 = vector.shape_cast %251 : vector<8x16x4xf32> to vector<128x4xf32>
    %c8_304 = arith.constant 8 : index
    %c0_305 = arith.constant 0 : index
    %c0_306 = arith.constant 0 : index
    %253 = vector.load %arg5[%c8_304, %c0_305, %c0_306] : memref<9x4x4xf32, #tpu.memory_space<vmem>>, vector<1x4x4xf32>
    %254 = vector.shape_cast %253 : vector<1x4x4xf32> to vector<4x4xf32>
    %cst_307 = arith.constant dense<0.000000e+00> : vector<128x4xf32>
    %255 = tpu.matmul %252, %254, %cst_307 {dimension_numbers = #tpu.dot_dimension_numbers<[1], [0], [0], [1], [0, 0, 1, 1], [], []>} : vector<128x4xf32>, vector<4x4xf32>, vector<128x4xf32> -> vector<128x4xf32>
    %256 = arith.addf %250, %255 : vector<128x4xf32>
    %257 = vector.broadcast %29 : vector<1x4xf32> to vector<128x4xf32>
    %258 = arith.mulf %256, %257 : vector<128x4xf32>
    %259 = vector.broadcast %30 : vector<1x4xf32> to vector<128x4xf32>
    %260 = arith.addf %258, %259 : vector<128x4xf32>
    %cst_308 = arith.constant 0.000000e+00 : f32
    %261 = vector.broadcast %cst_308 : f32 to vector<128x4xf32>
    %262 = arith.maximumf %260, %261 : vector<128x4xf32>
    %263 = vector.shape_cast %262 : vector<128x4xf32> to vector<8x16x4xf32>
    %c9_309 = arith.constant 9 : index
    %c1_310 = arith.constant 1 : index
    %c0_311 = arith.constant 0 : index
    %264 = vector.load %arg14[%c9_309, %c1_310, %c0_311] : memref<18x18x4xf32, #tpu.memory_space<vmem>>, vector<8x16x4xf32>
    tpu.vector_store %arg14[%c9_309, %c1_310, %c0_311], %263 {strides = array<i32>} : memref<18x18x4xf32, #tpu.memory_space<vmem>>, vector<8x16x4xf32>,
    %c0_312 = arith.constant 0 : index
    %c0_313 = arith.constant 0 : index
    %265 = vector.load %arg9[%c0_312, %c0_313] : memref<1x4xf32, #tpu.memory_space<vmem>>, vector<1x4xf32>
    %c0_314 = arith.constant 0 : index
    %c0_315 = arith.constant 0 : index
    %266 = vector.load %arg10[%c0_314, %c0_315] : memref<1x4xf32, #tpu.memory_space<vmem>>, vector<1x4xf32>
    %cst_316 = arith.constant 0.000000e+00 : f32
    %267 = vector.broadcast %cst_316 : f32 to vector<128x4xf32>
    %c0_317 = arith.constant 0 : index
    %c0_318 = arith.constant 0 : index
    %c0_319 = arith.constant 0 : index
    %268 = vector.load %arg14[%c0_317, %c0_318, %c0_319] : memref<18x18x4xf32, #tpu.memory_space<vmem>>, vector<8x16x4xf32>
    %269 = vector.shape_cast %268 : vector<8x16x4xf32> to vector<128x4xf32>
    %c0_320 = arith.constant 0 : index
    %c0_321 = arith.constant 0 : index
    %c0_322 = arith.constant 0 : index
    %270 = vector.load %arg6[%c0_320, %c0_321, %c0_322] : memref<9x4x4xf32, #tpu.memory_space<vmem>>, vector<1x4x4xf32>
    %271 = vector.shape_cast %270 : vector<1x4x4xf32> to vector<4x4xf32>
    %cst_323 = arith.constant dense<0.000000e+00> : vector<128x4xf32>
    %272 = tpu.matmul %269, %271, %cst_323 {dimension_numbers = #tpu.dot_dimension_numbers<[1], [0], [0], [1], [0, 0, 1, 1], [], []>} : vector<128x4xf32>, vector<4x4xf32>, vector<128x4xf32> -> vector<128x4xf32>
    %273 = arith.addf %267, %272 : vector<128x4xf32>
    %c0_324 = arith.constant 0 : index
    %c1_325 = arith.constant 1 : index
    %c0_326 = arith.constant 0 : index
    %274 = vector.load %arg14[%c0_324, %c1_325, %c0_326] : memref<18x18x4xf32, #tpu.memory_space<vmem>>, vector<8x16x4xf32>
    %275 = vector.shape_cast %274 : vector<8x16x4xf32> to vector<128x4xf32>
    %c1_327 = arith.constant 1 : index
    %c0_328 = arith.constant 0 : index
    %c0_329 = arith.constant 0 : index
    %276 = vector.load %arg6[%c1_327, %c0_328, %c0_329] : memref<9x4x4xf32, #tpu.memory_space<vmem>>, vector<1x4x4xf32>
    %277 = vector.shape_cast %276 : vector<1x4x4xf32> to vector<4x4xf32>
    %cst_330 = arith.constant dense<0.000000e+00> : vector<128x4xf32>
    %278 = tpu.matmul %275, %277, %cst_330 {dimension_numbers = #tpu.dot_dimension_numbers<[1], [0], [0], [1], [0, 0, 1, 1], [], []>} : vector<128x4xf32>, vector<4x4xf32>, vector<128x4xf32> -> vector<128x4xf32>
    %279 = arith.addf %273, %278 : vector<128x4xf32>
    %c0_331 = arith.constant 0 : index
    %c2_332 = arith.constant 2 : index
    %c0_333 = arith.constant 0 : index
    %280 = vector.load %arg14[%c0_331, %c2_332, %c0_333] : memref<18x18x4xf32, #tpu.memory_space<vmem>>, vector<8x16x4xf32>
    %281 = vector.shape_cast %280 : vector<8x16x4xf32> to vector<128x4xf32>
    %c2_334 = arith.constant 2 : index
    %c0_335 = arith.constant 0 : index
    %c0_336 = arith.constant 0 : index
    %282 = vector.load %arg6[%c2_334, %c0_335, %c0_336] : memref<9x4x4xf32, #tpu.memory_space<vmem>>, vector<1x4x4xf32>
    %283 = vector.shape_cast %282 : vector<1x4x4xf32> to vector<4x4xf32>
    %cst_337 = arith.constant dense<0.000000e+00> : vector<128x4xf32>
    %284 = tpu.matmul %281, %283, %cst_337 {dimension_numbers = #tpu.dot_dimension_numbers<[1], [0], [0], [1], [0, 0, 1, 1], [], []>} : vector<128x4xf32>, vector<4x4xf32>, vector<128x4xf32> -> vector<128x4xf32>
    %285 = arith.addf %279, %284 : vector<128x4xf32>
    %c1_338 = arith.constant 1 : index
    %c0_339 = arith.constant 0 : index
    %c0_340 = arith.constant 0 : index
    %286 = vector.load %arg14[%c1_338, %c0_339, %c0_340] : memref<18x18x4xf32, #tpu.memory_space<vmem>>, vector<8x16x4xf32>
    %287 = vector.shape_cast %286 : vector<8x16x4xf32> to vector<128x4xf32>
    %c3_341 = arith.constant 3 : index
    %c0_342 = arith.constant 0 : index
    %c0_343 = arith.constant 0 : index
    %288 = vector.load %arg6[%c3_341, %c0_342, %c0_343] : memref<9x4x4xf32, #tpu.memory_space<vmem>>, vector<1x4x4xf32>
    %289 = vector.shape_cast %288 : vector<1x4x4xf32> to vector<4x4xf32>
    %cst_344 = arith.constant dense<0.000000e+00> : vector<128x4xf32>
    %290 = tpu.matmul %287, %289, %cst_344 {dimension_numbers = #tpu.dot_dimension_numbers<[1], [0], [0], [1], [0, 0, 1, 1], [], []>} : vector<128x4xf32>, vector<4x4xf32>, vector<128x4xf32> -> vector<128x4xf32>
    %291 = arith.addf %285, %290 : vector<128x4xf32>
    %c1_345 = arith.constant 1 : index
    %c1_346 = arith.constant 1 : index
    %c0_347 = arith.constant 0 : index
    %292 = vector.load %arg14[%c1_345, %c1_346, %c0_347] : memref<18x18x4xf32, #tpu.memory_space<vmem>>, vector<8x16x4xf32>
    %293 = vector.shape_cast %292 : vector<8x16x4xf32> to vector<128x4xf32>
    %c4_348 = arith.constant 4 : index
    %c0_349 = arith.constant 0 : index
    %c0_350 = arith.constant 0 : index
    %294 = vector.load %arg6[%c4_348, %c0_349, %c0_350] : memref<9x4x4xf32, #tpu.memory_space<vmem>>, vector<1x4x4xf32>
    %295 = vector.shape_cast %294 : vector<1x4x4xf32> to vector<4x4xf32>
    %cst_351 = arith.constant dense<0.000000e+00> : vector<128x4xf32>
    %296 = tpu.matmul %293, %295, %cst_351 {dimension_numbers = #tpu.dot_dimension_numbers<[1], [0], [0], [1], [0, 0, 1, 1], [], []>} : vector<128x4xf32>, vector<4x4xf32>, vector<128x4xf32> -> vector<128x4xf32>
    %297 = arith.addf %291, %296 : vector<128x4xf32>
    %c1_352 = arith.constant 1 : index
    %c2_353 = arith.constant 2 : index
    %c0_354 = arith.constant 0 : index
    %298 = vector.load %arg14[%c1_352, %c2_353, %c0_354] : memref<18x18x4xf32, #tpu.memory_space<vmem>>, vector<8x16x4xf32>
    %299 = vector.shape_cast %298 : vector<8x16x4xf32> to vector<128x4xf32>
    %c5_355 = arith.constant 5 : index
    %c0_356 = arith.constant 0 : index
    %c0_357 = arith.constant 0 : index
    %300 = vector.load %arg6[%c5_355, %c0_356, %c0_357] : memref<9x4x4xf32, #tpu.memory_space<vmem>>, vector<1x4x4xf32>
    %301 = vector.shape_cast %300 : vector<1x4x4xf32> to vector<4x4xf32>
    %cst_358 = arith.constant dense<0.000000e+00> : vector<128x4xf32>
    %302 = tpu.matmul %299, %301, %cst_358 {dimension_numbers = #tpu.dot_dimension_numbers<[1], [0], [0], [1], [0, 0, 1, 1], [], []>} : vector<128x4xf32>, vector<4x4xf32>, vector<128x4xf32> -> vector<128x4xf32>
    %303 = arith.addf %297, %302 : vector<128x4xf32>
    %c2_359 = arith.constant 2 : index
    %c0_360 = arith.constant 0 : index
    %c0_361 = arith.constant 0 : index
    %304 = vector.load %arg14[%c2_359, %c0_360, %c0_361] : memref<18x18x4xf32, #tpu.memory_space<vmem>>, vector<8x16x4xf32>
    %305 = vector.shape_cast %304 : vector<8x16x4xf32> to vector<128x4xf32>
    %c6_362 = arith.constant 6 : index
    %c0_363 = arith.constant 0 : index
    %c0_364 = arith.constant 0 : index
    %306 = vector.load %arg6[%c6_362, %c0_363, %c0_364] : memref<9x4x4xf32, #tpu.memory_space<vmem>>, vector<1x4x4xf32>
    %307 = vector.shape_cast %306 : vector<1x4x4xf32> to vector<4x4xf32>
    %cst_365 = arith.constant dense<0.000000e+00> : vector<128x4xf32>
    %308 = tpu.matmul %305, %307, %cst_365 {dimension_numbers = #tpu.dot_dimension_numbers<[1], [0], [0], [1], [0, 0, 1, 1], [], []>} : vector<128x4xf32>, vector<4x4xf32>, vector<128x4xf32> -> vector<128x4xf32>
    %309 = arith.addf %303, %308 : vector<128x4xf32>
    %c2_366 = arith.constant 2 : index
    %c1_367 = arith.constant 1 : index
    %c0_368 = arith.constant 0 : index
    %310 = vector.load %arg14[%c2_366, %c1_367, %c0_368] : memref<18x18x4xf32, #tpu.memory_space<vmem>>, vector<8x16x4xf32>
    %311 = vector.shape_cast %310 : vector<8x16x4xf32> to vector<128x4xf32>
    %c7_369 = arith.constant 7 : index
    %c0_370 = arith.constant 0 : index
    %c0_371 = arith.constant 0 : index
    %312 = vector.load %arg6[%c7_369, %c0_370, %c0_371] : memref<9x4x4xf32, #tpu.memory_space<vmem>>, vector<1x4x4xf32>
    %313 = vector.shape_cast %312 : vector<1x4x4xf32> to vector<4x4xf32>
    %cst_372 = arith.constant dense<0.000000e+00> : vector<128x4xf32>
    %314 = tpu.matmul %311, %313, %cst_372 {dimension_numbers = #tpu.dot_dimension_numbers<[1], [0], [0], [1], [0, 0, 1, 1], [], []>} : vector<128x4xf32>, vector<4x4xf32>, vector<128x4xf32> -> vector<128x4xf32>
    %315 = arith.addf %309, %314 : vector<128x4xf32>
    %c2_373 = arith.constant 2 : index
    %c2_374 = arith.constant 2 : index
    %c0_375 = arith.constant 0 : index
    %316 = vector.load %arg14[%c2_373, %c2_374, %c0_375] : memref<18x18x4xf32, #tpu.memory_space<vmem>>, vector<8x16x4xf32>
    %317 = vector.shape_cast %316 : vector<8x16x4xf32> to vector<128x4xf32>
    %c8_376 = arith.constant 8 : index
    %c0_377 = arith.constant 0 : index
    %c0_378 = arith.constant 0 : index
    %318 = vector.load %arg6[%c8_376, %c0_377, %c0_378] : memref<9x4x4xf32, #tpu.memory_space<vmem>>, vector<1x4x4xf32>
    %319 = vector.shape_cast %318 : vector<1x4x4xf32> to vector<4x4xf32>
    %cst_379 = arith.constant dense<0.000000e+00> : vector<128x4xf32>
    %320 = tpu.matmul %317, %319, %cst_379 {dimension_numbers = #tpu.dot_dimension_numbers<[1], [0], [0], [1], [0, 0, 1, 1], [], []>} : vector<128x4xf32>, vector<4x4xf32>, vector<128x4xf32> -> vector<128x4xf32>
    %321 = arith.addf %315, %320 : vector<128x4xf32>
    %322 = vector.broadcast %265 : vector<1x4xf32> to vector<128x4xf32>
    %323 = arith.mulf %321, %322 : vector<128x4xf32>
    %324 = vector.broadcast %266 : vector<1x4xf32> to vector<128x4xf32>
    %325 = arith.addf %323, %324 : vector<128x4xf32>
    %cst_380 = arith.constant 0.000000e+00 : f32
    %326 = vector.broadcast %cst_380 : f32 to vector<128x4xf32>
    %327 = arith.maximumf %325, %326 : vector<128x4xf32>
    %328 = vector.shape_cast %327 : vector<128x4xf32> to vector<1x128x4xf32>
    %c0_381 = arith.constant 0 : index
    %c0_382 = arith.constant 0 : index
    %c0_383 = arith.constant 0 : index
    %329 = vector.load %arg11[%c0_381, %c0_382, %c0_383] : memref<1x256x4xf32, #tpu.memory_space<vmem>>, vector<1x128x4xf32>
    tpu.vector_store %arg11[%c0_381, %c0_382, %c0_383], %328 {strides = array<i32>} : memref<1x256x4xf32, #tpu.memory_space<vmem>>, vector<1x128x4xf32>,
    %cst_384 = arith.constant 0.000000e+00 : f32
    %330 = vector.broadcast %cst_384 : f32 to vector<128x4xf32>
    %c8_385 = arith.constant 8 : index
    %c0_386 = arith.constant 0 : index
    %c0_387 = arith.constant 0 : index
    %331 = vector.load %arg14[%c8_385, %c0_386, %c0_387] : memref<18x18x4xf32, #tpu.memory_space<vmem>>, vector<8x16x4xf32>
    %332 = vector.shape_cast %331 : vector<8x16x4xf32> to vector<128x4xf32>
    %c0_388 = arith.constant 0 : index
    %c0_389 = arith.constant 0 : index
    %c0_390 = arith.constant 0 : index
    %333 = vector.load %arg6[%c0_388, %c0_389, %c0_390] : memref<9x4x4xf32, #tpu.memory_space<vmem>>, vector<1x4x4xf32>
    %334 = vector.shape_cast %333 : vector<1x4x4xf32> to vector<4x4xf32>
    %cst_391 = arith.constant dense<0.000000e+00> : vector<128x4xf32>
    %335 = tpu.matmul %332, %334, %cst_391 {dimension_numbers = #tpu.dot_dimension_numbers<[1], [0], [0], [1], [0, 0, 1, 1], [], []>} : vector<128x4xf32>, vector<4x4xf32>, vector<128x4xf32> -> vector<128x4xf32>
    %336 = arith.addf %330, %335 : vector<128x4xf32>
    %c8_392 = arith.constant 8 : index
    %c1_393 = arith.constant 1 : index
    %c0_394 = arith.constant 0 : index
    %337 = vector.load %arg14[%c8_392, %c1_393, %c0_394] : memref<18x18x4xf32, #tpu.memory_space<vmem>>, vector<8x16x4xf32>
    %338 = vector.shape_cast %337 : vector<8x16x4xf32> to vector<128x4xf32>
    %c1_395 = arith.constant 1 : index
    %c0_396 = arith.constant 0 : index
    %c0_397 = arith.constant 0 : index
    %339 = vector.load %arg6[%c1_395, %c0_396, %c0_397] : memref<9x4x4xf32, #tpu.memory_space<vmem>>, vector<1x4x4xf32>
    %340 = vector.shape_cast %339 : vector<1x4x4xf32> to vector<4x4xf32>
    %cst_398 = arith.constant dense<0.000000e+00> : vector<128x4xf32>
    %341 = tpu.matmul %338, %340, %cst_398 {dimension_numbers = #tpu.dot_dimension_numbers<[1], [0], [0], [1], [0, 0, 1, 1], [], []>} : vector<128x4xf32>, vector<4x4xf32>, vector<128x4xf32> -> vector<128x4xf32>
    %342 = arith.addf %336, %341 : vector<128x4xf32>
    %c8_399 = arith.constant 8 : index
    %c2_400 = arith.constant 2 : index
    %c0_401 = arith.constant 0 : index
    %343 = vector.load %arg14[%c8_399, %c2_400, %c0_401] : memref<18x18x4xf32, #tpu.memory_space<vmem>>, vector<8x16x4xf32>
    %344 = vector.shape_cast %343 : vector<8x16x4xf32> to vector<128x4xf32>
    %c2_402 = arith.constant 2 : index
    %c0_403 = arith.constant 0 : index
    %c0_404 = arith.constant 0 : index
    %345 = vector.load %arg6[%c2_402, %c0_403, %c0_404] : memref<9x4x4xf32, #tpu.memory_space<vmem>>, vector<1x4x4xf32>
    %346 = vector.shape_cast %345 : vector<1x4x4xf32> to vector<4x4xf32>
    %cst_405 = arith.constant dense<0.000000e+00> : vector<128x4xf32>
    %347 = tpu.matmul %344, %346, %cst_405 {dimension_numbers = #tpu.dot_dimension_numbers<[1], [0], [0], [1], [0, 0, 1, 1], [], []>} : vector<128x4xf32>, vector<4x4xf32>, vector<128x4xf32> -> vector<128x4xf32>
    %348 = arith.addf %342, %347 : vector<128x4xf32>
    %c9_406 = arith.constant 9 : index
    %c0_407 = arith.constant 0 : index
    %c0_408 = arith.constant 0 : index
    %349 = vector.load %arg14[%c9_406, %c0_407, %c0_408] : memref<18x18x4xf32, #tpu.memory_space<vmem>>, vector<8x16x4xf32>
    %350 = vector.shape_cast %349 : vector<8x16x4xf32> to vector<128x4xf32>
    %c3_409 = arith.constant 3 : index
    %c0_410 = arith.constant 0 : index
    %c0_411 = arith.constant 0 : index
    %351 = vector.load %arg6[%c3_409, %c0_410, %c0_411] : memref<9x4x4xf32, #tpu.memory_space<vmem>>, vector<1x4x4xf32>
    %352 = vector.shape_cast %351 : vector<1x4x4xf32> to vector<4x4xf32>
    %cst_412 = arith.constant dense<0.000000e+00> : vector<128x4xf32>
    %353 = tpu.matmul %350, %352, %cst_412 {dimension_numbers = #tpu.dot_dimension_numbers<[1], [0], [0], [1], [0, 0, 1, 1], [], []>} : vector<128x4xf32>, vector<4x4xf32>, vector<128x4xf32> -> vector<128x4xf32>
    %354 = arith.addf %348, %353 : vector<128x4xf32>
    %c9_413 = arith.constant 9 : index
    %c1_414 = arith.constant 1 : index
    %c0_415 = arith.constant 0 : index
    %355 = vector.load %arg14[%c9_413, %c1_414, %c0_415] : memref<18x18x4xf32, #tpu.memory_space<vmem>>, vector<8x16x4xf32>
    %356 = vector.shape_cast %355 : vector<8x16x4xf32> to vector<128x4xf32>
    %c4_416 = arith.constant 4 : index
    %c0_417 = arith.constant 0 : index
    %c0_418 = arith.constant 0 : index
    %357 = vector.load %arg6[%c4_416, %c0_417, %c0_418] : memref<9x4x4xf32, #tpu.memory_space<vmem>>, vector<1x4x4xf32>
    %358 = vector.shape_cast %357 : vector<1x4x4xf32> to vector<4x4xf32>
    %cst_419 = arith.constant dense<0.000000e+00> : vector<128x4xf32>
    %359 = tpu.matmul %356, %358, %cst_419 {dimension_numbers = #tpu.dot_dimension_numbers<[1], [0], [0], [1], [0, 0, 1, 1], [], []>} : vector<128x4xf32>, vector<4x4xf32>, vector<128x4xf32> -> vector<128x4xf32>
    %360 = arith.addf %354, %359 : vector<128x4xf32>
    %c9_420 = arith.constant 9 : index
    %c2_421 = arith.constant 2 : index
    %c0_422 = arith.constant 0 : index
    %361 = vector.load %arg14[%c9_420, %c2_421, %c0_422] : memref<18x18x4xf32, #tpu.memory_space<vmem>>, vector<8x16x4xf32>
    %362 = vector.shape_cast %361 : vector<8x16x4xf32> to vector<128x4xf32>
    %c5_423 = arith.constant 5 : index
    %c0_424 = arith.constant 0 : index
    %c0_425 = arith.constant 0 : index
    %363 = vector.load %arg6[%c5_423, %c0_424, %c0_425] : memref<9x4x4xf32, #tpu.memory_space<vmem>>, vector<1x4x4xf32>
    %364 = vector.shape_cast %363 : vector<1x4x4xf32> to vector<4x4xf32>
    %cst_426 = arith.constant dense<0.000000e+00> : vector<128x4xf32>
    %365 = tpu.matmul %362, %364, %cst_426 {dimension_numbers = #tpu.dot_dimension_numbers<[1], [0], [0], [1], [0, 0, 1, 1], [], []>} : vector<128x4xf32>, vector<4x4xf32>, vector<128x4xf32> -> vector<128x4xf32>
    %366 = arith.addf %360, %365 : vector<128x4xf32>
    %c10_427 = arith.constant 10 : index
    %c0_428 = arith.constant 0 : index
    %c0_429 = arith.constant 0 : index
    %367 = vector.load %arg14[%c10_427, %c0_428, %c0_429] : memref<18x18x4xf32, #tpu.memory_space<vmem>>, vector<8x16x4xf32>
    %368 = vector.shape_cast %367 : vector<8x16x4xf32> to vector<128x4xf32>
    %c6_430 = arith.constant 6 : index
    %c0_431 = arith.constant 0 : index
    %c0_432 = arith.constant 0 : index
    %369 = vector.load %arg6[%c6_430, %c0_431, %c0_432] : memref<9x4x4xf32, #tpu.memory_space<vmem>>, vector<1x4x4xf32>
    %370 = vector.shape_cast %369 : vector<1x4x4xf32> to vector<4x4xf32>
    %cst_433 = arith.constant dense<0.000000e+00> : vector<128x4xf32>
    %371 = tpu.matmul %368, %370, %cst_433 {dimension_numbers = #tpu.dot_dimension_numbers<[1], [0], [0], [1], [0, 0, 1, 1], [], []>} : vector<128x4xf32>, vector<4x4xf32>, vector<128x4xf32> -> vector<128x4xf32>
    %372 = arith.addf %366, %371 : vector<128x4xf32>
    %c10_434 = arith.constant 10 : index
    %c1_435 = arith.constant 1 : index
    %c0_436 = arith.constant 0 : index
    %373 = vector.load %arg14[%c10_434, %c1_435, %c0_436] : memref<18x18x4xf32, #tpu.memory_space<vmem>>, vector<8x16x4xf32>
    %374 = vector.shape_cast %373 : vector<8x16x4xf32> to vector<128x4xf32>
    %c7_437 = arith.constant 7 : index
    %c0_438 = arith.constant 0 : index
    %c0_439 = arith.constant 0 : index
    %375 = vector.load %arg6[%c7_437, %c0_438, %c0_439] : memref<9x4x4xf32, #tpu.memory_space<vmem>>, vector<1x4x4xf32>
    %376 = vector.shape_cast %375 : vector<1x4x4xf32> to vector<4x4xf32>
    %cst_440 = arith.constant dense<0.000000e+00> : vector<128x4xf32>
    %377 = tpu.matmul %374, %376, %cst_440 {dimension_numbers = #tpu.dot_dimension_numbers<[1], [0], [0], [1], [0, 0, 1, 1], [], []>} : vector<128x4xf32>, vector<4x4xf32>, vector<128x4xf32> -> vector<128x4xf32>
    %378 = arith.addf %372, %377 : vector<128x4xf32>
    %c10_441 = arith.constant 10 : index
    %c2_442 = arith.constant 2 : index
    %c0_443 = arith.constant 0 : index
    %379 = vector.load %arg14[%c10_441, %c2_442, %c0_443] : memref<18x18x4xf32, #tpu.memory_space<vmem>>, vector<8x16x4xf32>
    %380 = vector.shape_cast %379 : vector<8x16x4xf32> to vector<128x4xf32>
    %c8_444 = arith.constant 8 : index
    %c0_445 = arith.constant 0 : index
    %c0_446 = arith.constant 0 : index
    %381 = vector.load %arg6[%c8_444, %c0_445, %c0_446] : memref<9x4x4xf32, #tpu.memory_space<vmem>>, vector<1x4x4xf32>
    %382 = vector.shape_cast %381 : vector<1x4x4xf32> to vector<4x4xf32>
    %cst_447 = arith.constant dense<0.000000e+00> : vector<128x4xf32>
    %383 = tpu.matmul %380, %382, %cst_447 {dimension_numbers = #tpu.dot_dimension_numbers<[1], [0], [0], [1], [0, 0, 1, 1], [], []>} : vector<128x4xf32>, vector<4x4xf32>, vector<128x4xf32> -> vector<128x4xf32>
    %384 = arith.addf %378, %383 : vector<128x4xf32>
    %385 = vector.broadcast %265 : vector<1x4xf32> to vector<128x4xf32>
    %386 = arith.mulf %384, %385 : vector<128x4xf32>
    %387 = vector.broadcast %266 : vector<1x4xf32> to vector<128x4xf32>
    %388 = arith.addf %386, %387 : vector<128x4xf32>
    %cst_448 = arith.constant 0.000000e+00 : f32
    %389 = vector.broadcast %cst_448 : f32 to vector<128x4xf32>
    %390 = arith.maximumf %388, %389 : vector<128x4xf32>
    %391 = vector.shape_cast %390 : vector<128x4xf32> to vector<1x128x4xf32>
    %c0_449 = arith.constant 0 : index
    %c128 = arith.constant 128 : index
    %c0_450 = arith.constant 0 : index
    %392 = vector.load %arg11[%c0_449, %c128, %c0_450] : memref<1x256x4xf32, #tpu.memory_space<vmem>>, vector<1x128x4xf32>
    tpu.vector_store %arg11[%c0_449, %c128, %c0_450], %391 {strides = array<i32>} : memref<1x256x4xf32, #tpu.memory_space<vmem>>, vector<1x128x4xf32>,
    return
  }
  func.func @transform_0(%arg0: i32) -> (i32, i32, i32, i32) {
    %c0_i32 = arith.constant 0 : i32
    %c0_i32_0 = arith.constant 0 : i32
    %c0_i32_1 = arith.constant 0 : i32
    %c0_i32_2 = arith.constant 0 : i32
    return %arg0, %c0_i32, %c0_i32_0, %c0_i32_1 : i32, i32, i32, i32
  }
  func.func @transform_1(%arg0: i32) -> (i32, i32, i32, i32) {
    %c0_i32 = arith.constant 0 : i32
    %c0_i32_0 = arith.constant 0 : i32
    %c0_i32_1 = arith.constant 0 : i32
    %c0_i32_2 = arith.constant 0 : i32
    return %arg0, %c0_i32, %c0_i32_0, %c0_i32_1 : i32, i32, i32, i32
  }
  func.func @transform_2(%arg0: i32) -> (i32, i32) {
    %c0_i32 = arith.constant 0 : i32
    %c0_i32_0 = arith.constant 0 : i32
    %c0_i32_1 = arith.constant 0 : i32
    return %c0_i32, %c0_i32_0 : i32, i32
  }
  func.func @transform_3(%arg0: i32) -> (i32, i32, i32) {
    %c0_i32 = arith.constant 0 : i32
    %c0_i32_0 = arith.constant 0 : i32
    %c0_i32_1 = arith.constant 0 : i32
    %c0_i32_2 = arith.constant 0 : i32
    return %c0_i32, %c0_i32_0, %c0_i32_1 : i32, i32, i32
  }
  func.func @transform_4(%arg0: i32) -> (i32, i32, i32) {
    %c0_i32 = arith.constant 0 : i32
    %c0_i32_0 = arith.constant 0 : i32
    %c0_i32_1 = arith.constant 0 : i32
    %c0_i32_2 = arith.constant 0 : i32
    return %c0_i32, %c0_i32_0, %c0_i32_1 : i32, i32, i32
  }
  func.func @transform_5(%arg0: i32) -> (i32, i32, i32) {
    %c0_i32 = arith.constant 0 : i32
    %c0_i32_0 = arith.constant 0 : i32
    %c0_i32_1 = arith.constant 0 : i32
    %c0_i32_2 = arith.constant 0 : i32
    return %c0_i32, %c0_i32_0, %c0_i32_1 : i32, i32, i32
  }
  func.func @transform_6(%arg0: i32) -> (i32, i32) {
    %c0_i32 = arith.constant 0 : i32
    %c0_i32_0 = arith.constant 0 : i32
    %c0_i32_1 = arith.constant 0 : i32
    return %c0_i32, %c0_i32_0 : i32, i32
  }
  func.func @transform_7(%arg0: i32) -> (i32, i32) {
    %c0_i32 = arith.constant 0 : i32
    %c0_i32_0 = arith.constant 0 : i32
    %c0_i32_1 = arith.constant 0 : i32
    return %c0_i32, %c0_i32_0 : i32, i32
  }
  func.func @transform_8(%arg0: i32) -> (i32, i32) {
    %c0_i32 = arith.constant 0 : i32
    %c0_i32_0 = arith.constant 0 : i32
    %c0_i32_1 = arith.constant 0 : i32
    return %c0_i32, %c0_i32_0 : i32, i32
  }
  func.func @transform_9(%arg0: i32) -> (i32, i32) {
    %c0_i32 = arith.constant 0 : i32
    %c0_i32_0 = arith.constant 0 : i32
    %c0_i32_1 = arith.constant 0 : i32
    return %c0_i32, %c0_i32_0 : i32, i32
  }
  func.func @transform_10(%arg0: i32) -> (i32, i32, i32) {
    %c0_i32 = arith.constant 0 : i32
    %c0_i32_0 = arith.constant 0 : i32
    %c0_i32_1 = arith.constant 0 : i32
    return %arg0, %c0_i32, %c0_i32_0 : i32, i32, i32
  }
}

</mosaic_0001>

<bundles_post_ra>
// kernel: tpu_custom_call.1
= control target key start
LH: loop header
LB: loop body
LE: loop exit
PB: predicated region body
PF: predicated region fallthrough
CT: control target
= control target key end

     0   :  { %s10459_s13 = smov 0   ;;  %s14231_s0 = inlined_call_operand.vmem [shape: f32[8,16,4,8], index: 0, kind: input, shape index: {}]   ;;  %s14232_s1 = inlined_call_operand.vmem [shape: f32[8,16,16,4], index: 1, kind: input, shape index: {}]   ;;  %s14233_s2 = inlined_call_operand.vmem [shape: f32[16,8], index: 2, kind: input, shape index: {}]   ;;  %s14234_s3 = inlined_call_operand.vmem [shape: f32[9,4,4], index: 3, kind: input, shape index: {}]   ;;  %s14235_s4 = inlined_call_operand.vmem [shape: f32[9,4,4], index: 4, kind: input, shape index: {}]   ;;  %s14236_s5 = inlined_call_operand.vmem [shape: f32[9,4,4], index: 5, kind: input, shape index: {}]   ;;  %s14237_s6 = inlined_call_operand.vmem [shape: f32[1,4], index: 6, kind: input, shape index: {}]   ;;  %s14238_s7 = inlined_call_operand.vmem [shape: f32[1,4], index: 7, kind: input, shape index: {}]   ;;  %s14239_s8 = inlined_call_operand.vmem [shape: f32[1,4], index: 8, kind: input, shape index: {}]   ;;  %s14240_s9 = inlined_call_operand.vmem [shape: f32[1,4], index: 9, kind: input, shape index: {}]   ;;  %s14241_s10 = inlined_call_operand.vmem [shape: f32[8,256,4], index: 10, kind: output, shape index: {}]  }
   0x1 LB: > { %s9346_s14 = sadd.s32 4294967295, %s10401_s13   ;;  %p9350_p0 = scmp.ge.s32.totalorder %s10401_s13, 1  ;;  %s10401_s13 = sphi %s10459_s13, %s20_s13  }
   0x2   : > { %p322_p1 = scmp.lt.s32.totalorder %s10401_s13, 9 }
   0x4   : > { %p323_p2 = pnand %p9350_p0, %p322_p1 }
   0x6   : > { %326 = sbr.rel (%p323_p2) target bundleno = 2006 (0x7d6), region = 60 }
   0xb   : > { %p365_p3 = scmp.lt.s32.totalorder %s9346_s14, 7  ;;  %vm530_vm0 = vcmask 64512   ;;  %v10478_v0 = vld [vmem:[%s14233_s2] sm:$0xff]  ;;  %v10515_v13 = vld [vmem:[%s14233_s2 + $0x8] sm:$0xff]  ;;  %vm380_vm1 = vcmask 31744   ;;  %v10403_v18 = vmov 0.0  }
   0xc   : > { %381 = vst.msk [vmem:[#allocation2] sm:$0xff] %vm380_vm1, %v10403_v18  ;;  %v9405_v19 = vld [vmem:[%s14234_s3 + $0x4] sm:$0xf]  ;;  %vm1136_vm2 = vcmask 1043456   ;;  %v1069_v20 = vld [vmem:[%s14234_s3] sm:$0xf] }
   0xd   : > { %s14349_s14 = smov (!%p365_p3, %s9346_s14), 7  ;;  %382 = vst.msk [vmem:[#allocation2 + $0x8] sm:$0xff] %vm380_vm1, %v10403_v18  ;;  %vm389_vm3 = vcmask 24576   ;;  %v9440_v26 = vld [vmem:[%s14234_s3 + $0x8] sm:$0xf]  ;;  %vm383_vm4 = vcmask 25600  }
   0xe   : > { %s10373_s15 = sshll.u32 %s14349_s14, 6  ;;  %386 = vst.msk [vmem:[#allocation2 + $0x198] sm:$0xff] %vm380_vm1, %v10403_v18  ;;  %s10374_s23 = sshll.u32 %s14349_s14, 8  ;;  %v9458_v27 = vld [vmem:[%s14234_s3 + $0xc] sm:$0xf] }
   0xf   : > { %s10473_s18 = scalar_lea.vmem %s14231_s0, %s10373_s15  ;;  %387 = vst.msk [vmem:[#allocation2 + $0x1a0] sm:$0xff] %vm380_vm1, %v10403_v18  ;;  %s10567_s26 = scalar_lea.vmem %s14232_s1, %s10374_s23  ;;  %v9476_v29 = vld [vmem:[%s14234_s3 + $0x10] sm:$0xf]  ;;  %v9494_v30 = vld [vmem:[%s14234_s3 + $0x14] sm:$0xf] }
  0x10   : > { %v512_v1 = vld [vmem:[%s10473_s18] sm:$0xf]  ;;  %v513_v2 = vld [vmem:[%s10473_s18 + $0x4] sm:$0xf]  ;;  %v514_v3 = vld [vmem:[%s10473_s18 + $0x8] sm:$0xf]  ;;  %s13700_s15 = scalar_lea.vmem %s14241_s10, %s10374_s23 }
  0x11   : > { %9357 = vmatpush.xpose.msk.msra.mxu0 %vm530_vm0, %v512_v1  ;;  %9360 = vmatpush.xpose.msk.msra.mxu1 %vm530_vm0, %v513_v2  ;;  %v515_v4 = vld [vmem:[%s10473_s18 + $0xc] sm:$0xf]  ;;  %v518_v5 = vld [vmem:[%s10473_s18 + $0x18] sm:$0xf]  ;;  %v519_v6 = vld [vmem:[%s10473_s18 + $0x1c] sm:$0xf] }
  0x12   : > { %9363 = vmatpush.xpose.msk.msra.mxu2 %vm530_vm0, %v514_v3  ;;  %9366 = vmatpush.xpose.msk.msra.mxu3 %vm530_vm0, %v515_v4  ;;  %v516_v7 = vld [vmem:[%s10473_s18 + $0x10] sm:$0xf]  ;;  %v517_v8 = vld [vmem:[%s10473_s18 + $0x14] sm:$0xf]  ;;  %v522_v9 = vld [vmem:[%s10473_s18 + $0x28] sm:$0xf] }
  0x13   : > { %v523_v10 = vld [vmem:[%s10473_s18 + $0x2c] sm:$0xf]  ;;  %v520_v11 = vld [vmem:[%s10473_s18 + $0x20] sm:$0xf]  ;;  %v521_v12 = vld [vmem:[%s10473_s18 + $0x24] sm:$0xf] }
  0x14   : > { %9358 = vmatmul.msk.f32.vlgmr.msra.gmra.mxu0 %vm530_vm0, %v10478_v0  ;;  %9361 = vmatmul.msk.f32.vlgmr.msra.gmra.mxu1 %vm530_vm0, %v10478_v0  ;;  %v526_v14 = vld [vmem:[%s10473_s18 + $0x38] sm:$0xf]  ;;  %v527_v15 = vld [vmem:[%s10473_s18 + $0x3c] sm:$0xf]  ;;  %v524_v16 = vld [vmem:[%s10473_s18 + $0x30] sm:$0xf] }
  0x15   : > { %9364 = vmatmul.msk.f32.vlgmr.msra.gmra.mxu2 %vm530_vm0, %v10478_v0  ;;  %9367 = vmatmul.msk.f32.vlgmr.msra.gmra.mxu3 %vm530_vm0, %v10478_v0  ;;  %v525_v17 = vld [vmem:[%s10473_s18 + $0x34] sm:$0xf]  ;;  %426 = vst.msk [vmem:[#allocation3] sm:$0xff] %vm380_vm1, %v10403_v18  ;;  %v1070_v22 = vld [vmem:[#allocation2 + $0x1] sm:$0xff]  ;;  %v993_v31 = vld [vmem:[%s10567_s26 + $0x38] sm:$0xff] }
  0x16   : > { %9375 = vmatpush.xpose.msk.msrb.mxu2 %vm530_vm0, %v518_v5  ;;  %9378 = vmatpush.xpose.msk.msrb.mxu3 %vm530_vm0, %v519_v6  ;;  %427 = vst.msk [vmem:[#allocation3 + $0x8] sm:$0xff] %vm380_vm1, %v10403_v18  ;;  %v992_v21 = vld [vmem:[%s10567_s26 + $0x30] sm:$0xff]  ;;  %v1054_v28 = vld [vmem:[#allocation2 + $0x8] sm:$0xff]  ;;  %v986_v33 = vld [vmem:[%s10567_s26] sm:$0xff] }
  0x17   : > { %9369 = vmatpush.xpose.msk.msrb.mxu0 %vm530_vm0, %v516_v7  ;;  %9372 = vmatpush.xpose.msk.msrb.mxu1 %vm530_vm0, %v517_v8  ;;  %430 = vst.msk [vmem:[#allocation3 + $0x198] sm:$0xff] %vm380_vm1, %v10403_v18  ;;  %v994_v34 = vld [vmem:[%s10567_s26 + $0x40] sm:$0xff]  ;;  %v987_v35 = vld [vmem:[%s10567_s26 + $0x8] sm:$0xff]  ;;  %v988_v39 = vld [vmem:[%s10567_s26 + $0x10] sm:$0xff] }
  0x18   : > { %431 = vst.msk [vmem:[#allocation3 + $0x1a0] sm:$0xff] %vm380_vm1, %v10403_v18  ;;  %v995_v36 = vld [vmem:[%s10567_s26 + $0x48] sm:$0xff]  ;;  %v996_v40 = vld [vmem:[%s10567_s26 + $0x50] sm:$0xff]  ;;  %v989_v41 = vld [vmem:[%s10567_s26 + $0x18] sm:$0xff] }
  0x19   : > { %469 = vst.msk [vmem:[#allocation4] sm:$0xff] %vm380_vm1, %v10403_v18  ;;  %v997_v42 = vld [vmem:[%s10567_s26 + $0x58] sm:$0xff]  ;;  %v990_v43 = vld [vmem:[%s10567_s26 + $0x20] sm:$0xff]  ;;  %v991_v49 = vld [vmem:[%s10567_s26 + $0x28] sm:$0xff] }
  0x1a   : > { %9387 = vmatpush.xpose.msk.msra.mxu2 %vm530_vm0, %v522_v9  ;;  %9390 = vmatpush.xpose.msk.msra.mxu3 %vm530_vm0, %v523_v10  ;;  %470 = vst.msk [vmem:[#allocation4 + $0x8] sm:$0xff] %vm380_vm1, %v10403_v18  ;;  %v998_v44 = vld [vmem:[%s10567_s26 + $0x60] sm:$0xff]  ;;  %v999_v50 = vld [vmem:[%s10567_s26 + $0x68] sm:$0xff]  ;;  %v9512_v61 = vld [vmem:[%s14234_s3 + $0x18] sm:$0xf] }
  0x1b   : > { %9381 = vmatpush.xpose.msk.msra.mxu0 %vm530_vm0, %v520_v11  ;;  %9384 = vmatpush.xpose.msk.msra.mxu1 %vm530_vm0, %v521_v12  ;;  %473 = vst.msk [vmem:[#allocation4 + $0x198] sm:$0xff] %vm380_vm1, %v10403_v18  ;;  %v9530_v62 = vld [vmem:[%s14234_s3 + $0x1c] sm:$0xf]  ;;  %v9548_v7 = vld [vmem:[%s14234_s3 + $0x20] sm:$0xf] }
  0x1c   : > { %9359 = vmatmul.msk.f32.gmra.mxu0 %vm530_vm0, %v10515_v13  ;;  %9362 = vmatmul.msk.f32.gmra.mxu1 %vm530_vm0, %v10515_v13  ;;  %474 = vst.msk [vmem:[#allocation4 + $0x1a0] sm:$0xff] %vm380_vm1, %v10403_v18  ;;  %v2388_v10 = vld [vmem:[%s14235_s4] sm:$0xf] }
  0x1d   : > { %9365 = vmatmul.msk.f32.gmra.mxu2 %vm530_vm0, %v10515_v13  ;;  %9368 = vmatmul.msk.f32.gmra.mxu3 %vm530_vm0, %v10515_v13  ;;  %1025 = vst.msk [vmem:[#allocation2 + $0x61] sm:$0xff] %vm380_vm1, %v992_v21 }
  0x1e   : > { %390 = vst.msk [vmem:[#allocation2] sm:$0x1] %vm389_vm3, %v10403_v18 }
  0x1f   : > { %391 = vst.msk [vmem:[#allocation2 + $0x18] sm:$0x1] %vm389_vm3, %v10403_v18 }
  0x20   : > { %392 = vst.msk [vmem:[#allocation2 + $0x30] sm:$0x1] %vm389_vm3, %v10403_v18 }
  0x21   : > { %393 = vst.msk [vmem:[#allocation2 + $0x48] sm:$0x1] %vm389_vm3, %v10403_v18 }
  0x22   : > { %394 = vst.msk [vmem:[#allocation2 + $0x60] sm:$0x1] %vm389_vm3, %v10403_v18 }
  0x23   : > { %395 = vst.msk [vmem:[#allocation2 + $0x78] sm:$0x1] %vm389_vm3, %v10403_v18 }
  0x24   : > { %9370 = vmatmul.msk.f32.vlgmr.msrb.gmra.mxu0 %vm530_vm0, %v10478_v0  ;;  %9373 = vmatmul.msk.f32.vlgmr.msrb.gmra.mxu1 %vm530_vm0, %v10478_v0  ;;  %396 = vst.msk [vmem:[#allocation2 + $0x90] sm:$0x1] %vm389_vm3, %v10403_v18  ;;  %v10675_v24 = vld [vmem:[#allocation2 + $0x61] sm:$0xff] }
  0x25   : > { %9376 = vmatmul.msk.f32.vlgmr.msrb.gmra.mxu2 %vm530_vm0, %v10478_v0  ;;  %9379 = vmatmul.msk.f32.vlgmr.msrb.gmra.mxu3 %vm530_vm0, %v10478_v0  ;;  %397 = vst.msk [vmem:[#allocation2 + $0xa8] sm:$0x1] %vm389_vm3, %v10403_v18  ;;  %v1053_v23 = vld [vmem:[#allocation2] sm:$0xff] }
  0x26   : > { %9399 = vmatpush.xpose.msk.msrb.mxu2 %vm530_vm0, %v526_v14  ;;  %9402 = vmatpush.xpose.msk.msrb.mxu3 %vm530_vm0, %v527_v15  ;;  %398 = vst.msk [vmem:[#allocation2 + $0xc0] sm:$0x1] %vm389_vm3, %v10403_v18 }
  0x27   : > { %9393 = vmatpush.xpose.msk.msrb.mxu0 %vm530_vm0, %v524_v16  ;;  %9396 = vmatpush.xpose.msk.msrb.mxu1 %vm530_vm0, %v525_v17  ;;  %399 = vst.msk [vmem:[#allocation2 + $0xd8] sm:$0x1] %vm389_vm3, %v10403_v18 }
  0x28   : > { %400 = vst.msk [vmem:[#allocation2 + $0xf0] sm:$0x1] %vm389_vm3, %v10403_v18 }
  0x29   : > { %401 = vst.msk [vmem:[#allocation2 + $0x108] sm:$0x1] %vm389_vm3, %v10403_v18  ;;  %v10679_v25 = vld [vmem:[#allocation2 + $0x60] sm:$0xff] }
  0x2a   : > { %402 = vst.msk [vmem:[#allocation2 + $0x120] sm:$0x1] %vm389_vm3, %v10403_v18 }
  0x2b   : > { %403 = vst.msk [vmem:[#allocation2 + $0x138] sm:$0x1] %vm389_vm3, %v10403_v18 }
  0x2c   : > { %9371 = vmatmul.msk.f32.gmra.mxu0 %vm530_vm0, %v10515_v13  ;;  %9374 = vmatmul.msk.f32.gmra.mxu1 %vm530_vm0, %v10515_v13  ;;  %404 = vst.msk [vmem:[#allocation2 + $0x150] sm:$0x1] %vm389_vm3, %v10403_v18 }
  0x2d   : > { %9377 = vmatmul.msk.f32.gmra.mxu2 %vm530_vm0, %v10515_v13  ;;  %9380 = vmatmul.msk.f32.gmra.mxu3 %vm530_vm0, %v10515_v13  ;;  %405 = vst.msk [vmem:[#allocation2 + $0x168] sm:$0x1] %vm389_vm3, %v10403_v18 }
  0x2e   : > { %406 = vst.msk [vmem:[#allocation2 + $0x180] sm:$0x1] %vm389_vm3, %v10403_v18 }
  0x2f   : > { %407 = vst.msk [vmem:[#allocation2 + $0x198] sm:$0x1] %vm389_vm3, %v10403_v18 }
  0x30   : > { %409 = vst.msk [vmem:[#allocation2 + $0x29] sm:$0x1] %vm389_vm3, %v10403_v18 }
  0x31   : > { %410 = vst.msk [vmem:[#allocation2 + $0x41] sm:$0x1] %vm389_vm3, %v10403_v18 }
  0x32   : > { %411 = vst.msk [vmem:[#allocation2 + $0x59] sm:$0x1] %vm389_vm3, %v10403_v18 }
  0x33   : > { %412 = vst.msk [vmem:[#allocation2 + $0x71] sm:$0x1] %vm389_vm3, %v10403_v18 }
  0x34   : > { %9382 = vmatmul.msk.f32.vlgmr.msra.gmra.mxu0 %vm530_vm0, %v10478_v0  ;;  %9385 = vmatmul.msk.f32.vlgmr.msra.gmra.mxu1 %vm530_vm0, %v10478_v0  ;;  %413 = vst.msk [vmem:[#allocation2 + $0x89] sm:$0x1] %vm389_vm3, %v10403_v18 }
  0x35   : > { %9388 = vmatmul.msk.f32.vlgmr.msra.gmra.mxu2 %vm530_vm0, %v10478_v0  ;;  %9391 = vmatmul.msk.f32.vlgmr.msra.gmra.mxu3 %vm530_vm0, %v10478_v0  ;;  %414 = vst.msk [vmem:[#allocation2 + $0xa1] sm:$0x1] %vm389_vm3, %v10403_v18 }
  0x36   : > { %10376 = vmatpush.msk.msra.mxu2 %vm1136_vm2, %v9405_v19  ;;  %10377 = vmatpush.msk.msra.mxu3 %vm1136_vm2, %v1069_v20  ;;  %415 = vst.msk [vmem:[#allocation2 + $0xb9] sm:$0x1] %vm389_vm3, %v10403_v18 }
  0x37   : > { %9406 = vmatpush.msk.msra.mxu0 %vm1136_vm2, %v9405_v19  ;;  %9423 = vmatpush.msk.msra.mxu1 %vm1136_vm2, %v1069_v20  ;;  %416 = vst.msk [vmem:[#allocation2 + $0xd1] sm:$0x1] %vm389_vm3, %v10403_v18 }
  0x38   : > { %417 = vst.msk [vmem:[#allocation2 + $0xe9] sm:$0x1] %vm389_vm3, %v10403_v18 }
  0x39   : > { %418 = vst.msk [vmem:[#allocation2 + $0x101] sm:$0x1] %vm389_vm3, %v10403_v18 }
  0x3a   : > { %419 = vst.msk [vmem:[#allocation2 + $0x119] sm:$0x1] %vm389_vm3, %v10403_v18 }
  0x3b   : > { %420 = vst.msk [vmem:[#allocation2 + $0x131] sm:$0x1] %vm389_vm3, %v10403_v18 }
  0x3c   : > { %9383 = vmatmul.msk.f32.gmra.mxu0 %vm530_vm0, %v10515_v13  ;;  %9386 = vmatmul.msk.f32.gmra.mxu1 %vm530_vm0, %v10515_v13  ;;  %421 = vst.msk [vmem:[#allocation2 + $0x149] sm:$0x1] %vm389_vm3, %v10403_v18 }
  0x3d   : > { %9389 = vmatmul.msk.f32.gmra.mxu2 %vm530_vm0, %v10515_v13  ;;  %9392 = vmatmul.msk.f32.gmra.mxu3 %vm530_vm0, %v10515_v13  ;;  %422 = vst.msk [vmem:[#allocation2 + $0x161] sm:$0x1] %vm389_vm3, %v10403_v18 }
  0x3e   : > { %423 = vst.msk [vmem:[#allocation2 + $0x179] sm:$0x1] %vm389_vm3, %v10403_v18 }
  0x3f   : > { %424 = vst.msk [vmem:[#allocation2 + $0x191] sm:$0x1] %vm389_vm3, %v10403_v18 }
  0x40   : > { %433 = vst.msk [vmem:[#allocation3] sm:$0x1] %vm389_vm3, %v10403_v18 }
  0x41   : > { %434 = vst.msk [vmem:[#allocation3 + $0x18] sm:$0x1] %vm389_vm3, %v10403_v18 }
  0x42   : > { %435 = vst.msk [vmem:[#allocation3 + $0x30] sm:$0x1] %vm389_vm3, %v10403_v18 }
  0x43   : > { %436 = vst.msk [vmem:[#allocation3 + $0x48] sm:$0x1] %vm389_vm3, %v10403_v18 }
  0x44   : > { %9394 = vmatmul.msk.f32.vlgmr.msrb.gmra.mxu0 %vm530_vm0, %v10478_v0  ;;  %9397 = vmatmul.msk.f32.vlgmr.msrb.gmra.mxu1 %vm530_vm0, %v10478_v0  ;;  %437 = vst.msk [vmem:[#allocation3 + $0x60] sm:$0x1] %vm389_vm3, %v10403_v18 }
  0x45   : > { %9400 = vmatmul.msk.f32.vlgmr.msrb.gmra.mxu2 %vm530_vm0, %v10478_v0  ;;  %9403 = vmatmul.msk.f32.vlgmr.msrb.gmra.mxu3 %vm530_vm0, %v10478_v0  ;;  %438 = vst.msk [vmem:[#allocation3 + $0x78] sm:$0x1] %vm389_vm3, %v10403_v18 }
  0x46   : > { %439 = vst.msk [vmem:[#allocation3 + $0x90] sm:$0x1] %vm389_vm3, %v10403_v18  ;;  %9441 = vmatpush.msk.msrb.mxu2 %vm1136_vm2, %v9440_v26  ;;  %9459 = vmatpush.msk.msrb.mxu3 %vm1136_vm2, %v9458_v27 }
  0x47   : > { %440 = vst.msk [vmem:[#allocation3 + $0xa8] sm:$0x1] %vm389_vm3, %v10403_v18  ;;  %9477 = vmatpush.msk.msrb.mxu0 %vm1136_vm2, %v9476_v29  ;;  %9495 = vmatpush.msk.msrb.mxu1 %vm1136_vm2, %v9494_v30 }
  0x48   : > { %441 = vst.msk [vmem:[#allocation3 + $0xc0] sm:$0x1] %vm389_vm3, %v10403_v18 }
  0x49   : > { %442 = vst.msk [vmem:[#allocation3 + $0xd8] sm:$0x1] %vm389_vm3, %v10403_v18 }
  0x4a   : > { %443 = vst.msk [vmem:[#allocation3 + $0xf0] sm:$0x1] %vm389_vm3, %v10403_v18 }
  0x4b   : > { %444 = vst.msk [vmem:[#allocation3 + $0x108] sm:$0x1] %vm389_vm3, %v10403_v18 }
  0x4c   : > { %9395 = vmatmul.msk.f32.gmra.mxu0 %vm530_vm0, %v10515_v13  ;;  %9398 = vmatmul.msk.f32.gmra.mxu1 %vm530_vm0, %v10515_v13  ;;  %445 = vst.msk [vmem:[#allocation3 + $0x120] sm:$0x1] %vm389_vm3, %v10403_v18 }
  0x4d   : > { %9401 = vmatmul.msk.f32.gmra.mxu2 %vm530_vm0, %v10515_v13  ;;  %9404 = vmatmul.msk.f32.gmra.mxu3 %vm530_vm0, %v10515_v13  ;;  %446 = vst.msk [vmem:[#allocation3 + $0x138] sm:$0x1] %vm389_vm3, %v10403_v18 }
  0x4e   : > { %447 = vst.msk [vmem:[#allocation3 + $0x150] sm:$0x1] %vm389_vm3, %v10403_v18 }
  0x4f   : > { %448 = vst.msk [vmem:[#allocation3 + $0x168] sm:$0x1] %vm389_vm3, %v10403_v18 }
  0x50   : > { %449 = vst.msk [vmem:[#allocation3 + $0x180] sm:$0x1] %vm389_vm3, %v10403_v18 }
  0x51   : > { %450 = vst.msk [vmem:[#allocation3 + $0x198] sm:$0x1] %vm389_vm3, %v10403_v18 }
  0x52   : > { %452 = vst.msk [vmem:[#allocation3 + $0x29] sm:$0x1] %vm389_vm3, %v10403_v18 }
  0x53   : > { %453 = vst.msk [vmem:[#allocation3 + $0x41] sm:$0x1] %vm389_vm3, %v10403_v18 }
  0x54   : > { %9407 = vmatmul.msk.f32.vlgmr.msra.gmra.mxu0 %vm380_vm1, %v1070_v22  ;;  %9424 = vmatmul.msk.f32.vlgmr.msra.gmra.mxu1 %vm380_vm1, %v1053_v23  ;;  %454 = vst.msk [vmem:[#allocation3 + $0x59] sm:$0x1] %vm389_vm3, %v10403_v18 }
  0x55   : > { %9415 = vmatmul.msk.f32.vlgmr.msra.gmra.mxu2 %vm380_vm1, %v10675_v24  ;;  %9432 = vmatmul.msk.f32.vlgmr.msra.gmra.mxu3 %vm380_vm1, %v10679_v25  ;;  %455 = vst.msk [vmem:[#allocation3 + $0x71] sm:$0x1] %vm389_vm3, %v10403_v18 }
  0x56   : > { %456 = vst.msk [vmem:[#allocation3 + $0x89] sm:$0x1] %vm389_vm3, %v10403_v18  ;;  %9513 = vmatpush.msk.msra.mxu2 %vm1136_vm2, %v9512_v61  ;;  %9531 = vmatpush.msk.msra.mxu3 %vm1136_vm2, %v9530_v62 }
  0x57   : > { %457 = vst.msk [vmem:[#allocation3 + $0xa1] sm:$0x1] %vm389_vm3, %v10403_v18  ;;  %9549 = vmatpush.msk.msra.mxu0 %vm1136_vm2, %v9548_v7  ;;  %9566 = vmatpush.msk.msra.mxu1 %vm1136_vm2, %v2388_v10 }
  0x58   : > { %458 = vst.msk [vmem:[#allocation3 + $0xb9] sm:$0x1] %vm389_vm3, %v10403_v18 }
  0x59   : > { %459 = vst.msk [vmem:[#allocation3 + $0xd1] sm:$0x1] %vm389_vm3, %v10403_v18 }
  0x5a   : > { %460 = vst.msk [vmem:[#allocation3 + $0xe9] sm:$0x1] %vm389_vm3, %v10403_v18 }
  0x5b   : > { %461 = vst.msk [vmem:[#allocation3 + $0x101] sm:$0x1] %vm389_vm3, %v10403_v18 }
  0x5c   : > { %462 = vst.msk [vmem:[#allocation3 + $0x119] sm:$0x1] %vm389_vm3, %v10403_v18  ;;  %9425 = vmatmul.msk.f32.gmra.mxu1 %vm380_vm1, %v1054_v28 }
  0x5d   : > { %463 = vst.msk [vmem:[#allocation3 + $0x131] sm:$0x1] %vm389_vm3, %v10403_v18 }
  0x5e   : > { %464 = vst.msk [vmem:[#allocation3 + $0x149] sm:$0x1] %vm389_vm3, %v10403_v18 }
  0x5f   : > { %465 = vst.msk [vmem:[#allocation3 + $0x161] sm:$0x1] %vm389_vm3, %v10403_v18 }
  0x60   : > { %466 = vst.msk [vmem:[#allocation3 + $0x179] sm:$0x1] %vm389_vm3, %v10403_v18 }
  0x61   : > { %467 = vst.msk [vmem:[#allocation3 + $0x191] sm:$0x1] %vm389_vm3, %v10403_v18 }
  0x62   : > { %476 = vst.msk [vmem:[#allocation4] sm:$0x1] %vm389_vm3, %v10403_v18 }
  0x63   : > { %477 = vst.msk [vmem:[#allocation4 + $0x18] sm:$0x1] %vm389_vm3, %v10403_v18 }
  0x64   : > { %478 = vst.msk [vmem:[#allocation4 + $0x30] sm:$0x1] %vm389_vm3, %v10403_v18 }
  0x65   : > { %479 = vst.msk [vmem:[#allocation4 + $0x48] sm:$0x1] %vm389_vm3, %v10403_v18 }
  0x66   : > { %480 = vst.msk [vmem:[#allocation4 + $0x60] sm:$0x1] %vm389_vm3, %v10403_v18 }
  0x67   : > { %481 = vst.msk [vmem:[#allocation4 + $0x78] sm:$0x1] %vm389_vm3, %v10403_v18 }
  0x68   : > { %482 = vst.msk [vmem:[#allocation4 + $0x90] sm:$0x1] %vm389_vm3, %v10403_v18 }
  0x69   : > { %483 = vst.msk [vmem:[#allocation4 + $0xa8] sm:$0x1] %vm389_vm3, %v10403_v18 }
  0x6a   : > { %484 = vst.msk [vmem:[#allocation4 + $0xc0] sm:$0x1] %vm389_vm3, %v10403_v18 }
  0x6b   : > { %485 = vst.msk [vmem:[#allocation4 + $0xd8] sm:$0x1] %vm389_vm3, %v10403_v18 }
  0x6c   : > { %486 = vst.msk [vmem:[#allocation4 + $0xf0] sm:$0x1] %vm389_vm3, %v10403_v18 }
  0x6d   : > { %487 = vst.msk [vmem:[#allocation4 + $0x108] sm:$0x1] %vm389_vm3, %v10403_v18 }
  0x6e   : > { %488 = vst.msk [vmem:[#allocation4 + $0x120] sm:$0x1] %vm389_vm3, %v10403_v18 }
  0x6f   : > { %489 = vst.msk [vmem:[#allocation4 + $0x138] sm:$0x1] %vm389_vm3, %v10403_v18 }
  0x70   : > { %490 = vst.msk [vmem:[#allocation4 + $0x150] sm:$0x1] %vm389_vm3, %v10403_v18 }
  0x71   : > { %491 = vst.msk [vmem:[#allocation4 + $0x168] sm:$0x1] %vm389_vm3, %v10403_v18 }
  0x72   : > { %492 = vst.msk [vmem:[#allocation4 + $0x180] sm:$0x1] %vm389_vm3, %v10403_v18 }
  0x73   : > { %493 = vst.msk [vmem:[#allocation4 + $0x198] sm:$0x1] %vm389_vm3, %v10403_v18 }
  0x74   : > { %495 = vst.msk [vmem:[#allocation4 + $0x29] sm:$0x1] %vm389_vm3, %v10403_v18 }
  0x75   : > { %496 = vst.msk [vmem:[#allocation4 + $0x41] sm:$0x1] %vm389_vm3, %v10403_v18 }
  0x76   : > { %497 = vst.msk [vmem:[#allocation4 + $0x59] sm:$0x1] %vm389_vm3, %v10403_v18 }
  0x77   : > { %498 = vst.msk [vmem:[#allocation4 + $0x71] sm:$0x1] %vm389_vm3, %v10403_v18 }
  0x78   : > { %499 = vst.msk [vmem:[#allocation4 + $0x89] sm:$0x1] %vm389_vm3, %v10403_v18 }
  0x79   : > { %500 = vst.msk [vmem:[#allocation4 + $0xa1] sm:$0x1] %vm389_vm3, %v10403_v18 }
  0x7a   : > { %501 = vst.msk [vmem:[#allocation4 + $0xb9] sm:$0x1] %vm389_vm3, %v10403_v18 }
  0x7b   : > { %502 = vst.msk [vmem:[#allocation4 + $0xd1] sm:$0x1] %vm389_vm3, %v10403_v18 }
  0x7c   : > { %503 = vst.msk [vmem:[#allocation4 + $0xe9] sm:$0x1] %vm389_vm3, %v10403_v18 }
  0x7d   : > { %504 = vst.msk [vmem:[#allocation4 + $0x101] sm:$0x1] %vm389_vm3, %v10403_v18 }
  0x7e   : > { %505 = vst.msk [vmem:[#allocation4 + $0x119] sm:$0x1] %vm389_vm3, %v10403_v18 }
  0x7f   : > { %506 = vst.msk [vmem:[#allocation4 + $0x131] sm:$0x1] %vm389_vm3, %v10403_v18 }
  0x80   : > { %507 = vst.msk [vmem:[#allocation4 + $0x149] sm:$0x1] %vm389_vm3, %v10403_v18 }
  0x81   : > { %508 = vst.msk [vmem:[#allocation4 + $0x161] sm:$0x1] %vm389_vm3, %v10403_v18 }
  0x82   : > { %509 = vst.msk [vmem:[#allocation4 + $0x179] sm:$0x1] %vm389_vm3, %v10403_v18 }
  0x83   : > { %510 = vst.msk [vmem:[#allocation4 + $0x191] sm:$0x1] %vm389_vm3, %v10403_v18 }
  0x84   : > { %384 = vst.msk [vmem:[#allocation2 + $0x10] sm:$0x3] %vm383_vm4, %v10403_v18 }
  0x85   : > { %388 = vst.msk [vmem:[#allocation2 + $0x1a8] sm:$0x3] %vm383_vm4, %v10403_v18 }
  0x86   : > { %408 = vst.msk [vmem:[#allocation2 + $0x11] sm:$0x1] %vm389_vm3, %v10403_v18 }
  0x87   : > { %428 = vst.msk [vmem:[#allocation3 + $0x10] sm:$0x3] %vm383_vm4, %v10403_v18 }
  0x88   : > { %432 = vst.msk [vmem:[#allocation3 + $0x1a8] sm:$0x3] %vm383_vm4, %v10403_v18 }
  0x89   : > { %471 = vst.msk [vmem:[#allocation4 + $0x10] sm:$0x3] %vm383_vm4, %v10403_v18 }
  0x8a   : > { %475 = vst.msk [vmem:[#allocation4 + $0x1a8] sm:$0x3] %vm383_vm4, %v10403_v18 }
  0x8b   : > { %v1071_v32 = vld [vmem:[#allocation2 + $0x9] sm:$0xff]  ;;  %1026 = vst.msk [vmem:[#allocation2 + $0x69] sm:$0xff] %vm380_vm1, %v993_v31 }
  0x8c   : > { %9408 = vmatmul.msk.f32.gmra.mxu0 %vm380_vm1, %v1071_v32  ;;  %425 = vst.msk [vmem:[#allocation2 + $0x1a9] sm:$0x1] %vm389_vm3, %v10403_v18  ;;  %v1321_v32 = vld [vmem:[#allocation2 + $0x2] sm:$0xff] }
  0x8d   : > { %451 = vst.msk [vmem:[#allocation3 + $0x11] sm:$0x1] %vm389_vm3, %v10403_v18 }
  0x8e   : > { %468 = vst.msk [vmem:[#allocation3 + $0x1a9] sm:$0x1] %vm389_vm3, %v10403_v18 }
  0x8f   : > { %494 = vst.msk [vmem:[#allocation4 + $0x11] sm:$0x1] %vm389_vm3, %v10403_v18 }
  0x90   : > { %511 = vst.msk [vmem:[#allocation4 + $0x1a9] sm:$0x1] %vm389_vm3, %v10403_v18 }
  0x91   : > { %1019 = vst.msk [vmem:[#allocation2 + $0x19] sm:$0xff] %vm380_vm1, %v986_v33  ;;  %v557_v55 = vpop.f32.mrf.mxu0  ;;  %v583_v56 = vpop.f32.mrf.mxu1 }
  0x92   : > { %v10882_v37 = vld [vmem:[#allocation2 + $0x69] sm:$0xff]  ;;  %1027 = vst.msk [vmem:[#allocation2 + $0x79] sm:$0xff] %vm380_vm1, %v994_v34 }
  0x93   : > { %v10884_v38 = vld [vmem:[#allocation2 + $0x68] sm:$0xff]  ;;  %9416 = vmatmul.msk.f32.gmra.mxu2 %vm380_vm1, %v10882_v37  ;;  %1020 = vst.msk [vmem:[#allocation2 + $0x21] sm:$0xff] %vm380_vm1, %v987_v35 }
  0x94   : > { %9433 = vmatmul.msk.f32.gmra.mxu3 %vm380_vm1, %v10884_v38  ;;  %1028 = vst.msk [vmem:[#allocation2 + $0x81] sm:$0xff] %vm380_vm1, %v995_v36 }
  0x95   : > { %1021 = vst.msk [vmem:[#allocation2 + $0x31] sm:$0xff] %vm380_vm1, %v988_v39 }
  0x96   : > { %1029 = vst.msk [vmem:[#allocation2 + $0x91] sm:$0xff] %vm380_vm1, %v996_v40  ;;  %v1322_v40 = vld [vmem:[#allocation2 + $0xa] sm:$0xff] }
  0x97   : > { %1022 = vst.msk [vmem:[#allocation2 + $0x39] sm:$0xff] %vm380_vm1, %v989_v41 }
  0x98   : > { %v10902_v45 = vld [vmem:[#allocation2 + $0x19] sm:$0xff]  ;;  %1030 = vst.msk [vmem:[#allocation2 + $0x99] sm:$0xff] %vm380_vm1, %v997_v42  ;;  %v609_v63 = vpop.f32.mrf.mxu2  ;;  %v635_v0 = vpop.f32.mrf.mxu3 }
  0x99   : > { %v10904_v46 = vld [vmem:[#allocation2 + $0x18] sm:$0xff]  ;;  %9409 = vmatmul.msk.f32.gmra.mxu0 %vm380_vm1, %v10902_v45  ;;  %1023 = vst.msk [vmem:[#allocation2 + $0x49] sm:$0xff] %vm380_vm1, %v990_v43  ;;  %v560_v1 = vpop.f32.mrf.mxu0  ;;  %v586_v2 = vpop.f32.mrf.mxu1 }
  0x9a   : > { %v10909_v47 = vld [vmem:[#allocation2 + $0x79] sm:$0xff]  ;;  %9426 = vmatmul.msk.f32.gmra.mxu1 %vm380_vm1, %v10904_v46  ;;  %1031 = vst.msk [vmem:[#allocation2 + $0xa9] sm:$0xff] %vm380_vm1, %v998_v44  ;;  %v10925_v51 = vld [vmem:[#allocation2 + $0x21] sm:$0xff] }
  0x9b   : > { %v10913_v48 = vld [vmem:[#allocation2 + $0x78] sm:$0xff]  ;;  %9417 = vmatmul.msk.f32.gmra.mxu2 %vm380_vm1, %v10909_v47  ;;  %1024 = vst.msk [vmem:[#allocation2 + $0x51] sm:$0xff] %vm380_vm1, %v991_v49  ;;  %v10927_v52 = vld [vmem:[#allocation2 + $0x20] sm:$0xff] }
  0x9c   : > { %9434 = vmatmul.msk.f32.gmra.mxu3 %vm380_vm1, %v10913_v48  ;;  %1032 = vst.msk [vmem:[#allocation2 + $0xb1] sm:$0xff] %vm380_vm1, %v999_v50  ;;  %v10929_v53 = vld [vmem:[#allocation2 + $0x81] sm:$0xff]  ;;  %v10943_v57 = vld [vmem:[#allocation2 + $0x31] sm:$0xff] }
  0x9d   : > { %v10931_v54 = vld [vmem:[#allocation2 + $0x80] sm:$0xff]  ;;  %954 = vst.msk [vmem:[#allocation3 + $0x19] sm:$0xff] %vm380_vm1, %v557_v55  ;;  %v10945_v58 = vld [vmem:[#allocation2 + $0x30] sm:$0xff] }
  0x9e   : > { %956 = vst.msk [vmem:[#allocation3 + $0x31] sm:$0xff] %vm380_vm1, %v583_v56  ;;  %v10947_v59 = vld [vmem:[#allocation2 + $0x91] sm:$0xff]  ;;  %v10969_v3 = vld [vmem:[#allocation2 + $0x39] sm:$0xff]  ;;  %v1772_v39 = vld [vmem:[#allocation2 + $0x22] sm:$0xff] }
  0x9f   : > { %v10949_v60 = vld [vmem:[#allocation2 + $0x90] sm:$0xff]  ;;  %958 = vst.msk [vmem:[#allocation3 + $0x49] sm:$0xff] %vm380_vm1, %v609_v63  ;;  %v10971_v4 = vld [vmem:[#allocation2 + $0x38] sm:$0xff]  ;;  %v11103_v63 = vld [vmem:[#allocation2 + $0x62] sm:$0xff] }
  0xa0   : > { %960 = vst.msk [vmem:[#allocation3 + $0x61] sm:$0xff] %vm380_vm1, %v635_v0  ;;  %v10975_v5 = vld [vmem:[#allocation2 + $0x99] sm:$0xff]  ;;  %v612_v8 = vpop.f32.mrf.mxu2  ;;  %v638_v9 = vpop.f32.mrf.mxu3  ;;  %v10997_v13 = vld [vmem:[#allocation2 + $0x49] sm:$0xff] }
  0xa1   : > { %9410 = vmatmul.msk.f32.gmra.mxu0 %vm380_vm1, %v10925_v51  ;;  %955 = vst.msk [vmem:[#allocation3 + $0x21] sm:$0xff] %vm380_vm1, %v560_v1  ;;  %v10977_v6 = vld [vmem:[#allocation2 + $0x98] sm:$0xff]  ;;  %v661_v11 = vpop.f32.mrf.mxu0  ;;  %v687_v12 = vpop.f32.mrf.mxu1  ;;  %v10999_v14 = vld [vmem:[#allocation2 + $0x48] sm:$0xff] }
  0xa2   : > { %9427 = vmatmul.msk.f32.gmra.mxu1 %vm380_vm1, %v10927_v52  ;;  %957 = vst.msk [vmem:[#allocation3 + $0x39] sm:$0xff] %vm380_vm1, %v586_v2  ;;  %v11003_v15 = vld [vmem:[#allocation2 + $0xa9] sm:$0xff]  ;;  %v11017_v21 = vld [vmem:[#allocation2 + $0x51] sm:$0xff]  ;;  %v1771_v31 = vld [vmem:[#allocation2 + $0x1a] sm:$0xff] }
  0xa3   : > { %9418 = vmatmul.msk.f32.gmra.mxu2 %vm380_vm1, %v10929_v53  ;;  %959 = vst.msk [vmem:[#allocation3 + $0x51] sm:$0xff] %vm380_vm1, %v612_v8  ;;  %v11005_v16 = vld [vmem:[#allocation2 + $0xa8] sm:$0xff]  ;;  %v11019_v22 = vld [vmem:[#allocation2 + $0x50] sm:$0xff]  ;;  %v11127_v2 = vld [vmem:[#allocation2 + $0x7a] sm:$0xff] }
  0xa4   : > { %9435 = vmatmul.msk.f32.gmra.mxu3 %vm380_vm1, %v10931_v54  ;;  %961 = vst.msk [vmem:[#allocation3 + $0x69] sm:$0xff] %vm380_vm1, %v638_v9  ;;  %v11023_v23 = vld [vmem:[#allocation2 + $0xb1] sm:$0xff] }
  0xa5   : > { %962 = vst.msk [vmem:[#allocation3 + $0x79] sm:$0xff] %vm380_vm1, %v661_v11  ;;  %v11025_v26 = vld [vmem:[#allocation2 + $0xb0] sm:$0xff]  ;;  %v11145_v11 = vld [vmem:[#allocation2 + $0x82] sm:$0xff] }
  0xa6   : > { %964 = vst.msk [vmem:[#allocation3 + $0x91] sm:$0xff] %vm380_vm1, %v687_v12  ;;  %v11083_v61 = vld [vmem:[#allocation2 + $0x4a] sm:$0xff]  ;;  %v11093_v62 = vld [vmem:[#allocation2 + $0x52] sm:$0xff] }
  0xa7   : > { %14266 = vst [vmem:[#allocation5_spill] sm:$0xff] %v11023_v23  ;;  %v11113_v0 = vld [vmem:[#allocation2 + $0x6a] sm:$0xff] }
  0xa8   : > { %v713_v17 = vpop.f32.mrf.mxu2  ;;  %v739_v18 = vpop.f32.mrf.mxu3  ;;  %14267 = vst [vmem:[#allocation6_spill] sm:$0xff] %v11025_v26  ;;  %v1000_v12 = vld [vmem:[%s10567_s26 + $0x70] sm:$0xff] }
  0xa9   : > { %9411 = vmatmul.msk.f32.gmra.mxu0 %vm380_vm1, %v10943_v57  ;;  %966 = vst.msk [vmem:[#allocation3 + $0xa9] sm:$0xff] %vm380_vm1, %v713_v17  ;;  %v664_v19 = vpop.f32.mrf.mxu0  ;;  %v690_v20 = vpop.f32.mrf.mxu1  ;;  %v1001_v17 = vld [vmem:[%s10567_s26 + $0x78] sm:$0xff] }
  0xaa   : > { %9428 = vmatmul.msk.f32.gmra.mxu1 %vm380_vm1, %v10945_v58  ;;  %968 = vst.msk [vmem:[#allocation3 + $0xc1] sm:$0xff] %vm380_vm1, %v739_v18 }
  0xab   : > { %9419 = vmatmul.msk.f32.gmra.mxu2 %vm380_vm1, %v10947_v59  ;;  %963 = vst.msk [vmem:[#allocation3 + $0x81] sm:$0xff] %vm380_vm1, %v664_v19 }
  0xac   : > { %9436 = vmatmul.msk.f32.gmra.mxu3 %vm380_vm1, %v10949_v60  ;;  %965 = vst.msk [vmem:[#allocation3 + $0x99] sm:$0xff] %vm380_vm1, %v690_v20  ;;  %v11159_v20 = vld [vmem:[#allocation2 + $0x92] sm:$0xff] }
  0xad   : > { %1033 = vst.msk [vmem:[#allocation2 + $0xc1] sm:$0xff] %vm380_vm1, %v1000_v12 }
  0xae   : > { %1034 = vst.msk [vmem:[#allocation2 + $0xc9] sm:$0xff] %vm380_vm1, %v1001_v17  ;;  %v9619_v17 = vld [vmem:[%s14235_s4 + $0xc] sm:$0xf] }
  0xb0   : > { %v716_v27 = vpop.f32.mrf.mxu2  ;;  %v742_v28 = vpop.f32.mrf.mxu3 }
  0xb1   : > { %9412 = vmatmul.msk.f32.gmra.mxu0 %vm380_vm1, %v10969_v3  ;;  %967 = vst.msk [vmem:[#allocation3 + $0xb1] sm:$0xff] %vm380_vm1, %v716_v27  ;;  %v765_v29 = vpop.f32.mrf.mxu0  ;;  %v791_v30 = vpop.f32.mrf.mxu1 }
  0xb2   : > { %9429 = vmatmul.msk.f32.gmra.mxu1 %vm380_vm1, %v10971_v4  ;;  %969 = vst.msk [vmem:[#allocation3 + $0xc9] sm:$0xff] %vm380_vm1, %v742_v28 }
  0xb3   : > { %9420 = vmatmul.msk.f32.gmra.mxu2 %vm380_vm1, %v10975_v5  ;;  %970 = vst.msk [vmem:[#allocation3 + $0xd9] sm:$0xff] %vm380_vm1, %v765_v29 }
  0xb4   : > { %9437 = vmatmul.msk.f32.gmra.mxu3 %vm380_vm1, %v10977_v6  ;;  %972 = vst.msk [vmem:[#allocation3 + $0xf1] sm:$0xff] %vm380_vm1, %v791_v30 }
  0xb8   : > { %v817_v33 = vpop.f32.mrf.mxu2  ;;  %v843_v34 = vpop.f32.mrf.mxu3 }
  0xb9   : > { %9413 = vmatmul.msk.f32.gmra.mxu0 %vm380_vm1, %v10997_v13  ;;  %974 = vst.msk [vmem:[#allocation3 + $0x109] sm:$0xff] %vm380_vm1, %v817_v33  ;;  %v768_v35 = vpop.f32.mrf.mxu0  ;;  %v794_v36 = vpop.f32.mrf.mxu1 }
  0xba   : > { %9430 = vmatmul.msk.f32.gmra.mxu1 %vm380_vm1, %v10999_v14  ;;  %976 = vst.msk [vmem:[#allocation3 + $0x121] sm:$0xff] %vm380_vm1, %v843_v34 }
  0xbb   : > { %9421 = vmatmul.msk.f32.gmra.mxu2 %vm380_vm1, %v11003_v15  ;;  %971 = vst.msk [vmem:[#allocation3 + $0xe1] sm:$0xff] %vm380_vm1, %v768_v35 }
  0xbc   : > { %9438 = vmatmul.msk.f32.gmra.mxu3 %vm380_vm1, %v11005_v16  ;;  %973 = vst.msk [vmem:[#allocation3 + $0xf9] sm:$0xff] %vm380_vm1, %v794_v36 }
  0xc0   : > { %v820_v41 = vpop.f32.mrf.mxu2  ;;  %v846_v42 = vpop.f32.mrf.mxu3 }
  0xc1   : > { %9414 = vmatmul.msk.f32.gmra.mxu0 %vm380_vm1, %v11017_v21  ;;  %975 = vst.msk [vmem:[#allocation3 + $0x111] sm:$0xff] %vm380_vm1, %v820_v41  ;;  %v869_v43 = vpop.f32.mrf.mxu0  ;;  %v895_v44 = vpop.f32.mrf.mxu1 }
  0xc2   : > { %9431 = vmatmul.msk.f32.gmra.mxu1 %vm380_vm1, %v11019_v22  ;;  %977 = vst.msk [vmem:[#allocation3 + $0x129] sm:$0xff] %vm380_vm1, %v846_v42 }
  0xc3   : > { %9422 = vmatmul.msk.f32.gmra.mxu2 %vm380_vm1, %v11023_v23  ;;  %978 = vst.msk [vmem:[#allocation3 + $0x139] sm:$0xff] %vm380_vm1, %v869_v43 }
  0xc4   : > { %9439 = vmatmul.msk.f32.gmra.mxu3 %vm380_vm1, %v11025_v26  ;;  %980 = vst.msk [vmem:[#allocation3 + $0x151] sm:$0xff] %vm380_vm1, %v895_v44  ;;  %v9583_v44 = vld [vmem:[%s14235_s4 + $0x4] sm:$0xf] }
  0xc8   : > { %v947_v49 = vpop.f32.mrf.mxu3 }
  0xc9   : > { %9478 = vmatmul.msk.f32.vlgmr.msrb.gmra.mxu0 %vm380_vm1, %v10902_v45  ;;  %v11057_v45 = vld [vmem:[#allocation2 + $0x32] sm:$0xff]  ;;  %984 = vst.msk [vmem:[#allocation3 + $0x181] sm:$0xff] %vm380_vm1, %v947_v49  ;;  %v872_v50 = vpop.f32.mrf.mxu0 }
  0xca   : > { %9496 = vmatmul.msk.f32.vlgmr.msrb.gmra.mxu1 %vm380_vm1, %v1771_v31  ;;  %979 = vst.msk [vmem:[#allocation3 + $0x141] sm:$0xff] %vm380_vm1, %v872_v50  ;;  %9620 = vmatpush.msk.msrb.mxu0 %vm1136_vm2, %v9619_v17 }
  0xcb   : > { %9442 = vmatmul.msk.f32.vlgmr.msrb.gmra.mxu2 %vm380_vm1, %v1321_v32  ;;  %v11175_v32 = vld [vmem:[#allocation2 + $0x9a] sm:$0xff] }
  0xcc   : > { %9460 = vmatmul.msk.f32.vlgmr.msrb.gmra.mxu3 %vm380_vm1, %v10904_v46  ;;  %v921_v46 = vpop.f32.mrf.mxu2  ;;  %9584 = vmatpush.msk.msrb.mxu2 %vm1136_vm2, %v9583_v44 }
  0xcd   : > { %982 = vst.msk [vmem:[#allocation3 + $0x169] sm:$0xff] %vm380_vm1, %v921_v46  ;;  %v9601_v46 = vld [vmem:[%s14235_s4 + $0x8] sm:$0xf] }
  0xce   : > { %9602 = vmatpush.msk.msrb.mxu3 %vm1136_vm2, %v9601_v46  ;;  %v11245_v46 = vld [vmem:[#allocation2 + $0xc0] sm:$0xff] }
  0xcf   : > { %14273 = vst [vmem:[#allocation12_spill] sm:$0xff] %v11245_v46 }
  0xd0   : > { %v950_v56 = vpop.f32.mrf.mxu3 }
  0xd1   : > { %9479 = vmatmul.msk.f32.gmra.mxu0 %vm380_vm1, %v10925_v51  ;;  %v11070_v51 = vld [vmem:[#allocation2 + $0x3a] sm:$0xff]  ;;  %985 = vst.msk [vmem:[#allocation3 + $0x189] sm:$0xff] %vm380_vm1, %v950_v56 }
  0xd2   : > { %9497 = vmatmul.msk.f32.gmra.mxu1 %vm380_vm1, %v1772_v39 }
  0xd3   : > { %9443 = vmatmul.msk.f32.gmra.mxu2 %vm380_vm1, %v1322_v40  ;;  %v11191_v40 = vld [vmem:[#allocation2 + $0xaa] sm:$0xff] }
  0xd4   : > { %9461 = vmatmul.msk.f32.gmra.mxu3 %vm380_vm1, %v10927_v52  ;;  %v898_v52 = vpop.f32.mrf.mxu1  ;;  %v924_v55 = vpop.f32.mrf.mxu2 }
  0xd5   : > { %981 = vst.msk [vmem:[#allocation3 + $0x159] sm:$0xff] %vm380_vm1, %v898_v52  ;;  %v11215_v52 = vld [vmem:[#allocation2 + $0xb2] sm:$0xff] }
  0xd6   : > { %983 = vst.msk [vmem:[#allocation3 + $0x171] sm:$0xff] %vm380_vm1, %v924_v55 }
  0xd8   : > { %v11139_v8 = vpop.f32.mrf.mxu3 }
  0xd9   : > { %9480 = vmatmul.msk.f32.gmra.mxu0 %vm380_vm1, %v10943_v57 }
  0xda   : > { %9498 = vmatmul.msk.f32.gmra.mxu1 %vm380_vm1, %v11057_v45 }
  0xdb   : > { %9444 = vmatmul.msk.f32.gmra.mxu2 %vm380_vm1, %v1771_v31 }
  0xdc   : > { %9462 = vmatmul.msk.f32.gmra.mxu3 %vm380_vm1, %v10945_v58  ;;  %v11125_v1 = vpop.f32.mrf.mxu1  ;;  %v11137_v7 = vpop.f32.mrf.mxu2 }
  0xe1   : > { %9481 = vmatmul.msk.f32.gmra.mxu0 %vm380_vm1, %v10969_v3 }
  0xe2   : > { %9499 = vmatmul.msk.f32.gmra.mxu1 %vm380_vm1, %v11070_v51 }
  0xe3   : > { %9445 = vmatmul.msk.f32.gmra.mxu2 %vm380_vm1, %v1772_v39 }
  0xe4   : > { %9463 = vmatmul.msk.f32.gmra.mxu3 %vm380_vm1, %v10971_v4  ;;  %v11143_v10 = vpop.f32.mrf.mxu1 }
  0xe9   : > { %9482 = vmatmul.msk.f32.gmra.mxu0 %vm380_vm1, %v10997_v13 }
  0xea   : > { %9500 = vmatmul.msk.f32.gmra.mxu1 %vm380_vm1, %v11083_v61 }
  0xeb   : > { %9446 = vmatmul.msk.f32.gmra.mxu2 %vm380_vm1, %v11057_v45 }
  0xec   : > { %9464 = vmatmul.msk.f32.gmra.mxu3 %vm380_vm1, %v10999_v14 }
  0xf1   : > { %9483 = vmatmul.msk.f32.gmra.mxu0 %vm380_vm1, %v11017_v21 }
  0xf2   : > { %9501 = vmatmul.msk.f32.gmra.mxu1 %vm380_vm1, %v11093_v62 }
  0xf3   : > { %9447 = vmatmul.msk.f32.gmra.mxu2 %vm380_vm1, %v11070_v51 }
  0xf4   : > { %9465 = vmatmul.msk.f32.gmra.mxu3 %vm380_vm1, %v11019_v22 }
  0xf9   : > { %9484 = vmatmul.msk.f32.gmra.mxu0 %vm380_vm1, %v10675_v24  ;;  %v11123_v24 = vpop.f32.mrf.mxu0 }
  0xfa   : > { %9502 = vmatmul.msk.f32.gmra.mxu1 %vm380_vm1, %v11103_v63 }
  0xfb   : > { %9448 = vmatmul.msk.f32.gmra.mxu2 %vm380_vm1, %v11083_v61 }
  0xfc   : > { %9466 = vmatmul.msk.f32.gmra.mxu3 %vm380_vm1, %v10679_v25 }
 0x101   : > { %9485 = vmatmul.msk.f32.gmra.mxu0 %vm380_vm1, %v10882_v37 }
 0x102   : > { %9503 = vmatmul.msk.f32.gmra.mxu1 %vm380_vm1, %v11113_v0 }
 0x103   : > { %9449 = vmatmul.msk.f32.gmra.mxu2 %vm380_vm1, %v11093_v62 }
 0x104   : > { %9467 = vmatmul.msk.f32.gmra.mxu3 %vm380_vm1, %v10884_v38 }
 0x109   : > { %9486 = vmatmul.msk.f32.gmra.mxu0 %vm380_vm1, %v10909_v47  ;;  %v11141_v9 = vpop.f32.mrf.mxu0 }
 0x10a   : > { %9504 = vmatmul.msk.f32.gmra.mxu1 %vm380_vm1, %v11127_v2 }
 0x10b   : > { %9450 = vmatmul.msk.f32.gmra.mxu2 %vm380_vm1, %v11103_v63 }
 0x10c   : > { %9468 = vmatmul.msk.f32.gmra.mxu3 %vm380_vm1, %v10913_v48 }
 0x111   : > { %9487 = vmatmul.msk.f32.gmra.mxu0 %vm380_vm1, %v10929_v53 }
 0x112   : > { %9505 = vmatmul.msk.f32.gmra.mxu1 %vm380_vm1, %v11145_v11 }
 0x113   : > { %9451 = vmatmul.msk.f32.gmra.mxu2 %vm380_vm1, %v11113_v0 }
 0x114   : > { %9469 = vmatmul.msk.f32.gmra.mxu3 %vm380_vm1, %v10931_v54 }
 0x116   : > { %v1184_v18 = vpop.f32.mrf.mxu2  ;;  %v11163_v28 = vpop.f32.mrf.mxu0 }
 0x117   : > { %v1300_v19 = vpop.f32.mrf.mxu3  ;;  %v11165_v29 = vpop.f32.mrf.mxu1 }
 0x118   : > { %v11161_v27 = vadd.f32 %v1300_v19, %v1184_v18 }
 0x119   : > { %9488 = vmatmul.msk.f32.gmra.mxu0 %vm380_vm1, %v10947_v59 }
 0x11a   : > { %9506 = vmatmul.msk.f32.gmra.mxu1 %vm380_vm1, %v11159_v20 }
 0x11b   : > { %9452 = vmatmul.msk.f32.gmra.mxu2 %vm380_vm1, %v11127_v2 }
 0x11c   : > { %9470 = vmatmul.msk.f32.gmra.mxu3 %vm380_vm1, %v10949_v60 }
 0x11e   : > { %v1187_v30 = vpop.f32.mrf.mxu2  ;;  %v11179_v34 = vpop.f32.mrf.mxu0 }
 0x11f   : > { %v1303_v31 = vpop.f32.mrf.mxu3  ;;  %v11181_v35 = vpop.f32.mrf.mxu1 }
 0x120   : > { %v11177_v33 = vadd.f32 %v1303_v31, %v1187_v30  ;;  %v11235_v30 = vld [vmem:[#allocation2 + $0xc1] sm:$0xff] }
 0x121   : > { %9489 = vmatmul.msk.f32.gmra.mxu0 %vm380_vm1, %v10975_v5  ;;  %14270 = vst [vmem:[#allocation9_spill] sm:$0xff] %v11235_v30  ;;  %v11237_v31 = vld [vmem:[#allocation2 + $0xc2] sm:$0xff] }
 0x122   : > { %9507 = vmatmul.msk.f32.gmra.mxu1 %vm380_vm1, %v11175_v32  ;;  %14271 = vst [vmem:[#allocation10_spill] sm:$0xff] %v11237_v31 }
 0x123   : > { %9453 = vmatmul.msk.f32.gmra.mxu2 %vm380_vm1, %v11145_v11 }
 0x124   : > { %9471 = vmatmul.msk.f32.gmra.mxu3 %vm380_vm1, %v10977_v6 }
 0x126   : > { %v1190_v36 = vpop.f32.mrf.mxu2  ;;  %v11195_v42 = vpop.f32.mrf.mxu0 }
 0x127   : > { %v1306_v39 = vpop.f32.mrf.mxu3  ;;  %v11197_v43 = vpop.f32.mrf.mxu1 }
 0x128   : > { %v11193_v41 = vadd.f32 %v1306_v39, %v1190_v36 }
 0x129   : > { %9490 = vmatmul.msk.f32.gmra.mxu0 %vm380_vm1, %v11003_v15 }
 0x12a   : > { %14268 = vst [vmem:[#allocation7_spill] sm:$0xff] %v11193_v41  ;;  %9508 = vmatmul.msk.f32.gmra.mxu1 %vm380_vm1, %v11191_v40 }
 0x12b   : > { %9454 = vmatmul.msk.f32.gmra.mxu2 %vm380_vm1, %v11159_v20 }
 0x12c   : > { %9472 = vmatmul.msk.f32.gmra.mxu3 %vm380_vm1, %v11005_v16 }
 0x12e   : > { %v1193_v49 = vpop.f32.mrf.mxu2  ;;  %v11219_v56 = vpop.f32.mrf.mxu0 }
 0x12f   : > { %v1309_v50 = vpop.f32.mrf.mxu3  ;;  %v11221_v12 = vpop.f32.mrf.mxu1 }
 0x130   : > { %v11217_v55 = vadd.f32 %v1309_v50, %v1193_v49  ;;  %v9637_v49 = vld [vmem:[%s14235_s4 + $0x10] sm:$0xf] }
 0x131   : > { %9491 = vmatmul.msk.f32.gmra.mxu0 %vm380_vm1, %v11023_v23  ;;  %9638 = vmatpush.msk.msrb.mxu1 %vm1136_vm2, %v9637_v49 }
 0x132   : > { %14269 = vst [vmem:[#allocation8_spill] sm:$0xff] %v11217_v55  ;;  %9509 = vmatmul.msk.f32.gmra.mxu1 %vm380_vm1, %v11215_v52 }
 0x133   : > { %9455 = vmatmul.msk.f32.gmra.mxu2 %vm380_vm1, %v11175_v32 }
 0x134   : > { %9473 = vmatmul.msk.f32.gmra.mxu3 %vm380_vm1, %v11025_v26 }
 0x136   : > { %v1196_v18 = vpop.f32.mrf.mxu2  ;;  %v11241_v39 = vpop.f32.mrf.mxu0 }
 0x137   : > { %v1312_v19 = vpop.f32.mrf.mxu3  ;;  %v11243_v44 = vpop.f32.mrf.mxu1 }
 0x138   : > { %v11239_v36 = vadd.f32 %v1312_v19, %v1196_v18  ;;  %v11259_v18 = vld [vmem:[#allocation2 + $0xc9] sm:$0xff] }
 0x139   : > { %9492 = vmatmul.msk.f32.gmra.mxu0 %vm380_vm1, %v11235_v30  ;;  %14274 = vst [vmem:[#allocation13_spill] sm:$0xff] %v11259_v18  ;;  %v11261_v19 = vld [vmem:[#allocation2 + $0xca] sm:$0xff] }
 0x13a   : > { %14272 = vst [vmem:[#allocation11_spill] sm:$0xff] %v11239_v36  ;;  %9510 = vmatmul.msk.f32.gmra.mxu1 %vm380_vm1, %v11237_v31  ;;  %v11269_v31 = vld [vmem:[#allocation2 + $0xc8] sm:$0xff] }
 0x13b   : > { %9456 = vmatmul.msk.f32.gmra.mxu2 %vm380_vm1, %v11191_v40  ;;  %14275 = vst [vmem:[#allocation14_spill] sm:$0xff] %v11261_v19 }
 0x13c   : > { %9474 = vmatmul.msk.f32.gmra.mxu3 %vm380_vm1, %v11245_v46  ;;  %14277 = vst [vmem:[#allocation16_spill] sm:$0xff] %v11269_v31 }
 0x13e   : > { %v1199_v50 = vpop.f32.mrf.mxu2  ;;  %v11265_v55 = vpop.f32.mrf.mxu0 }
 0x13f   : > { %v1315_v17 = vpop.f32.mrf.mxu3  ;;  %v11267_v30 = vpop.f32.mrf.mxu1 }
 0x140   : > { %v11263_v36 = vadd.f32 %v1315_v17, %v1199_v50  ;;  %v2372_v17 = vld [vmem:[#allocation3] sm:$0xff] }
 0x141   : > { %9493 = vmatmul.msk.f32.gmra.mxu0 %vm380_vm1, %v11259_v18  ;;  %v1274_v18 = vadd.f32 %v11125_v1, %v11123_v24 }
 0x142   : > { %14276 = vst [vmem:[#allocation15_spill] sm:$0xff] %v11263_v36  ;;  %9511 = vmatmul.msk.f32.gmra.mxu1 %vm380_vm1, %v11261_v19 }
 0x143   : > { %9457 = vmatmul.msk.f32.gmra.mxu2 %vm380_vm1, %v11215_v52 }
 0x144   : > { %9475 = vmatmul.msk.f32.gmra.mxu3 %vm380_vm1, %v11269_v31 }
 0x146   : > { %v1202_v49 = vpop.f32.mrf.mxu2  ;;  %v1707_v46 = vpop.f32.mrf.mxu0 }
 0x147   : > { %v1318_v50 = vpop.f32.mrf.mxu3  ;;  %v1857_v41 = vpop.f32.mrf.mxu1 }
 0x148   : > { %v11279_v36 = vadd.f32 %v1318_v50, %v1202_v49  ;;  %v2373_v49 = vld [vmem:[#allocation3 + $0x8] sm:$0xff] }
 0x149   : > { %9550 = vmatmul.msk.f32.vlgmr.msra.gmra.mxu0 %vm380_vm1, %v11057_v45 }
 0x14a   : > { %14278 = vst [vmem:[#allocation17_spill] sm:$0xff] %v11279_v36  ;;  %9567 = vmatmul.msk.f32.vlgmr.msra.gmra.mxu1 %vm380_vm1, %v2372_v17 }
 0x14b   : > { %9514 = vmatmul.msk.f32.vlgmr.msra.gmra.mxu2 %vm380_vm1, %v10945_v58 }
 0x14c   : > { %9532 = vmatmul.msk.f32.vlgmr.msra.gmra.mxu3 %vm380_vm1, %v10943_v57  ;;  %v1277_v57 = vadd.f32 %v11143_v10, %v11141_v9 }
 0x14e   : > { %v1407_v31 = vpop.f32.mrf.mxu2  ;;  %v1710_v36 = vpop.f32.mrf.mxu0 }
 0x14f   : > { %v1557_v19 = vpop.f32.mrf.mxu3  ;;  %v1455_v50 = vadd.f32 %v1407_v31, %v1274_v18  ;;  %v1860_v23 = vpop.f32.mrf.mxu1 }
 0x151   : > { %v1605_v26 = vadd.f32 %v1557_v19, %v1455_v50  ;;  %9551 = vmatmul.msk.f32.gmra.mxu0 %vm380_vm1, %v11070_v51  ;;  %v11301_v51 = vld [vmem:[#allocation3 + $0x18] sm:$0xff] }
 0x152   : > { %9568 = vmatmul.msk.f32.gmra.mxu1 %vm380_vm1, %v2373_v49  ;;  %v11315_v49 = vld [vmem:[#allocation3 + $0x20] sm:$0xff] }
 0x153   : > { %v1755_v45 = vadd.f32 %v1707_v46, %v1605_v26  ;;  %9515 = vmatmul.msk.f32.gmra.mxu2 %vm380_vm1, %v10971_v4  ;;  %v1280_v4 = vadd.f32 %v11165_v29, %v11163_v28 }
 0x154   : > { %9533 = vmatmul.msk.f32.gmra.mxu3 %vm380_vm1, %v10969_v3 }
 0x155   : > { %v11299_v58 = vadd.f32 %v1857_v41, %v1755_v45 }
 0x156   : > { %v1410_v24 = vpop.f32.mrf.mxu2  ;;  %v1713_v18 = vpop.f32.mrf.mxu0 }
 0x157   : > { %v1560_v1 = vpop.f32.mrf.mxu3  ;;  %v1456_v31 = vadd.f32 %v1410_v24, %v1277_v57  ;;  %v1863_v19 = vpop.f32.mrf.mxu1  ;;  %v2076_v57 = vld [vmem:[#allocation2 + $0x61] sm:$0xff] }
 0x158   : > { %v11329_v24 = vld [vmem:[#allocation3 + $0x30] sm:$0xff] }
 0x159   : > { %v1606_v17 = vadd.f32 %v1560_v1, %v1456_v31  ;;  %9552 = vmatmul.msk.f32.gmra.mxu0 %vm380_vm1, %v11083_v61 }
 0x15a   : > { %9569 = vmatmul.msk.f32.gmra.mxu1 %vm380_vm1, %v11301_v51 }
 0x15b   : > { %v1756_v3 = vadd.f32 %v1710_v36, %v1606_v17  ;;  %9516 = vmatmul.msk.f32.gmra.mxu2 %vm380_vm1, %v10999_v14  ;;  %v1283_v14 = vadd.f32 %v11181_v35, %v11179_v34 }
 0x15c   : > { %9534 = vmatmul.msk.f32.gmra.mxu3 %vm380_vm1, %v10997_v13 }
 0x15d   : > { %v11313_v26 = vadd.f32 %v1860_v23, %v1756_v3 }
 0x15e   : > { %v1413_v9 = vpop.f32.mrf.mxu2  ;;  %v1716_v46 = vpop.f32.mrf.mxu0 }
 0x15f   : > { %v1563_v10 = vpop.f32.mrf.mxu3  ;;  %v1457_v41 = vadd.f32 %v1413_v9, %v1280_v4  ;;  %v1866_v61 = vpop.f32.mrf.mxu1 }
 0x161   : > { %v1607_v50 = vadd.f32 %v1563_v10, %v1457_v41  ;;  %9553 = vmatmul.msk.f32.gmra.mxu0 %vm380_vm1, %v11093_v62 }
 0x162   : > { %9570 = vmatmul.msk.f32.gmra.mxu1 %vm380_vm1, %v11315_v49 }
 0x163   : > { %v1757_v13 = vadd.f32 %v1713_v18, %v1607_v50  ;;  %9517 = vmatmul.msk.f32.gmra.mxu2 %vm380_vm1, %v11019_v22  ;;  %v1286_v22 = vadd.f32 %v11197_v43, %v11195_v42  ;;  %v1289_v42 = vadd.f32 %v11221_v12, %v11219_v56 }
 0x164   : > { %9535 = vmatmul.msk.f32.gmra.mxu3 %vm380_vm1, %v11017_v21 }
 0x165   : > { %v11327_v23 = vadd.f32 %v1863_v19, %v1757_v13 }
 0x166   : > { %v1416_v28 = vpop.f32.mrf.mxu2  ;;  %v1719_v45 = vpop.f32.mrf.mxu0 }
 0x167   : > { %v1566_v29 = vpop.f32.mrf.mxu3  ;;  %v1458_v36 = vadd.f32 %v1416_v28, %v1283_v14  ;;  %v1869_v62 = vpop.f32.mrf.mxu1  ;;  %v11370_v28 = vld [vmem:[#allocation3 + $0x50] sm:$0xff] }
 0x169   : > { %v1608_v1 = vadd.f32 %v1566_v29, %v1458_v36  ;;  %9554 = vmatmul.msk.f32.gmra.mxu0 %vm380_vm1, %v11103_v63  ;;  %v11342_v63 = vld [vmem:[#allocation3 + $0x38] sm:$0xff] }
 0x16a   : > { %9571 = vmatmul.msk.f32.gmra.mxu1 %vm380_vm1, %v11329_v24 }
 0x16b   : > { %v1758_v21 = vadd.f32 %v1716_v46, %v1608_v1  ;;  %9518 = vmatmul.msk.f32.gmra.mxu2 %vm380_vm1, %v10679_v25  ;;  %v11356_v46 = vld [vmem:[#allocation3 + $0x48] sm:$0xff] }
 0x16c   : > { %9536 = vmatmul.msk.f32.gmra.mxu3 %vm380_vm1, %v2076_v57  ;;  %v11384_v57 = vld [vmem:[#allocation3 + $0x60] sm:$0xff] }
 0x16d   : > { %v11340_v34 = vadd.f32 %v1866_v61, %v1758_v21 }
 0x16e   : > { %v1419_v35 = vpop.f32.mrf.mxu2  ;;  %v1722_v19 = vpop.f32.mrf.mxu0 }
 0x16f   : > { %v1569_v31 = vpop.f32.mrf.mxu3  ;;  %v1459_v18 = vadd.f32 %v1419_v35, %v1286_v22  ;;  %v1872_v17 = vpop.f32.mrf.mxu1 }
 0x171   : > { %v1609_v3 = vadd.f32 %v1569_v31, %v1459_v18  ;;  %9555 = vmatmul.msk.f32.gmra.mxu0 %vm380_vm1, %v11113_v0  ;;  %v11398_v31 = vld [vmem:[#allocation3 + $0x68] sm:$0xff] }
 0x172   : > { %9572 = vmatmul.msk.f32.gmra.mxu1 %vm380_vm1, %v11342_v63 }
 0x173   : > { %v1759_v25 = vadd.f32 %v1719_v45, %v1609_v3  ;;  %9519 = vmatmul.msk.f32.gmra.mxu2 %vm380_vm1, %v10884_v38  ;;  %v1292_v38 = vadd.f32 %v11243_v44, %v11241_v39 }
 0x174   : > { %9537 = vmatmul.msk.f32.gmra.mxu3 %vm380_vm1, %v10882_v37 }
 0x175   : > { %v11354_v43 = vadd.f32 %v1869_v62, %v1759_v25 }
 0x176   : > { %v1422_v4 = vpop.f32.mrf.mxu2  ;;  %v1725_v41 = vpop.f32.mrf.mxu0 }
 0x177   : > { %v1572_v9 = vpop.f32.mrf.mxu3  ;;  %v1460_v10 = vadd.f32 %v1422_v4, %v1289_v42  ;;  %v1875_v0 = vpop.f32.mrf.mxu1  ;;  %v11415_v42 = vld [vmem:[#allocation3 + $0x78] sm:$0xff] }
 0x179   : > { %v1610_v61 = vadd.f32 %v1572_v9, %v1460_v10  ;;  %9556 = vmatmul.msk.f32.gmra.mxu0 %vm380_vm1, %v11127_v2 }
 0x17a   : > { %9573 = vmatmul.msk.f32.gmra.mxu1 %vm380_vm1, %v11356_v46 }
 0x17b   : > { %v1760_v37 = vadd.f32 %v1722_v19, %v1610_v61  ;;  %9520 = vmatmul.msk.f32.gmra.mxu2 %vm380_vm1, %v10913_v48  ;;  %v1295_v48 = vadd.f32 %v11267_v30, %v11265_v55  ;;  %v11428_v61 = vld [vmem:[#allocation3 + $0x80] sm:$0xff] }
 0x17c   : > { %9538 = vmatmul.msk.f32.gmra.mxu3 %vm380_vm1, %v10909_v47 }
 0x17d   : > { %v11368_v56 = vadd.f32 %v1872_v17, %v1760_v37  ;;  %v14279_v37 = vld [vmem:[#allocation6_spill] sm:$0xff] }
 0x17e   : > { %v1425_v12 = vpop.f32.mrf.mxu2  ;;  %v1728_v14 = vpop.f32.mrf.mxu0 }
 0x17f   : > { %v1575_v50 = vpop.f32.mrf.mxu3  ;;  %v1461_v13 = vadd.f32 %v1425_v12, %v1292_v38  ;;  %v1878_v2 = vpop.f32.mrf.mxu1 }
 0x181   : > { %v1611_v29 = vadd.f32 %v1575_v50, %v1461_v13  ;;  %9557 = vmatmul.msk.f32.gmra.mxu0 %vm380_vm1, %v11145_v11  ;;  %v14281_v50 = vld [vmem:[#allocation7_spill] sm:$0xff] }
 0x182   : > { %9574 = vmatmul.msk.f32.gmra.mxu1 %vm380_vm1, %v11370_v28 }
 0x183   : > { %v1761_v47 = vadd.f32 %v1725_v41, %v1611_v29  ;;  %9521 = vmatmul.msk.f32.gmra.mxu2 %vm380_vm1, %v10931_v54  ;;  %v1298_v54 = vadd.f32 %v11139_v8, %v11137_v7  ;;  %v11441_v29 = vld [vmem:[#allocation3 + $0x90] sm:$0xff] }
 0x184   : > { %9539 = vmatmul.msk.f32.gmra.mxu3 %vm380_vm1, %v10929_v53 }
 0x185   : > { %v11382_v39 = vadd.f32 %v1875_v0, %v1761_v47  ;;  %v14282_v47 = vld [vmem:[#allocation10_spill] sm:$0xff] }
 0x186   : > { %v1428_v44 = vpop.f32.mrf.mxu2  ;;  %v1731_v62 = vpop.f32.mrf.mxu0 }
 0x187   : > { %v1578_v36 = vpop.f32.mrf.mxu3  ;;  %v1462_v45 = vadd.f32 %v1428_v44, %v1295_v48  ;;  %v1881_v11 = vpop.f32.mrf.mxu1  ;;  %v14283_v44 = vld [vmem:[#allocation12_spill] sm:$0xff] }
 0x189   : > { %v1612_v1 = vadd.f32 %v1578_v36, %v1462_v45  ;;  %9558 = vmatmul.msk.f32.gmra.mxu0 %vm380_vm1, %v11159_v20  ;;  %v14284_v36 = vld [vmem:[#allocation9_spill] sm:$0xff] }
 0x18a   : > { %9575 = vmatmul.msk.f32.gmra.mxu1 %vm380_vm1, %v11384_v57  ;;  %v9655_v45 = vld [vmem:[%s14235_s4 + $0x14] sm:$0xf] }
 0x18b   : > { %v1762_v53 = vadd.f32 %v1728_v14, %v1612_v1  ;;  %9522 = vmatmul.msk.f32.gmra.mxu2 %vm380_vm1, %v10949_v60  ;;  %v1003_v60 = vld [vmem:[%s10567_s26 + $0x88] sm:$0xff] }
 0x18c   : > { %9540 = vmatmul.msk.f32.gmra.mxu3 %vm380_vm1, %v10947_v59  ;;  %v1002_v59 = vld [vmem:[%s10567_s26 + $0x80] sm:$0xff]  ;;  %1036 = vst.msk [vmem:[#allocation2 + $0xe1] sm:$0xff] %vm380_vm1, %v1003_v60  ;;  %9656 = vmatpush.msk.msra.mxu2 %vm1136_vm2, %v9655_v45  ;;  %v14287_v60 = vld [vmem:[#allocation16_spill] sm:$0xff] }
 0x18d   : > { %v11396_v55 = vadd.f32 %v1878_v2, %v1762_v53  ;;  %1035 = vst.msk [vmem:[#allocation2 + $0xd9] sm:$0xff] %vm380_vm1, %v1002_v59 }
 0x18e   : > { %v1431_v30 = vpop.f32.mrf.mxu2  ;;  %v1734_v22 = vpop.f32.mrf.mxu0 }
 0x18f   : > { %v1581_v21 = vpop.f32.mrf.mxu3  ;;  %v1463_v20 = vadd.f32 %v1431_v30, %v1298_v54  ;;  %v1884_v35 = vpop.f32.mrf.mxu1  ;;  %v14285_v54 = vld [vmem:[#allocation8_spill] sm:$0xff] }
 0x191   : > { %v1613_v18 = vadd.f32 %v1581_v21, %v1463_v20  ;;  %9559 = vmatmul.msk.f32.gmra.mxu0 %vm380_vm1, %v11175_v32 }
 0x192   : > { %9576 = vmatmul.msk.f32.gmra.mxu1 %vm380_vm1, %v11398_v31 }
 0x193   : > { %v1763_v19 = vadd.f32 %v1731_v62, %v1613_v18  ;;  %9523 = vmatmul.msk.f32.gmra.mxu2 %vm380_vm1, %v10977_v6  ;;  %v9673_v62 = vld [vmem:[%s14235_s4 + $0x18] sm:$0xf] }
 0x194   : > { %9541 = vmatmul.msk.f32.gmra.mxu3 %vm380_vm1, %v10975_v5  ;;  %v14286_v18 = vld [vmem:[#allocation14_spill] sm:$0xff] }
 0x195   : > { %v11412_v7 = vadd.f32 %v1881_v11, %v1763_v19  ;;  %9674 = vmatpush.msk.msra.mxu3 %vm1136_vm2, %v9673_v62  ;;  %v14288_v19 = vld [vmem:[#allocation13_spill] sm:$0xff] }
 0x196   : > { %v1434_v8 = vpop.f32.mrf.mxu2  ;;  %v1737_v3 = vpop.f32.mrf.mxu0 }
 0x197   : > { %v1584_v32 = vpop.f32.mrf.mxu3  ;;  %v1464_v17 = vadd.f32 %v1434_v8, %v11161_v27  ;;  %v1887_v25 = vpop.f32.mrf.mxu1  ;;  %v9691_v8 = vld [vmem:[%s14235_s4 + $0x1c] sm:$0xf] }
 0x198   : > { %9692 = vmatpush.msk.msra.mxu0 %vm1136_vm2, %v9691_v8 }
 0x199   : > { %v1614_v4 = vadd.f32 %v1584_v32, %v1464_v17  ;;  %9560 = vmatmul.msk.f32.gmra.mxu0 %vm380_vm1, %v11191_v40 }
 0x19a   : > { %9577 = vmatmul.msk.f32.gmra.mxu1 %vm380_vm1, %v11415_v42 }
 0x19b   : > { %v1764_v5 = vadd.f32 %v1734_v22, %v1614_v4  ;;  %9524 = vmatmul.msk.f32.gmra.mxu2 %vm380_vm1, %v11005_v16  ;;  %v11462_v22 = vld [vmem:[#allocation3 + $0x98] sm:$0xff]  ;;  %v14289_v4 = vld [vmem:[#allocation11_spill] sm:$0xff] }
 0x19c   : > { %9542 = vmatmul.msk.f32.gmra.mxu3 %vm380_vm1, %v11003_v15  ;;  %v14280_v15 = vld [vmem:[#allocation5_spill] sm:$0xff] }
 0x19d   : > { %v11425_v6 = vadd.f32 %v1884_v35, %v1764_v5 }
 0x19e   : > { %v1437_v27 = vpop.f32.mrf.mxu2  ;;  %v1740_v41 = vpop.f32.mrf.mxu0 }
 0x19f   : > { %v1587_v9 = vpop.f32.mrf.mxu3  ;;  %v1465_v10 = vadd.f32 %v1437_v27, %v11177_v33  ;;  %v1890_v0 = vpop.f32.mrf.mxu1 }
 0x1a1   : > { %v1615_v40 = vadd.f32 %v1587_v9, %v1465_v10  ;;  %9561 = vmatmul.msk.f32.gmra.mxu0 %vm380_vm1, %v11215_v52  ;;  %v1936_v10 = vld [vmem:[#allocation2 + $0xd8] sm:$0xff] }
 0x1a2   : > { %9578 = vmatmul.msk.f32.gmra.mxu1 %vm380_vm1, %v11428_v61 }
 0x1a3   : > { %v1765_v16 = vadd.f32 %v1737_v3, %v1615_v40  ;;  %9525 = vmatmul.msk.f32.gmra.mxu2 %vm380_vm1, %v14279_v37  ;;  %v9709_v37 = vld [vmem:[%s14235_s4 + $0x20] sm:$0xf] }
 0x1a4   : > { %9543 = vmatmul.msk.f32.gmra.mxu3 %vm380_vm1, %v14280_v15  ;;  %9710 = vmatpush.msk.msra.mxu1 %vm1136_vm2, %v9709_v37 }
 0x1a5   : > { %v11438_v38 = vadd.f32 %v1887_v25, %v1765_v16  ;;  %v2236_v25 = vld [vmem:[#allocation2 + $0xda] sm:$0xff] }
 0x1a6   : > { %v1440_v33 = vpop.f32.mrf.mxu2  ;;  %v1743_v14 = vpop.f32.mrf.mxu0 }
 0x1a7   : > { %v1590_v12 = vpop.f32.mrf.mxu3  ;;  %v1466_v13 = vadd.f32 %v1440_v33, %v14281_v50  ;;  %v1893_v2 = vpop.f32.mrf.mxu1  ;;  %v2237_v50 = vld [vmem:[#allocation2 + $0xe2] sm:$0xff] }
 0x1a9   : > { %v1616_v52 = vadd.f32 %v1590_v12, %v1466_v13  ;;  %9562 = vmatmul.msk.f32.gmra.mxu0 %vm380_vm1, %v14282_v47  ;;  %v14290_v13 = vld [vmem:[#allocation15_spill] sm:$0xff] }
 0x1aa   : > { %9579 = vmatmul.msk.f32.gmra.mxu1 %vm380_vm1, %v11441_v29  ;;  %v1937_v47 = vld [vmem:[#allocation2 + $0xe0] sm:$0xff] }
 0x1ab   : > { %v1766_v48 = vadd.f32 %v1740_v41, %v1616_v52  ;;  %9526 = vmatmul.msk.f32.gmra.mxu2 %vm380_vm1, %v14283_v44  ;;  %v2086_v41 = vld [vmem:[#allocation2 + $0xd9] sm:$0xff] }
 0x1ac   : > { %9544 = vmatmul.msk.f32.gmra.mxu3 %vm380_vm1, %v14284_v36  ;;  %v11493_v44 = vld [vmem:[#allocation3 + $0xb0] sm:$0xff] }
 0x1ad   : > { %v11459_v11 = vadd.f32 %v1890_v0, %v1766_v48  ;;  %v11479_v0 = vld [vmem:[#allocation3 + $0xa8] sm:$0xff]  ;;  %v2087_v48 = vld [vmem:[#allocation2 + $0xe1] sm:$0xff] }
 0x1ae   : > { %v1443_v1 = vpop.f32.mrf.mxu2  ;;  %v1746_v21 = vpop.f32.mrf.mxu0 }
 0x1af   : > { %v1593_v53 = vpop.f32.mrf.mxu3  ;;  %v1467_v30 = vadd.f32 %v1443_v1, %v14285_v54  ;;  %v1896_v20 = vpop.f32.mrf.mxu1  ;;  %v14291_v54 = vld [vmem:[#allocation17_spill] sm:$0xff] }
 0x1b1   : > { %v1617_v35 = vadd.f32 %v1593_v53, %v1467_v30  ;;  %9563 = vmatmul.msk.f32.gmra.mxu0 %vm380_vm1, %v14286_v18  ;;  %v2671_v18 = vld [vmem:[#allocation3 + $0x2] sm:$0xff] }
 0x1b2   : > { %9580 = vmatmul.msk.f32.gmra.mxu1 %vm380_vm1, %v11462_v22 }
 0x1b3   : > { %v1767_v59 = vadd.f32 %v1743_v14, %v1617_v35  ;;  %9527 = vmatmul.msk.f32.gmra.mxu2 %vm380_vm1, %v14287_v60  ;;  %v2521_v35 = vld [vmem:[#allocation3 + $0x1] sm:$0xff] }
 0x1b4   : > { %9545 = vmatmul.msk.f32.gmra.mxu3 %vm380_vm1, %v14288_v19 }
 0x1b5   : > { %v11476_v32 = vadd.f32 %v1893_v2, %v1767_v59  ;;  %v2971_v59 = vld [vmem:[#allocation3 + $0x19] sm:$0xff] }
 0x1b6   : > { %v1446_v17 = vpop.f32.mrf.mxu2  ;;  %v1749_v27 = vpop.f32.mrf.mxu0 }
 0x1b7   : > { %v1596_v3 = vpop.f32.mrf.mxu3  ;;  %v1468_v5 = vadd.f32 %v1446_v17, %v14289_v4  ;;  %v1899_v9 = vpop.f32.mrf.mxu1 }
 0x1b9   : > { %v1618_v40 = vadd.f32 %v1596_v3, %v1468_v5  ;;  %9564 = vmatmul.msk.f32.gmra.mxu0 %vm380_vm1, %v2236_v25 }
 0x1ba   : > { %9581 = vmatmul.msk.f32.gmra.mxu1 %vm380_vm1, %v11479_v0 }
 0x1bb   : > { %v1768_v16 = vadd.f32 %v1746_v21, %v1618_v40  ;;  %9528 = vmatmul.msk.f32.gmra.mxu2 %vm380_vm1, %v1936_v10  ;;  %v2972_v10 = vld [vmem:[#allocation3 + $0x21] sm:$0xff] }
 0x1bc   : > { %9546 = vmatmul.msk.f32.gmra.mxu3 %vm380_vm1, %v2086_v41 }
 0x1bd   : > { %v11490_v15 = vadd.f32 %v1896_v20, %v1768_v16 }
 0x1be   : > { %v1449_v33 = vpop.f32.mrf.mxu2  ;;  %v1752_v2 = vpop.f32.mrf.mxu0 }
 0x1bf   : > { %v1599_v12 = vpop.f32.mrf.mxu3  ;;  %v1469_v14 = vadd.f32 %v1449_v33, %v14290_v13  ;;  %v1902_v52 = vpop.f32.mrf.mxu1 }
 0x1c1   : > { %v1619_v36 = vadd.f32 %v1599_v12, %v1469_v14  ;;  %9565 = vmatmul.msk.f32.gmra.mxu0 %vm380_vm1, %v2237_v50  ;;  %v11519_v50 = vld [vmem:[#allocation3 + $0x31] sm:$0xff] }
 0x1c2   : > { %9582 = vmatmul.msk.f32.gmra.mxu1 %vm380_vm1, %v11493_v44 }
 0x1c3   : > { %v1769_v45 = vadd.f32 %v1749_v27, %v1619_v36  ;;  %9529 = vmatmul.msk.f32.gmra.mxu2 %vm380_vm1, %v1937_v47  ;;  %v2522_v27 = vld [vmem:[#allocation3 + $0x9] sm:$0xff] }
 0x1c4   : > { %9547 = vmatmul.msk.f32.gmra.mxu3 %vm380_vm1, %v2087_v48 }
 0x1c5   : > { %v11500_v62 = vadd.f32 %v1899_v9, %v1769_v45  ;;  %v2672_v9 = vld [vmem:[#allocation3 + $0xa] sm:$0xff]  ;;  %v11533_v45 = vld [vmem:[#allocation3 + $0x39] sm:$0xff] }
 0x1c6   : > { %v1452_v1 = vpop.f32.mrf.mxu2  ;;  %v2308_v21 = vpop.f32.mrf.mxu0 }
 0x1c7   : > { %v1602_v53 = vpop.f32.mrf.mxu3  ;;  %v1470_v30 = vadd.f32 %v1452_v1, %v14291_v54  ;;  %v2457_v20 = vpop.f32.mrf.mxu1 }
 0x1c9   : > { %v1620_v60 = vadd.f32 %v1602_v53, %v1470_v30  ;;  %9621 = vmatmul.msk.f32.vlgmr.msrb.gmra.mxu0 %vm380_vm1, %v11301_v51  ;;  %v11539_v53 = vld [vmem:[#allocation3 + $0x22] sm:$0xff] }
 0x1ca   : > { %9639 = vmatmul.msk.f32.vlgmr.msrb.gmra.mxu1 %vm380_vm1, %v2971_v59 }
 0x1cb   : > { %v1770_v19 = vadd.f32 %v1752_v2, %v1620_v60  ;;  %9585 = vmatmul.msk.f32.vlgmr.msrb.gmra.mxu2 %vm380_vm1, %v2521_v35 }
 0x1cc   : > { %9603 = vmatmul.msk.f32.vlgmr.msrb.gmra.mxu3 %vm380_vm1, %v2671_v18 }
 0x1cd   : > { %v11508_v8 = vadd.f32 %v1902_v52, %v1770_v19  ;;  %v11553_v19 = vld [vmem:[#allocation3 + $0x32] sm:$0xff] }
 0x1ce   : > { %v2008_v17 = vpop.f32.mrf.mxu2  ;;  %v2311_v4 = vpop.f32.mrf.mxu0 }
 0x1cf   : > { %v2158_v3 = vpop.f32.mrf.mxu3  ;;  %v2056_v25 = vadd.f32 %v2008_v17, %v11299_v58  ;;  %v2460_v5 = vpop.f32.mrf.mxu1 }
 0x1d1   : > { %v2206_v41 = vadd.f32 %v2158_v3, %v2056_v25  ;;  %9622 = vmatmul.msk.f32.gmra.mxu0 %vm380_vm1, %v11315_v49  ;;  %v11525_v49 = vld [vmem:[#allocation3 + $0x1a] sm:$0xff] }
 0x1d2   : > { %9640 = vmatmul.msk.f32.gmra.mxu1 %vm380_vm1, %v2972_v10 }
 0x1d3   : > { %v2356_v51 = vadd.f32 %v2308_v21, %v2206_v41  ;;  %9586 = vmatmul.msk.f32.gmra.mxu2 %vm380_vm1, %v2522_v27  ;;  %v11568_v41 = vld [vmem:[#allocation3 + $0x3a] sm:$0xff] }
 0x1d4   : > { %9604 = vmatmul.msk.f32.gmra.mxu3 %vm380_vm1, %v2672_v9  ;;  %v11562_v9 = vld [vmem:[#allocation3 + $0x51] sm:$0xff] }
 0x1d5   : > { %v11516_v40 = vadd.f32 %v2457_v20, %v2356_v51 }
 0x1d6   : > { %v2011_v16 = vpop.f32.mrf.mxu2  ;;  %v2314_v33 = vpop.f32.mrf.mxu0 }
 0x1d7   : > { %v2161_v58 = vpop.f32.mrf.mxu3  ;;  %v2057_v37 = vadd.f32 %v2011_v16, %v11313_v26  ;;  %v2463_v12 = vpop.f32.mrf.mxu1 }
 0x1d9   : > { %v2207_v13 = vadd.f32 %v2161_v58, %v2057_v37  ;;  %9623 = vmatmul.msk.f32.gmra.mxu0 %vm380_vm1, %v11329_v24 }
 0x1da   : > { %9641 = vmatmul.msk.f32.gmra.mxu1 %vm380_vm1, %v11519_v50 }
 0x1db   : > { %v2357_v14 = vadd.f32 %v2311_v4, %v2207_v13  ;;  %9587 = vmatmul.msk.f32.gmra.mxu2 %vm380_vm1, %v2971_v59  ;;  %v11547_v59 = vld [vmem:[#allocation3 + $0x49] sm:$0xff]  ;;  %v11577_v13 = vld [vmem:[#allocation3 + $0x61] sm:$0xff] }
 0x1dc   : > { %9605 = vmatmul.msk.f32.gmra.mxu3 %vm380_vm1, %v11525_v49 }
 0x1dd   : > { %v11530_v26 = vadd.f32 %v2460_v5, %v2357_v14 }
 0x1de   : > { %v2014_v2 = vpop.f32.mrf.mxu2  ;;  %v2317_v48 = vpop.f32.mrf.mxu0 }
 0x1df   : > { %v2164_v52 = vpop.f32.mrf.mxu3  ;;  %v2058_v47 = vadd.f32 %v2014_v2, %v11327_v23  ;;  %v2466_v36 = vpop.f32.mrf.mxu1  ;;  %v11583_v2 = vld [vmem:[#allocation3 + $0x4a] sm:$0xff] }
 0x1e1   : > { %v2208_v1 = vadd.f32 %v2164_v52, %v2058_v47  ;;  %9624 = vmatmul.msk.f32.gmra.mxu0 %vm380_vm1, %v11342_v63 }
 0x1e2   : > { %9642 = vmatmul.msk.f32.gmra.mxu1 %vm380_vm1, %v11533_v45 }
 0x1e3   : > { %v2358_v54 = vadd.f32 %v2314_v33, %v2208_v1  ;;  %9588 = vmatmul.msk.f32.gmra.mxu2 %vm380_vm1, %v2972_v10 }
 0x1e4   : > { %9606 = vmatmul.msk.f32.gmra.mxu3 %vm380_vm1, %v11539_v53 }
 0x1e5   : > { %v11544_v23 = vadd.f32 %v2463_v12, %v2358_v54 }
 0x1e6   : > { %v2017_v30 = vpop.f32.mrf.mxu2  ;;  %v2320_v35 = vpop.f32.mrf.mxu0 }
 0x1e7   : > { %v2167_v21 = vpop.f32.mrf.mxu3  ;;  %v2059_v20 = vadd.f32 %v2017_v30, %v11340_v34  ;;  %v2469_v18 = vpop.f32.mrf.mxu1  ;;  %v11592_v30 = vld [vmem:[#allocation3 + $0x69] sm:$0xff] }
 0x1e9   : > { %v2209_v60 = vadd.f32 %v2167_v21, %v2059_v20  ;;  %9625 = vmatmul.msk.f32.gmra.mxu0 %vm380_vm1, %v11356_v46  ;;  %v11598_v20 = vld [vmem:[#allocation3 + $0x52] sm:$0xff] }
 0x1ea   : > { %9643 = vmatmul.msk.f32.gmra.mxu1 %vm380_vm1, %v11547_v59 }
 0x1eb   : > { %v2359_v17 = vadd.f32 %v2317_v48, %v2209_v60  ;;  %9589 = vmatmul.msk.f32.gmra.mxu2 %vm380_vm1, %v11519_v50 }
 0x1ec   : > { %9607 = vmatmul.msk.f32.gmra.mxu3 %vm380_vm1, %v11553_v19 }
 0x1ed   : > { %v11559_v34 = vadd.f32 %v2466_v36, %v2359_v17 }
 0x1ee   : > { %v2020_v3 = vpop.f32.mrf.mxu2  ;;  %v2323_v5 = vpop.f32.mrf.mxu0 }
 0x1ef   : > { %v2170_v25 = vpop.f32.mrf.mxu3  ;;  %v2060_v4 = vadd.f32 %v2020_v3, %v11354_v43  ;;  %v2472_v27 = vpop.f32.mrf.mxu1 }
 0x1f1   : > { %v2210_v10 = vadd.f32 %v2170_v25, %v2060_v4  ;;  %9626 = vmatmul.msk.f32.gmra.mxu0 %vm380_vm1, %v11370_v28  ;;  %v11607_v4 = vld [vmem:[#allocation3 + $0x79] sm:$0xff] }
 0x1f2   : > { %9644 = vmatmul.msk.f32.gmra.mxu1 %vm380_vm1, %v11562_v9 }
 0x1f3   : > { %v2360_v51 = vadd.f32 %v2320_v35, %v2210_v10  ;;  %9590 = vmatmul.msk.f32.gmra.mxu2 %vm380_vm1, %v11533_v45 }
 0x1f4   : > { %9608 = vmatmul.msk.f32.gmra.mxu3 %vm380_vm1, %v11568_v41 }
 0x1f5   : > { %v11574_v43 = vadd.f32 %v2469_v18, %v2360_v51 }
 0x1f6   : > { %v2023_v16 = vpop.f32.mrf.mxu2  ;;  %v2326_v33 = vpop.f32.mrf.mxu0 }
 0x1f7   : > { %v2173_v58 = vpop.f32.mrf.mxu3  ;;  %v2061_v37 = vadd.f32 %v2023_v16, %v11368_v56  ;;  %v2475_v12 = vpop.f32.mrf.mxu1 }
 0x1f9   : > { %v2211_v14 = vadd.f32 %v2173_v58, %v2061_v37  ;;  %9627 = vmatmul.msk.f32.gmra.mxu0 %vm380_vm1, %v11384_v57 }
 0x1fa   : > { %9645 = vmatmul.msk.f32.gmra.mxu1 %vm380_vm1, %v11577_v13 }
 0x1fb   : > { %v2361_v52 = vadd.f32 %v2323_v5, %v2211_v14  ;;  %9591 = vmatmul.msk.f32.gmra.mxu2 %vm380_vm1, %v11547_v59 }
 0x1fc   : > { %9609 = vmatmul.msk.f32.gmra.mxu3 %vm380_vm1, %v11583_v2 }
 0x1fd   : > { %v11589_v56 = vadd.f32 %v2472_v27, %v2361_v52  ;;  %v11613_v27 = vld [vmem:[#allocation3 + $0x62] sm:$0xff]  ;;  %v11628_v52 = vld [vmem:[#allocation3 + $0x6a] sm:$0xff] }
 0x1fe   : > { %v2026_v47 = vpop.f32.mrf.mxu2  ;;  %v2329_v1 = vpop.f32.mrf.mxu0 }
 0x1ff   : > { %v2176_v48 = vpop.f32.mrf.mxu3  ;;  %v2062_v36 = vadd.f32 %v2026_v47, %v11382_v39  ;;  %v2478_v54 = vpop.f32.mrf.mxu1 }
 0x201   : > { %v2212_v21 = vadd.f32 %v2176_v48, %v2062_v36  ;;  %9628 = vmatmul.msk.f32.gmra.mxu0 %vm380_vm1, %v11398_v31 }
 0x202   : > { %9646 = vmatmul.msk.f32.gmra.mxu1 %vm380_vm1, %v11592_v30 }
 0x203   : > { %v2362_v35 = vadd.f32 %v2326_v33, %v2212_v21  ;;  %9592 = vmatmul.msk.f32.gmra.mxu2 %vm380_vm1, %v11562_v9 }
 0x204   : > { %9610 = vmatmul.msk.f32.gmra.mxu3 %vm380_vm1, %v11598_v20 }
 0x205   : > { %v11604_v39 = vadd.f32 %v2475_v12, %v2362_v35  ;;  %v11622_v12 = vld [vmem:[#allocation3 + $0x81] sm:$0xff]  ;;  %v11637_v35 = vld [vmem:[#allocation3 + $0x91] sm:$0xff] }
 0x206   : > { %v2029_v18 = vpop.f32.mrf.mxu2  ;;  %v2332_v3 = vpop.f32.mrf.mxu0 }
 0x207   : > { %v2179_v60 = vpop.f32.mrf.mxu3  ;;  %v2063_v17 = vadd.f32 %v2029_v18, %v11396_v55  ;;  %v2481_v25 = vpop.f32.mrf.mxu1 }
 0x209   : > { %v2213_v5 = vadd.f32 %v2179_v60, %v2063_v17  ;;  %9629 = vmatmul.msk.f32.gmra.mxu0 %vm380_vm1, %v11415_v42  ;;  %v11643_v60 = vld [vmem:[#allocation3 + $0x7a] sm:$0xff] }
 0x20a   : > { %9647 = vmatmul.msk.f32.gmra.mxu1 %vm380_vm1, %v11607_v4 }
 0x20b   : > { %v2363_v10 = vadd.f32 %v2329_v1, %v2213_v5  ;;  %9593 = vmatmul.msk.f32.gmra.mxu2 %vm380_vm1, %v11577_v13 }
 0x20c   : > { %9611 = vmatmul.msk.f32.gmra.mxu3 %vm380_vm1, %v11613_v27 }
 0x20d   : > { %v11619_v55 = vadd.f32 %v2478_v54, %v2363_v10 }
 0x20e   : > { %v2032_v51 = vpop.f32.mrf.mxu2  ;;  %v2335_v37 = vpop.f32.mrf.mxu0 }
 0x20f   : > { %v2182_v16 = vpop.f32.mrf.mxu3  ;;  %v2064_v58 = vadd.f32 %v2032_v51, %v11412_v7  ;;  %v2484_v33 = vpop.f32.mrf.mxu1 }
 0x211   : > { %v2214_v14 = vadd.f32 %v2182_v16, %v2064_v58  ;;  %9630 = vmatmul.msk.f32.gmra.mxu0 %vm380_vm1, %v11428_v61  ;;  %v11652_v16 = vld [vmem:[#allocation3 + $0x99] sm:$0xff] }
 0x212   : > { %9648 = vmatmul.msk.f32.gmra.mxu1 %vm380_vm1, %v11622_v12 }
 0x213   : > { %v2364_v47 = vadd.f32 %v2332_v3, %v2214_v14  ;;  %9594 = vmatmul.msk.f32.gmra.mxu2 %vm380_vm1, %v11592_v30 }
 0x214   : > { %9612 = vmatmul.msk.f32.gmra.mxu3 %vm380_vm1, %v11628_v52 }
 0x215   : > { %v11634_v7 = vadd.f32 %v2481_v25, %v2364_v47 }
 0x216   : > { %v2035_v48 = vpop.f32.mrf.mxu2  ;;  %v2338_v54 = vpop.f32.mrf.mxu0 }
 0x217   : > { %v2185_v36 = vpop.f32.mrf.mxu3  ;;  %v2065_v1 = vadd.f32 %v2035_v48, %v11425_v6  ;;  %v2487_v21 = vpop.f32.mrf.mxu1 }
 0x219   : > { %v2215_v18 = vadd.f32 %v2185_v36, %v2065_v1  ;;  %9631 = vmatmul.msk.f32.gmra.mxu0 %vm380_vm1, %v11441_v29 }
 0x21a   : > { %9649 = vmatmul.msk.f32.gmra.mxu1 %vm380_vm1, %v11637_v35 }
 0x21b   : > { %v2365_v17 = vadd.f32 %v2335_v37, %v2215_v18  ;;  %9595 = vmatmul.msk.f32.gmra.mxu2 %vm380_vm1, %v11607_v4  ;;  %v11658_v37 = vld [vmem:[#allocation3 + $0x82] sm:$0xff] }
 0x21c   : > { %9613 = vmatmul.msk.f32.gmra.mxu3 %vm380_vm1, %v11643_v60  ;;  %v11667_v18 = vld [vmem:[#allocation3 + $0xa9] sm:$0xff] }
 0x21d   : > { %v11649_v6 = vadd.f32 %v2484_v33, %v2365_v17 }
 0x21e   : > { %v2038_v3 = vpop.f32.mrf.mxu2  ;;  %v2341_v10 = vpop.f32.mrf.mxu0 }
 0x21f   : > { %v2188_v25 = vpop.f32.mrf.mxu3  ;;  %v2066_v5 = vadd.f32 %v2038_v3, %v11438_v38  ;;  %v2490_v51 = vpop.f32.mrf.mxu1 }
 0x221   : > { %v2216_v58 = vadd.f32 %v2188_v25, %v2066_v5  ;;  %9632 = vmatmul.msk.f32.gmra.mxu0 %vm380_vm1, %v11462_v22 }
 0x222   : > { %9650 = vmatmul.msk.f32.gmra.mxu1 %vm380_vm1, %v11652_v16 }
 0x223   : > { %v2366_v14 = vadd.f32 %v2338_v54, %v2216_v58  ;;  %9596 = vmatmul.msk.f32.gmra.mxu2 %vm380_vm1, %v11622_v12  ;;  %v11673_v54 = vld [vmem:[#allocation3 + $0x92] sm:$0xff] }
 0x224   : > { %9614 = vmatmul.msk.f32.gmra.mxu3 %vm380_vm1, %v11658_v37 }
 0x225   : > { %v11664_v38 = vadd.f32 %v2487_v21, %v2366_v14  ;;  %v3810_v21 = vld [vmem:[%s14234_s3] sm:$0xf] }
 0x226   : > { %v2041_v33 = vpop.f32.mrf.mxu2  ;;  %v2344_v36 = vpop.f32.mrf.mxu0  ;;  %9745 = vmatpush.msk.msrb.mxu3 %vm1136_vm2, %v3810_v21 }
 0x227   : > { %v2191_v47 = vpop.f32.mrf.mxu3  ;;  %v2067_v48 = vadd.f32 %v2041_v33, %v11459_v11  ;;  %v2493_v1 = vpop.f32.mrf.mxu1  ;;  %v9727_v11 = vld [vmem:[%s14234_s3 + $0x4] sm:$0xf] }
 0x228   : > { %9728 = vmatpush.msk.msrb.mxu2 %vm1136_vm2, %v9727_v11 }
 0x229   : > { %v2217_v17 = vadd.f32 %v2191_v47, %v2067_v48  ;;  %9633 = vmatmul.msk.f32.gmra.mxu0 %vm380_vm1, %v11479_v0  ;;  %v11690_v47 = vld [vmem:[#allocation3 + $0xb1] sm:$0xff] }
 0x22a   : > { %9651 = vmatmul.msk.f32.gmra.mxu1 %vm380_vm1, %v11667_v18 }
 0x22b   : > { %v2367_v3 = vadd.f32 %v2341_v10, %v2217_v17  ;;  %9597 = vmatmul.msk.f32.gmra.mxu2 %vm380_vm1, %v11637_v35  ;;  %v11696_v17 = vld [vmem:[#allocation3 + $0x9a] sm:$0xff] }
 0x22c   : > { %9615 = vmatmul.msk.f32.gmra.mxu3 %vm380_vm1, %v11673_v54 }
 0x22d   : > { %v11687_v25 = vadd.f32 %v2490_v51, %v2367_v3 }
 0x22e   : > { %v2044_v5 = vpop.f32.mrf.mxu2  ;;  %v2347_v14 = vpop.f32.mrf.mxu0 }
 0x22f   : > { %14292 = vst [vmem:[#allocation6_spill] sm:$0xff] %v11687_v25  ;;  %v2194_v10 = vpop.f32.mrf.mxu3  ;;  %v2068_v58 = vadd.f32 %v2044_v5, %v11476_v32  ;;  %v2496_v33 = vpop.f32.mrf.mxu1  ;;  %v9762_v32 = vld [vmem:[%s14234_s3 + $0x8] sm:$0xf] }
 0x230   : > { %9763 = vmatpush.msk.msrb.mxu0 %vm1136_vm2, %v9762_v32  ;;  %v11717_v32 = vld [vmem:[#allocation3 + $0xaa] sm:$0xff] }
 0x231   : > { %v2218_v48 = vadd.f32 %v2194_v10, %v2068_v58  ;;  %9634 = vmatmul.msk.f32.gmra.mxu0 %vm380_vm1, %v11493_v44  ;;  %v11709_v58 = vld [vmem:[#allocation3 + $0xc0] sm:$0xff] }
 0x232   : > { %9652 = vmatmul.msk.f32.gmra.mxu1 %vm380_vm1, %v11690_v47  ;;  %14294 = vst [vmem:[#allocation7_spill] sm:$0xff] %v11709_v58 }
 0x233   : > { %v2368_v11 = vadd.f32 %v2344_v36, %v2218_v48  ;;  %9598 = vmatmul.msk.f32.gmra.mxu2 %vm380_vm1, %v11652_v16  ;;  %v11711_v48 = vld [vmem:[#allocation3 + $0xc1] sm:$0xff] }
 0x234   : > { %9616 = vmatmul.msk.f32.gmra.mxu3 %vm380_vm1, %v11696_v17  ;;  %14295 = vst [vmem:[#allocation10_spill] sm:$0xff] %v11711_v48 }
 0x235   : > { %v11706_v51 = vadd.f32 %v2493_v1, %v2368_v11 }
 0x236   : > { %v2047_v3 = vpop.f32.mrf.mxu2  ;;  %v2350_v10 = vpop.f32.mrf.mxu0 }
 0x237   : > { %14293 = vst [vmem:[#allocation5_spill] sm:$0xff] %v11706_v51  ;;  %v2197_v21 = vpop.f32.mrf.mxu3  ;;  %v2069_v5 = vadd.f32 %v2047_v3, %v11490_v15  ;;  %v2499_v36 = vpop.f32.mrf.mxu1  ;;  %v9780_v15 = vld [vmem:[%s14234_s3 + $0xc] sm:$0xf] }
 0x238   : > { %9781 = vmatpush.msk.msrb.mxu1 %vm1136_vm2, %v9780_v15  ;;  %v11738_v15 = vld [vmem:[#allocation3 + $0xb2] sm:$0xff] }
 0x239   : > { %v2219_v25 = vadd.f32 %v2197_v21, %v2069_v5  ;;  %9635 = vmatmul.msk.f32.gmra.mxu0 %vm380_vm1, %v11709_v58  ;;  %v11732_v58 = vld [vmem:[#allocation3 + $0xc9] sm:$0xff] }
 0x23a   : > { %9653 = vmatmul.msk.f32.gmra.mxu1 %vm380_vm1, %v11711_v48 }
 0x23b   : > { %v2369_v1 = vadd.f32 %v2347_v14, %v2219_v25  ;;  %9599 = vmatmul.msk.f32.gmra.mxu2 %vm380_vm1, %v11667_v18  ;;  %v11730_v14 = vld [vmem:[#allocation3 + $0xc8] sm:$0xff] }
 0x23c   : > { %9617 = vmatmul.msk.f32.gmra.mxu3 %vm380_vm1, %v11717_v32  ;;  %14297 = vst [vmem:[#allocation9_spill] sm:$0xff] %v11730_v14 }
 0x23d   : > { %v11727_v11 = vadd.f32 %v2496_v33, %v2369_v1 }
 0x23e   : > { %v2050_v3 = vpop.f32.mrf.mxu2  ;;  %v2353_v51 = vpop.f32.mrf.mxu0 }
 0x23f   : > { %14296 = vst [vmem:[#allocation12_spill] sm:$0xff] %v11727_v11  ;;  %v2200_v21 = vpop.f32.mrf.mxu3  ;;  %v2070_v5 = vadd.f32 %v2050_v3, %v11500_v62  ;;  %v2502_v25 = vpop.f32.mrf.mxu1 }
 0x241   : > { %v2220_v48 = vadd.f32 %v2200_v21, %v2070_v5  ;;  %9636 = vmatmul.msk.f32.gmra.mxu0 %vm380_vm1, %v11730_v14 }
 0x242   : > { %9654 = vmatmul.msk.f32.gmra.mxu1 %vm380_vm1, %v11732_v58 }
 0x243   : > { %v2370_v33 = vadd.f32 %v2350_v10, %v2220_v48  ;;  %9600 = vmatmul.msk.f32.gmra.mxu2 %vm380_vm1, %v11690_v47 }
 0x244   : > { %9618 = vmatmul.msk.f32.gmra.mxu3 %vm380_vm1, %v11738_v15 }
 0x245   : > { %v11744_v62 = vadd.f32 %v2499_v36, %v2370_v33 }
 0x246   : > { %v2053_v1 = vpop.f32.mrf.mxu2  ;;  %v2907_v5 = vpop.f32.mrf.mxu0 }
 0x247   : > { %v2203_v3 = vpop.f32.mrf.mxu3  ;;  %v2071_v21 = vadd.f32 %v2053_v1, %v11508_v8  ;;  %v3057_v11 = vpop.f32.mrf.mxu1 }
 0x249   : > { %v2221_v14 = vadd.f32 %v2203_v3, %v2071_v21  ;;  %9693 = vmatmul.msk.f32.vlgmr.msra.gmra.mxu0 %vm380_vm1, %v11519_v50 }
 0x24a   : > { %9711 = vmatmul.msk.f32.vlgmr.msra.gmra.mxu1 %vm380_vm1, %v11553_v19 }
 0x24b   : > { %v2371_v10 = vadd.f32 %v2353_v51, %v2221_v14  ;;  %9657 = vmatmul.msk.f32.vlgmr.msra.gmra.mxu2 %vm380_vm1, %v11525_v49 }
 0x24c   : > { %9675 = vmatmul.msk.f32.vlgmr.msra.gmra.mxu3 %vm380_vm1, %v11329_v24 }
 0x24d   : > { %v11755_v36 = vadd.f32 %v2502_v25, %v2371_v10 }
 0x24e   : > { %v2607_v48 = vpop.f32.mrf.mxu2  ;;  %v2910_v1 = vpop.f32.mrf.mxu0 }
 0x24f   : > { %v2757_v8 = vpop.f32.mrf.mxu3  ;;  %v2655_v33 = vadd.f32 %v2607_v48, %v11516_v40  ;;  %v3060_v3 = vpop.f32.mrf.mxu1 }
 0x251   : > { %v2805_v21 = vadd.f32 %v2757_v8, %v2655_v33  ;;  %9694 = vmatmul.msk.f32.gmra.mxu0 %vm380_vm1, %v11533_v45 }
 0x252   : > { %9712 = vmatmul.msk.f32.gmra.mxu1 %vm380_vm1, %v11568_v41 }
 0x253   : > { %v2955_v50 = vadd.f32 %v2907_v5, %v2805_v21  ;;  %9658 = vmatmul.msk.f32.gmra.mxu2 %vm380_vm1, %v11539_v53 }
 0x254   : > { %9676 = vmatmul.msk.f32.gmra.mxu3 %vm380_vm1, %v11342_v63 }
 0x255   : > { %v11766_v24 = vadd.f32 %v3057_v11, %v2955_v50 }
 0x256   : > { %v2610_v49 = vpop.f32.mrf.mxu2  ;;  %v2913_v25 = vpop.f32.mrf.mxu0 }
 0x257   : > { %v2760_v40 = vpop.f32.mrf.mxu3  ;;  %v2656_v51 = vadd.f32 %v2610_v49, %v11530_v26  ;;  %v3063_v14 = vpop.f32.mrf.mxu1 }
 0x259   : > { %v2806_v10 = vadd.f32 %v2760_v40, %v2656_v51  ;;  %9695 = vmatmul.msk.f32.gmra.mxu0 %vm380_vm1, %v11547_v59 }
 0x25a   : > { %9713 = vmatmul.msk.f32.gmra.mxu1 %vm380_vm1, %v11583_v2 }
 0x25b   : > { %v2956_v45 = vadd.f32 %v2910_v1, %v2806_v10  ;;  %9659 = vmatmul.msk.f32.gmra.mxu2 %vm380_vm1, %v11553_v19 }
 0x25c   : > { %9677 = vmatmul.msk.f32.gmra.mxu3 %vm380_vm1, %v11356_v46 }
 0x25d   : > { %v11777_v63 = vadd.f32 %v3060_v3, %v2956_v45 }
 0x25e   : > { %v2613_v53 = vpop.f32.mrf.mxu2  ;;  %v2916_v5 = vpop.f32.mrf.mxu0 }
 0x25f   : > { %v2763_v26 = vpop.f32.mrf.mxu3  ;;  %v2657_v11 = vadd.f32 %v2613_v53, %v11544_v23  ;;  %v3066_v48 = vpop.f32.mrf.mxu1 }
 0x261   : > { %v2807_v8 = vadd.f32 %v2763_v26, %v2657_v11  ;;  %9696 = vmatmul.msk.f32.gmra.mxu0 %vm380_vm1, %v11562_v9 }
 0x262   : > { %9714 = vmatmul.msk.f32.gmra.mxu1 %vm380_vm1, %v11598_v20 }
 0x263   : > { %v2957_v59 = vadd.f32 %v2913_v25, %v2807_v8  ;;  %9660 = vmatmul.msk.f32.gmra.mxu2 %vm380_vm1, %v11568_v41 }
 0x264   : > { %9678 = vmatmul.msk.f32.gmra.mxu3 %vm380_vm1, %v11370_v28 }
 0x265   : > { %v11788_v46 = vadd.f32 %v3063_v14, %v2957_v59 }
 0x266   : > { %v2616_v19 = vpop.f32.mrf.mxu2  ;;  %v2919_v1 = vpop.f32.mrf.mxu0 }
 0x267   : > { %v2766_v23 = vpop.f32.mrf.mxu3  ;;  %v2658_v33 = vadd.f32 %v2616_v19, %v11559_v34  ;;  %v3069_v3 = vpop.f32.mrf.mxu1 }
 0x269   : > { %v2808_v21 = vadd.f32 %v2766_v23, %v2658_v33  ;;  %9697 = vmatmul.msk.f32.gmra.mxu0 %vm380_vm1, %v11577_v13 }
 0x26a   : > { %9715 = vmatmul.msk.f32.gmra.mxu1 %vm380_vm1, %v11613_v27 }
 0x26b   : > { %v2958_v9 = vadd.f32 %v2916_v5, %v2808_v21  ;;  %9661 = vmatmul.msk.f32.gmra.mxu2 %vm380_vm1, %v11583_v2 }
 0x26c   : > { %9679 = vmatmul.msk.f32.gmra.mxu3 %vm380_vm1, %v11384_v57 }
 0x26d   : > { %v11799_v28 = vadd.f32 %v3066_v48, %v2958_v9 }
 0x26e   : > { %v2619_v41 = vpop.f32.mrf.mxu2  ;;  %v2922_v49 = vpop.f32.mrf.mxu0 }
 0x26f   : > { %v2769_v34 = vpop.f32.mrf.mxu3  ;;  %v2659_v50 = vadd.f32 %v2619_v41, %v11574_v43  ;;  %v3072_v40 = vpop.f32.mrf.mxu1 }
 0x271   : > { %v2809_v51 = vadd.f32 %v2769_v34, %v2659_v50  ;;  %9698 = vmatmul.msk.f32.gmra.mxu0 %vm380_vm1, %v11592_v30 }
 0x272   : > { %9716 = vmatmul.msk.f32.gmra.mxu1 %vm380_vm1, %v11628_v52 }
 0x273   : > { %v2959_v13 = vadd.f32 %v2919_v1, %v2809_v51  ;;  %9662 = vmatmul.msk.f32.gmra.mxu2 %vm380_vm1, %v11598_v20 }
 0x274   : > { %9680 = vmatmul.msk.f32.gmra.mxu3 %vm380_vm1, %v11398_v31 }
 0x275   : > { %v11810_v57 = vadd.f32 %v3069_v3, %v2959_v13  ;;  %v14298_v13 = vld [vmem:[#allocation6_spill] sm:$0xff] }
 0x276   : > { %v2622_v2 = vpop.f32.mrf.mxu2  ;;  %v2925_v14 = vpop.f32.mrf.mxu0 }
 0x277   : > { %v2772_v43 = vpop.f32.mrf.mxu3  ;;  %v2660_v25 = vadd.f32 %v2622_v2, %v11589_v56  ;;  %v3075_v10 = vpop.f32.mrf.mxu1 }
 0x279   : > { %v2810_v45 = vadd.f32 %v2772_v43, %v2660_v25  ;;  %9699 = vmatmul.msk.f32.gmra.mxu0 %vm380_vm1, %v11607_v4 }
 0x27a   : > { %9717 = vmatmul.msk.f32.gmra.mxu1 %vm380_vm1, %v11643_v60 }
 0x27b   : > { %v2960_v30 = vadd.f32 %v2922_v49, %v2810_v45  ;;  %9663 = vmatmul.msk.f32.gmra.mxu2 %vm380_vm1, %v11613_v27 }
 0x27c   : > { %9681 = vmatmul.msk.f32.gmra.mxu3 %vm380_vm1, %v11415_v42 }
 0x27d   : > { %v11821_v31 = vadd.f32 %v3072_v40, %v2960_v30  ;;  %v9816_v30 = vld [vmem:[%s14234_s3 + $0x14] sm:$0xf] }
 0x27e   : > { %v2625_v20 = vpop.f32.mrf.mxu2  ;;  %v2928_v26 = vpop.f32.mrf.mxu0  ;;  %9817 = vmatpush.msk.msra.mxu3 %vm1136_vm2, %v9816_v30 }
 0x27f   : > { %v2775_v56 = vpop.f32.mrf.mxu3  ;;  %v2661_v53 = vadd.f32 %v2625_v20, %v11604_v39  ;;  %v3078_v11 = vpop.f32.mrf.mxu1 }
 0x281   : > { %v2811_v5 = vadd.f32 %v2775_v56, %v2661_v53  ;;  %9700 = vmatmul.msk.f32.gmra.mxu0 %vm380_vm1, %v11622_v12  ;;  %v14301_v53 = vld [vmem:[#allocation5_spill] sm:$0xff] }
 0x282   : > { %9718 = vmatmul.msk.f32.gmra.mxu1 %vm380_vm1, %v11658_v37 }
 0x283   : > { %v2961_v4 = vadd.f32 %v2925_v14, %v2811_v5  ;;  %9664 = vmatmul.msk.f32.gmra.mxu2 %vm380_vm1, %v11628_v52  ;;  %v3584_v14 = vld [vmem:[#allocation3 + $0xc2] sm:$0xff] }
 0x284   : > { %9682 = vmatmul.msk.f32.gmra.mxu3 %vm380_vm1, %v11428_v61 }
 0x285   : > { %v11832_v42 = vadd.f32 %v3075_v10, %v2961_v4  ;;  %v14299_v10 = vld [vmem:[#allocation10_spill] sm:$0xff] }
 0x286   : > { %v2628_v27 = vpop.f32.mrf.mxu2  ;;  %v2931_v8 = vpop.f32.mrf.mxu0  ;;  %v3585_v4 = vld [vmem:[#allocation3 + $0xca] sm:$0xff] }
 0x287   : > { %v2778_v39 = vpop.f32.mrf.mxu3  ;;  %v2662_v48 = vadd.f32 %v2628_v27, %v11619_v55  ;;  %v3081_v59 = vpop.f32.mrf.mxu1 }
 0x289   : > { %v2812_v19 = vadd.f32 %v2778_v39, %v2662_v48  ;;  %9701 = vmatmul.msk.f32.gmra.mxu0 %vm380_vm1, %v11637_v35  ;;  %v14302_v48 = vld [vmem:[#allocation9_spill] sm:$0xff] }
 0x28a   : > { %9719 = vmatmul.msk.f32.gmra.mxu1 %vm380_vm1, %v11673_v54 }
 0x28b   : > { %v2962_v12 = vadd.f32 %v2928_v26, %v2812_v19  ;;  %9665 = vmatmul.msk.f32.gmra.mxu2 %vm380_vm1, %v11643_v60 }
 0x28c   : > { %9683 = vmatmul.msk.f32.gmra.mxu3 %vm380_vm1, %v11441_v29 }
 0x28d   : > { %v11843_v61 = vadd.f32 %v3078_v11, %v2962_v12 }
 0x28e   : > { %v2631_v52 = vpop.f32.mrf.mxu2  ;;  %v2934_v33 = vpop.f32.mrf.mxu0 }
 0x28f   : > { %v2781_v55 = vpop.f32.mrf.mxu3  ;;  %v2663_v23 = vadd.f32 %v2631_v52, %v11634_v7  ;;  %v3084_v1 = vpop.f32.mrf.mxu1  ;;  %v14303_v52 = vld [vmem:[#allocation12_spill] sm:$0xff] }
 0x291   : > { %v2813_v3 = vadd.f32 %v2781_v55, %v2663_v23  ;;  %9702 = vmatmul.msk.f32.gmra.mxu0 %vm380_vm1, %v11652_v16 }
 0x292   : > { %9720 = vmatmul.msk.f32.gmra.mxu1 %vm380_vm1, %v11696_v17 }
 0x293   : > { %v2963_v35 = vadd.f32 %v2931_v8, %v2813_v3  ;;  %9666 = vmatmul.msk.f32.gmra.mxu2 %vm380_vm1, %v11658_v37  ;;  %v1004_v8 = vld [vmem:[%s10567_s26 + $0x90] sm:$0xff] }
 0x294   : > { %9684 = vmatmul.msk.f32.gmra.mxu3 %vm380_vm1, %v11462_v22  ;;  %1037 = vst.msk [vmem:[#allocation2 + $0xf1] sm:$0xff] %vm380_vm1, %v1004_v8 }
 0x295   : > { %v11854_v29 = vadd.f32 %v3081_v59, %v2963_v35  ;;  %v1005_v35 = vld [vmem:[%s10567_s26 + $0x98] sm:$0xff] }
 0x296   : > { %v2634_v60 = vpop.f32.mrf.mxu2  ;;  %v2937_v9 = vpop.f32.mrf.mxu0  ;;  %1038 = vst.msk [vmem:[#allocation2 + $0xf9] sm:$0xff] %vm380_vm1, %v1005_v35 }
 0x297   : > { %v2784_v7 = vpop.f32.mrf.mxu3  ;;  %v2664_v21 = vadd.f32 %v2634_v60, %v11649_v6  ;;  %v3087_v41 = vpop.f32.mrf.mxu1 }
 0x299   : > { %v2814_v34 = vadd.f32 %v2784_v7, %v2664_v21  ;;  %9703 = vmatmul.msk.f32.gmra.mxu0 %vm380_vm1, %v11667_v18  ;;  %v9834_v7 = vld [vmem:[%s14234_s3 + $0x18] sm:$0xf] }
 0x29a   : > { %9721 = vmatmul.msk.f32.gmra.mxu1 %vm380_vm1, %v11717_v32  ;;  %9835 = vmatpush.msk.msra.mxu0 %vm1136_vm2, %v9834_v7 }
 0x29b   : > { %v2964_v16 = vadd.f32 %v2934_v33, %v2814_v34  ;;  %9667 = vmatmul.msk.f32.gmra.mxu2 %vm380_vm1, %v11673_v54  ;;  %v3436_v33 = vld [vmem:[#allocation3 + $0xd9] sm:$0xff] }
 0x29c   : > { %9685 = vmatmul.msk.f32.gmra.mxu3 %vm380_vm1, %v11479_v0 }
 0x29d   : > { %v11865_v22 = vadd.f32 %v3084_v1, %v2964_v16  ;;  %v3586_v1 = vld [vmem:[#allocation3 + $0xda] sm:$0xff] }
 0x29e   : > { %v2637_v37 = vpop.f32.mrf.mxu2  ;;  %v2940_v49 = vpop.f32.mrf.mxu0 }
 0x29f   : > { %v2787_v6 = vpop.f32.mrf.mxu3  ;;  %v2665_v50 = vadd.f32 %v2637_v37, %v11664_v38  ;;  %v3090_v40 = vpop.f32.mrf.mxu1 }
 0x2a1   : > { %v2815_v51 = vadd.f32 %v2787_v6, %v2665_v50  ;;  %9704 = vmatmul.msk.f32.gmra.mxu0 %vm380_vm1, %v11690_v47  ;;  %v3437_v6 = vld [vmem:[#allocation3 + $0xe1] sm:$0xff] }
 0x2a2   : > { %9722 = vmatmul.msk.f32.gmra.mxu1 %vm380_vm1, %v11738_v15  ;;  %v3587_v50 = vld [vmem:[#allocation3 + $0xe2] sm:$0xff] }
 0x2a3   : > { %v2965_v18 = vadd.f32 %v2937_v9, %v2815_v51  ;;  %9668 = vmatmul.msk.f32.gmra.mxu2 %vm380_vm1, %v11696_v17  ;;  %v9798_v17 = vld [vmem:[%s14234_s3 + $0x10] sm:$0xf] }
 0x2a4   : > { %9686 = vmatmul.msk.f32.gmra.mxu3 %vm380_vm1, %v11493_v44  ;;  %v14300_v44 = vld [vmem:[#allocation7_spill] sm:$0xff]  ;;  %9799 = vmatpush.msk.msra.mxu2 %vm1136_vm2, %v9798_v17  ;;  %v1007_v17 = vld [vmem:[%s10567_s26 + $0xa8] sm:$0xff] }
 0x2a5   : > { %v11876_v0 = vadd.f32 %v3087_v41, %v2965_v18  ;;  %v1006_v18 = vld [vmem:[%s10567_s26 + $0xa0] sm:$0xff]  ;;  %1040 = vst.msk [vmem:[#allocation2 + $0x111] sm:$0xff] %vm380_vm1, %v1007_v17 }
 0x2a6   : > { %v2640_v54 = vpop.f32.mrf.mxu2  ;;  %v2943_v43 = vpop.f32.mrf.mxu0  ;;  %1039 = vst.msk [vmem:[#allocation2 + $0x109] sm:$0xff] %vm380_vm1, %v1006_v18 }
 0x2a7   : > { %v2790_v38 = vpop.f32.mrf.mxu3  ;;  %v2666_v2 = vadd.f32 %v2640_v54, %v14298_v13  ;;  %v3093_v25 = vpop.f32.mrf.mxu1 }
 0x2a9   : > { %v2816_v47 = vadd.f32 %v2790_v38, %v2666_v2  ;;  %9705 = vmatmul.msk.f32.gmra.mxu0 %vm380_vm1, %v14299_v10  ;;  %v4060_v2 = vld [vmem:[#allocation2 + $0xc2] sm:$0xff] }
 0x2aa   : > { %9723 = vmatmul.msk.f32.gmra.mxu1 %vm380_vm1, %v3584_v14  ;;  %v3811_v10 = vld [vmem:[#allocation2 + $0xc1] sm:$0xff] }
 0x2ab   : > { %v2966_v45 = vadd.f32 %v2940_v49, %v2816_v47  ;;  %9669 = vmatmul.msk.f32.gmra.mxu2 %vm380_vm1, %v11717_v32 }
 0x2ac   : > { %9687 = vmatmul.msk.f32.gmra.mxu3 %vm380_vm1, %v14300_v44 }
 0x2ad   : > { %v11894_v20 = vadd.f32 %v3090_v40, %v2966_v45  ;;  %v3287_v40 = vld [vmem:[#allocation3 + $0xe0] sm:$0xff]  ;;  %v3794_v45 = vld [vmem:[#allocation2 + $0xc0] sm:$0xff] }
 0x2ae   : > { %v2643_v56 = vpop.f32.mrf.mxu2  ;;  %v2946_v11 = vpop.f32.mrf.mxu0 }
 0x2af   : > { %v2793_v32 = vpop.f32.mrf.mxu3  ;;  %v2667_v26 = vadd.f32 %v2643_v56, %v14301_v53  ;;  %v3096_v5 = vpop.f32.mrf.mxu1  ;;  %v4061_v53 = vld [vmem:[#allocation2 + $0xca] sm:$0xff] }
 0x2b1   : > { %v2817_v27 = vadd.f32 %v2793_v32, %v2667_v26  ;;  %9706 = vmatmul.msk.f32.gmra.mxu0 %vm380_vm1, %v11732_v58  ;;  %v4211_v26 = vld [vmem:[#allocation2 + $0xe0] sm:$0xff] }
 0x2b2   : > { %9724 = vmatmul.msk.f32.gmra.mxu1 %vm380_vm1, %v3585_v4 }
 0x2b3   : > { %v2967_v39 = vadd.f32 %v2943_v43, %v2817_v27  ;;  %9670 = vmatmul.msk.f32.gmra.mxu2 %vm380_vm1, %v11738_v15  ;;  %v3286_v15 = vld [vmem:[#allocation3 + $0xd8] sm:$0xff]  ;;  %v4210_v43 = vld [vmem:[#allocation2 + $0xd8] sm:$0xff] }
 0x2b4   : > { %9688 = vmatmul.msk.f32.gmra.mxu3 %vm380_vm1, %v14302_v48  ;;  %v3812_v27 = vld [vmem:[#allocation2 + $0xc9] sm:$0xff] }
 0x2b5   : > { %v11906_v59 = vadd.f32 %v3093_v25, %v2967_v39  ;;  %v3795_v39 = vld [vmem:[#allocation2 + $0xc8] sm:$0xff] }
 0x2b6   : > { %v2646_v19 = vpop.f32.mrf.mxu2  ;;  %v2949_v58 = vpop.f32.mrf.mxu0 }
 0x2b7   : > { %v2796_v12 = vpop.f32.mrf.mxu3  ;;  %v2668_v55 = vadd.f32 %v2646_v19, %v14303_v52  ;;  %v3099_v23 = vpop.f32.mrf.mxu1  ;;  %v11949_v19 = vld [vmem:[%s14237_s6] ss:$0 sm:$0xff] }
 0x2b8   : > { %v11958_v52 = vld [vmem:[%s14238_s7] ss:$0 sm:$0xff] }
 0x2b9   : > { %v2818_v3 = vadd.f32 %v2796_v12, %v2668_v55  ;;  %9707 = vmatmul.msk.f32.gmra.mxu0 %vm380_vm1, %v3436_v33  ;;  %v11962_v33 = vld [vmem:[#allocation2 + $0xf0] sm:$0xff] }
 0x2ba   : > { %9725 = vmatmul.msk.f32.gmra.mxu1 %vm380_vm1, %v3586_v1 }
 0x2bb   : > { %v2968_v60 = vadd.f32 %v2946_v11, %v2818_v3  ;;  %9671 = vmatmul.msk.f32.gmra.mxu2 %vm380_vm1, %v3584_v14 }
 0x2bc   : > { %9689 = vmatmul.msk.f32.gmra.mxu3 %vm380_vm1, %v3286_v15 }
 0x2bd   : > { %v11918_v21 = vadd.f32 %v3096_v5, %v2968_v60  ;;  %v11966_v60 = vld [vmem:[#allocation2 + $0xd9] sm:$0xff] }
 0x2be   : > { %v2649_v9 = vpop.f32.mrf.mxu2  ;;  %v2952_v16 = vpop.f32.mrf.mxu0 }
 0x2bf   : > { %v2799_v41 = vpop.f32.mrf.mxu3  ;;  %v2669_v34 = vadd.f32 %v2649_v9, %v11744_v62  ;;  %v3102_v37 = vpop.f32.mrf.mxu1  ;;  %v9852_v62 = vld [vmem:[%s14234_s3 + $0x1c] sm:$0xf] }
 0x2c0   : > { %9853 = vmatpush.msk.msra.mxu1 %vm1136_vm2, %v9852_v62 }
 0x2c1   : > { %v2819_v49 = vadd.f32 %v2799_v41, %v2669_v34  ;;  %9708 = vmatmul.msk.f32.gmra.mxu0 %vm380_vm1, %v3437_v6  ;;  %v1009_v41 = vld [vmem:[%s10567_s26 + $0xb8] sm:$0xff] }
 0x2c2   : > { %9726 = vmatmul.msk.f32.gmra.mxu1 %vm380_vm1, %v3587_v50  ;;  %1042 = vst.msk [vmem:[#allocation2 + $0x129] sm:$0xff] %vm380_vm1, %v1009_v41  ;;  %v11979_v50 = vld [vmem:[#allocation2 + $0xe2] sm:$0xff] }
 0x2c3   : > { %v2969_v51 = vadd.f32 %v2949_v58, %v2819_v49  ;;  %9672 = vmatmul.msk.f32.gmra.mxu2 %vm380_vm1, %v3585_v4  ;;  %v11981_v49 = vld [vmem:[#allocation2 + $0xf8] sm:$0xff] }
 0x2c4   : > { %9690 = vmatmul.msk.f32.gmra.mxu3 %vm380_vm1, %v3287_v40 }
 0x2c5   : > { %v11931_v54 = vadd.f32 %v3099_v23, %v2969_v51  ;;  %v11960_v23 = vld [vmem:[#allocation2 + $0xda] sm:$0xff] }
 0x2c6   : > { %v2652_v38 = vpop.f32.mrf.mxu2  ;;  %v3508_v14 = vpop.f32.mrf.mxu0 }
 0x2c7   : > { %v2802_v13 = vpop.f32.mrf.mxu3  ;;  %v2670_v25 = vadd.f32 %v2652_v38, %v11755_v36  ;;  %v3658_v47 = vpop.f32.mrf.mxu1  ;;  %v11985_v38 = vld [vmem:[#allocation2 + $0xe1] sm:$0xff] }
 0x2c9   : > { %v2820_v44 = vadd.f32 %v2802_v13, %v2670_v25  ;;  %9764 = vmatmul.msk.f32.vlgmr.msrb.gmra.mxu0 %vm380_vm1, %v4060_v2 }
 0x2ca   : > { %9782 = vmatmul.msk.f32.vlgmr.msrb.gmra.mxu1 %vm380_vm1, %v4210_v43 }
 0x2cb   : > { %v2970_v30 = vadd.f32 %v2952_v16, %v2820_v44  ;;  %9729 = vmatmul.msk.f32.vlgmr.msrb.gmra.mxu2 %vm380_vm1, %v3811_v10  ;;  %v12000_v44 = vld [vmem:[#allocation2 + $0x108] sm:$0xff] }
 0x2cc   : > { %9746 = vmatmul.msk.f32.vlgmr.msrb.gmra.mxu3 %vm380_vm1, %v3794_v45  ;;  %v11998_v45 = vld [vmem:[#allocation2 + $0xf2] sm:$0xff] }
 0x2cd   : > { %v11941_v56 = vadd.f32 %v3102_v37, %v2970_v30 }
 0x2ce   : > { %v3207_v36 = vpop.f32.mrf.mxu2  ;;  %v3511_v5 = vpop.f32.mrf.mxu0 }
 0x2cf   : > { %v3358_v32 = vpop.f32.mrf.mxu3  ;;  %v3255_v11 = vadd.f32 %v3207_v36, %v11766_v24  ;;  %v3661_v4 = vpop.f32.mrf.mxu1  ;;  %v1008_v24 = vld [vmem:[%s10567_s26 + $0xb0] sm:$0xff] }
 0x2d0   : > { %1041 = vst.msk [vmem:[#allocation2 + $0x121] sm:$0xff] %vm380_vm1, %v1008_v24  ;;  %v12020_v24 = vld [vmem:[#allocation2 + $0x110] sm:$0xff] }
 0x2d1   : > { %v3406_v48 = vadd.f32 %v3358_v32, %v3255_v11  ;;  %9765 = vmatmul.msk.f32.gmra.mxu0 %vm380_vm1, %v4061_v53  ;;  %v12004_v53 = vld [vmem:[#allocation2 + $0xf1] sm:$0xff] }
 0x2d2   : > { %9783 = vmatmul.msk.f32.gmra.mxu1 %vm380_vm1, %v4211_v26 }
 0x2d3   : > { %v3556_v8 = vadd.f32 %v3508_v14, %v3406_v48  ;;  %9730 = vmatmul.msk.f32.gmra.mxu2 %vm380_vm1, %v3812_v27 }
 0x2d4   : > { %9747 = vmatmul.msk.f32.gmra.mxu3 %vm380_vm1, %v3795_v39 }
 0x2d5   : > { %v3706_v12 = vadd.f32 %v3658_v47, %v3556_v8  ;;  %v12018_v8 = vld [vmem:[#allocation2 + $0xfa] sm:$0xff] }
 0x2d6   : > { %v3210_v55 = vpop.f32.mrf.mxu2  ;;  %v3514_v15 = vpop.f32.mrf.mxu0 }
 0x2d7   : > { %v3361_v58 = vpop.f32.mrf.mxu3  ;;  %v3725_v1 = vmul.f32 %v11949_v19, %v3706_v12  ;;  %v3256_v3 = vadd.f32 %v3210_v55, %v11777_v63  ;;  %v3664_v35 = vpop.f32.mrf.mxu1 }
 0x2d9   : > { %v3744_v7 = vadd.f32 %v11958_v52, %v3725_v1  ;;  %v3407_v9 = vadd.f32 %v3361_v58, %v3256_v3  ;;  %9766 = vmatmul.msk.f32.gmra.mxu0 %vm380_vm1, %v11960_v23  ;;  %v12024_v3 = vld [vmem:[#allocation2 + $0xf9] sm:$0xff] }
 0x2da   : > { %9784 = vmatmul.msk.f32.gmra.mxu1 %vm380_vm1, %v11962_v33 }
 0x2db   : > { %v3760_v34 = vmax.f32 %v3744_v7, 0.0  ;;  %v3557_v16 = vadd.f32 %v3511_v5, %v3407_v9  ;;  %9731 = vmatmul.msk.f32.gmra.mxu2 %vm380_vm1, %v11966_v60  ;;  %v1011_v5 = vld [vmem:[%s10567_s26 + $0xc8] sm:$0xff] }
 0x2dc   : > { %9748 = vmatmul.msk.f32.gmra.mxu3 %vm380_vm1, %v4210_v43  ;;  %1044 = vst.msk [vmem:[#allocation2 + $0x141] sm:$0xff] %vm380_vm1, %v1011_v5 }
 0x2dd   : > { %3777 = vst.msk [vmem:[#allocation4 + $0x19] sm:$0xff] %vm380_vm1, %v3760_v34  ;;  %v3707_v63 = vadd.f32 %v3661_v4, %v3557_v16 }
 0x2de   : > { %v3213_v37 = vpop.f32.mrf.mxu2  ;;  %v3517_v18 = vpop.f32.mrf.mxu0 }
 0x2df   : > { %v3364_v6 = vpop.f32.mrf.mxu3  ;;  %v3726_v40 = vmul.f32 %v11949_v19, %v3707_v63  ;;  %v3257_v51 = vadd.f32 %v3213_v37, %v11788_v46  ;;  %v3667_v62 = vpop.f32.mrf.mxu1  ;;  %v1010_v46 = vld [vmem:[%s10567_s26 + $0xc0] sm:$0xff]  ;;  %v12038_v63 = vld [vmem:[#allocation2 + $0x10a] sm:$0xff] }
 0x2e0   : > { %1043 = vst.msk [vmem:[#allocation2 + $0x139] sm:$0xff] %vm380_vm1, %v1010_v46  ;;  %v12040_v37 = vld [vmem:[#allocation2 + $0x120] sm:$0xff] }
 0x2e1   : > { %v3745_v13 = vadd.f32 %v11958_v52, %v3726_v40  ;;  %v3408_v2 = vadd.f32 %v3364_v6, %v3257_v51  ;;  %9767 = vmatmul.msk.f32.gmra.mxu0 %vm380_vm1, %v11979_v50 }
 0x2e2   : > { %9785 = vmatmul.msk.f32.gmra.mxu1 %vm380_vm1, %v11981_v49 }
 0x2e3   : > { %v3761_v43 = vmax.f32 %v3745_v13, 0.0  ;;  %v3558_v25 = vadd.f32 %v3514_v15, %v3408_v2  ;;  %9732 = vmatmul.msk.f32.gmra.mxu2 %vm380_vm1, %v11985_v38 }
 0x2e4   : > { %9749 = vmatmul.msk.f32.gmra.mxu3 %vm380_vm1, %v4211_v26 }
 0x2e5   : > { %3778 = vst.msk [vmem:[#allocation4 + $0x21] sm:$0xff] %vm380_vm1, %v3761_v43  ;;  %v3708_v14 = vadd.f32 %v3664_v35, %v3558_v25  ;;  %v1013_v43 = vld [vmem:[%s10567_s26 + $0xd8] sm:$0xff] }
 0x2e6   : > { %v3216_v47 = vpop.f32.mrf.mxu2  ;;  %v3520_v36 = vpop.f32.mrf.mxu0  ;;  %1046 = vst.msk [vmem:[#allocation2 + $0x159] sm:$0xff] %vm380_vm1, %v1013_v43 }
 0x2e7   : > { %v3367_v10 = vpop.f32.mrf.mxu3  ;;  %v3727_v17 = vmul.f32 %v11949_v19, %v3708_v14  ;;  %v3258_v30 = vadd.f32 %v3216_v47, %v11799_v28  ;;  %v3670_v32 = vpop.f32.mrf.mxu1 }
 0x2e9   : > { %v3746_v26 = vadd.f32 %v11958_v52, %v3727_v17  ;;  %v3409_v11 = vadd.f32 %v3367_v10, %v3258_v30  ;;  %9768 = vmatmul.msk.f32.gmra.mxu0 %vm380_vm1, %v11998_v45  ;;  %v12058_v10 = vld [vmem:[#allocation2 + $0x112] sm:$0xff]  ;;  %v12060_v17 = vld [vmem:[#allocation2 + $0x128] sm:$0xff] }
 0x2ea   : > { %9786 = vmatmul.msk.f32.gmra.mxu1 %vm380_vm1, %v12000_v44 }
 0x2eb   : > { %v3762_v4 = vmax.f32 %v3746_v26, 0.0  ;;  %v3559_v27 = vadd.f32 %v3517_v18, %v3409_v11  ;;  %9733 = vmatmul.msk.f32.gmra.mxu2 %vm380_vm1, %v12004_v53  ;;  %v12064_v11 = vld [vmem:[#allocation2 + $0x111] sm:$0xff] }
 0x2ec   : > { %9750 = vmatmul.msk.f32.gmra.mxu3 %vm380_vm1, %v11962_v33 }
 0x2ed   : > { %3779 = vst.msk [vmem:[#allocation4 + $0x31] sm:$0xff] %vm380_vm1, %v3762_v4  ;;  %v3709_v28 = vadd.f32 %v3667_v62, %v3559_v27  ;;  %v12044_v62 = vld [vmem:[#allocation2 + $0x109] sm:$0xff] }
 0x2ee   : > { %v3219_v39 = vpop.f32.mrf.mxu2  ;;  %v3523_v58 = vpop.f32.mrf.mxu0 }
 0x2ef   : > { %v3370_v48 = vpop.f32.mrf.mxu3  ;;  %v3728_v12 = vmul.f32 %v11949_v19, %v3709_v28  ;;  %v3259_v55 = vadd.f32 %v3219_v39, %v11810_v57  ;;  %v3673_v1 = vpop.f32.mrf.mxu1  ;;  %v1012_v57 = vld [vmem:[%s10567_s26 + $0xd0] sm:$0xff] }
 0x2f0   : > { %1045 = vst.msk [vmem:[#allocation2 + $0x151] sm:$0xff] %vm380_vm1, %v1012_v57 }
 0x2f1   : > { %v3747_v15 = vadd.f32 %v11958_v52, %v3728_v12  ;;  %v3410_v35 = vadd.f32 %v3370_v48, %v3259_v55  ;;  %9769 = vmatmul.msk.f32.gmra.mxu0 %vm380_vm1, %v12018_v8  ;;  %v12078_v55 = vld [vmem:[#allocation2 + $0x122] sm:$0xff] }
 0x2f2   : > { %9787 = vmatmul.msk.f32.gmra.mxu1 %vm380_vm1, %v12020_v24 }
 0x2f3   : > { %v3763_v7 = vmax.f32 %v3747_v15, 0.0  ;;  %v3560_v9 = vadd.f32 %v3520_v36, %v3410_v35  ;;  %9734 = vmatmul.msk.f32.gmra.mxu2 %vm380_vm1, %v12024_v3 }
 0x2f4   : > { %9751 = vmatmul.msk.f32.gmra.mxu3 %vm380_vm1, %v11981_v49 }
 0x2f5   : > { %3780 = vst.msk [vmem:[#allocation4 + $0x39] sm:$0xff] %vm380_vm1, %v3763_v7  ;;  %v3710_v41 = vadd.f32 %v3670_v32, %v3560_v9  ;;  %v12084_v9 = vld [vmem:[#allocation2 + $0x121] sm:$0xff] }
 0x2f6   : > { %v3222_v34 = vpop.f32.mrf.mxu2  ;;  %v3526_v51 = vpop.f32.mrf.mxu0 }
 0x2f7   : > { %v3373_v16 = vpop.f32.mrf.mxu3  ;;  %v3729_v6 = vmul.f32 %v11949_v19, %v3710_v41  ;;  %v3260_v40 = vadd.f32 %v3222_v34, %v11821_v31  ;;  %v3676_v18 = vpop.f32.mrf.mxu1  ;;  %v1015_v34 = vld [vmem:[%s10567_s26 + $0xe8] sm:$0xff] }
 0x2f8   : > { %1048 = vst.msk [vmem:[#allocation2 + $0x171] sm:$0xff] %vm380_vm1, %v1015_v34 }
 0x2f9   : > { %v3748_v13 = vadd.f32 %v11958_v52, %v3729_v6  ;;  %v3411_v2 = vadd.f32 %v3373_v16, %v3260_v40  ;;  %9770 = vmatmul.msk.f32.gmra.mxu0 %vm380_vm1, %v12038_v63 }
 0x2fa   : > { %9788 = vmatmul.msk.f32.gmra.mxu1 %vm380_vm1, %v12040_v37 }
 0x2fb   : > { %v3764_v25 = vmax.f32 %v3748_v13, 0.0  ;;  %v3561_v46 = vadd.f32 %v3523_v58, %v3411_v2  ;;  %9735 = vmatmul.msk.f32.gmra.mxu2 %vm380_vm1, %v12044_v62  ;;  %v12080_v58 = vld [vmem:[#allocation2 + $0x138] sm:$0xff]  ;;  %v12100_v13 = vld [vmem:[#allocation2 + $0x140] sm:$0xff] }
 0x2fc   : > { %9752 = vmatmul.msk.f32.gmra.mxu3 %vm380_vm1, %v12000_v44 }
 0x2fd   : > { %3781 = vst.msk [vmem:[#allocation4 + $0x49] sm:$0xff] %vm380_vm1, %v3764_v25  ;;  %v3711_v31 = vadd.f32 %v3673_v1, %v3561_v46 }
 0x2fe   : > { %v3225_v14 = vpop.f32.mrf.mxu2  ;;  %v3529_v32 = vpop.f32.mrf.mxu0 }
 0x2ff   : > { %v3376_v47 = vpop.f32.mrf.mxu3  ;;  %v3730_v30 = vmul.f32 %v11949_v19, %v3711_v31  ;;  %v3261_v36 = vadd.f32 %v3225_v14, %v11832_v42  ;;  %v3679_v26 = vpop.f32.mrf.mxu1  ;;  %v1014_v42 = vld [vmem:[%s10567_s26 + $0xe0] sm:$0xff]  ;;  %v12104_v31 = vld [vmem:[#allocation2 + $0x129] sm:$0xff] }
 0x300   : > { %1047 = vst.msk [vmem:[#allocation2 + $0x169] sm:$0xff] %vm380_vm1, %v1014_v42 }
 0x301   : > { %v3749_v5 = vadd.f32 %v11958_v52, %v3730_v30  ;;  %v3412_v4 = vadd.f32 %v3376_v47, %v3261_v36  ;;  %9771 = vmatmul.msk.f32.gmra.mxu0 %vm380_vm1, %v12058_v10 }
 0x302   : > { %9789 = vmatmul.msk.f32.gmra.mxu1 %vm380_vm1, %v12060_v17 }
 0x303   : > { %v3765_v27 = vmax.f32 %v3749_v5, 0.0  ;;  %v3562_v28 = vadd.f32 %v3526_v51, %v3412_v4  ;;  %9736 = vmatmul.msk.f32.gmra.mxu2 %vm380_vm1, %v12064_v11  ;;  %v12118_v4 = vld [vmem:[#allocation2 + $0x13a] sm:$0xff] }
 0x304   : > { %9753 = vmatmul.msk.f32.gmra.mxu3 %vm380_vm1, %v12020_v24 }
 0x305   : > { %3782 = vst.msk [vmem:[#allocation4 + $0x51] sm:$0xff] %vm380_vm1, %v3765_v27  ;;  %v3712_v39 = vadd.f32 %v3676_v18, %v3562_v28  ;;  %v12098_v18 = vld [vmem:[#allocation2 + $0x12a] sm:$0xff] }
 0x306   : > { %v3228_v48 = vpop.f32.mrf.mxu2  ;;  %v3532_v35 = vpop.f32.mrf.mxu0  ;;  %v12120_v27 = vld [vmem:[#allocation2 + $0x150] sm:$0xff] }
 0x307   : > { %v3379_v12 = vpop.f32.mrf.mxu3  ;;  %v3731_v1 = vmul.f32 %v11949_v19, %v3712_v39  ;;  %v3262_v15 = vadd.f32 %v3228_v48, %v11843_v61  ;;  %v3682_v7 = vpop.f32.mrf.mxu1 }
 0x309   : > { %v3750_v57 = vadd.f32 %v11958_v52, %v3731_v1  ;;  %v3413_v41 = vadd.f32 %v3379_v12, %v3262_v15  ;;  %9772 = vmatmul.msk.f32.gmra.mxu0 %vm380_vm1, %v12078_v55  ;;  %v12124_v12 = vld [vmem:[#allocation2 + $0x139] sm:$0xff] }
 0x30a   : > { %9790 = vmatmul.msk.f32.gmra.mxu1 %vm380_vm1, %v12080_v58 }
 0x30b   : > { %v3766_v16 = vmax.f32 %v3750_v57, 0.0  ;;  %v3563_v6 = vadd.f32 %v3529_v32, %v3413_v41  ;;  %9737 = vmatmul.msk.f32.gmra.mxu2 %vm380_vm1, %v12084_v9 }
 0x30c   : > { %9754 = vmatmul.msk.f32.gmra.mxu3 %vm380_vm1, %v12040_v37 }
 0x30d   : > { %3783 = vst.msk [vmem:[#allocation4 + $0x61] sm:$0xff] %vm380_vm1, %v3766_v16  ;;  %v3713_v61 = vadd.f32 %v3679_v26, %v3563_v6  ;;  %v12138_v16 = vld [vmem:[#allocation2 + $0x142] sm:$0xff]  ;;  %v12140_v6 = vld [vmem:[#allocation2 + $0x158] sm:$0xff] }
 0x30e   : > { %v3231_v40 = vpop.f32.mrf.mxu2  ;;  %v3535_v25 = vpop.f32.mrf.mxu0 }
 0x30f   : > { %v3382_v51 = vpop.f32.mrf.mxu3  ;;  %v3732_v2 = vmul.f32 %v11949_v19, %v3713_v61  ;;  %v3263_v43 = vadd.f32 %v3231_v40, %v11854_v29  ;;  %v3685_v46 = vpop.f32.mrf.mxu1  ;;  %v1016_v29 = vld [vmem:[%s10567_s26 + $0xf0] sm:$0xff] }
 0x310   : > { %1049 = vst.msk [vmem:[#allocation2 + $0x181] sm:$0xff] %vm380_vm1, %v1016_v29  ;;  %v12156_v29 = vld [vmem:[#allocation2 + $0x152] sm:$0xff] }
 0x311   : > { %v3751_v14 = vadd.f32 %v11958_v52, %v3732_v2  ;;  %v3414_v47 = vadd.f32 %v3382_v51, %v3263_v43  ;;  %9773 = vmatmul.msk.f32.gmra.mxu0 %vm380_vm1, %v12098_v18  ;;  %v12144_v43 = vld [vmem:[#allocation2 + $0x141] sm:$0xff] }
 0x312   : > { %9791 = vmatmul.msk.f32.gmra.mxu1 %vm380_vm1, %v12100_v13 }
 0x313   : > { %v3767_v30 = vmax.f32 %v3751_v14, 0.0  ;;  %v3564_v36 = vadd.f32 %v3532_v35, %v3414_v47  ;;  %9738 = vmatmul.msk.f32.gmra.mxu2 %vm380_vm1, %v12104_v31  ;;  %v1017_v35 = vld [vmem:[%s10567_s26 + $0xf8] sm:$0xff] }
 0x314   : > { %9755 = vmatmul.msk.f32.gmra.mxu3 %vm380_vm1, %v12060_v17  ;;  %1050 = vst.msk [vmem:[#allocation2 + $0x189] sm:$0xff] %vm380_vm1, %v1017_v35 }
 0x315   : > { %3784 = vst.msk [vmem:[#allocation4 + $0x69] sm:$0xff] %vm380_vm1, %v3767_v30  ;;  %v3714_v32 = vadd.f32 %v3682_v7, %v3564_v36 }
 0x316   : > { %v3234_v26 = vpop.f32.mrf.mxu2  ;;  %v3538_v39 = vpop.f32.mrf.mxu0 }
 0x317   : > { %v3385_v5 = vpop.f32.mrf.mxu3  ;;  %v3733_v28 = vmul.f32 %v11949_v19, %v3714_v32  ;;  %v3264_v42 = vadd.f32 %v3234_v26, %v11865_v22  ;;  %v3688_v48 = vpop.f32.mrf.mxu1  ;;  %v12158_v32 = vld [vmem:[#allocation2 + $0x168] sm:$0xff] }
 0x319   : > { %v3752_v1 = vadd.f32 %v11958_v52, %v3733_v28  ;;  %v3415_v15 = vadd.f32 %v3385_v5, %v3264_v42  ;;  %9774 = vmatmul.msk.f32.gmra.mxu0 %vm380_vm1, %v12118_v4 }
 0x31a   : > { %9792 = vmatmul.msk.f32.gmra.mxu1 %vm380_vm1, %v12120_v27 }
 0x31b   : > { %v3768_v7 = vmax.f32 %v3752_v1, 0.0  ;;  %v3565_v57 = vadd.f32 %v3535_v25, %v3415_v15  ;;  %9739 = vmatmul.msk.f32.gmra.mxu2 %vm380_vm1, %v12124_v12 }
 0x31c   : > { %9756 = vmatmul.msk.f32.gmra.mxu3 %vm380_vm1, %v12080_v58 }
 0x31d   : > { %3785 = vst.msk [vmem:[#allocation4 + $0x79] sm:$0xff] %vm380_vm1, %v3768_v7  ;;  %v3715_v22 = vadd.f32 %v3685_v46, %v3565_v57 }
 0x31e   : > { %v3237_v41 = vpop.f32.mrf.mxu2  ;;  %v3541_v51 = vpop.f32.mrf.mxu0 }
 0x31f   : > { %v3388_v34 = vpop.f32.mrf.mxu3  ;;  %v3734_v61 = vmul.f32 %v11949_v19, %v3715_v22  ;;  %v3265_v40 = vadd.f32 %v3237_v41, %v11876_v0  ;;  %v3691_v2 = vpop.f32.mrf.mxu1  ;;  %v12174_v22 = vld [vmem:[#allocation2 + $0x15a] sm:$0xff]  ;;  %v12176_v41 = vld [vmem:[#allocation2 + $0x170] sm:$0xff] }
 0x321   : > { %v3753_v25 = vadd.f32 %v11958_v52, %v3734_v61  ;;  %v3416_v14 = vadd.f32 %v3388_v34, %v3265_v40  ;;  %9775 = vmatmul.msk.f32.gmra.mxu0 %vm380_vm1, %v12138_v16 }
 0x322   : > { %9793 = vmatmul.msk.f32.gmra.mxu1 %vm380_vm1, %v12140_v6 }
 0x323   : > { %v3769_v46 = vmax.f32 %v3753_v25, 0.0  ;;  %v3566_v47 = vadd.f32 %v3538_v39, %v3416_v14  ;;  %9740 = vmatmul.msk.f32.gmra.mxu2 %vm380_vm1, %v12144_v43  ;;  %v12162_v39 = vld [vmem:[#allocation2 + $0x151] sm:$0xff]  ;;  %v12180_v25 = vld [vmem:[#allocation2 + $0x159] sm:$0xff] }
 0x324   : > { %9757 = vmatmul.msk.f32.gmra.mxu3 %vm380_vm1, %v12100_v13 }
 0x325   : > { %3786 = vst.msk [vmem:[#allocation4 + $0x81] sm:$0xff] %vm380_vm1, %v3769_v46  ;;  %v3716_v0 = vadd.f32 %v3688_v48, %v3566_v47 }
 0x326   : > { %v3240_v30 = vpop.f32.mrf.mxu2  ;;  %v3544_v28 = vpop.f32.mrf.mxu0 }
 0x327   : > { %v3391_v36 = vpop.f32.mrf.mxu3  ;;  %v3735_v26 = vmul.f32 %v11949_v19, %v3716_v0  ;;  %v3266_v5 = vadd.f32 %v3240_v30, %v11894_v20  ;;  %v3694_v42 = vpop.f32.mrf.mxu1  ;;  %v9870_v0 = vld [vmem:[%s14234_s3 + $0x20] sm:$0xf] }
 0x328   : > { %v5122_v30 = vld [vmem:[%s14235_s4] sm:$0xf]  ;;  %9871 = vmatpush.msk.msrb.mxu2 %vm1136_vm2, %v9870_v0 }
 0x329   : > { %v3754_v1 = vadd.f32 %v11958_v52, %v3735_v26  ;;  %v3417_v15 = vadd.f32 %v3391_v36, %v3266_v5  ;;  %9776 = vmatmul.msk.f32.gmra.mxu0 %vm380_vm1, %v12156_v29  ;;  %v12198_v5 = vld [vmem:[#allocation2 + $0x16a] sm:$0xff]  ;;  %9888 = vmatpush.msk.msrb.mxu3 %vm1136_vm2, %v5122_v30 }
 0x32a   : > { %9794 = vmatmul.msk.f32.gmra.mxu1 %vm380_vm1, %v12158_v32 }
 0x32b   : > { %v3770_v48 = vmax.f32 %v3754_v1, 0.0  ;;  %v3567_v35 = vadd.f32 %v3541_v51, %v3417_v15  ;;  %9741 = vmatmul.msk.f32.gmra.mxu2 %vm380_vm1, %v12162_v39 }
 0x32c   : > { %9758 = vmatmul.msk.f32.gmra.mxu3 %vm380_vm1, %v12120_v27 }
 0x32d   : > { %3787 = vst.msk [vmem:[#allocation4 + $0x91] sm:$0xff] %vm380_vm1, %v3770_v48  ;;  %v3717_v20 = vadd.f32 %v3691_v2, %v3567_v35 }
 0x32e   : > { %v3243_v7 = vpop.f32.mrf.mxu2  ;;  %v3547_v40 = vpop.f32.mrf.mxu0 }
 0x32f   : > { %v3394_v57 = vpop.f32.mrf.mxu3  ;;  %v3736_v34 = vmul.f32 %v11949_v19, %v3717_v20  ;;  %v3267_v61 = vadd.f32 %v3243_v7, %v11906_v59  ;;  %v3697_v51 = vpop.f32.mrf.mxu1  ;;  %v12210_v20 = vld [vmem:[#allocation2 + $0x169] sm:$0xff] }
 0x331   : > { %v3755_v14 = vadd.f32 %v11958_v52, %v3736_v34  ;;  %v3418_v46 = vadd.f32 %v3394_v57, %v3267_v61  ;;  %9777 = vmatmul.msk.f32.gmra.mxu0 %vm380_vm1, %v12174_v22  ;;  %v9923_v34 = vld [vmem:[%s14235_s4 + $0x8] sm:$0xf] }
 0x332   : > { %9795 = vmatmul.msk.f32.gmra.mxu1 %vm380_vm1, %v12176_v41 }
 0x333   : > { %v3771_v2 = vmax.f32 %v3755_v14, 0.0  ;;  %v3568_v47 = vadd.f32 %v3544_v28, %v3418_v46  ;;  %9742 = vmatmul.msk.f32.gmra.mxu2 %vm380_vm1, %v12180_v25  ;;  %v12200_v28 = vld [vmem:[#allocation2 + $0x180] sm:$0xff]  ;;  %9924 = vmatpush.msk.msrb.mxu1 %vm1136_vm2, %v9923_v34 }
 0x334   : > { %9759 = vmatmul.msk.f32.gmra.mxu3 %vm380_vm1, %v12140_v6 }
 0x335   : > { %3788 = vst.msk [vmem:[#allocation4 + $0x99] sm:$0xff] %vm380_vm1, %v3771_v2  ;;  %v3718_v59 = vadd.f32 %v3694_v42, %v3568_v47  ;;  %v9905_v42 = vld [vmem:[%s14235_s4 + $0x4] sm:$0xf]  ;;  %v12226_v47 = vld [vmem:[#allocation2 + $0x172] sm:$0xff] }
 0x336   : > { %v3246_v36 = vpop.f32.mrf.mxu2  ;;  %v3550_v48 = vpop.f32.mrf.mxu0  ;;  %9906 = vmatpush.msk.msrb.mxu0 %vm1136_vm2, %v9905_v42 }
 0x337   : > { %v3397_v26 = vpop.f32.mrf.mxu3  ;;  %v3737_v1 = vmul.f32 %v11949_v19, %v3718_v59  ;;  %v3268_v15 = vadd.f32 %v3246_v36, %v11918_v21  ;;  %v3700_v35 = vpop.f32.mrf.mxu1  ;;  %v12228_v59 = vld [vmem:[#allocation2 + $0x188] sm:$0xff] }
 0x339   : > { %v3756_v7 = vadd.f32 %v11958_v52, %v3737_v1  ;;  %v3419_v57 = vadd.f32 %v3397_v26, %v3268_v15  ;;  %9778 = vmatmul.msk.f32.gmra.mxu0 %vm380_vm1, %v12198_v5  ;;  %v12232_v26 = vld [vmem:[#allocation2 + $0x171] sm:$0xff] }
 0x33a   : > { %9796 = vmatmul.msk.f32.gmra.mxu1 %vm380_vm1, %v12200_v28 }
 0x33b   : > { %v3772_v21 = vmax.f32 %v3756_v7, 0.0  ;;  %v3569_v61 = vadd.f32 %v3547_v40, %v3419_v57  ;;  %9743 = vmatmul.msk.f32.gmra.mxu2 %vm380_vm1, %v12210_v20 }
 0x33c   : > { %9760 = vmatmul.msk.f32.gmra.mxu3 %vm380_vm1, %v12158_v32 }
 0x33d   : > { %3789 = vst.msk [vmem:[#allocation4 + $0xa9] sm:$0xff] %vm380_vm1, %v3772_v21  ;;  %v3719_v14 = vadd.f32 %v3697_v51, %v3569_v61 }
 0x33e   : > { %v3249_v46 = vpop.f32.mrf.mxu2  ;;  %v3553_v40 = vpop.f32.mrf.mxu0 }
 0x33f   : > { %v3400_v2 = vpop.f32.mrf.mxu3  ;;  %v3738_v0 = vmul.f32 %v11949_v19, %v3719_v14  ;;  %v3269_v30 = vadd.f32 %v3249_v46, %v11931_v54  ;;  %v3703_v36 = vpop.f32.mrf.mxu1 }
 0x341   : > { %v3757_v42 = vadd.f32 %v11958_v52, %v3738_v0  ;;  %v3420_v1 = vadd.f32 %v3400_v2, %v3269_v30  ;;  %9779 = vmatmul.msk.f32.gmra.mxu0 %vm380_vm1, %v12226_v47 }
 0x342   : > { %9797 = vmatmul.msk.f32.gmra.mxu1 %vm380_vm1, %v12228_v59 }
 0x343   : > { %v3773_v51 = vmax.f32 %v3757_v42, 0.0  ;;  %v3570_v15 = vadd.f32 %v3550_v48, %v3420_v1  ;;  %9744 = vmatmul.msk.f32.gmra.mxu2 %vm380_vm1, %v12232_v26 }
 0x344   : > { %9761 = vmatmul.msk.f32.gmra.mxu3 %vm380_vm1, %v12176_v41 }
 0x345   : > { %3790 = vst.msk [vmem:[#allocation4 + $0xb1] sm:$0xff] %vm380_vm1, %v3773_v51  ;;  %v3720_v54 = vadd.f32 %v3700_v35, %v3570_v15 }
 0x346   : > { %v3252_v7 = vpop.f32.mrf.mxu2  ;;  %v4145_v61 = vpop.f32.mrf.mxu0 }
 0x347   : > { %v3403_v57 = vpop.f32.mrf.mxu3  ;;  %v3739_v34 = vmul.f32 %v11949_v19, %v3720_v54  ;;  %v3270_v21 = vadd.f32 %v3252_v7, %v11941_v56  ;;  %v4295_v14 = vpop.f32.mrf.mxu1 }
 0x349   : > { %v3758_v46 = vadd.f32 %v11958_v52, %v3739_v34  ;;  %v3421_v48 = vadd.f32 %v3403_v57, %v3270_v21  ;;  %9836 = vmatmul.msk.f32.vlgmr.msra.gmra.mxu0 %vm380_vm1, %v11962_v33 }
 0x34a   : > { %9854 = vmatmul.msk.f32.vlgmr.msra.gmra.mxu1 %vm380_vm1, %v12004_v53 }
 0x34b   : > { %v3774_v2 = vmax.f32 %v3758_v46, 0.0  ;;  %v3571_v0 = vadd.f32 %v3553_v40, %v3421_v48  ;;  %9800 = vmatmul.msk.f32.vlgmr.msra.gmra.mxu2 %vm380_vm1, %v11966_v60 }
 0x34c   : > { %9818 = vmatmul.msk.f32.vlgmr.msra.gmra.mxu3 %vm380_vm1, %v11960_v23 }
 0x34d   : > { %3791 = vst.msk [vmem:[#allocation4 + $0xc1] sm:$0xff] %vm380_vm1, %v3774_v2  ;;  %v3721_v56 = vadd.f32 %v3703_v36, %v3571_v0 }
 0x34e   : > { %v3896_v35 = vpop.f32.mrf.mxu2  ;;  %v4148_v33 = vpop.f32.mrf.mxu0 }
 0x34f   : > { %v4012_v30 = vpop.f32.mrf.mxu3  ;;  %v3740_v42 = vmul.f32 %v11949_v19, %v3721_v56  ;;  %v4298_v51 = vpop.f32.mrf.mxu1 }
 0x350   : > { %v4013_v1 = vadd.f32 %v4012_v30, %v3896_v35 }
 0x351   : > { %v3759_v15 = vadd.f32 %v11958_v52, %v3740_v42  ;;  %9837 = vmatmul.msk.f32.gmra.mxu0 %vm380_vm1, %v11981_v49 }
 0x352   : > { %v4193_v54 = vadd.f32 %v4145_v61, %v4013_v1  ;;  %9855 = vmatmul.msk.f32.gmra.mxu1 %vm380_vm1, %v12024_v3 }
 0x353   : > { %v3775_v23 = vmax.f32 %v3759_v15, 0.0  ;;  %9801 = vmatmul.msk.f32.gmra.mxu2 %vm380_vm1, %v11985_v38 }
 0x354   : > { %9819 = vmatmul.msk.f32.gmra.mxu3 %vm380_vm1, %v11979_v50  ;;  %v12266_v19 = vadd.f32 %v4295_v14, %v4193_v54 }
 0x355   : > { %3792 = vst.msk [vmem:[#allocation4 + $0xc9] sm:$0xff] %vm380_vm1, %v3775_v23 }
 0x356   : > { %v3899_v60 = vpop.f32.mrf.mxu2  ;;  %v4151_v36 = vpop.f32.mrf.mxu0 }
 0x357   : > { %v4015_v52 = vpop.f32.mrf.mxu3  ;;  %v4301_v7 = vpop.f32.mrf.mxu1 }
 0x358   : > { %v4016_v40 = vadd.f32 %v4015_v52, %v3899_v60 }
 0x359   : > { %9838 = vmatmul.msk.f32.gmra.mxu0 %vm380_vm1, %v12000_v44 }
 0x35a   : > { %v4194_v49 = vadd.f32 %v4148_v33, %v4016_v40  ;;  %9856 = vmatmul.msk.f32.gmra.mxu1 %vm380_vm1, %v12044_v62 }
 0x35b   : > { %9802 = vmatmul.msk.f32.gmra.mxu2 %vm380_vm1, %v12004_v53 }
 0x35c   : > { %9820 = vmatmul.msk.f32.gmra.mxu3 %vm380_vm1, %v11998_v45  ;;  %v12277_v50 = vadd.f32 %v4298_v51, %v4194_v49 }
 0x35e   : > { %v3902_v38 = vpop.f32.mrf.mxu2  ;;  %v4154_v21 = vpop.f32.mrf.mxu0 }
 0x35f   : > { %v4018_v57 = vpop.f32.mrf.mxu3  ;;  %v4304_v61 = vpop.f32.mrf.mxu1 }
 0x360   : > { %v4019_v34 = vadd.f32 %v4018_v57, %v3902_v38 }
 0x361   : > { %9839 = vmatmul.msk.f32.gmra.mxu0 %vm380_vm1, %v12020_v24 }
 0x362   : > { %v4195_v14 = vadd.f32 %v4151_v36, %v4019_v34  ;;  %9857 = vmatmul.msk.f32.gmra.mxu1 %vm380_vm1, %v12064_v11 }
 0x363   : > { %9803 = vmatmul.msk.f32.gmra.mxu2 %vm380_vm1, %v12024_v3 }
 0x364   : > { %9821 = vmatmul.msk.f32.gmra.mxu3 %vm380_vm1, %v12018_v8  ;;  %v12287_v44 = vadd.f32 %v4301_v7, %v4195_v14 }
 0x366   : > { %v3905_v53 = vpop.f32.mrf.mxu2  ;;  %v4157_v2 = vpop.f32.mrf.mxu0 }
 0x367   : > { %v4021_v46 = vpop.f32.mrf.mxu3  ;;  %v4307_v0 = vpop.f32.mrf.mxu1 }
 0x368   : > { %v4022_v48 = vadd.f32 %v4021_v46, %v3905_v53 }
 0x369   : > { %9840 = vmatmul.msk.f32.gmra.mxu0 %vm380_vm1, %v12040_v37 }
 0x36a   : > { %v4196_v56 = vadd.f32 %v4154_v21, %v4022_v48  ;;  %9858 = vmatmul.msk.f32.gmra.mxu1 %vm380_vm1, %v12084_v9 }
 0x36b   : > { %9804 = vmatmul.msk.f32.gmra.mxu2 %vm380_vm1, %v12044_v62 }
 0x36c   : > { %9822 = vmatmul.msk.f32.gmra.mxu3 %vm380_vm1, %v12038_v63  ;;  %v12297_v24 = vadd.f32 %v4304_v61, %v4196_v56 }
 0x36e   : > { %v3908_v3 = vpop.f32.mrf.mxu2  ;;  %v4160_v42 = vpop.f32.mrf.mxu0 }
 0x36f   : > { %v4024_v35 = vpop.f32.mrf.mxu3  ;;  %v4310_v1 = vpop.f32.mrf.mxu1 }
 0x370   : > { %v4025_v30 = vadd.f32 %v4024_v35, %v3908_v3 }
 0x371   : > { %9841 = vmatmul.msk.f32.gmra.mxu0 %vm380_vm1, %v12060_v17 }
 0x372   : > { %v4197_v33 = vadd.f32 %v4157_v2, %v4025_v30  ;;  %9859 = vmatmul.msk.f32.gmra.mxu1 %vm380_vm1, %v12104_v31 }
 0x373   : > { %9805 = vmatmul.msk.f32.gmra.mxu2 %vm380_vm1, %v12064_v11 }
 0x374   : > { %9823 = vmatmul.msk.f32.gmra.mxu3 %vm380_vm1, %v12058_v10  ;;  %v12307_v37 = vadd.f32 %v4307_v0, %v4197_v33 }
 0x376   : > { %v3911_v62 = vpop.f32.mrf.mxu2  ;;  %v4163_v54 = vpop.f32.mrf.mxu0 }
 0x377   : > { %v4027_v51 = vpop.f32.mrf.mxu3  ;;  %v4313_v23 = vpop.f32.mrf.mxu1 }
 0x378   : > { %v4028_v15 = vadd.f32 %v4027_v51, %v3911_v62 }
 0x379   : > { %9842 = vmatmul.msk.f32.gmra.mxu0 %vm380_vm1, %v12080_v58 }
 0x37a   : > { %v4198_v60 = vadd.f32 %v4160_v42, %v4028_v15  ;;  %9860 = vmatmul.msk.f32.gmra.mxu1 %vm380_vm1, %v12124_v12 }
 0x37b   : > { %9806 = vmatmul.msk.f32.gmra.mxu2 %vm380_vm1, %v12084_v9 }
 0x37c   : > { %9824 = vmatmul.msk.f32.gmra.mxu3 %vm380_vm1, %v12078_v55  ;;  %v12317_v17 = vadd.f32 %v4310_v1, %v4198_v60 }
 0x37e   : > { %v3914_v11 = vpop.f32.mrf.mxu2  ;;  %v4166_v36 = vpop.f32.mrf.mxu0 }
 0x37f   : > { %v4030_v52 = vpop.f32.mrf.mxu3  ;;  %v4316_v7 = vpop.f32.mrf.mxu1 }
 0x380   : > { %v4031_v40 = vadd.f32 %v4030_v52, %v3914_v11 }
 0x381   : > { %9843 = vmatmul.msk.f32.gmra.mxu0 %vm380_vm1, %v12100_v13 }
 0x382   : > { %v4199_v49 = vadd.f32 %v4163_v54, %v4031_v40  ;;  %9861 = vmatmul.msk.f32.gmra.mxu1 %vm380_vm1, %v12144_v43  ;;  %v4819_v54 = vld [vmem:[#allocation2 + $0x181] sm:$0xff] }
 0x383   : > { %9807 = vmatmul.msk.f32.gmra.mxu2 %vm380_vm1, %v12104_v31 }
 0x384   : > { %9825 = vmatmul.msk.f32.gmra.mxu3 %vm380_vm1, %v12098_v18  ;;  %v12327_v58 = vadd.f32 %v4313_v23, %v4199_v49 }
 0x386   : > { %v3917_v9 = vpop.f32.mrf.mxu2  ;;  %v4169_v34 = vpop.f32.mrf.mxu0 }
 0x387   : > { %v4033_v38 = vpop.f32.mrf.mxu3  ;;  %v4319_v21 = vpop.f32.mrf.mxu1 }
 0x388   : > { %v4034_v57 = vadd.f32 %v4033_v38, %v3917_v9 }
 0x389   : > { %9844 = vmatmul.msk.f32.gmra.mxu0 %vm380_vm1, %v12120_v27 }
 0x38a   : > { %v4200_v61 = vadd.f32 %v4166_v36, %v4034_v57  ;;  %9862 = vmatmul.msk.f32.gmra.mxu1 %vm380_vm1, %v12162_v39  ;;  %v9977_v57 = vld [vmem:[%s14235_s4 + $0x14] sm:$0xf] }
 0x38b   : > { %9808 = vmatmul.msk.f32.gmra.mxu2 %vm380_vm1, %v12124_v12  ;;  %9978 = vmatpush.msk.msra.mxu0 %vm1136_vm2, %v9977_v57 }
 0x38c   : > { %9826 = vmatmul.msk.f32.gmra.mxu3 %vm380_vm1, %v12118_v4  ;;  %v12337_v13 = vadd.f32 %v4316_v7, %v4200_v61 }
 0x38e   : > { %v3920_v31 = vpop.f32.mrf.mxu2  ;;  %v4172_v46 = vpop.f32.mrf.mxu0 }
 0x38f   : > { %v4036_v14 = vpop.f32.mrf.mxu3  ;;  %v4322_v48 = vpop.f32.mrf.mxu1 }
 0x390   : > { %v4037_v53 = vadd.f32 %v4036_v14, %v3920_v31  ;;  %v4672_v31 = vld [vmem:[#allocation2 + $0x198] sm:$0xff] }
 0x391   : > { %9845 = vmatmul.msk.f32.gmra.mxu0 %vm380_vm1, %v12140_v6 }
 0x392   : > { %v4201_v2 = vadd.f32 %v4169_v34, %v4037_v53  ;;  %9863 = vmatmul.msk.f32.gmra.mxu1 %vm380_vm1, %v12180_v25 }
 0x393   : > { %9809 = vmatmul.msk.f32.gmra.mxu2 %vm380_vm1, %v12144_v43 }
 0x394   : > { %9827 = vmatmul.msk.f32.gmra.mxu3 %vm380_vm1, %v12138_v16  ;;  %v12347_v27 = vadd.f32 %v4319_v21, %v4201_v2  ;;  %v9995_v2 = vld [vmem:[%s14235_s4 + $0x18] sm:$0xf] }
 0x395   : > { %9996 = vmatpush.msk.msra.mxu1 %vm1136_vm2, %v9995_v2 }
 0x396   : > { %v3923_v12 = vpop.f32.mrf.mxu2  ;;  %v4175_v3 = vpop.f32.mrf.mxu0 }
 0x397   : > { %v4039_v0 = vpop.f32.mrf.mxu3  ;;  %v4325_v35 = vpop.f32.mrf.mxu1 }
 0x398   : > { %v4040_v56 = vadd.f32 %v4039_v0, %v3923_v12 }
 0x399   : > { %9846 = vmatmul.msk.f32.gmra.mxu0 %vm380_vm1, %v12158_v32 }
 0x39a   : > { %v4202_v30 = vadd.f32 %v4172_v46, %v4040_v56  ;;  %9864 = vmatmul.msk.f32.gmra.mxu1 %vm380_vm1, %v12210_v20 }
 0x39b   : > { %9810 = vmatmul.msk.f32.gmra.mxu2 %vm380_vm1, %v12162_v39 }
 0x39c   : > { %9828 = vmatmul.msk.f32.gmra.mxu3 %vm380_vm1, %v12156_v29  ;;  %v12357_v6 = vadd.f32 %v4322_v48, %v4202_v30  ;;  %v12399_v48 = vld [vmem:[#allocation2 + $0x182] sm:$0xff] }
 0x39e   : > { %v3926_v43 = vpop.f32.mrf.mxu2  ;;  %v4178_v33 = vpop.f32.mrf.mxu0 }
 0x39f   : > { %v4042_v42 = vpop.f32.mrf.mxu3  ;;  %v4328_v62 = vpop.f32.mrf.mxu1 }
 0x3a0   : > { %v4043_v1 = vadd.f32 %v4042_v42, %v3926_v43 }
 0x3a1   : > { %9847 = vmatmul.msk.f32.gmra.mxu0 %vm380_vm1, %v12176_v41  ;;  %v9941_v41 = vld [vmem:[%s14235_s4 + $0xc] sm:$0xf] }
 0x3a2   : > { %v4203_v51 = vadd.f32 %v4175_v3, %v4043_v1  ;;  %9865 = vmatmul.msk.f32.gmra.mxu1 %vm380_vm1, %v12232_v26  ;;  %9942 = vmatpush.msk.msra.mxu2 %vm1136_vm2, %v9941_v41  ;;  %v4673_v3 = vld [vmem:[#allocation2 + $0x1a0] sm:$0xff]  ;;  %v12412_v1 = vld [vmem:[#allocation2 + $0x18a] sm:$0xff] }
 0x3a3   : > { %9811 = vmatmul.msk.f32.gmra.mxu2 %vm380_vm1, %v12180_v25  ;;  %v9959_v25 = vld [vmem:[%s14235_s4 + $0x10] sm:$0xf] }
 0x3a4   : > { %9829 = vmatmul.msk.f32.gmra.mxu3 %vm380_vm1, %v12174_v22  ;;  %v12367_v32 = vadd.f32 %v4325_v35, %v4203_v51  ;;  %v4822_v35 = vld [vmem:[#allocation2 + $0x1a1] sm:$0xff]  ;;  %v5106_v41 = vld [vmem:[#allocation3 + $0xc0] sm:$0xff] }
 0x3a5   : > { %9960 = vmatpush.msk.msra.mxu3 %vm1136_vm2, %v9959_v25 }
 0x3a6   : > { %v3929_v39 = vpop.f32.mrf.mxu2  ;;  %v4181_v60 = vpop.f32.mrf.mxu0 }
 0x3a7   : > { %v4045_v15 = vpop.f32.mrf.mxu3  ;;  %v4331_v11 = vpop.f32.mrf.mxu1 }
 0x3a8   : > { %v4046_v23 = vadd.f32 %v4045_v15, %v3929_v39 }
 0x3a9   : > { %9848 = vmatmul.msk.f32.gmra.mxu0 %vm380_vm1, %v12200_v28 }
 0x3aa   : > { %v4204_v52 = vadd.f32 %v4178_v33, %v4046_v23  ;;  %9866 = vmatmul.msk.f32.gmra.mxu1 %vm380_vm1, %v4819_v54 }
 0x3ab   : > { %9812 = vmatmul.msk.f32.gmra.mxu2 %vm380_vm1, %v12210_v20  ;;  %v4820_v20 = vld [vmem:[#allocation2 + $0x189] sm:$0xff] }
 0x3ac   : > { %9830 = vmatmul.msk.f32.gmra.mxu3 %vm380_vm1, %v12198_v5  ;;  %v12382_v40 = vadd.f32 %v4328_v62, %v4204_v52 }
 0x3ae   : > { %v3932_v28 = vpop.f32.mrf.mxu2  ;;  %v4184_v49 = vpop.f32.mrf.mxu0 }
 0x3af   : > { %v4048_v36 = vpop.f32.mrf.mxu3  ;;  %v4334_v9 = vpop.f32.mrf.mxu1 }
 0x3b0   : > { %v4049_v7 = vadd.f32 %v4048_v36, %v3932_v28 }
 0x3b1   : > { %9849 = vmatmul.msk.f32.gmra.mxu0 %vm380_vm1, %v12228_v59  ;;  %v4821_v59 = vld [vmem:[#allocation2 + $0x199] sm:$0xff] }
 0x3b2   : > { %v4205_v38 = vadd.f32 %v4181_v60, %v4049_v7  ;;  %9867 = vmatmul.msk.f32.gmra.mxu1 %vm380_vm1, %v4820_v20  ;;  %v5255_v60 = vld [vmem:[#allocation3 + $0xc1] sm:$0xff] }
 0x3b3   : > { %9813 = vmatmul.msk.f32.gmra.mxu2 %vm380_vm1, %v12232_v26 }
 0x3b4   : > { %9831 = vmatmul.msk.f32.gmra.mxu3 %vm380_vm1, %v12226_v47  ;;  %v12396_v34 = vadd.f32 %v4331_v11, %v4205_v38  ;;  %v5404_v11 = vld [vmem:[#allocation3 + $0xc2] sm:$0xff]  ;;  %v5405_v38 = vld [vmem:[#allocation3 + $0xca] sm:$0xff] }
 0x3b6   : > { %v3935_v21 = vpop.f32.mrf.mxu2  ;;  %v4187_v53 = vpop.f32.mrf.mxu0 }
 0x3b7   : > { %v4051_v61 = vpop.f32.mrf.mxu3  ;;  %v4337_v46 = vpop.f32.mrf.mxu1 }
 0x3b8   : > { %v4052_v14 = vadd.f32 %v4051_v61, %v3935_v21  ;;  %v5107_v21 = vld [vmem:[#allocation3 + $0xc8] sm:$0xff] }
 0x3b9   : > { %9850 = vmatmul.msk.f32.gmra.mxu0 %vm380_vm1, %v4672_v31 }
 0x3ba   : > { %v4206_v26 = vadd.f32 %v4184_v49, %v4052_v14  ;;  %9868 = vmatmul.msk.f32.gmra.mxu1 %vm380_vm1, %v4821_v59 }
 0x3bb   : > { %9814 = vmatmul.msk.f32.gmra.mxu2 %vm380_vm1, %v4819_v54 }
 0x3bc   : > { %9832 = vmatmul.msk.f32.gmra.mxu3 %vm380_vm1, %v12399_v48  ;;  %v12409_v12 = vadd.f32 %v4334_v9, %v4206_v26  ;;  %v5256_v9 = vld [vmem:[#allocation3 + $0xc9] sm:$0xff]  ;;  %v12439_v26 = vld [vmem:[#allocation3 + $0xda] sm:$0xff] }
 0x3be   : > { %v3938_v0 = vpop.f32.mrf.mxu2  ;;  %v4190_v43 = vpop.f32.mrf.mxu0 }
 0x3bf   : > { %v4054_v56 = vpop.f32.mrf.mxu3  ;;  %v4340_v42 = vpop.f32.mrf.mxu1 }
 0x3c0   : > { %v4055_v30 = vadd.f32 %v4054_v56, %v3938_v0 }
 0x3c1   : > { %9851 = vmatmul.msk.f32.gmra.mxu0 %vm380_vm1, %v4673_v3 }
 0x3c2   : > { %v4207_v33 = vadd.f32 %v4187_v53, %v4055_v30  ;;  %9869 = vmatmul.msk.f32.gmra.mxu1 %vm380_vm1, %v4822_v35 }
 0x3c3   : > { %9815 = vmatmul.msk.f32.gmra.mxu2 %vm380_vm1, %v4820_v20 }
 0x3c4   : > { %9833 = vmatmul.msk.f32.gmra.mxu3 %vm380_vm1, %v12412_v1  ;;  %v12419_v62 = vadd.f32 %v4337_v46, %v4207_v33  ;;  %v12437_v46 = vld [vmem:[#allocation3 + $0xd9] sm:$0xff]  ;;  %v12456_v33 = vld [vmem:[#allocation3 + $0xe2] sm:$0xff] }
 0x3c6   : > { %v3941_v51 = vpop.f32.mrf.mxu2  ;;  %v4743_v54 = vpop.f32.mrf.mxu0 }
 0x3c7   : > { %v4057_v39 = vpop.f32.mrf.mxu3  ;;  %v4892_v23 = vpop.f32.mrf.mxu1 }
 0x3c8   : > { %v4058_v15 = vadd.f32 %v4057_v39, %v3941_v51 }
 0x3c9   : > { %9907 = vmatmul.msk.f32.vlgmr.msrb.gmra.mxu0 %vm380_vm1, %v5255_v60 }
 0x3ca   : > { %v4208_v52 = vadd.f32 %v4190_v43, %v4058_v15  ;;  %9925 = vmatmul.msk.f32.vlgmr.msrb.gmra.mxu1 %vm380_vm1, %v5404_v11 }
 0x3cb   : > { %9872 = vmatmul.msk.f32.vlgmr.msrb.gmra.mxu2 %vm380_vm1, %v11998_v45 }
 0x3cc   : > { %9889 = vmatmul.msk.f32.vlgmr.msrb.gmra.mxu3 %vm380_vm1, %v5106_v41  ;;  %v12426_v25 = vadd.f32 %v4340_v42, %v4208_v52  ;;  %v12454_v42 = vld [vmem:[#allocation3 + $0xe1] sm:$0xff]  ;;  %v12471_v52 = vld [vmem:[#allocation3 + $0xf1] sm:$0xff] }
 0x3cd   : > { %v12473_v41 = vld [vmem:[#allocation3 + $0xf2] sm:$0xff] }
 0x3ce   : > { %v4444_v28 = vpop.f32.mrf.mxu2  ;;  %v4746_v7 = vpop.f32.mrf.mxu0 }
 0x3cf   : > { %v4593_v36 = vpop.f32.mrf.mxu3  ;;  %v4492_v20 = vadd.f32 %v4444_v28, %v12266_v19  ;;  %v4895_v49 = vpop.f32.mrf.mxu1 }
 0x3d1   : > { %v4641_v57 = vadd.f32 %v4593_v36, %v4492_v20  ;;  %9908 = vmatmul.msk.f32.gmra.mxu0 %vm380_vm1, %v5256_v9 }
 0x3d2   : > { %9926 = vmatmul.msk.f32.gmra.mxu1 %vm380_vm1, %v5405_v38 }
 0x3d3   : > { %v4791_v61 = vadd.f32 %v4743_v54, %v4641_v57  ;;  %9873 = vmatmul.msk.f32.gmra.mxu2 %vm380_vm1, %v12018_v8  ;;  %v12445_v8 = vld [vmem:[#allocation3 + $0xd8] sm:$0xff] }
 0x3d4   : > { %9890 = vmatmul.msk.f32.gmra.mxu3 %vm380_vm1, %v5107_v21  ;;  %v12488_v57 = vld [vmem:[#allocation3 + $0xf9] sm:$0xff] }
 0x3d5   : > { %v12434_v45 = vadd.f32 %v4892_v23, %v4791_v61  ;;  %v12490_v21 = vld [vmem:[#allocation3 + $0xfa] sm:$0xff] }
 0x3d6   : > { %v4447_v31 = vpop.f32.mrf.mxu2  ;;  %v4749_v14 = vpop.f32.mrf.mxu0 }
 0x3d7   : > { %v4596_v19 = vpop.f32.mrf.mxu3  ;;  %v4493_v59 = vadd.f32 %v4447_v31, %v12277_v50  ;;  %v4898_v53 = vpop.f32.mrf.mxu1 }
 0x3d9   : > { %v4642_v2 = vadd.f32 %v4596_v19, %v4493_v59  ;;  %9909 = vmatmul.msk.f32.gmra.mxu0 %vm380_vm1, %v12437_v46 }
 0x3da   : > { %9927 = vmatmul.msk.f32.gmra.mxu1 %vm380_vm1, %v12439_v26 }
 0x3db   : > { %v4792_v0 = vadd.f32 %v4746_v7, %v4642_v2  ;;  %9874 = vmatmul.msk.f32.gmra.mxu2 %vm380_vm1, %v12038_v63  ;;  %v12462_v63 = vld [vmem:[#allocation3 + $0xe0] sm:$0xff] }
 0x3dc   : > { %9891 = vmatmul.msk.f32.gmra.mxu3 %vm380_vm1, %v12445_v8 }
 0x3dd   : > { %v12451_v50 = vadd.f32 %v4895_v49, %v4792_v0  ;;  %v12505_v0 = vld [vmem:[#allocation3 + $0x109] sm:$0xff] }
 0x3de   : > { %v4450_v56 = vpop.f32.mrf.mxu2  ;;  %v4752_v30 = vpop.f32.mrf.mxu0 }
 0x3df   : > { %v4599_v3 = vpop.f32.mrf.mxu3  ;;  %v4494_v35 = vadd.f32 %v4450_v56, %v12287_v44  ;;  %v4901_v43 = vpop.f32.mrf.mxu1  ;;  %v12507_v56 = vld [vmem:[#allocation3 + $0x10a] sm:$0xff] }
 0x3e1   : > { %v4643_v51 = vadd.f32 %v4599_v3, %v4494_v35  ;;  %9910 = vmatmul.msk.f32.gmra.mxu0 %vm380_vm1, %v12454_v42 }
 0x3e2   : > { %9928 = vmatmul.msk.f32.gmra.mxu1 %vm380_vm1, %v12456_v33 }
 0x3e3   : > { %v4793_v39 = vadd.f32 %v4749_v14, %v4643_v51  ;;  %9875 = vmatmul.msk.f32.gmra.mxu2 %vm380_vm1, %v12058_v10  ;;  %v12479_v10 = vld [vmem:[#allocation3 + $0xf0] sm:$0xff] }
 0x3e4   : > { %9892 = vmatmul.msk.f32.gmra.mxu3 %vm380_vm1, %v12462_v63 }
 0x3e5   : > { %v12468_v44 = vadd.f32 %v4898_v53, %v4793_v39 }
 0x3e6   : > { %v4453_v15 = vpop.f32.mrf.mxu2  ;;  %v4755_v60 = vpop.f32.mrf.mxu0 }
 0x3e7   : > { %v4602_v54 = vpop.f32.mrf.mxu3  ;;  %v4495_v23 = vadd.f32 %v4453_v15, %v12297_v24  ;;  %v4904_v11 = vpop.f32.mrf.mxu1 }
 0x3e9   : > { %v4644_v28 = vadd.f32 %v4602_v54, %v4495_v23  ;;  %9911 = vmatmul.msk.f32.gmra.mxu0 %vm380_vm1, %v12471_v52  ;;  %v12522_v54 = vld [vmem:[#allocation3 + $0x111] sm:$0xff] }
 0x3ea   : > { %9929 = vmatmul.msk.f32.gmra.mxu1 %vm380_vm1, %v12473_v41  ;;  %v12524_v23 = vld [vmem:[#allocation3 + $0x112] sm:$0xff] }
 0x3eb   : > { %v4794_v36 = vadd.f32 %v4752_v30, %v4644_v28  ;;  %9876 = vmatmul.msk.f32.gmra.mxu2 %vm380_vm1, %v12078_v55  ;;  %v12496_v55 = vld [vmem:[#allocation3 + $0xf8] sm:$0xff] }
 0x3ec   : > { %9893 = vmatmul.msk.f32.gmra.mxu3 %vm380_vm1, %v12479_v10 }
 0x3ed   : > { %v12485_v24 = vadd.f32 %v4901_v43, %v4794_v36 }
 0x3ee   : > { %v4456_v20 = vpop.f32.mrf.mxu2  ;;  %v4758_v9 = vpop.f32.mrf.mxu0 }
 0x3ef   : > { %v4605_v7 = vpop.f32.mrf.mxu3  ;;  %v4496_v49 = vadd.f32 %v4456_v20, %v12307_v37  ;;  %v4907_v38 = vpop.f32.mrf.mxu1 }
 0x3f1   : > { %v4645_v61 = vadd.f32 %v4605_v7, %v4496_v49  ;;  %9912 = vmatmul.msk.f32.gmra.mxu0 %vm380_vm1, %v12488_v57 }
 0x3f2   : > { %9930 = vmatmul.msk.f32.gmra.mxu1 %vm380_vm1, %v12490_v21 }
 0x3f3   : > { %v4795_v31 = vadd.f32 %v4755_v60, %v4645_v61  ;;  %9877 = vmatmul.msk.f32.gmra.mxu2 %vm380_vm1, %v12098_v18  ;;  %v12513_v18 = vld [vmem:[#allocation3 + $0x108] sm:$0xff] }
 0x3f4   : > { %9894 = vmatmul.msk.f32.gmra.mxu3 %vm380_vm1, %v12496_v55 }
 0x3f5   : > { %v12502_v37 = vadd.f32 %v4904_v11, %v4795_v31 }
 0x3f6   : > { %v4459_v19 = vpop.f32.mrf.mxu2  ;;  %v4761_v53 = vpop.f32.mrf.mxu0 }
 0x3f7   : > { %v4608_v59 = vpop.f32.mrf.mxu3  ;;  %v4497_v14 = vadd.f32 %v4459_v19, %v12317_v17  ;;  %v4910_v2 = vpop.f32.mrf.mxu1 }
 0x3f9   : > { %v4646_v3 = vadd.f32 %v4608_v59, %v4497_v14  ;;  %9913 = vmatmul.msk.f32.gmra.mxu0 %vm380_vm1, %v12505_v0 }
 0x3fa   : > { %9931 = vmatmul.msk.f32.gmra.mxu1 %vm380_vm1, %v12507_v56 }
 0x3fb   : > { %v4796_v35 = vadd.f32 %v4758_v9, %v4646_v3  ;;  %9878 = vmatmul.msk.f32.gmra.mxu2 %vm380_vm1, %v12118_v4  ;;  %v12530_v4 = vld [vmem:[#allocation3 + $0x110] sm:$0xff]  ;;  %v12539_v9 = vld [vmem:[#allocation3 + $0x121] sm:$0xff] }
 0x3fc   : > { %9895 = vmatmul.msk.f32.gmra.mxu3 %vm380_vm1, %v12513_v18  ;;  %v12556_v3 = vld [vmem:[#allocation3 + $0x129] sm:$0xff] }
 0x3fd   : > { %v12519_v17 = vadd.f32 %v4907_v38, %v4796_v35  ;;  %v12541_v38 = vld [vmem:[#allocation3 + $0x122] sm:$0xff]  ;;  %v12558_v35 = vld [vmem:[#allocation3 + $0x12a] sm:$0xff] }
 0x3fe   : > { %v4462_v30 = vpop.f32.mrf.mxu2  ;;  %v4764_v39 = vpop.f32.mrf.mxu0 }
 0x3ff   : > { %v4611_v43 = vpop.f32.mrf.mxu3  ;;  %v4498_v51 = vadd.f32 %v4462_v30, %v12327_v58  ;;  %v4913_v15 = vpop.f32.mrf.mxu1 }
 0x401   : > { %v4647_v60 = vadd.f32 %v4611_v43, %v4498_v51  ;;  %9914 = vmatmul.msk.f32.gmra.mxu0 %vm380_vm1, %v12522_v54 }
 0x402   : > { %9932 = vmatmul.msk.f32.gmra.mxu1 %vm380_vm1, %v12524_v23 }
 0x403   : > { %v4797_v11 = vadd.f32 %v4761_v53, %v4647_v60  ;;  %9879 = vmatmul.msk.f32.gmra.mxu2 %vm380_vm1, %v12138_v16  ;;  %v12547_v16 = vld [vmem:[#allocation3 + $0x120] sm:$0xff] }
 0x404   : > { %9896 = vmatmul.msk.f32.gmra.mxu3 %vm380_vm1, %v12530_v4 }
 0x405   : > { %v12536_v58 = vadd.f32 %v4910_v2, %v4797_v11 }
 0x406   : > { %v4465_v28 = vpop.f32.mrf.mxu2  ;;  %v4767_v7 = vpop.f32.mrf.mxu0 }
 0x407   : > { %v4614_v36 = vpop.f32.mrf.mxu3  ;;  %v4499_v20 = vadd.f32 %v4465_v28, %v12337_v13  ;;  %v4916_v49 = vpop.f32.mrf.mxu1  ;;  %v12573_v28 = vld [vmem:[#allocation3 + $0x139] sm:$0xff] }
 0x409   : > { %v4648_v61 = vadd.f32 %v4614_v36, %v4499_v20  ;;  %9915 = vmatmul.msk.f32.gmra.mxu0 %vm380_vm1, %v12539_v9  ;;  %v12575_v36 = vld [vmem:[#allocation3 + $0x13a] sm:$0xff] }
 0x40a   : > { %9933 = vmatmul.msk.f32.gmra.mxu1 %vm380_vm1, %v12541_v38 }
 0x40b   : > { %v4798_v31 = vadd.f32 %v4764_v39, %v4648_v61  ;;  %9880 = vmatmul.msk.f32.gmra.mxu2 %vm380_vm1, %v12156_v29  ;;  %v12564_v29 = vld [vmem:[#allocation3 + $0x128] sm:$0xff] }
 0x40c   : > { %9897 = vmatmul.msk.f32.gmra.mxu3 %vm380_vm1, %v12547_v16 }
 0x40d   : > { %v12553_v13 = vadd.f32 %v4913_v15, %v4798_v31 }
 0x40e   : > { %v4468_v19 = vpop.f32.mrf.mxu2  ;;  %v4770_v53 = vpop.f32.mrf.mxu0 }
 0x40f   : > { %v4617_v59 = vpop.f32.mrf.mxu3  ;;  %v4500_v14 = vadd.f32 %v4468_v19, %v12347_v27  ;;  %v4919_v2 = vpop.f32.mrf.mxu1 }
 0x411   : > { %v4649_v30 = vadd.f32 %v4617_v59, %v4500_v14  ;;  %9916 = vmatmul.msk.f32.gmra.mxu0 %vm380_vm1, %v12556_v3  ;;  %v12590_v14 = vld [vmem:[#allocation3 + $0x141] sm:$0xff] }
 0x412   : > { %9934 = vmatmul.msk.f32.gmra.mxu1 %vm380_vm1, %v12558_v35 }
 0x413   : > { %v4799_v43 = vadd.f32 %v4767_v7, %v4649_v30  ;;  %9881 = vmatmul.msk.f32.gmra.mxu2 %vm380_vm1, %v12174_v22  ;;  %v12581_v22 = vld [vmem:[#allocation3 + $0x138] sm:$0xff]  ;;  %v12592_v30 = vld [vmem:[#allocation3 + $0x142] sm:$0xff] }
 0x414   : > { %9898 = vmatmul.msk.f32.gmra.mxu3 %vm380_vm1, %v12564_v29 }
 0x415   : > { %v12570_v27 = vadd.f32 %v4916_v49, %v4799_v43 }
 0x416   : > { %v4471_v51 = vpop.f32.mrf.mxu2  ;;  %v4773_v60 = vpop.f32.mrf.mxu0 }
 0x417   : > { %v4620_v39 = vpop.f32.mrf.mxu3  ;;  %v4501_v15 = vadd.f32 %v4471_v51, %v12357_v6  ;;  %v4922_v11 = vpop.f32.mrf.mxu1 }
 0x419   : > { %v4650_v20 = vadd.f32 %v4620_v39, %v4501_v15  ;;  %9917 = vmatmul.msk.f32.gmra.mxu0 %vm380_vm1, %v12573_v28 }
 0x41a   : > { %9935 = vmatmul.msk.f32.gmra.mxu1 %vm380_vm1, %v12575_v36 }
 0x41b   : > { %v4800_v7 = vadd.f32 %v4770_v53, %v4650_v20  ;;  %9882 = vmatmul.msk.f32.gmra.mxu2 %vm380_vm1, %v12198_v5  ;;  %v12598_v5 = vld [vmem:[#allocation3 + $0x140] sm:$0xff] }
 0x41c   : > { %9899 = vmatmul.msk.f32.gmra.mxu3 %vm380_vm1, %v12581_v22 }
 0x41d   : > { %v12587_v6 = vadd.f32 %v4919_v2, %v4800_v7  ;;  %v12607_v7 = vld [vmem:[#allocation3 + $0x151] sm:$0xff] }
 0x41e   : > { %v4474_v49 = vpop.f32.mrf.mxu2  ;;  %v4776_v19 = vpop.f32.mrf.mxu0 }
 0x41f   : > { %v4623_v61 = vpop.f32.mrf.mxu3  ;;  %v4502_v31 = vadd.f32 %v4474_v49, %v12367_v32  ;;  %v4925_v59 = vpop.f32.mrf.mxu1  ;;  %v12609_v49 = vld [vmem:[#allocation3 + $0x152] sm:$0xff] }
 0x421   : > { %v4651_v43 = vadd.f32 %v4623_v61, %v4502_v31  ;;  %9918 = vmatmul.msk.f32.gmra.mxu0 %vm380_vm1, %v12590_v14 }
 0x422   : > { %9936 = vmatmul.msk.f32.gmra.mxu1 %vm380_vm1, %v12592_v30 }
 0x423   : > { %v4801_v53 = vadd.f32 %v4773_v60, %v4651_v43  ;;  %9883 = vmatmul.msk.f32.gmra.mxu2 %vm380_vm1, %v12226_v47  ;;  %v12615_v47 = vld [vmem:[#allocation3 + $0x150] sm:$0xff] }
 0x424   : > { %9900 = vmatmul.msk.f32.gmra.mxu3 %vm380_vm1, %v12598_v5 }
 0x425   : > { %v12604_v32 = vadd.f32 %v4922_v11, %v4801_v53  ;;  %v10031_v11 = vld [vmem:[%s14235_s4 + $0x20] sm:$0xf] }
 0x426   : > { %v4477_v2 = vpop.f32.mrf.mxu2  ;;  %v4779_v15 = vpop.f32.mrf.mxu0  ;;  %10032 = vmatpush.msk.msrb.mxu3 %vm1136_vm2, %v10031_v11 }
 0x427   : > { %v4626_v51 = vpop.f32.mrf.mxu3  ;;  %v4503_v39 = vadd.f32 %v4477_v2, %v12382_v40  ;;  %v4928_v20 = vpop.f32.mrf.mxu1  ;;  %v10013_v40 = vld [vmem:[%s14235_s4 + $0x1c] sm:$0xf] }
 0x428   : > { %10014 = vmatpush.msk.msrb.mxu2 %vm1136_vm2, %v10013_v40  ;;  %v12640_v40 = vld [vmem:[#allocation3 + $0x158] sm:$0xff] }
 0x429   : > { %v4652_v61 = vadd.f32 %v4626_v51, %v4503_v39  ;;  %9919 = vmatmul.msk.f32.gmra.mxu0 %vm380_vm1, %v12607_v7  ;;  %v12632_v51 = vld [vmem:[#allocation3 + $0x159] sm:$0xff] }
 0x42a   : > { %9937 = vmatmul.msk.f32.gmra.mxu1 %vm380_vm1, %v12609_v49  ;;  %14305 = vst [vmem:[#allocation14_spill] sm:$0xff] %v12632_v51  ;;  %v12634_v39 = vld [vmem:[#allocation3 + $0x15a] sm:$0xff] }
 0x42b   : > { %v4802_v60 = vadd.f32 %v4776_v19, %v4652_v61  ;;  %9884 = vmatmul.msk.f32.gmra.mxu2 %vm380_vm1, %v12399_v48 }
 0x42c   : > { %9901 = vmatmul.msk.f32.gmra.mxu3 %vm380_vm1, %v12615_v47 }
 0x42d   : > { %v12629_v31 = vadd.f32 %v4925_v59, %v4802_v60 }
 0x42e   : > { %v4480_v19 = vpop.f32.mrf.mxu2  ;;  %v4782_v53 = vpop.f32.mrf.mxu0 }
 0x42f   : > { %14304 = vst [vmem:[#allocation8_spill] sm:$0xff] %v12629_v31  ;;  %v4629_v43 = vpop.f32.mrf.mxu3  ;;  %v4504_v48 = vadd.f32 %v4480_v19, %v12396_v34  ;;  %v4931_v2 = vpop.f32.mrf.mxu1  ;;  %v10049_v34 = vld [vmem:[%s14236_s5 + $0x4] sm:$0xf]  ;;  %v12653_v31 = vld [vmem:[#allocation3 + $0x169] sm:$0xff] }
 0x430   : > { %10050 = vmatpush.msk.msrb.mxu0 %vm1136_vm2, %v10049_v34  ;;  %14307 = vst [vmem:[#allocation13_spill] sm:$0xff] %v12653_v31 }
 0x431   : > { %v4653_v61 = vadd.f32 %v4629_v43, %v4504_v48  ;;  %9920 = vmatmul.msk.f32.gmra.mxu0 %vm380_vm1, %v12632_v51 }
 0x432   : > { %9938 = vmatmul.msk.f32.gmra.mxu1 %vm380_vm1, %v12634_v39 }
 0x433   : > { %v4803_v59 = vadd.f32 %v4779_v15, %v4653_v61  ;;  %9885 = vmatmul.msk.f32.gmra.mxu2 %vm380_vm1, %v12412_v1  ;;  %v4970_v61 = vld [vmem:[#allocation2 + $0x19a] sm:$0xff] }
 0x434   : > { %9902 = vmatmul.msk.f32.gmra.mxu3 %vm380_vm1, %v12640_v40  ;;  %v12655_v1 = vld [vmem:[#allocation3 + $0x16a] sm:$0xff] }
 0x435   : > { %v12650_v60 = vadd.f32 %v4928_v20, %v4803_v59  ;;  %14308 = vst [vmem:[#allocation11_spill] sm:$0xff] %v12655_v1  ;;  %v12661_v20 = vld [vmem:[#allocation3 + $0x168] sm:$0xff] }
 0x436   : > { %v4483_v11 = vpop.f32.mrf.mxu2  ;;  %v4785_v48 = vpop.f32.mrf.mxu0 }
 0x437   : > { %14306 = vst [vmem:[#allocation16_spill] sm:$0xff] %v12650_v60  ;;  %v4632_v19 = vpop.f32.mrf.mxu3  ;;  %v4505_v43 = vadd.f32 %v4483_v11, %v12409_v12  ;;  %v4934_v15 = vpop.f32.mrf.mxu1  ;;  %v6532_v12 = vld [vmem:[%s14236_s5] sm:$0xf] }
 0x438   : > { %10067 = vmatpush.msk.msrb.mxu1 %vm1136_vm2, %v6532_v12 }
 0x439   : > { %v4654_v51 = vadd.f32 %v4632_v19, %v4505_v43  ;;  %9921 = vmatmul.msk.f32.gmra.mxu0 %vm380_vm1, %v12653_v31 }
 0x43a   : > { %9939 = vmatmul.msk.f32.gmra.mxu1 %vm380_vm1, %v12655_v1 }
 0x43b   : > { %v4804_v59 = vadd.f32 %v4782_v53, %v4654_v51  ;;  %9886 = vmatmul.msk.f32.gmra.mxu2 %vm380_vm1, %v4970_v61  ;;  %v4971_v53 = vld [vmem:[#allocation2 + $0x1a2] sm:$0xff] }
 0x43c   : > { %9903 = vmatmul.msk.f32.gmra.mxu3 %vm380_vm1, %v12661_v20  ;;  %v12673_v51 = vld [vmem:[#allocation3 + $0x171] sm:$0xff] }
 0x43d   : > { %v12670_v34 = vadd.f32 %v4931_v2, %v4804_v59  ;;  %14310 = vst [vmem:[#allocation17_spill] sm:$0xff] %v12673_v51  ;;  %v12675_v61 = vld [vmem:[#allocation3 + $0x172] sm:$0xff] }
 0x43e   : > { %v4486_v11 = vpop.f32.mrf.mxu2  ;;  %v4788_v60 = vpop.f32.mrf.mxu0  ;;  %v12681_v2 = vld [vmem:[#allocation3 + $0x170] sm:$0xff] }
 0x43f   : > { %14309 = vst [vmem:[#allocation15_spill] sm:$0xff] %v12670_v34  ;;  %v4635_v19 = vpop.f32.mrf.mxu3  ;;  %v4506_v43 = vadd.f32 %v4486_v11, %v12419_v62  ;;  %v4937_v31 = vpop.f32.mrf.mxu1 }
 0x441   : > { %v4655_v1 = vadd.f32 %v4635_v19, %v4506_v43  ;;  %9922 = vmatmul.msk.f32.gmra.mxu0 %vm380_vm1, %v12673_v51 }
 0x442   : > { %9940 = vmatmul.msk.f32.gmra.mxu1 %vm380_vm1, %v12675_v61 }
 0x443   : > { %v4805_v59 = vadd.f32 %v4785_v48, %v4655_v1  ;;  %9887 = vmatmul.msk.f32.gmra.mxu2 %vm380_vm1, %v4971_v53 }
 0x444   : > { %9904 = vmatmul.msk.f32.gmra.mxu3 %vm380_vm1, %v12681_v2 }
 0x445   : > { %v12686_v62 = vadd.f32 %v4934_v15, %v4805_v59 }
 0x446   : > { %v4489_v12 = vpop.f32.mrf.mxu2  ;;  %v5340_v43 = vpop.f32.mrf.mxu0 }
 0x447   : > { %v4638_v11 = vpop.f32.mrf.mxu3  ;;  %v4507_v19 = vadd.f32 %v4489_v12, %v12426_v25  ;;  %v5489_v34 = vpop.f32.mrf.mxu1 }
 0x449   : > { %v4656_v51 = vadd.f32 %v4638_v11, %v4507_v19  ;;  %9979 = vmatmul.msk.f32.vlgmr.msra.gmra.mxu0 %vm380_vm1, %v12439_v26 }
 0x44a   : > { %9997 = vmatmul.msk.f32.vlgmr.msra.gmra.mxu1 %vm380_vm1, %v12479_v10 }
 0x44b   : > { %v4806_v48 = vadd.f32 %v4788_v60, %v4656_v51  ;;  %9943 = vmatmul.msk.f32.vlgmr.msra.gmra.mxu2 %vm380_vm1, %v12445_v8 }
 0x44c   : > { %9961 = vmatmul.msk.f32.vlgmr.msra.gmra.mxu3 %vm380_vm1, %v12437_v46 }
 0x44d   : > { %v12697_v15 = vadd.f32 %v4937_v31, %v4806_v48 }
 0x44e   : > { %v5041_v1 = vpop.f32.mrf.mxu2  ;;  %v5343_v59 = vpop.f32.mrf.mxu0 }
 0x44f   : > { %v5191_v25 = vpop.f32.mrf.mxu3  ;;  %v5089_v53 = vadd.f32 %v5041_v1, %v12434_v45  ;;  %v5492_v12 = vpop.f32.mrf.mxu1 }
 0x451   : > { %v5239_v11 = vadd.f32 %v5191_v25, %v5089_v53  ;;  %9980 = vmatmul.msk.f32.gmra.mxu0 %vm380_vm1, %v12456_v33 }
 0x452   : > { %9998 = vmatmul.msk.f32.gmra.mxu1 %vm380_vm1, %v12496_v55 }
 0x453   : > { %v5388_v26 = vadd.f32 %v5340_v43, %v5239_v11  ;;  %9944 = vmatmul.msk.f32.gmra.mxu2 %vm380_vm1, %v12462_v63 }
 0x454   : > { %9962 = vmatmul.msk.f32.gmra.mxu3 %vm380_vm1, %v12454_v42 }
 0x455   : > { %v12708_v46 = vadd.f32 %v5489_v34, %v5388_v26 }
 0x456   : > { %v5044_v8 = vpop.f32.mrf.mxu2  ;;  %v5346_v60 = vpop.f32.mrf.mxu0 }
 0x457   : > { %v5194_v45 = vpop.f32.mrf.mxu3  ;;  %v5090_v31 = vadd.f32 %v5044_v8, %v12451_v50  ;;  %v5495_v51 = vpop.f32.mrf.mxu1 }
 0x459   : > { %v5240_v19 = vadd.f32 %v5194_v45, %v5090_v31  ;;  %9981 = vmatmul.msk.f32.gmra.mxu0 %vm380_vm1, %v12473_v41 }
 0x45a   : > { %9999 = vmatmul.msk.f32.gmra.mxu1 %vm380_vm1, %v12513_v18 }
 0x45b   : > { %v5389_v33 = vadd.f32 %v5343_v59, %v5240_v19  ;;  %9945 = vmatmul.msk.f32.gmra.mxu2 %vm380_vm1, %v12479_v10 }
 0x45c   : > { %9963 = vmatmul.msk.f32.gmra.mxu3 %vm380_vm1, %v12471_v52 }
 0x45d   : > { %v12719_v42 = vadd.f32 %v5492_v12, %v5389_v33 }
 0x45e   : > { %v5047_v63 = vpop.f32.mrf.mxu2  ;;  %v5349_v43 = vpop.f32.mrf.mxu0 }
 0x45f   : > { %v5197_v50 = vpop.f32.mrf.mxu3  ;;  %v5091_v34 = vadd.f32 %v5047_v63, %v12468_v44  ;;  %v5498_v48 = vpop.f32.mrf.mxu1 }
 0x461   : > { %v5241_v1 = vadd.f32 %v5197_v50, %v5091_v34  ;;  %9982 = vmatmul.msk.f32.gmra.mxu0 %vm380_vm1, %v12490_v21 }
 0x462   : > { %10000 = vmatmul.msk.f32.gmra.mxu1 %vm380_vm1, %v12530_v4 }
 0x463   : > { %v5390_v25 = vadd.f32 %v5346_v60, %v5241_v1  ;;  %9946 = vmatmul.msk.f32.gmra.mxu2 %vm380_vm1, %v12496_v55 }
 0x464   : > { %9964 = vmatmul.msk.f32.gmra.mxu3 %vm380_vm1, %v12488_v57 }
 0x465   : > { %v12730_v10 = vadd.f32 %v5495_v51, %v5390_v25 }
 0x466   : > { %v5050_v53 = vpop.f32.mrf.mxu2  ;;  %v5352_v12 = vpop.f32.mrf.mxu0 }
 0x467   : > { %v5200_v44 = vpop.f32.mrf.mxu3  ;;  %v5092_v59 = vadd.f32 %v5050_v53, %v12485_v24  ;;  %v5501_v11 = vpop.f32.mrf.mxu1 }
 0x469   : > { %v5242_v26 = vadd.f32 %v5200_v44, %v5092_v59  ;;  %9983 = vmatmul.msk.f32.gmra.mxu0 %vm380_vm1, %v12507_v56 }
 0x46a   : > { %10001 = vmatmul.msk.f32.gmra.mxu1 %vm380_vm1, %v12547_v16 }
 0x46b   : > { %v5391_v8 = vadd.f32 %v5349_v43, %v5242_v26  ;;  %9947 = vmatmul.msk.f32.gmra.mxu2 %vm380_vm1, %v12513_v18 }
 0x46c   : > { %9965 = vmatmul.msk.f32.gmra.mxu3 %vm380_vm1, %v12505_v0 }
 0x46d   : > { %v12741_v55 = vadd.f32 %v5498_v48, %v5391_v8 }
 0x46e   : > { %v5053_v45 = vpop.f32.mrf.mxu2  ;;  %v5355_v60 = vpop.f32.mrf.mxu0 }
 0x46f   : > { %v5203_v24 = vpop.f32.mrf.mxu3  ;;  %v5093_v31 = vadd.f32 %v5053_v45, %v12502_v37  ;;  %v5504_v51 = vpop.f32.mrf.mxu1 }
 0x471   : > { %v5243_v19 = vadd.f32 %v5203_v24, %v5093_v31  ;;  %9984 = vmatmul.msk.f32.gmra.mxu0 %vm380_vm1, %v12524_v23 }
 0x472   : > { %10002 = vmatmul.msk.f32.gmra.mxu1 %vm380_vm1, %v12564_v29 }
 0x473   : > { %v5392_v33 = vadd.f32 %v5352_v12, %v5243_v19  ;;  %9948 = vmatmul.msk.f32.gmra.mxu2 %vm380_vm1, %v12530_v4 }
 0x474   : > { %9966 = vmatmul.msk.f32.gmra.mxu3 %vm380_vm1, %v12522_v54 }
 0x475   : > { %v12752_v18 = vadd.f32 %v5501_v11, %v5392_v33 }
 0x476   : > { %v5056_v63 = vpop.f32.mrf.mxu2  ;;  %v5358_v34 = vpop.f32.mrf.mxu0 }
 0x477   : > { %v5206_v37 = vpop.f32.mrf.mxu3  ;;  %v5094_v50 = vadd.f32 %v5056_v63, %v12519_v17  ;;  %v5507_v43 = vpop.f32.mrf.mxu1 }
 0x479   : > { %v5244_v48 = vadd.f32 %v5206_v37, %v5094_v50  ;;  %9985 = vmatmul.msk.f32.gmra.mxu0 %vm380_vm1, %v12541_v38 }
 0x47a   : > { %10003 = vmatmul.msk.f32.gmra.mxu1 %vm380_vm1, %v12581_v22 }
 0x47b   : > { %v5393_v1 = vadd.f32 %v5355_v60, %v5244_v48  ;;  %9949 = vmatmul.msk.f32.gmra.mxu2 %vm380_vm1, %v12547_v16 }
 0x47c   : > { %9967 = vmatmul.msk.f32.gmra.mxu3 %vm380_vm1, %v12539_v9 }
 0x47d   : > { %v12763_v4 = vadd.f32 %v5504_v51, %v5393_v1 }
 0x47e   : > { %v5059_v25 = vpop.f32.mrf.mxu2  ;;  %v5361_v44 = vpop.f32.mrf.mxu0 }
 0x47f   : > { %v5209_v17 = vpop.f32.mrf.mxu3  ;;  %v5095_v53 = vadd.f32 %v5059_v25, %v12536_v58  ;;  %v5510_v59 = vpop.f32.mrf.mxu1 }
 0x481   : > { %v5245_v12 = vadd.f32 %v5209_v17, %v5095_v53  ;;  %9986 = vmatmul.msk.f32.gmra.mxu0 %vm380_vm1, %v12558_v35 }
 0x482   : > { %10004 = vmatmul.msk.f32.gmra.mxu1 %vm380_vm1, %v12598_v5 }
 0x483   : > { %v5394_v11 = vadd.f32 %v5358_v34, %v5245_v12  ;;  %9950 = vmatmul.msk.f32.gmra.mxu2 %vm380_vm1, %v12564_v29 }
 0x484   : > { %9968 = vmatmul.msk.f32.gmra.mxu3 %vm380_vm1, %v12556_v3 }
 0x485   : > { %v12774_v16 = vadd.f32 %v5507_v43, %v5394_v11 }
 0x486   : > { %v5062_v26 = vpop.f32.mrf.mxu2  ;;  %v5364_v45 = vpop.f32.mrf.mxu0 }
 0x487   : > { %v5212_v58 = vpop.f32.mrf.mxu3  ;;  %v5096_v8 = vadd.f32 %v5062_v26, %v12553_v13  ;;  %v5513_v24 = vpop.f32.mrf.mxu1 }
 0x489   : > { %v5246_v31 = vadd.f32 %v5212_v58, %v5096_v8  ;;  %9987 = vmatmul.msk.f32.gmra.mxu0 %vm380_vm1, %v12575_v36 }
 0x48a   : > { %10005 = vmatmul.msk.f32.gmra.mxu1 %vm380_vm1, %v12615_v47 }
 0x48b   : > { %v5395_v60 = vadd.f32 %v5361_v44, %v5246_v31  ;;  %9951 = vmatmul.msk.f32.gmra.mxu2 %vm380_vm1, %v12581_v22 }
 0x48c   : > { %9969 = vmatmul.msk.f32.gmra.mxu3 %vm380_vm1, %v12573_v28 }
 0x48d   : > { %v12785_v29 = vadd.f32 %v5510_v59, %v5395_v60 }
 0x48e   : > { %v5065_v51 = vpop.f32.mrf.mxu2  ;;  %v5367_v33 = vpop.f32.mrf.mxu0 }
 0x48f   : > { %v5215_v13 = vpop.f32.mrf.mxu3  ;;  %v5097_v19 = vadd.f32 %v5065_v51, %v12570_v27  ;;  %v5516_v63 = vpop.f32.mrf.mxu1  ;;  %v6014_v51 = vld [vmem:[#allocation3 + $0x180] sm:$0xff] }
 0x491   : > { %v5247_v37 = vadd.f32 %v5215_v13, %v5097_v19  ;;  %9988 = vmatmul.msk.f32.gmra.mxu0 %vm380_vm1, %v12592_v30  ;;  %v14313_v19 = vld [vmem:[#allocation11_spill] sm:$0xff] }
 0x492   : > { %10006 = vmatmul.msk.f32.gmra.mxu1 %vm380_vm1, %v12640_v40 }
 0x493   : > { %v5396_v50 = vadd.f32 %v5364_v45, %v5247_v37  ;;  %9952 = vmatmul.msk.f32.gmra.mxu2 %vm380_vm1, %v12598_v5  ;;  %v14312_v45 = vld [vmem:[#allocation8_spill] sm:$0xff] }
 0x494   : > { %9970 = vmatmul.msk.f32.gmra.mxu3 %vm380_vm1, %v12590_v14  ;;  %v10102_v37 = vld [vmem:[%s14236_s5 + $0xc] sm:$0xf] }
 0x495   : > { %v12796_v22 = vadd.f32 %v5513_v24, %v5396_v50  ;;  %10103 = vmatpush.msk.msra.mxu3 %vm1136_vm2, %v10102_v37 }
 0x496   : > { %v5068_v34 = vpop.f32.mrf.mxu2  ;;  %v5370_v48 = vpop.f32.mrf.mxu0 }
 0x497   : > { %v5218_v27 = vpop.f32.mrf.mxu3  ;;  %v5098_v43 = vadd.f32 %v5068_v34, %v12587_v6  ;;  %v5519_v1 = vpop.f32.mrf.mxu1 }
 0x499   : > { %v5248_v25 = vadd.f32 %v5218_v27, %v5098_v43  ;;  %9989 = vmatmul.msk.f32.gmra.mxu0 %vm380_vm1, %v12609_v49 }
 0x49a   : > { %10007 = vmatmul.msk.f32.gmra.mxu1 %vm380_vm1, %v12661_v20 }
 0x49b   : > { %v5397_v17 = vadd.f32 %v5367_v33, %v5248_v25  ;;  %9953 = vmatmul.msk.f32.gmra.mxu2 %vm380_vm1, %v12615_v47  ;;  %v14311_v47 = vld [vmem:[#allocation14_spill] sm:$0xff] }
 0x49c   : > { %9971 = vmatmul.msk.f32.gmra.mxu3 %vm380_vm1, %v12607_v7  ;;  %v6015_v25 = vld [vmem:[#allocation3 + $0x188] sm:$0xff] }
 0x49d   : > { %v12807_v5 = vadd.f32 %v5516_v63, %v5397_v17  ;;  %v10084_v63 = vld [vmem:[%s14236_s5 + $0x8] sm:$0xf] }
 0x49e   : > { %v5071_v53 = vpop.f32.mrf.mxu2  ;;  %v5373_v59 = vpop.f32.mrf.mxu0  ;;  %10085 = vmatpush.msk.msra.mxu2 %vm1136_vm2, %v10084_v63 }
 0x49f   : > { %v5221_v6 = vpop.f32.mrf.mxu3  ;;  %v5099_v44 = vadd.f32 %v5071_v53, %v12604_v32  ;;  %v5522_v12 = vpop.f32.mrf.mxu1 }
 0x4a1   : > { %v5249_v11 = vadd.f32 %v5221_v6, %v5099_v44  ;;  %9990 = vmatmul.msk.f32.gmra.mxu0 %vm380_vm1, %v12634_v39  ;;  %v14316_v6 = vld [vmem:[#allocation17_spill] sm:$0xff] }
 0x4a2   : > { %10008 = vmatmul.msk.f32.gmra.mxu1 %vm380_vm1, %v12681_v2  ;;  %v10120_v44 = vld [vmem:[%s14236_s5 + $0x10] sm:$0xf] }
 0x4a3   : > { %v5398_v26 = vadd.f32 %v5370_v48, %v5249_v11  ;;  %9954 = vmatmul.msk.f32.gmra.mxu2 %vm380_vm1, %v12640_v40  ;;  %v14314_v40 = vld [vmem:[#allocation13_spill] sm:$0xff]  ;;  %10121 = vmatpush.msk.msra.mxu0 %vm1136_vm2, %v10120_v44 }
 0x4a4   : > { %9972 = vmatmul.msk.f32.gmra.mxu3 %vm380_vm1, %v14311_v47 }
 0x4a5   : > { %v12818_v58 = vadd.f32 %v5519_v1, %v5398_v26  ;;  %v6016_v26 = vld [vmem:[#allocation3 + $0x198] sm:$0xff] }
 0x4a6   : > { %v5074_v8 = vpop.f32.mrf.mxu2  ;;  %v5376_v31 = vpop.f32.mrf.mxu0 }
 0x4a7   : > { %v5224_v32 = vpop.f32.mrf.mxu3  ;;  %v5100_v24 = vadd.f32 %v5074_v8, %v14312_v45  ;;  %v5525_v60 = vpop.f32.mrf.mxu1  ;;  %v14317_v8 = vld [vmem:[#allocation15_spill] sm:$0xff] }
 0x4a9   : > { %v5250_v13 = vadd.f32 %v5224_v32, %v5100_v24  ;;  %9991 = vmatmul.msk.f32.gmra.mxu0 %vm380_vm1, %v14313_v19 }
 0x4aa   : > { %10009 = vmatmul.msk.f32.gmra.mxu1 %vm380_vm1, %v6014_v51 }
 0x4ab   : > { %v5399_v33 = vadd.f32 %v5373_v59, %v5250_v13  ;;  %9955 = vmatmul.msk.f32.gmra.mxu2 %vm380_vm1, %v12661_v20  ;;  %v14315_v20 = vld [vmem:[#allocation16_spill] sm:$0xff]  ;;  %v12858_v13 = vld [vmem:[#allocation3 + $0x181] sm:$0xff] }
 0x4ac   : > { %9973 = vmatmul.msk.f32.gmra.mxu3 %vm380_vm1, %v14314_v40 }
 0x4ad   : > { %v12836_v50 = vadd.f32 %v5522_v12, %v5399_v33 }
 0x4ae   : > { %v5077_v34 = vpop.f32.mrf.mxu2  ;;  %v5379_v48 = vpop.f32.mrf.mxu0 }
 0x4af   : > { %v5227_v27 = vpop.f32.mrf.mxu3  ;;  %v5101_v43 = vadd.f32 %v5077_v34, %v14315_v20  ;;  %v5528_v1 = vpop.f32.mrf.mxu1 }
 0x4b1   : > { %v5251_v17 = vadd.f32 %v5227_v27, %v5101_v43  ;;  %9992 = vmatmul.msk.f32.gmra.mxu0 %vm380_vm1, %v12675_v61  ;;  %v6017_v27 = vld [vmem:[#allocation3 + $0x1a0] sm:$0xff] }
 0x4b2   : > { %10010 = vmatmul.msk.f32.gmra.mxu1 %vm380_vm1, %v6015_v25 }
 0x4b3   : > { %v5400_v53 = vadd.f32 %v5376_v31, %v5251_v17  ;;  %9956 = vmatmul.msk.f32.gmra.mxu2 %vm380_vm1, %v12681_v2  ;;  %v12853_v31 = vld [vmem:[#allocation3 + $0x182] sm:$0xff]  ;;  %v12870_v17 = vld [vmem:[#allocation3 + $0x18a] sm:$0xff] }
 0x4b4   : > { %9974 = vmatmul.msk.f32.gmra.mxu3 %vm380_vm1, %v14316_v6 }
 0x4b5   : > { %v12850_v59 = vadd.f32 %v5525_v60, %v5400_v53  ;;  %v10138_v60 = vld [vmem:[%s14236_s5 + $0x14] sm:$0xf]  ;;  %v12875_v53 = vld [vmem:[#allocation3 + $0x189] sm:$0xff] }
 0x4b6   : > { %v5080_v12 = vpop.f32.mrf.mxu2  ;;  %v5382_v45 = vpop.f32.mrf.mxu0  ;;  %10139 = vmatpush.msk.msra.mxu1 %vm1136_vm2, %v10138_v60 }
 0x4b7   : > { %v5230_v11 = vpop.f32.mrf.mxu3  ;;  %v5102_v32 = vadd.f32 %v5080_v12, %v14317_v8  ;;  %v5531_v24 = vpop.f32.mrf.mxu1 }
 0x4b9   : > { %v5252_v2 = vadd.f32 %v5230_v11, %v5102_v32  ;;  %9993 = vmatmul.msk.f32.gmra.mxu0 %vm380_vm1, %v12853_v31  ;;  %v6533_v11 = vld [vmem:[#allocation4 + $0x1] sm:$0xff] }
 0x4ba   : > { %10011 = vmatmul.msk.f32.gmra.mxu1 %vm380_vm1, %v6016_v26  ;;  %v6516_v26 = vld [vmem:[#allocation4] sm:$0xff] }
 0x4bb   : > { %v5401_v33 = vadd.f32 %v5379_v48, %v5252_v2  ;;  %9957 = vmatmul.msk.f32.gmra.mxu2 %vm380_vm1, %v6014_v51 }
 0x4bc   : > { %9975 = vmatmul.msk.f32.gmra.mxu3 %vm380_vm1, %v12858_v13 }
 0x4bd   : > { %v12867_v63 = vadd.f32 %v5528_v1, %v5401_v33 }
 0x4be   : > { %v5083_v37 = vpop.f32.mrf.mxu2  ;;  %v5385_v43 = vpop.f32.mrf.mxu0 }
 0x4bf   : > { %v5233_v34 = vpop.f32.mrf.mxu3  ;;  %v5103_v20 = vadd.f32 %v5083_v37, %v12686_v62  ;;  %v5534_v48 = vpop.f32.mrf.mxu1  ;;  %v6534_v37 = vld [vmem:[#allocation4 + $0x9] sm:$0xff] }
 0x4c1   : > { %v5253_v51 = vadd.f32 %v5233_v34, %v5103_v20  ;;  %9994 = vmatmul.msk.f32.gmra.mxu0 %vm380_vm1, %v12870_v17 }
 0x4c2   : > { %10012 = vmatmul.msk.f32.gmra.mxu1 %vm380_vm1, %v6017_v27 }
 0x4c3   : > { %v5402_v44 = vadd.f32 %v5382_v45, %v5253_v51  ;;  %9958 = vmatmul.msk.f32.gmra.mxu2 %vm380_vm1, %v6015_v25 }
 0x4c4   : > { %9976 = vmatmul.msk.f32.gmra.mxu3 %vm380_vm1, %v12875_v53 }
 0x4c5   : > { %v12880_v1 = vadd.f32 %v5531_v24, %v5402_v44 }
 0x4c6   : > { %v5086_v62 = vpop.f32.mrf.mxu2  ;;  %v5937_v32 = vpop.f32.mrf.mxu0 }
 0x4c7   : > { %v5236_v12 = vpop.f32.mrf.mxu3  ;;  %v5104_v8 = vadd.f32 %v5086_v62, %v12697_v15  ;;  %v6087_v2 = vpop.f32.mrf.mxu1  ;;  %v6517_v15 = vld [vmem:[#allocation4 + $0x8] sm:$0xff] }
 0x4c9   : > { %v5254_v33 = vadd.f32 %v5236_v12, %v5104_v8  ;;  %10051 = vmatmul.msk.f32.vlgmr.msrb.gmra.mxu0 %vm380_vm1, %v6533_v11  ;;  %v12901_v12 = vld [vmem:[#allocation4 + $0x19] sm:$0xff] }
 0x4ca   : > { %10068 = vmatmul.msk.f32.vlgmr.msrb.gmra.mxu1 %vm380_vm1, %v6516_v26  ;;  %v12903_v11 = vld [vmem:[#allocation4 + $0x18] sm:$0xff] }
 0x4cb   : > { %v5403_v45 = vadd.f32 %v5385_v43, %v5254_v33  ;;  %10015 = vmatmul.msk.f32.vlgmr.msrb.gmra.mxu2 %vm380_vm1, %v12471_v52 }
 0x4cc   : > { %10033 = vmatmul.msk.f32.vlgmr.msrb.gmra.mxu3 %vm380_vm1, %v12473_v41 }
 0x4cd   : > { %v12889_v25 = vadd.f32 %v5534_v48, %v5403_v45  ;;  %v12916_v45 = vld [vmem:[#allocation4 + $0x21] sm:$0xff] }
 0x4ce   : > { %v5639_v24 = vpop.f32.mrf.mxu2  ;;  %v5940_v27 = vpop.f32.mrf.mxu0 }
 0x4cf   : > { %v5788_v60 = vpop.f32.mrf.mxu3  ;;  %v5687_v34 = vadd.f32 %v5639_v24, %v12708_v46  ;;  %v6090_v20 = vpop.f32.mrf.mxu1  ;;  %v12918_v24 = vld [vmem:[#allocation4 + $0x20] sm:$0xff] }
 0x4d1   : > { %v5836_v51 = vadd.f32 %v5788_v60, %v5687_v34  ;;  %10052 = vmatmul.msk.f32.gmra.mxu0 %vm380_vm1, %v6534_v37 }
 0x4d2   : > { %10069 = vmatmul.msk.f32.gmra.mxu1 %vm380_vm1, %v6517_v15 }
 0x4d3   : > { %v5985_v43 = vadd.f32 %v5937_v32, %v5836_v51  ;;  %10016 = vmatmul.msk.f32.gmra.mxu2 %vm380_vm1, %v12488_v57  ;;  %v12933_v51 = vld [vmem:[#allocation4 + $0x30] sm:$0xff] }
 0x4d4   : > { %10034 = vmatmul.msk.f32.gmra.mxu3 %vm380_vm1, %v12490_v21 }
 0x4d5   : > { %v12898_v52 = vadd.f32 %v6087_v2, %v5985_v43 }
 0x4d6   : > { %v5642_v41 = vpop.f32.mrf.mxu2  ;;  %v5943_v44 = vpop.f32.mrf.mxu0 }
 0x4d7   : > { %v5791_v48 = vpop.f32.mrf.mxu3  ;;  %v5688_v46 = vadd.f32 %v5642_v41, %v12719_v42  ;;  %v6093_v62 = vpop.f32.mrf.mxu1 }
 0x4d9   : > { %v5837_v26 = vadd.f32 %v5791_v48, %v5688_v46  ;;  %10053 = vmatmul.msk.f32.gmra.mxu0 %vm380_vm1, %v12901_v12 }
 0x4da   : > { %10070 = vmatmul.msk.f32.gmra.mxu1 %vm380_vm1, %v12903_v11 }
 0x4db   : > { %v5986_v57 = vadd.f32 %v5940_v27, %v5837_v26  ;;  %10017 = vmatmul.msk.f32.gmra.mxu2 %vm380_vm1, %v12505_v0  ;;  %v12948_v26 = vld [vmem:[#allocation4 + $0x38] sm:$0xff] }
 0x4dc   : > { %10035 = vmatmul.msk.f32.gmra.mxu3 %vm380_vm1, %v12507_v56 }
 0x4dd   : > { %v12913_v21 = vadd.f32 %v6090_v20, %v5986_v57  ;;  %v12931_v20 = vld [vmem:[#allocation4 + $0x31] sm:$0xff] }
 0x4de   : > { %v5645_v42 = vpop.f32.mrf.mxu2  ;;  %v5946_v2 = vpop.f32.mrf.mxu0 }
 0x4df   : > { %v5794_v8 = vpop.f32.mrf.mxu3  ;;  %v5689_v32 = vadd.f32 %v5645_v42, %v12730_v10  ;;  %v6096_v33 = vpop.f32.mrf.mxu1 }
 0x4e1   : > { %v5838_v60 = vadd.f32 %v5794_v8, %v5689_v32  ;;  %10054 = vmatmul.msk.f32.gmra.mxu0 %vm380_vm1, %v12916_v45 }
 0x4e2   : > { %10071 = vmatmul.msk.f32.gmra.mxu1 %vm380_vm1, %v12918_v24 }
 0x4e3   : > { %v5987_v0 = vadd.f32 %v5943_v44, %v5838_v60  ;;  %10018 = vmatmul.msk.f32.gmra.mxu2 %vm380_vm1, %v12522_v54  ;;  %v12963_v60 = vld [vmem:[#allocation4 + $0x48] sm:$0xff] }
 0x4e4   : > { %10036 = vmatmul.msk.f32.gmra.mxu3 %vm380_vm1, %v12524_v23 }
 0x4e5   : > { %v12928_v56 = vadd.f32 %v6093_v62, %v5987_v0  ;;  %v12946_v62 = vld [vmem:[#allocation4 + $0x39] sm:$0xff] }
 0x4e6   : > { %v5648_v10 = vpop.f32.mrf.mxu2  ;;  %v5949_v34 = vpop.f32.mrf.mxu0 }
 0x4e7   : > { %v5797_v37 = vpop.f32.mrf.mxu3  ;;  %v5690_v15 = vadd.f32 %v5648_v10, %v12741_v55  ;;  %v6099_v27 = vpop.f32.mrf.mxu1 }
 0x4e9   : > { %v5839_v43 = vadd.f32 %v5797_v37, %v5690_v15  ;;  %10055 = vmatmul.msk.f32.gmra.mxu0 %vm380_vm1, %v12931_v20 }
 0x4ea   : > { %10072 = vmatmul.msk.f32.gmra.mxu1 %vm380_vm1, %v12933_v51 }
 0x4eb   : > { %v5988_v54 = vadd.f32 %v5946_v2, %v5839_v43  ;;  %10019 = vmatmul.msk.f32.gmra.mxu2 %vm380_vm1, %v12539_v9  ;;  %v12978_v43 = vld [vmem:[#allocation4 + $0x50] sm:$0xff] }
 0x4ec   : > { %10037 = vmatmul.msk.f32.gmra.mxu3 %vm380_vm1, %v12541_v38 }
 0x4ed   : > { %v12943_v23 = vadd.f32 %v6096_v33, %v5988_v54  ;;  %v12961_v33 = vld [vmem:[#allocation4 + $0x49] sm:$0xff] }
 0x4ee   : > { %v5651_v55 = vpop.f32.mrf.mxu2  ;;  %v5952_v46 = vpop.f32.mrf.mxu0 }
 0x4ef   : > { %v5800_v41 = vpop.f32.mrf.mxu3  ;;  %v5691_v48 = vadd.f32 %v5651_v55, %v12752_v18  ;;  %v6102_v44 = vpop.f32.mrf.mxu1 }
 0x4f1   : > { %v5840_v57 = vadd.f32 %v5800_v41, %v5691_v48  ;;  %10056 = vmatmul.msk.f32.gmra.mxu0 %vm380_vm1, %v12946_v62 }
 0x4f2   : > { %10073 = vmatmul.msk.f32.gmra.mxu1 %vm380_vm1, %v12948_v26 }
 0x4f3   : > { %v5989_v9 = vadd.f32 %v5949_v34, %v5840_v57  ;;  %10020 = vmatmul.msk.f32.gmra.mxu2 %vm380_vm1, %v12556_v3  ;;  %v12993_v57 = vld [vmem:[#allocation4 + $0x60] sm:$0xff] }
 0x4f4   : > { %10038 = vmatmul.msk.f32.gmra.mxu3 %vm380_vm1, %v12558_v35 }
 0x4f5   : > { %v12958_v38 = vadd.f32 %v6099_v27, %v5989_v9  ;;  %v12976_v27 = vld [vmem:[#allocation4 + $0x51] sm:$0xff] }
 0x4f6   : > { %v5654_v18 = vpop.f32.mrf.mxu2  ;;  %v5955_v32 = vpop.f32.mrf.mxu0 }
 0x4f7   : > { %v5803_v42 = vpop.f32.mrf.mxu3  ;;  %v5692_v8 = vadd.f32 %v5654_v18, %v12763_v4  ;;  %v6105_v2 = vpop.f32.mrf.mxu1 }
 0x4f9   : > { %v5841_v0 = vadd.f32 %v5803_v42, %v5692_v8  ;;  %10057 = vmatmul.msk.f32.gmra.mxu0 %vm380_vm1, %v12961_v33 }
 0x4fa   : > { %10074 = vmatmul.msk.f32.gmra.mxu1 %vm380_vm1, %v12963_v60 }
 0x4fb   : > { %v5990_v3 = vadd.f32 %v5952_v46, %v5841_v0  ;;  %10021 = vmatmul.msk.f32.gmra.mxu2 %vm380_vm1, %v12573_v28  ;;  %v13008_v0 = vld [vmem:[#allocation4 + $0x68] sm:$0xff] }
 0x4fc   : > { %10039 = vmatmul.msk.f32.gmra.mxu3 %vm380_vm1, %v12575_v36 }
 0x4fd   : > { %v12973_v35 = vadd.f32 %v6102_v44, %v5990_v3  ;;  %v12991_v44 = vld [vmem:[#allocation4 + $0x61] sm:$0xff] }
 0x4fe   : > { %v5657_v4 = vpop.f32.mrf.mxu2  ;;  %v5958_v15 = vpop.f32.mrf.mxu0 }
 0x4ff   : > { %v5806_v10 = vpop.f32.mrf.mxu3  ;;  %v5693_v37 = vadd.f32 %v5657_v4, %v12774_v16  ;;  %v6108_v34 = vpop.f32.mrf.mxu1 }
 0x501   : > { %v5842_v54 = vadd.f32 %v5806_v10, %v5693_v37  ;;  %10058 = vmatmul.msk.f32.gmra.mxu0 %vm380_vm1, %v12976_v27 }
 0x502   : > { %10075 = vmatmul.msk.f32.gmra.mxu1 %vm380_vm1, %v12978_v43 }
 0x503   : > { %v5991_v28 = vadd.f32 %v5955_v32, %v5842_v54  ;;  %10022 = vmatmul.msk.f32.gmra.mxu2 %vm380_vm1, %v12590_v14  ;;  %v13023_v54 = vld [vmem:[#allocation4 + $0x78] sm:$0xff] }
 0x504   : > { %10040 = vmatmul.msk.f32.gmra.mxu3 %vm380_vm1, %v12592_v30 }
 0x505   : > { %v12988_v36 = vadd.f32 %v6105_v2, %v5991_v28  ;;  %v13006_v2 = vld [vmem:[#allocation4 + $0x69] sm:$0xff] }
 0x506   : > { %v5660_v16 = vpop.f32.mrf.mxu2  ;;  %v5961_v48 = vpop.f32.mrf.mxu0 }
 0x507   : > { %v5809_v55 = vpop.f32.mrf.mxu3  ;;  %v5694_v41 = vadd.f32 %v5660_v16, %v12785_v29  ;;  %v6111_v46 = vpop.f32.mrf.mxu1 }
 0x509   : > { %v5843_v9 = vadd.f32 %v5809_v55, %v5694_v41  ;;  %10059 = vmatmul.msk.f32.gmra.mxu0 %vm380_vm1, %v12991_v44 }
 0x50a   : > { %10076 = vmatmul.msk.f32.gmra.mxu1 %vm380_vm1, %v12993_v57 }
 0x50b   : > { %v5992_v14 = vadd.f32 %v5958_v15, %v5843_v9  ;;  %10023 = vmatmul.msk.f32.gmra.mxu2 %vm380_vm1, %v12607_v7  ;;  %v13038_v9 = vld [vmem:[#allocation4 + $0x80] sm:$0xff] }
 0x50c   : > { %10041 = vmatmul.msk.f32.gmra.mxu3 %vm380_vm1, %v12609_v49 }
 0x50d   : > { %v13003_v30 = vadd.f32 %v6108_v34, %v5992_v14  ;;  %v13021_v34 = vld [vmem:[#allocation4 + $0x79] sm:$0xff] }
 0x50e   : > { %v5663_v29 = vpop.f32.mrf.mxu2  ;;  %v5964_v8 = vpop.f32.mrf.mxu0 }
 0x50f   : > { %v5812_v18 = vpop.f32.mrf.mxu3  ;;  %v5695_v42 = vadd.f32 %v5663_v29, %v12796_v22  ;;  %v6114_v32 = vpop.f32.mrf.mxu1 }
 0x511   : > { %v5844_v3 = vadd.f32 %v5812_v18, %v5695_v42  ;;  %10060 = vmatmul.msk.f32.gmra.mxu0 %vm380_vm1, %v13006_v2 }
 0x512   : > { %10077 = vmatmul.msk.f32.gmra.mxu1 %vm380_vm1, %v13008_v0 }
 0x513   : > { %v5993_v7 = vadd.f32 %v5961_v48, %v5844_v3  ;;  %10024 = vmatmul.msk.f32.gmra.mxu2 %vm380_vm1, %v14311_v47  ;;  %v13053_v3 = vld [vmem:[#allocation4 + $0x90] sm:$0xff] }
 0x514   : > { %10042 = vmatmul.msk.f32.gmra.mxu3 %vm380_vm1, %v12634_v39 }
 0x515   : > { %v13018_v49 = vadd.f32 %v6111_v46, %v5993_v7  ;;  %v13036_v46 = vld [vmem:[#allocation4 + $0x81] sm:$0xff] }
 0x516   : > { %v5666_v22 = vpop.f32.mrf.mxu2  ;;  %v5967_v37 = vpop.f32.mrf.mxu0 }
 0x517   : > { %v5815_v4 = vpop.f32.mrf.mxu3  ;;  %v5696_v10 = vadd.f32 %v5666_v22, %v12807_v5  ;;  %v6117_v15 = vpop.f32.mrf.mxu1 }
 0x519   : > { %v5845_v28 = vadd.f32 %v5815_v4, %v5696_v10  ;;  %10061 = vmatmul.msk.f32.gmra.mxu0 %vm380_vm1, %v13021_v34 }
 0x51a   : > { %10078 = vmatmul.msk.f32.gmra.mxu1 %vm380_vm1, %v13023_v54 }
 0x51b   : > { %v5994_v39 = vadd.f32 %v5964_v8, %v5845_v28  ;;  %10025 = vmatmul.msk.f32.gmra.mxu2 %vm380_vm1, %v14314_v40  ;;  %v13076_v28 = vld [vmem:[#allocation4 + $0x98] sm:$0xff] }
 0x51c   : > { %10043 = vmatmul.msk.f32.gmra.mxu3 %vm380_vm1, %v14313_v19 }
 0x51d   : > { %v13033_v5 = vadd.f32 %v6114_v32, %v5994_v39  ;;  %v13051_v32 = vld [vmem:[#allocation4 + $0x91] sm:$0xff] }
 0x51e   : > { %v5669_v47 = vpop.f32.mrf.mxu2  ;;  %v5970_v41 = vpop.f32.mrf.mxu0 }
 0x51f   : > { %v5818_v16 = vpop.f32.mrf.mxu3  ;;  %v5697_v55 = vadd.f32 %v5669_v47, %v12818_v58  ;;  %v6120_v48 = vpop.f32.mrf.mxu1 }
 0x521   : > { %v5846_v14 = vadd.f32 %v5818_v16, %v5697_v55  ;;  %10062 = vmatmul.msk.f32.gmra.mxu0 %vm380_vm1, %v13036_v46 }
 0x522   : > { %10079 = vmatmul.msk.f32.gmra.mxu1 %vm380_vm1, %v13038_v9 }
 0x523   : > { %v5995_v19 = vadd.f32 %v5967_v37, %v5846_v14  ;;  %10026 = vmatmul.msk.f32.gmra.mxu2 %vm380_vm1, %v14316_v6  ;;  %v10174_v6 = vld [vmem:[%s14236_s5 + $0x1c] sm:$0xf] }
 0x524   : > { %10044 = vmatmul.msk.f32.gmra.mxu3 %vm380_vm1, %v12675_v61 }
 0x525   : > { %v13048_v58 = vadd.f32 %v6117_v15, %v5995_v19  ;;  %10175 = vmatpush.msk.msrb.mxu3 %vm1136_vm2, %v10174_v6  ;;  %v13074_v15 = vld [vmem:[#allocation4 + $0x99] sm:$0xff]  ;;  %v13089_v19 = vld [vmem:[#allocation4 + $0xa9] sm:$0xff] }
 0x526   : > { %v5672_v40 = vpop.f32.mrf.mxu2  ;;  %v5973_v42 = vpop.f32.mrf.mxu0 }
 0x527   : > { %v5821_v29 = vpop.f32.mrf.mxu3  ;;  %v5698_v18 = vadd.f32 %v5672_v40, %v12836_v50  ;;  %v6123_v8 = vpop.f32.mrf.mxu1  ;;  %v10156_v50 = vld [vmem:[%s14236_s5 + $0x18] sm:$0xf]  ;;  %v6165_v40 = vld [vmem:[#allocation3 + $0x199] sm:$0xff] }
 0x528   : > { %10157 = vmatpush.msk.msrb.mxu2 %vm1136_vm2, %v10156_v50 }
 0x529   : > { %v5847_v7 = vadd.f32 %v5821_v29, %v5698_v18  ;;  %10063 = vmatmul.msk.f32.gmra.mxu0 %vm380_vm1, %v13051_v32  ;;  %v6314_v29 = vld [vmem:[#allocation3 + $0x19a] sm:$0xff] }
 0x52a   : > { %10080 = vmatmul.msk.f32.gmra.mxu1 %vm380_vm1, %v13053_v3  ;;  %v13091_v18 = vld [vmem:[#allocation4 + $0xa8] sm:$0xff] }
 0x52b   : > { %v5996_v61 = vadd.f32 %v5970_v41, %v5847_v7  ;;  %10027 = vmatmul.msk.f32.gmra.mxu2 %vm380_vm1, %v12858_v13 }
 0x52c   : > { %10045 = vmatmul.msk.f32.gmra.mxu3 %vm380_vm1, %v12853_v31 }
 0x52d   : > { %v13071_v22 = vadd.f32 %v6120_v48, %v5996_v61 }
 0x52e   : > { %v5675_v4 = vpop.f32.mrf.mxu2  ;;  %v5976_v37 = vpop.f32.mrf.mxu0 }
 0x52f   : > { %v5824_v10 = vpop.f32.mrf.mxu3  ;;  %v5699_v13 = vadd.f32 %v5675_v4, %v12850_v59  ;;  %v6126_v31 = vpop.f32.mrf.mxu1  ;;  %v13106_v4 = vld [vmem:[#allocation4 + $0xb1] sm:$0xff] }
 0x531   : > { %v5848_v39 = vadd.f32 %v5824_v10, %v5699_v13  ;;  %10064 = vmatmul.msk.f32.gmra.mxu0 %vm380_vm1, %v13074_v15  ;;  %v6166_v10 = vld [vmem:[#allocation3 + $0x1a1] sm:$0xff] }
 0x532   : > { %10081 = vmatmul.msk.f32.gmra.mxu1 %vm380_vm1, %v13076_v28  ;;  %v6315_v13 = vld [vmem:[#allocation3 + $0x1a2] sm:$0xff] }
 0x533   : > { %v5997_v47 = vadd.f32 %v5973_v42, %v5848_v39  ;;  %10028 = vmatmul.msk.f32.gmra.mxu2 %vm380_vm1, %v12875_v53  ;;  %v13108_v39 = vld [vmem:[#allocation4 + $0xb0] sm:$0xff] }
 0x534   : > { %10046 = vmatmul.msk.f32.gmra.mxu3 %vm380_vm1, %v12870_v17  ;;  %v10192_v17 = vld [vmem:[%s14236_s5 + $0x20] sm:$0xf] }
 0x535   : > { %v13086_v59 = vadd.f32 %v6123_v8, %v5997_v47  ;;  %10193 = vmatpush.msk.msrb.mxu0 %vm1136_vm2, %v10192_v17  ;;  %v7233_v17 = vld [vmem:[#allocation4 + $0x1a] sm:$0xff] }
 0x536   : > { %v5678_v16 = vpop.f32.mrf.mxu2  ;;  %v5979_v48 = vpop.f32.mrf.mxu0 }
 0x537   : > { %v5827_v55 = vpop.f32.mrf.mxu3  ;;  %v5700_v41 = vadd.f32 %v5678_v16, %v12867_v63  ;;  %v6129_v14 = vpop.f32.mrf.mxu1 }
 0x539   : > { %v5849_v42 = vadd.f32 %v5827_v55, %v5700_v41  ;;  %10065 = vmatmul.msk.f32.gmra.mxu0 %vm380_vm1, %v13089_v19 }
 0x53a   : > { %10082 = vmatmul.msk.f32.gmra.mxu1 %vm380_vm1, %v13091_v18 }
 0x53b   : > { %v5998_v63 = vadd.f32 %v5976_v37, %v5849_v42  ;;  %10029 = vmatmul.msk.f32.gmra.mxu2 %vm380_vm1, %v6165_v40  ;;  %v10210_v37 = vld [vmem:[%s14236_s5 + $0x4] sm:$0xf] }
 0x53c   : > { %10047 = vmatmul.msk.f32.gmra.mxu3 %vm380_vm1, %v6314_v29  ;;  %10211 = vmatpush.msk.msrb.mxu1 %vm1136_vm2, %v10210_v37  ;;  %v6783_v42 = vld [vmem:[#allocation4 + $0x2] sm:$0xff] }
 0x53d   : > { %v13103_v53 = vadd.f32 %v6126_v31, %v5998_v63 }
 0x53e   : > { %v5681_v8 = vpop.f32.mrf.mxu2  ;;  %v5982_v50 = vpop.f32.mrf.mxu0 }
 0x53f   : > { %v5830_v7 = vpop.f32.mrf.mxu3  ;;  %v5701_v61 = vadd.f32 %v5681_v8, %v12880_v1  ;;  %v6132_v6 = vpop.f32.mrf.mxu1 }
 0x541   : > { %v5850_v47 = vadd.f32 %v5830_v7, %v5701_v61  ;;  %10066 = vmatmul.msk.f32.gmra.mxu0 %vm380_vm1, %v13106_v4 }
 0x542   : > { %10083 = vmatmul.msk.f32.gmra.mxu1 %vm380_vm1, %v13108_v39 }
 0x543   : > { %v5999_v1 = vadd.f32 %v5979_v48, %v5850_v47  ;;  %10030 = vmatmul.msk.f32.gmra.mxu2 %vm380_vm1, %v6166_v10 }
 0x544   : > { %10048 = vmatmul.msk.f32.gmra.mxu3 %vm380_vm1, %v6315_v13  ;;  %v6784_v13 = vld [vmem:[#allocation4 + $0xa] sm:$0xff] }
 0x545   : > { %v13120_v31 = vadd.f32 %v6129_v14, %v5999_v1 }
 0x546   : > { %v5684_v16 = vpop.f32.mrf.mxu2  ;;  %v13123_v40 = vpop.f32.mrf.mxu0 }
 0x547   : > { %v5833_v55 = vpop.f32.mrf.mxu3  ;;  %v5702_v41 = vadd.f32 %v5684_v16, %v12889_v25  ;;  %v13125_v29 = vpop.f32.mrf.mxu1 }
 0x549   : > { %v5851_v63 = vadd.f32 %v5833_v55, %v5702_v41  ;;  %10122 = vmatmul.msk.f32.vlgmr.msra.gmra.mxu0 %vm380_vm1, %v12901_v12  ;;  %v7234_v12 = vld [vmem:[#allocation4 + $0x22] sm:$0xff] }
 0x54a   : > { %10140 = vmatmul.msk.f32.vlgmr.msra.gmra.mxu1 %vm380_vm1, %v7233_v17 }
 0x54b   : > { %v6000_v48 = vadd.f32 %v5982_v50, %v5851_v63  ;;  %10086 = vmatmul.msk.f32.vlgmr.msra.gmra.mxu2 %vm380_vm1, %v6783_v42  ;;  %v13163_v42 = vld [vmem:[#allocation4 + $0x32] sm:$0xff] }
 0x54c   : > { %10104 = vmatmul.msk.f32.vlgmr.msra.gmra.mxu3 %vm380_vm1, %v12903_v11  ;;  %v13146_v11 = vld [vmem:[%s14237_s6] ss:$0 sm:$0xff] }
 0x54d   : > { %v13133_v14 = vadd.f32 %v6132_v6, %v6000_v48 }
 0x54e   : > { %v6236_v25 = vpop.f32.mrf.mxu2  ;;  %v13136_v61 = vpop.f32.mrf.mxu0 }
 0x54f   : > { %v6385_v8 = vpop.f32.mrf.mxu3  ;;  %v6284_v7 = vadd.f32 %v6236_v25, %v12898_v52  ;;  %v13138_v10 = vpop.f32.mrf.mxu1  ;;  %v13155_v52 = vld [vmem:[%s14238_s7] ss:$0 sm:$0xff] }
 0x551   : > { %v6433_v47 = vadd.f32 %v6385_v8, %v6284_v7  ;;  %10123 = vmatmul.msk.f32.gmra.mxu0 %vm380_vm1, %v12916_v45 }
 0x552   : > { %10141 = vmatmul.msk.f32.gmra.mxu1 %vm380_vm1, %v7234_v12 }
 0x553   : > { %v6449_v50 = vmul.f32 %v13146_v11, %v6433_v47  ;;  %10087 = vmatmul.msk.f32.gmra.mxu2 %vm380_vm1, %v6784_v13  ;;  %v13180_v47 = vld [vmem:[#allocation4 + $0x3a] sm:$0xff] }
 0x554   : > { %10105 = vmatmul.msk.f32.gmra.mxu3 %vm380_vm1, %v12918_v24 }
 0x555   : > { %v6465_v45 = vadd.f32 %v13155_v52, %v6449_v50 }
 0x556   : > { %v6239_v6 = vpop.f32.mrf.mxu2  ;;  %v13159_v55 = vpop.f32.mrf.mxu0 }
 0x557   : > { %v6388_v37 = vpop.f32.mrf.mxu3  ;;  %v6481_v1 = vmax.f32 %v6465_v45, 0.0  ;;  %v6285_v16 = vadd.f32 %v6239_v6, %v12913_v21  ;;  %v13161_v41 = vpop.f32.mrf.mxu1 }
 0x559   : > { %6498 = vst.msk [vmem:[#allocation4 + $0xd9] sm:$0xff] %vm380_vm1, %v6481_v1  ;;  %v6434_v24 = vadd.f32 %v6388_v37, %v6285_v16  ;;  %10124 = vmatmul.msk.f32.gmra.mxu0 %vm380_vm1, %v12931_v20  ;;  %v13197_v16 = vld [vmem:[#allocation4 + $0x4a] sm:$0xff] }
 0x55a   : > { %10142 = vmatmul.msk.f32.gmra.mxu1 %vm380_vm1, %v13163_v42 }
 0x55b   : > { %v6450_v63 = vmul.f32 %v13146_v11, %v6434_v24  ;;  %10088 = vmatmul.msk.f32.gmra.mxu2 %vm380_vm1, %v7233_v17 }
 0x55c   : > { %10106 = vmatmul.msk.f32.gmra.mxu3 %vm380_vm1, %v12933_v51 }
 0x55d   : > { %v6466_v21 = vadd.f32 %v13155_v52, %v6450_v63 }
 0x55e   : > { %v6242_v48 = vpop.f32.mrf.mxu2  ;;  %v13176_v13 = vpop.f32.mrf.mxu0 }
 0x55f   : > { %v6391_v25 = vpop.f32.mrf.mxu3  ;;  %v6482_v8 = vmax.f32 %v6466_v21, 0.0  ;;  %v6286_v7 = vadd.f32 %v6242_v48, %v12928_v56  ;;  %v13178_v20 = vpop.f32.mrf.mxu1 }
 0x561   : > { %6499 = vst.msk [vmem:[#allocation4 + $0xe1] sm:$0xff] %vm380_vm1, %v6482_v8  ;;  %v6435_v50 = vadd.f32 %v6391_v25, %v6286_v7  ;;  %10125 = vmatmul.msk.f32.gmra.mxu0 %vm380_vm1, %v12946_v62  ;;  %v13215_v8 = vld [vmem:[#allocation4 + $0x52] sm:$0xff] }
 0x562   : > { %10143 = vmatmul.msk.f32.gmra.mxu1 %vm380_vm1, %v13180_v47 }
 0x563   : > { %v6451_v51 = vmul.f32 %v13146_v11, %v6435_v50  ;;  %10089 = vmatmul.msk.f32.gmra.mxu2 %vm380_vm1, %v7234_v12 }
 0x564   : > { %10107 = vmatmul.msk.f32.gmra.mxu3 %vm380_vm1, %v12948_v26 }
 0x565   : > { %v6467_v56 = vadd.f32 %v13155_v52, %v6451_v51 }
 0x566   : > { %v6245_v17 = vpop.f32.mrf.mxu2  ;;  %v13193_v1 = vpop.f32.mrf.mxu0 }
 0x567   : > { %v6394_v45 = vpop.f32.mrf.mxu3  ;;  %v6483_v6 = vmax.f32 %v6467_v56, 0.0  ;;  %v6287_v37 = vadd.f32 %v6245_v17, %v12943_v23  ;;  %v13195_v62 = vpop.f32.mrf.mxu1 }
 0x569   : > { %6500 = vst.msk [vmem:[#allocation4 + $0xf1] sm:$0xff] %vm380_vm1, %v6483_v6  ;;  %v6436_v24 = vadd.f32 %v6394_v45, %v6287_v37  ;;  %10126 = vmatmul.msk.f32.gmra.mxu0 %vm380_vm1, %v12961_v33  ;;  %v13233_v6 = vld [vmem:[#allocation4 + $0x62] sm:$0xff] }
 0x56a   : > { %10144 = vmatmul.msk.f32.gmra.mxu1 %vm380_vm1, %v13197_v16 }
 0x56b   : > { %v6452_v26 = vmul.f32 %v13146_v11, %v6436_v24  ;;  %10090 = vmatmul.msk.f32.gmra.mxu2 %vm380_vm1, %v13163_v42 }
 0x56c   : > { %10108 = vmatmul.msk.f32.gmra.mxu3 %vm380_vm1, %v12963_v60 }
 0x56d   : > { %v6468_v23 = vadd.f32 %v13155_v52, %v6452_v26 }
 0x56e   : > { %v6248_v12 = vpop.f32.mrf.mxu2  ;;  %v13211_v25 = vpop.f32.mrf.mxu0 }
 0x56f   : > { %v6397_v63 = vpop.f32.mrf.mxu3  ;;  %v6484_v21 = vmax.f32 %v6468_v23, 0.0  ;;  %v6288_v48 = vadd.f32 %v6248_v12, %v12958_v38  ;;  %v13213_v33 = vpop.f32.mrf.mxu1 }
 0x571   : > { %6501 = vst.msk [vmem:[#allocation4 + $0xf9] sm:$0xff] %vm380_vm1, %v6484_v21  ;;  %v6437_v7 = vadd.f32 %v6397_v63, %v6288_v48  ;;  %10127 = vmatmul.msk.f32.gmra.mxu0 %vm380_vm1, %v12976_v27  ;;  %v13251_v21 = vld [vmem:[#allocation4 + $0x6a] sm:$0xff] }
 0x572   : > { %10145 = vmatmul.msk.f32.gmra.mxu1 %vm380_vm1, %v13215_v8 }
 0x573   : > { %v6453_v60 = vmul.f32 %v13146_v11, %v6437_v7  ;;  %10091 = vmatmul.msk.f32.gmra.mxu2 %vm380_vm1, %v13180_v47 }
 0x574   : > { %10109 = vmatmul.msk.f32.gmra.mxu3 %vm380_vm1, %v12978_v43 }
 0x575   : > { %v6469_v38 = vadd.f32 %v13155_v52, %v6453_v60 }
 0x576   : > { %v6251_v50 = vpop.f32.mrf.mxu2  ;;  %v13229_v45 = vpop.f32.mrf.mxu0 }
 0x577   : > { %v6400_v51 = vpop.f32.mrf.mxu3  ;;  %v6485_v56 = vmax.f32 %v6469_v38, 0.0  ;;  %v6289_v17 = vadd.f32 %v6251_v50, %v12973_v35  ;;  %v13231_v27 = vpop.f32.mrf.mxu1 }
 0x579   : > { %6502 = vst.msk [vmem:[#allocation4 + $0x109] sm:$0xff] %vm380_vm1, %v6485_v56  ;;  %v6438_v37 = vadd.f32 %v6400_v51, %v6289_v17  ;;  %10128 = vmatmul.msk.f32.gmra.mxu0 %vm380_vm1, %v12991_v44  ;;  %v13269_v56 = vld [vmem:[#allocation4 + $0x7a] sm:$0xff] }
 0x57a   : > { %10146 = vmatmul.msk.f32.gmra.mxu1 %vm380_vm1, %v13233_v6 }
 0x57b   : > { %v6454_v43 = vmul.f32 %v13146_v11, %v6438_v37  ;;  %10092 = vmatmul.msk.f32.gmra.mxu2 %vm380_vm1, %v13197_v16 }
 0x57c   : > { %10110 = vmatmul.msk.f32.gmra.mxu3 %vm380_vm1, %v12993_v57 }
 0x57d   : > { %v6470_v35 = vadd.f32 %v13155_v52, %v6454_v43 }
 0x57e   : > { %v6254_v24 = vpop.f32.mrf.mxu2  ;;  %v13247_v63 = vpop.f32.mrf.mxu0 }
 0x57f   : > { %v6403_v26 = vpop.f32.mrf.mxu3  ;;  %v6486_v23 = vmax.f32 %v6470_v35, 0.0  ;;  %v6290_v12 = vadd.f32 %v6254_v24, %v12988_v36  ;;  %v13249_v44 = vpop.f32.mrf.mxu1 }
 0x581   : > { %6503 = vst.msk [vmem:[#allocation4 + $0x111] sm:$0xff] %vm380_vm1, %v6486_v23  ;;  %v6439_v48 = vadd.f32 %v6403_v26, %v6290_v12  ;;  %10129 = vmatmul.msk.f32.gmra.mxu0 %vm380_vm1, %v13006_v2  ;;  %v13287_v23 = vld [vmem:[#allocation4 + $0x82] sm:$0xff] }
 0x582   : > { %10147 = vmatmul.msk.f32.gmra.mxu1 %vm380_vm1, %v13251_v21 }
 0x583   : > { %v6455_v57 = vmul.f32 %v13146_v11, %v6439_v48  ;;  %10093 = vmatmul.msk.f32.gmra.mxu2 %vm380_vm1, %v13215_v8 }
 0x584   : > { %10111 = vmatmul.msk.f32.gmra.mxu3 %vm380_vm1, %v13008_v0 }
 0x585   : > { %v6471_v36 = vadd.f32 %v13155_v52, %v6455_v57 }
 0x586   : > { %v6257_v7 = vpop.f32.mrf.mxu2  ;;  %v13265_v51 = vpop.f32.mrf.mxu0 }
 0x587   : > { %v6406_v60 = vpop.f32.mrf.mxu3  ;;  %v6487_v38 = vmax.f32 %v6471_v36, 0.0  ;;  %v6291_v50 = vadd.f32 %v6257_v7, %v13003_v30  ;;  %v13267_v2 = vpop.f32.mrf.mxu1 }
 0x589   : > { %6504 = vst.msk [vmem:[#allocation4 + $0x121] sm:$0xff] %vm380_vm1, %v6487_v38  ;;  %v6440_v17 = vadd.f32 %v6406_v60, %v6291_v50  ;;  %10130 = vmatmul.msk.f32.gmra.mxu0 %vm380_vm1, %v13021_v34  ;;  %v13305_v38 = vld [vmem:[#allocation4 + $0x92] sm:$0xff] }
 0x58a   : > { %10148 = vmatmul.msk.f32.gmra.mxu1 %vm380_vm1, %v13269_v56 }
 0x58b   : > { %v6456_v0 = vmul.f32 %v13146_v11, %v6440_v17  ;;  %10094 = vmatmul.msk.f32.gmra.mxu2 %vm380_vm1, %v13233_v6 }
 0x58c   : > { %10112 = vmatmul.msk.f32.gmra.mxu3 %vm380_vm1, %v13023_v54 }
 0x58d   : > { %v6472_v30 = vadd.f32 %v13155_v52, %v6456_v0 }
 0x58e   : > { %v6260_v37 = vpop.f32.mrf.mxu2  ;;  %v13283_v26 = vpop.f32.mrf.mxu0 }
 0x58f   : > { %v6409_v43 = vpop.f32.mrf.mxu3  ;;  %v6488_v35 = vmax.f32 %v6472_v30, 0.0  ;;  %v6292_v24 = vadd.f32 %v6260_v37, %v13018_v49  ;;  %v13285_v34 = vpop.f32.mrf.mxu1 }
 0x591   : > { %6505 = vst.msk [vmem:[#allocation4 + $0x129] sm:$0xff] %vm380_vm1, %v6488_v35  ;;  %v6441_v12 = vadd.f32 %v6409_v43, %v6292_v24  ;;  %10131 = vmatmul.msk.f32.gmra.mxu0 %vm380_vm1, %v13036_v46  ;;  %v13323_v35 = vld [vmem:[#allocation4 + $0x9a] sm:$0xff] }
 0x592   : > { %10149 = vmatmul.msk.f32.gmra.mxu1 %vm380_vm1, %v13287_v23 }
 0x593   : > { %v6457_v54 = vmul.f32 %v13146_v11, %v6441_v12  ;;  %10095 = vmatmul.msk.f32.gmra.mxu2 %vm380_vm1, %v13251_v21 }
 0x594   : > { %10113 = vmatmul.msk.f32.gmra.mxu3 %vm380_vm1, %v13038_v9 }
 0x595   : > { %v6473_v49 = vadd.f32 %v13155_v52, %v6457_v54 }
 0x596   : > { %v6263_v48 = vpop.f32.mrf.mxu2  ;;  %v13301_v60 = vpop.f32.mrf.mxu0 }
 0x597   : > { %v6412_v57 = vpop.f32.mrf.mxu3  ;;  %v6489_v36 = vmax.f32 %v6473_v49, 0.0  ;;  %v6293_v7 = vadd.f32 %v6263_v48, %v13033_v5  ;;  %v13303_v46 = vpop.f32.mrf.mxu1 }
 0x599   : > { %6506 = vst.msk [vmem:[#allocation4 + $0x139] sm:$0xff] %vm380_vm1, %v6489_v36  ;;  %v6442_v50 = vadd.f32 %v6412_v57, %v6293_v7  ;;  %10132 = vmatmul.msk.f32.gmra.mxu0 %vm380_vm1, %v13051_v32  ;;  %v13341_v36 = vld [vmem:[#allocation4 + $0xaa] sm:$0xff] }
 0x59a   : > { %10150 = vmatmul.msk.f32.gmra.mxu1 %vm380_vm1, %v13305_v38 }
 0x59b   : > { %v6458_v9 = vmul.f32 %v13146_v11, %v6442_v50  ;;  %10096 = vmatmul.msk.f32.gmra.mxu2 %vm380_vm1, %v13269_v56 }
 0x59c   : > { %10114 = vmatmul.msk.f32.gmra.mxu3 %vm380_vm1, %v13053_v3 }
 0x59d   : > { %v6474_v5 = vadd.f32 %v13155_v52, %v6458_v9 }
 0x59e   : > { %v6266_v17 = vpop.f32.mrf.mxu2  ;;  %v13319_v43 = vpop.f32.mrf.mxu0 }
 0x59f   : > { %v6415_v0 = vpop.f32.mrf.mxu3  ;;  %v6490_v30 = vmax.f32 %v6474_v5, 0.0  ;;  %v6294_v37 = vadd.f32 %v6266_v17, %v13048_v58  ;;  %v13321_v32 = vpop.f32.mrf.mxu1 }
 0x5a1   : > { %6507 = vst.msk [vmem:[#allocation4 + $0x141] sm:$0xff] %vm380_vm1, %v6490_v30  ;;  %v6443_v24 = vadd.f32 %v6415_v0, %v6294_v37  ;;  %10133 = vmatmul.msk.f32.gmra.mxu0 %vm380_vm1, %v13074_v15  ;;  %v13359_v30 = vld [vmem:[#allocation4 + $0xb2] sm:$0xff] }
 0x5a2   : > { %10151 = vmatmul.msk.f32.gmra.mxu1 %vm380_vm1, %v13323_v35 }
 0x5a3   : > { %v6459_v3 = vmul.f32 %v13146_v11, %v6443_v24  ;;  %10097 = vmatmul.msk.f32.gmra.mxu2 %vm380_vm1, %v13287_v23  ;;  %v7921_v24 = vld [vmem:[%s14236_s5] sm:$0xf] }
 0x5a4   : > { %10115 = vmatmul.msk.f32.gmra.mxu3 %vm380_vm1, %v13076_v28  ;;  %10228 = vmatpush.msk.msra.mxu2 %vm1136_vm2, %v7921_v24 }
 0x5a5   : > { %v6475_v58 = vadd.f32 %v13155_v52, %v6459_v3 }
 0x5a6   : > { %v6269_v12 = vpop.f32.mrf.mxu2  ;;  %v13337_v57 = vpop.f32.mrf.mxu0 }
 0x5a7   : > { %v6418_v54 = vpop.f32.mrf.mxu3  ;;  %v6491_v49 = vmax.f32 %v6475_v58, 0.0  ;;  %v6295_v48 = vadd.f32 %v6269_v12, %v13071_v22  ;;  %v13339_v15 = vpop.f32.mrf.mxu1 }
 0x5a9   : > { %6508 = vst.msk [vmem:[#allocation4 + $0x151] sm:$0xff] %vm380_vm1, %v6491_v49  ;;  %v6444_v7 = vadd.f32 %v6418_v54, %v6295_v48  ;;  %10134 = vmatmul.msk.f32.gmra.mxu0 %vm380_vm1, %v13089_v19 }
 0x5aa   : > { %10152 = vmatmul.msk.f32.gmra.mxu1 %vm380_vm1, %v13341_v36 }
 0x5ab   : > { %v6460_v28 = vmul.f32 %v13146_v11, %v6444_v7  ;;  %10098 = vmatmul.msk.f32.gmra.mxu2 %vm380_vm1, %v13305_v38 }
 0x5ac   : > { %10116 = vmatmul.msk.f32.gmra.mxu3 %vm380_vm1, %v13091_v18 }
 0x5ad   : > { %v6476_v22 = vadd.f32 %v13155_v52, %v6460_v28 }
 0x5ae   : > { %v6272_v50 = vpop.f32.mrf.mxu2  ;;  %v13355_v0 = vpop.f32.mrf.mxu0 }
 0x5af   : > { %v6421_v9 = vpop.f32.mrf.mxu3  ;;  %v6492_v5 = vmax.f32 %v6476_v22, 0.0  ;;  %v6296_v17 = vadd.f32 %v6272_v50, %v13086_v59  ;;  %v13357_v19 = vpop.f32.mrf.mxu1  ;;  %v10245_v59 = vld [vmem:[%s14236_s5 + $0x8] sm:$0xf] }
 0x5b0   : > { %10246 = vmatpush.msk.msra.mxu3 %vm1136_vm2, %v10245_v59  ;;  %v13389_v22 = vld [vmem:[#allocation4 + $0xc1] sm:$0xff] }
 0x5b1   : > { %6509 = vst.msk [vmem:[#allocation4 + $0x159] sm:$0xff] %vm380_vm1, %v6492_v5  ;;  %v6445_v37 = vadd.f32 %v6421_v9, %v6296_v17  ;;  %10135 = vmatmul.msk.f32.gmra.mxu0 %vm380_vm1, %v13106_v4  ;;  %v10263_v4 = vld [vmem:[%s14236_s5 + $0xc] sm:$0xf]  ;;  %v13391_v50 = vld [vmem:[#allocation4 + $0xc2] sm:$0xff]  ;;  %v10281_v17 = vld [vmem:[%s14236_s5 + $0x10] sm:$0xf] }
 0x5b2   : > { %10153 = vmatmul.msk.f32.gmra.mxu1 %vm380_vm1, %v13359_v30  ;;  %10264 = vmatpush.msk.msra.mxu0 %vm1136_vm2, %v10263_v4  ;;  %v13398_v5 = vld [vmem:[#allocation4 + $0xc0] sm:$0xff] }
 0x5b3   : > { %v6461_v3 = vmul.f32 %v13146_v11, %v6445_v37  ;;  %10099 = vmatmul.msk.f32.gmra.mxu2 %vm380_vm1, %v13323_v35  ;;  %10282 = vmatpush.msk.msra.mxu1 %vm1136_vm2, %v10281_v17 }
 0x5b4   : > { %10117 = vmatmul.msk.f32.gmra.mxu3 %vm380_vm1, %v13108_v39 }
 0x5b5   : > { %v6477_v58 = vadd.f32 %v13155_v52, %v6461_v3 }
 0x5b6   : > { %v6275_v12 = vpop.f32.mrf.mxu2  ;;  %v13385_v7 = vpop.f32.mrf.mxu0 }
 0x5b7   : > { %v6424_v54 = vpop.f32.mrf.mxu3  ;;  %v6493_v49 = vmax.f32 %v6477_v58, 0.0  ;;  %v6297_v48 = vadd.f32 %v6275_v12, %v13103_v53  ;;  %14318 = vst [vmem:[#allocation6_spill] sm:$0xff] %v13385_v7  ;;  %v13387_v28 = vpop.f32.mrf.mxu1 }
 0x5b8   : > { %14319 = vst [vmem:[#allocation10_spill] sm:$0xff] %v13387_v28 }
 0x5b9   : > { %6510 = vst.msk [vmem:[#allocation4 + $0x169] sm:$0xff] %vm380_vm1, %v6493_v49  ;;  %v6446_v9 = vadd.f32 %v6424_v54, %v6297_v48  ;;  %10136 = vmatmul.msk.f32.gmra.mxu0 %vm380_vm1, %v13389_v22  ;;  %v13415_v54 = vld [vmem:[#allocation4 + $0xc9] sm:$0xff] }
 0x5ba   : > { %10154 = vmatmul.msk.f32.gmra.mxu1 %vm380_vm1, %v13391_v50  ;;  %v13417_v49 = vld [vmem:[#allocation4 + $0xca] sm:$0xff] }
 0x5bb   : > { %v6462_v53 = vmul.f32 %v13146_v11, %v6446_v9  ;;  %10100 = vmatmul.msk.f32.gmra.mxu2 %vm380_vm1, %v13341_v36  ;;  %v13424_v9 = vld [vmem:[#allocation4 + $0xc8] sm:$0xff] }
 0x5bc   : > { %10118 = vmatmul.msk.f32.gmra.mxu3 %vm380_vm1, %v13398_v5 }
 0x5bd   : > { %v6478_v37 = vadd.f32 %v13155_v52, %v6462_v53 }
 0x5be   : > { %v6278_v24 = vpop.f32.mrf.mxu2  ;;  %v13411_v58 = vpop.f32.mrf.mxu0 }
 0x5bf   : > { %v6427_v59 = vpop.f32.mrf.mxu3  ;;  %v6494_v3 = vmax.f32 %v6478_v37, 0.0  ;;  %v6298_v4 = vadd.f32 %v6278_v24, %v13120_v31  ;;  %14320 = vst [vmem:[#allocation7_spill] sm:$0xff] %v13411_v58  ;;  %v13413_v12 = vpop.f32.mrf.mxu1  ;;  %v7534_v58 = vld [vmem:[#allocation4 + $0x31] sm:$0xff] }
 0x5c0   : > { %14321 = vst [vmem:[#allocation5_spill] sm:$0xff] %v13413_v12 }
 0x5c1   : > { %6511 = vst.msk [vmem:[#allocation4 + $0x171] sm:$0xff] %vm380_vm1, %v6494_v3  ;;  %v6447_v48 = vadd.f32 %v6427_v59, %v6298_v4  ;;  %10137 = vmatmul.msk.f32.gmra.mxu0 %vm380_vm1, %v13415_v54 }
 0x5c2   : > { %10155 = vmatmul.msk.f32.gmra.mxu1 %vm380_vm1, %v13417_v49 }
 0x5c3   : > { %v6463_v31 = vmul.f32 %v13146_v11, %v6447_v48  ;;  %10101 = vmatmul.msk.f32.gmra.mxu2 %vm380_vm1, %v13359_v30  ;;  %v7384_v48 = vld [vmem:[#allocation4 + $0x30] sm:$0xff] }
 0x5c4   : > { %10119 = vmatmul.msk.f32.gmra.mxu3 %vm380_vm1, %v13424_v9 }
 0x5c5   : > { %v6479_v53 = vadd.f32 %v13155_v52, %v6463_v31 }
 0x5c6   : > { %v6281_v17 = vpop.f32.mrf.mxu2  ;;  %v7169_v3 = vpop.f32.mrf.mxu0 }
 0x5c7   : > { %v6430_v37 = vpop.f32.mrf.mxu3  ;;  %v6495_v24 = vmax.f32 %v6479_v53, 0.0  ;;  %v6299_v59 = vadd.f32 %v6281_v17, %v13133_v14  ;;  %v7319_v4 = vpop.f32.mrf.mxu1  ;;  %v6736_v14 = vadd.f32 %v13125_v29, %v13123_v40  ;;  %v6739_v29 = vadd.f32 %v13138_v10, %v13136_v61 }
 0x5c8   : > { %v6742_v61 = vadd.f32 %v13161_v41, %v13159_v55  ;;  %v6745_v55 = vadd.f32 %v13178_v20, %v13176_v13  ;;  %v6748_v13 = vadd.f32 %v13195_v62, %v13193_v1  ;;  %v6751_v1 = vadd.f32 %v13213_v33, %v13211_v25 }
 0x5c9   : > { %6512 = vst.msk [vmem:[#allocation4 + $0x181] sm:$0xff] %vm380_vm1, %v6495_v24  ;;  %v6448_v12 = vadd.f32 %v6430_v37, %v6299_v59  ;;  %10194 = vmatmul.msk.f32.vlgmr.msrb.gmra.mxu0 %vm380_vm1, %v13163_v42  ;;  %v6754_v25 = vadd.f32 %v13231_v27, %v13229_v45  ;;  %v6757_v45 = vadd.f32 %v13249_v44, %v13247_v63 }
 0x5ca   : > { %10212 = vmatmul.msk.f32.vlgmr.msrb.gmra.mxu1 %vm380_vm1, %v13389_v22  ;;  %v6760_v63 = vadd.f32 %v13267_v2, %v13265_v51  ;;  %v6763_v51 = vadd.f32 %v13285_v34, %v13283_v26  ;;  %v6766_v26 = vadd.f32 %v13303_v46, %v13301_v60  ;;  %v6769_v60 = vadd.f32 %v13321_v32, %v13319_v43  ;;  %v10299_v43 = vld [vmem:[%s14236_s5 + $0x14] sm:$0xf]  ;;  %v10317_v32 = vld [vmem:[%s14236_s5 + $0x18] sm:$0xf] }
 0x5cb   : > { %v6464_v31 = vmul.f32 %v13146_v11, %v6448_v12  ;;  %10158 = vmatmul.msk.f32.vlgmr.msrb.gmra.mxu2 %vm380_vm1, %v7384_v48  ;;  %v7385_v11 = vld [vmem:[#allocation4 + $0x38] sm:$0xff] }
 0x5cc   : > { %10176 = vmatmul.msk.f32.vlgmr.msrb.gmra.mxu3 %vm380_vm1, %v7534_v58  ;;  %v7535_v58 = vld [vmem:[#allocation4 + $0x39] sm:$0xff]  ;;  %10300 = vmatpush.msk.msrb.mxu2 %vm1136_vm2, %v10299_v43 }
 0x5cd   : > { %v6480_v53 = vadd.f32 %v13155_v52, %v6464_v31  ;;  %10318 = vmatpush.msk.msrb.mxu3 %vm1136_vm2, %v10317_v32  ;;  %v10353_v32 = vld [vmem:[%s14236_s5 + $0x20] sm:$0xf] }
 0x5ce   : > { %v6869_v17 = vpop.f32.mrf.mxu2  ;;  %v7172_v59 = vpop.f32.mrf.mxu0  ;;  %10354 = vmatpush.msk.msrb.mxu1 %vm1136_vm2, %v10353_v32 }
 0x5cf   : > { %v7019_v37 = vpop.f32.mrf.mxu3  ;;  %v6496_v24 = vmax.f32 %v6480_v53, 0.0  ;;  %v6917_v42 = vadd.f32 %v6869_v17, %v6736_v14  ;;  %v7322_v28 = vpop.f32.mrf.mxu1  ;;  %v13455_v53 = vld [vmem:[#allocation4 + $0xd9] sm:$0xff] }
 0x5d1   : > { %6513 = vst.msk [vmem:[#allocation4 + $0x189] sm:$0xff] %vm380_vm1, %v6496_v24  ;;  %v7067_v7 = vadd.f32 %v7019_v37, %v6917_v42  ;;  %10195 = vmatmul.msk.f32.gmra.mxu0 %vm380_vm1, %v13180_v47 }
 0x5d2   : > { %10213 = vmatmul.msk.f32.gmra.mxu1 %vm380_vm1, %v13415_v54 }
 0x5d3   : > { %v7217_v40 = vadd.f32 %v7169_v3, %v7067_v7  ;;  %10159 = vmatmul.msk.f32.gmra.mxu2 %vm380_vm1, %v7385_v11  ;;  %v7386_v7 = vld [vmem:[#allocation4 + $0x48] sm:$0xff] }
 0x5d4   : > { %10177 = vmatmul.msk.f32.gmra.mxu3 %vm380_vm1, %v7535_v58  ;;  %v7536_v3 = vld [vmem:[#allocation4 + $0x49] sm:$0xff]  ;;  %v13467_v58 = vld [vmem:[#allocation4 + $0xe1] sm:$0xff] }
 0x5d5   : > { %v13453_v52 = vadd.f32 %v7319_v4, %v7217_v40 }
 0x5d6   : > { %v6872_v12 = vpop.f32.mrf.mxu2  ;;  %v7175_v14 = vpop.f32.mrf.mxu0 }
 0x5d7   : > { %v7022_v48 = vpop.f32.mrf.mxu3  ;;  %v6918_v31 = vadd.f32 %v6872_v12, %v6739_v29  ;;  %v7325_v47 = vpop.f32.mrf.mxu1  ;;  %v7537_v29 = vld [vmem:[#allocation4 + $0x51] sm:$0xff] }
 0x5d9   : > { %v7068_v17 = vadd.f32 %v7022_v48, %v6918_v31  ;;  %10196 = vmatmul.msk.f32.gmra.mxu0 %vm380_vm1, %v13197_v16 }
 0x5da   : > { %10214 = vmatmul.msk.f32.gmra.mxu1 %vm380_vm1, %v13455_v53 }
 0x5db   : > { %v7218_v37 = vadd.f32 %v7172_v59, %v7068_v17  ;;  %10160 = vmatmul.msk.f32.gmra.mxu2 %vm380_vm1, %v7386_v7  ;;  %v7387_v59 = vld [vmem:[#allocation4 + $0x50] sm:$0xff] }
 0x5dc   : > { %10178 = vmatmul.msk.f32.gmra.mxu3 %vm380_vm1, %v7536_v3  ;;  %v13479_v7 = vld [vmem:[#allocation4 + $0xf1] sm:$0xff] }
 0x5dd   : > { %v13465_v10 = vadd.f32 %v7322_v28, %v7218_v37  ;;  %v7538_v37 = vld [vmem:[#allocation4 + $0x61] sm:$0xff] }
 0x5de   : > { %v6875_v4 = vpop.f32.mrf.mxu2  ;;  %v7178_v11 = vpop.f32.mrf.mxu0 }
 0x5df   : > { %v7025_v24 = vpop.f32.mrf.mxu3  ;;  %v6919_v42 = vadd.f32 %v6875_v4, %v6742_v61  ;;  %v7328_v16 = vpop.f32.mrf.mxu1 }
 0x5e1   : > { %v7069_v40 = vadd.f32 %v7025_v24, %v6919_v42  ;;  %10197 = vmatmul.msk.f32.gmra.mxu0 %vm380_vm1, %v13215_v8 }
 0x5e2   : > { %10215 = vmatmul.msk.f32.gmra.mxu1 %vm380_vm1, %v13467_v58 }
 0x5e3   : > { %v7219_v12 = vadd.f32 %v7175_v14, %v7069_v40  ;;  %10161 = vmatmul.msk.f32.gmra.mxu2 %vm380_vm1, %v7387_v59  ;;  %v7388_v14 = vld [vmem:[#allocation4 + $0x60] sm:$0xff] }
 0x5e4   : > { %10179 = vmatmul.msk.f32.gmra.mxu3 %vm380_vm1, %v7537_v29  ;;  %v13491_v40 = vld [vmem:[#allocation4 + $0xf9] sm:$0xff]  ;;  %v7539_v29 = vld [vmem:[#allocation4 + $0x69] sm:$0xff] }
 0x5e5   : > { %v13477_v41 = vadd.f32 %v7325_v47, %v7219_v12 }
 0x5e6   : > { %v6878_v28 = vpop.f32.mrf.mxu2  ;;  %v7181_v17 = vpop.f32.mrf.mxu0 }
 0x5e7   : > { %v7028_v48 = vpop.f32.mrf.mxu3  ;;  %v6920_v31 = vadd.f32 %v6878_v28, %v6745_v55  ;;  %v7331_v8 = vpop.f32.mrf.mxu1 }
 0x5e9   : > { %v7070_v3 = vadd.f32 %v7028_v48, %v6920_v31  ;;  %10198 = vmatmul.msk.f32.gmra.mxu0 %vm380_vm1, %v13233_v6  ;;  %v13503_v31 = vld [vmem:[#allocation4 + $0x109] sm:$0xff] }
 0x5ea   : > { %10216 = vmatmul.msk.f32.gmra.mxu1 %vm380_vm1, %v13479_v7 }
 0x5eb   : > { %v7220_v61 = vadd.f32 %v7178_v11, %v7070_v3  ;;  %10162 = vmatmul.msk.f32.gmra.mxu2 %vm380_vm1, %v7388_v14  ;;  %v7389_v11 = vld [vmem:[#allocation4 + $0x68] sm:$0xff]  ;;  %v7540_v14 = vld [vmem:[#allocation4 + $0x79] sm:$0xff] }
 0x5ec   : > { %10180 = vmatmul.msk.f32.gmra.mxu3 %vm380_vm1, %v7538_v37 }
 0x5ed   : > { %v13489_v20 = vadd.f32 %v7328_v16, %v7220_v61 }
 0x5ee   : > { %v6881_v47 = vpop.f32.mrf.mxu2  ;;  %v7184_v42 = vpop.f32.mrf.mxu0 }
 0x5ef   : > { %v7031_v4 = vpop.f32.mrf.mxu3  ;;  %v6921_v24 = vadd.f32 %v6881_v47, %v6748_v13  ;;  %v7334_v6 = vpop.f32.mrf.mxu1 }
 0x5f1   : > { %v7071_v59 = vadd.f32 %v7031_v4, %v6921_v24  ;;  %10199 = vmatmul.msk.f32.gmra.mxu0 %vm380_vm1, %v13251_v21  ;;  %v13515_v4 = vld [vmem:[#allocation4 + $0x111] sm:$0xff] }
 0x5f2   : > { %10217 = vmatmul.msk.f32.gmra.mxu1 %vm380_vm1, %v13491_v40 }
 0x5f3   : > { %v7221_v12 = vadd.f32 %v7181_v17, %v7071_v59  ;;  %10163 = vmatmul.msk.f32.gmra.mxu2 %vm380_vm1, %v7389_v11  ;;  %v7390_v17 = vld [vmem:[#allocation4 + $0x78] sm:$0xff]  ;;  %v7541_v59 = vld [vmem:[#allocation4 + $0x81] sm:$0xff] }
 0x5f4   : > { %10181 = vmatmul.msk.f32.gmra.mxu3 %vm380_vm1, %v7539_v29 }
 0x5f5   : > { %v13501_v62 = vadd.f32 %v7331_v8, %v7221_v12 }
 0x5f6   : > { %v6884_v16 = vpop.f32.mrf.mxu2  ;;  %v7187_v48 = vpop.f32.mrf.mxu0 }
 0x5f7   : > { %v7034_v55 = vpop.f32.mrf.mxu3  ;;  %v6922_v28 = vadd.f32 %v6884_v16, %v6751_v1  ;;  %v7337_v21 = vpop.f32.mrf.mxu1  ;;  %v13527_v16 = vld [vmem:[#allocation4 + $0x121] sm:$0xff] }
 0x5f9   : > { %v7072_v3 = vadd.f32 %v7034_v55, %v6922_v28  ;;  %10200 = vmatmul.msk.f32.gmra.mxu0 %vm380_vm1, %v13269_v56  ;;  %v7392_v28 = vld [vmem:[#allocation4 + $0x90] sm:$0xff] }
 0x5fa   : > { %10218 = vmatmul.msk.f32.gmra.mxu1 %vm380_vm1, %v13503_v31 }
 0x5fb   : > { %v7222_v37 = vadd.f32 %v7184_v42, %v7072_v3  ;;  %10164 = vmatmul.msk.f32.gmra.mxu2 %vm380_vm1, %v7390_v17  ;;  %v7391_v42 = vld [vmem:[#allocation4 + $0x80] sm:$0xff] }
 0x5fc   : > { %10182 = vmatmul.msk.f32.gmra.mxu3 %vm380_vm1, %v7540_v14 }
 0x5fd   : > { %v13513_v33 = vadd.f32 %v7334_v6, %v7222_v37 }
 0x5fe   : > { %v6887_v8 = vpop.f32.mrf.mxu2  ;;  %v7190_v47 = vpop.f32.mrf.mxu0 }
 0x5ff   : > { %v7037_v61 = vpop.f32.mrf.mxu3  ;;  %v6923_v13 = vadd.f32 %v6887_v8, %v6754_v25  ;;  %v7340_v56 = vpop.f32.mrf.mxu1  ;;  %v13539_v25 = vld [vmem:[#allocation4 + $0x129] sm:$0xff] }
 0x601   : > { %v7073_v24 = vadd.f32 %v7037_v61, %v6923_v13  ;;  %10201 = vmatmul.msk.f32.gmra.mxu0 %vm380_vm1, %v13287_v23  ;;  %v7393_v61 = vld [vmem:[#allocation4 + $0x98] sm:$0xff] }
 0x602   : > { %10219 = vmatmul.msk.f32.gmra.mxu1 %vm380_vm1, %v13515_v4  ;;  %v7543_v13 = vld [vmem:[#allocation4 + $0x99] sm:$0xff] }
 0x603   : > { %v7223_v11 = vadd.f32 %v7187_v48, %v7073_v24  ;;  %10165 = vmatmul.msk.f32.gmra.mxu2 %vm380_vm1, %v7391_v42  ;;  %v7542_v48 = vld [vmem:[#allocation4 + $0x91] sm:$0xff] }
 0x604   : > { %10183 = vmatmul.msk.f32.gmra.mxu3 %vm380_vm1, %v7541_v59 }
 0x605   : > { %v13525_v27 = vadd.f32 %v7337_v21, %v7223_v11  ;;  %v13551_v11 = vld [vmem:[#allocation4 + $0x139] sm:$0xff] }
 0x606   : > { %v6890_v6 = vpop.f32.mrf.mxu2  ;;  %v7193_v1 = vpop.f32.mrf.mxu0 }
 0x607   : > { %v7040_v29 = vpop.f32.mrf.mxu3  ;;  %v6924_v12 = vadd.f32 %v6890_v6, %v6757_v45  ;;  %v7343_v23 = vpop.f32.mrf.mxu1  ;;  %v7544_v6 = vld [vmem:[#allocation4 + $0xa9] sm:$0xff] }
 0x609   : > { %v7074_v55 = vadd.f32 %v7040_v29, %v6924_v12  ;;  %10202 = vmatmul.msk.f32.gmra.mxu0 %vm380_vm1, %v13305_v38 }
 0x60a   : > { %10220 = vmatmul.msk.f32.gmra.mxu1 %vm380_vm1, %v13527_v16 }
 0x60b   : > { %v7224_v3 = vadd.f32 %v7190_v47, %v7074_v55  ;;  %10166 = vmatmul.msk.f32.gmra.mxu2 %vm380_vm1, %v7392_v28  ;;  %v13564_v28 = vld [vmem:[#allocation4 + $0x141] sm:$0xff] }
 0x60c   : > { %10184 = vmatmul.msk.f32.gmra.mxu3 %vm380_vm1, %v7542_v48 }
 0x60d   : > { %v13537_v44 = vadd.f32 %v7340_v56, %v7224_v3 }
 0x60e   : > { %v6893_v21 = vpop.f32.mrf.mxu2  ;;  %v7196_v37 = vpop.f32.mrf.mxu0 }
 0x60f   : > { %v7043_v17 = vpop.f32.mrf.mxu3  ;;  %v6925_v14 = vadd.f32 %v6893_v21, %v6760_v63  ;;  %v7346_v38 = vpop.f32.mrf.mxu1 }
 0x611   : > { %v7075_v8 = vadd.f32 %v7043_v17, %v6925_v14  ;;  %10203 = vmatmul.msk.f32.gmra.mxu0 %vm380_vm1, %v13323_v35 }
 0x612   : > { %10221 = vmatmul.msk.f32.gmra.mxu1 %vm380_vm1, %v13539_v25 }
 0x613   : > { %v7225_v47 = vadd.f32 %v7193_v1, %v7075_v8  ;;  %10167 = vmatmul.msk.f32.gmra.mxu2 %vm380_vm1, %v7393_v61  ;;  %v6772_v8 = vadd.f32 %v13339_v15, %v13337_v57  ;;  %v6775_v57 = vadd.f32 %v13357_v19, %v13355_v0  ;;  %v10335_v19 = vld [vmem:[%s14236_s5 + $0x1c] sm:$0xf] }
 0x614   : > { %10185 = vmatmul.msk.f32.gmra.mxu3 %vm380_vm1, %v7543_v13  ;;  %10336 = vmatpush.msk.msrb.mxu0 %vm1136_vm2, %v10335_v19 }
 0x615   : > { %v13549_v2 = vadd.f32 %v7343_v23, %v7225_v47 }
 0x616   : > { %v6896_v56 = vpop.f32.mrf.mxu2  ;;  %v7199_v59 = vpop.f32.mrf.mxu0 }
 0x617   : > { %v7046_v24 = vpop.f32.mrf.mxu3  ;;  %v6926_v42 = vadd.f32 %v6896_v56, %v6763_v51  ;;  %v7349_v35 = vpop.f32.mrf.mxu1 }
 0x619   : > { %v7076_v45 = vadd.f32 %v7046_v24, %v6926_v42  ;;  %10204 = vmatmul.msk.f32.gmra.mxu0 %vm380_vm1, %v13341_v36  ;;  %v13599_v24 = vld [vmem:[#allocation4 + $0x159] sm:$0xff] }
 0x61a   : > { %10222 = vmatmul.msk.f32.gmra.mxu1 %vm380_vm1, %v13551_v11 }
 0x61b   : > { %v7226_v29 = vadd.f32 %v7196_v37, %v7076_v45  ;;  %10168 = vmatmul.msk.f32.gmra.mxu2 %vm380_vm1, %v13091_v18  ;;  %v7545_v18 = vld [vmem:[#allocation4 + $0xb1] sm:$0xff] }
 0x61c   : > { %10186 = vmatmul.msk.f32.gmra.mxu3 %vm380_vm1, %v7544_v6  ;;  %v13577_v37 = vld [vmem:[#allocation4 + $0x151] sm:$0xff] }
 0x61d   : > { %v13562_v34 = vadd.f32 %v7346_v38, %v7226_v29 }
 0x61e   : > { %v6899_v12 = vpop.f32.mrf.mxu2  ;;  %v7202_v55 = vpop.f32.mrf.mxu0 }
 0x61f   : > { %v7049_v1 = vpop.f32.mrf.mxu3  ;;  %v6927_v23 = vadd.f32 %v6899_v12, %v6766_v26  ;;  %v7352_v36 = vpop.f32.mrf.mxu1  ;;  %v13613_v12 = vld [vmem:[#allocation4 + $0xda] sm:$0xff] }
 0x621   : > { %v7077_v48 = vadd.f32 %v7049_v1, %v6927_v23  ;;  %10205 = vmatmul.msk.f32.gmra.mxu0 %vm380_vm1, %v13359_v30  ;;  %v13615_v1 = vld [vmem:[#allocation4 + $0x169] sm:$0xff] }
 0x622   : > { %10223 = vmatmul.msk.f32.gmra.mxu1 %vm380_vm1, %v13564_v28 }
 0x623   : > { %v7227_v3 = vadd.f32 %v7199_v59, %v7077_v48  ;;  %10169 = vmatmul.msk.f32.gmra.mxu2 %vm380_vm1, %v13108_v39 }
 0x624   : > { %10187 = vmatmul.msk.f32.gmra.mxu3 %vm380_vm1, %v7545_v18 }
 0x625   : > { %v13575_v46 = vadd.f32 %v7349_v35, %v7227_v3 }
 0x626   : > { %v6902_v63 = vpop.f32.mrf.mxu2  ;;  %v7205_v14 = vpop.f32.mrf.mxu0 }
 0x627   : > { %v7052_v21 = vpop.f32.mrf.mxu3  ;;  %v6928_v17 = vadd.f32 %v6902_v63, %v6769_v60  ;;  %v7355_v30 = vpop.f32.mrf.mxu1 }
 0x629   : > { %v7078_v38 = vadd.f32 %v7052_v21, %v6928_v17  ;;  %10206 = vmatmul.msk.f32.gmra.mxu0 %vm380_vm1, %v13391_v50 }
 0x62a   : > { %10224 = vmatmul.msk.f32.gmra.mxu1 %vm380_vm1, %v13577_v37 }
 0x62b   : > { %v7228_v39 = vadd.f32 %v7202_v55, %v7078_v38  ;;  %10170 = vmatmul.msk.f32.gmra.mxu2 %vm380_vm1, %v13398_v5  ;;  %v14322_v55 = vld [vmem:[#allocation6_spill] sm:$0xff] }
 0x62c   : > { %10188 = vmatmul.msk.f32.gmra.mxu3 %vm380_vm1, %v13389_v22 }
 0x62d   : > { %v13597_v61 = vadd.f32 %v7352_v36, %v7228_v39  ;;  %v14323_v36 = vld [vmem:[#allocation10_spill] sm:$0xff]  ;;  %v13643_v39 = vld [vmem:[#allocation4 + $0xe0] sm:$0xff] }
 0x62e   : > { %v6905_v13 = vpop.f32.mrf.mxu2  ;;  %v7208_v51 = vpop.f32.mrf.mxu0  ;;  %v6778_v48 = vadd.f32 %v14323_v36, %v14322_v55 }
 0x62f   : > { %v7055_v47 = vpop.f32.mrf.mxu3  ;;  %v6929_v22 = vadd.f32 %v6905_v13, %v6772_v8  ;;  %v7358_v56 = vpop.f32.mrf.mxu1  ;;  %v14325_v8 = vld [vmem:[#allocation7_spill] sm:$0xff]  ;;  %v14326_v13 = vld [vmem:[#allocation5_spill] sm:$0xff] }
 0x631   : > { %v7079_v42 = vadd.f32 %v7055_v47, %v6929_v22  ;;  %10207 = vmatmul.msk.f32.gmra.mxu0 %vm380_vm1, %v13417_v49  ;;  %v6781_v47 = vadd.f32 %v14326_v13, %v14325_v8 }
 0x632   : > { %10225 = vmatmul.msk.f32.gmra.mxu1 %vm380_vm1, %v13599_v24 }
 0x633   : > { %v7229_v59 = vadd.f32 %v7205_v14, %v7079_v42  ;;  %10171 = vmatmul.msk.f32.gmra.mxu2 %vm380_vm1, %v13424_v9  ;;  %v13635_v14 = vld [vmem:[#allocation4 + $0xe2] sm:$0xff] }
 0x634   : > { %10189 = vmatmul.msk.f32.gmra.mxu3 %vm380_vm1, %v13415_v54  ;;  %v13621_v54 = vld [vmem:[#allocation4 + $0xd8] sm:$0xff] }
 0x635   : > { %v13611_v15 = vadd.f32 %v7355_v30, %v7229_v59  ;;  %v13637_v30 = vld [vmem:[#allocation4 + $0x171] sm:$0xff] }
 0x636   : > { %v6908_v35 = vpop.f32.mrf.mxu2  ;;  %v7211_v29 = vpop.f32.mrf.mxu0  ;;  %14324 = vst [vmem:[#allocation9_spill] sm:$0xff] %v13637_v30 }
 0x637   : > { %v7058_v45 = vpop.f32.mrf.mxu3  ;;  %v6930_v6 = vadd.f32 %v6908_v35, %v6775_v57  ;;  %v7361_v26 = vpop.f32.mrf.mxu1 }
 0x639   : > { %v7080_v23 = vadd.f32 %v7058_v45, %v6930_v6  ;;  %10208 = vmatmul.msk.f32.gmra.mxu0 %vm380_vm1, %v13613_v12 }
 0x63a   : > { %10226 = vmatmul.msk.f32.gmra.mxu1 %vm380_vm1, %v13615_v1 }
 0x63b   : > { %v7230_v0 = vadd.f32 %v7208_v51, %v7080_v23  ;;  %10172 = vmatmul.msk.f32.gmra.mxu2 %vm380_vm1, %v13621_v54 }
 0x63c   : > { %10190 = vmatmul.msk.f32.gmra.mxu3 %vm380_vm1, %v13455_v53 }
 0x63d   : > { %v13633_v18 = vadd.f32 %v7358_v56, %v7230_v0 }
 0x63e   : > { %v6911_v3 = vpop.f32.mrf.mxu2  ;;  %v7214_v21 = vpop.f32.mrf.mxu0 }
 0x63f   : > { %v7061_v60 = vpop.f32.mrf.mxu3  ;;  %v6931_v63 = vadd.f32 %v6911_v3, %v6778_v48  ;;  %v7364_v17 = vpop.f32.mrf.mxu1 }
 0x641   : > { %v7081_v38 = vadd.f32 %v7061_v60, %v6931_v63  ;;  %10209 = vmatmul.msk.f32.gmra.mxu0 %vm380_vm1, %v13635_v14 }
 0x642   : > { %10227 = vmatmul.msk.f32.gmra.mxu1 %vm380_vm1, %v13637_v30 }
 0x643   : > { %v7231_v43 = vadd.f32 %v7211_v29, %v7081_v38  ;;  %10173 = vmatmul.msk.f32.gmra.mxu2 %vm380_vm1, %v13643_v39 }
 0x644   : > { %10191 = vmatmul.msk.f32.gmra.mxu3 %vm380_vm1, %v13467_v58 }
 0x645   : > { %v13655_v22 = vadd.f32 %v7361_v26, %v7231_v43 }
 0x646   : > { %v6914_v51 = vpop.f32.mrf.mxu2  ;;  %v7770_v59 = vpop.f32.mrf.mxu0 }
 0x647   : > { %v7064_v56 = vpop.f32.mrf.mxu3  ;;  %v6932_v42 = vadd.f32 %v6914_v51, %v6781_v47  ;;  %v13657_v57 = vpop.f32.mrf.mxu1  ;;  %v13719_v51 = vld [vmem:[#allocation4 + $0xf8] sm:$0xff] }
 0x649   : > { %v7082_v35 = vadd.f32 %v7064_v56, %v6932_v42  ;;  %10265 = vmatmul.msk.f32.vlgmr.msra.gmra.mxu0 %vm380_vm1, %v13621_v54 }
 0x64a   : > { %10283 = vmatmul.msk.f32.vlgmr.msra.gmra.mxu1 %vm380_vm1, %v13455_v53  ;;  %v13675_v53 = vld [vmem:[%s14239_s8] ss:$0 sm:$0xff] }
 0x64b   : > { %v7232_v45 = vadd.f32 %v7214_v21, %v7082_v35  ;;  %10229 = vmatmul.msk.f32.vlgmr.msra.gmra.mxu2 %vm380_vm1, %v13398_v5  ;;  %v13684_v5 = vld [vmem:[%s14240_s9] ss:$0 sm:$0xff] }
 0x64c   : > { %10247 = vmatmul.msk.f32.vlgmr.msra.gmra.mxu3 %vm380_vm1, %v13391_v50 }
 0x64d   : > { %v13667_v6 = vadd.f32 %v7364_v17, %v7232_v45 }
 0x64e   : > { %v7470_v29 = vpop.f32.mrf.mxu2  ;;  %v7773_v0 = vpop.f32.mrf.mxu0 }
 0x64f   : > { %v7620_v26 = vpop.f32.mrf.mxu3  ;;  %v7518_v23 = vadd.f32 %v7470_v29, %v13453_v52  ;;  %v13670_v19 = vpop.f32.mrf.mxu1 }
 0x651   : > { %v7668_v55 = vadd.f32 %v7620_v26, %v7518_v23  ;;  %10266 = vmatmul.msk.f32.gmra.mxu0 %vm380_vm1, %v13643_v39 }
 0x652   : > { %10284 = vmatmul.msk.f32.gmra.mxu1 %vm380_vm1, %v13467_v58 }
 0x653   : > { %v7818_v50 = vadd.f32 %v7770_v59, %v7668_v55  ;;  %10230 = vmatmul.msk.f32.gmra.mxu2 %vm380_vm1, %v13424_v9  ;;  %v13702_v9 = vld [vmem:[#allocation4 + $0xf0] sm:$0xff] }
 0x654   : > { %10248 = vmatmul.msk.f32.gmra.mxu3 %vm380_vm1, %v13417_v49 }
 0x655   : > { %v7837_v52 = vmul.f32 %v13675_v53, %v7818_v50 }
 0x656   : > { %v7473_v36 = vpop.f32.mrf.mxu2  ;;  %v7776_v60 = vpop.f32.mrf.mxu0 }
 0x657   : > { %v7623_v48 = vpop.f32.mrf.mxu3  ;;  %v7856_v3 = vadd.f32 %v13684_v5, %v7837_v52  ;;  %v7519_v58 = vadd.f32 %v7473_v36, %v13465_v10  ;;  %v13693_v63 = vpop.f32.mrf.mxu1 }
 0x659   : > { %v7872_v49 = vmax.f32 %v7856_v3, 0.0  ;;  %v7669_v21 = vadd.f32 %v7623_v48, %v7519_v58  ;;  %10267 = vmatmul.msk.f32.gmra.mxu0 %vm380_vm1, %v13702_v9 }
 0x65a   : > { %10285 = vmatmul.msk.f32.gmra.mxu1 %vm380_vm1, %v13479_v7 }
 0x65b   : > { %7888 = vst.msk [vmem:[%s13700_s15] sm:$0xff] %vm380_vm1, %v7872_v49  ;;  %v7819_v10 = vadd.f32 %v7773_v0, %v7669_v21  ;;  %10231 = vmatmul.msk.f32.gmra.mxu2 %vm380_vm1, %v13621_v54  ;;  %v13736_v0 = vld [vmem:[#allocation4 + $0x108] sm:$0xff]  ;;  %v13755_v21 = vld [vmem:[#allocation4 + $0x110] sm:$0xff] }
 0x65c   : > { %10249 = vmatmul.msk.f32.gmra.mxu3 %vm380_vm1, %v13613_v12 }
 0x65d   : > { %v7838_v17 = vmul.f32 %v13675_v53, %v7819_v10 }
 0x65e   : > { %v7476_v38 = vpop.f32.mrf.mxu2  ;;  %v7779_v13 = vpop.f32.mrf.mxu0 }
 0x65f   : > { %v7626_v43 = vpop.f32.mrf.mxu3  ;;  %v7857_v32 = vadd.f32 %v13684_v5, %v7838_v17  ;;  %v7520_v8 = vadd.f32 %v7476_v38, %v13477_v41  ;;  %v13717_v47 = vpop.f32.mrf.mxu1  ;;  %v13761_v38 = vld [vmem:[#allocation4 + $0xfa] sm:$0xff] }
 0x661   : > { %v7873_v56 = vmax.f32 %v7857_v32, 0.0  ;;  %v7670_v42 = vadd.f32 %v7626_v43, %v7520_v8  ;;  %10268 = vmatmul.msk.f32.gmra.mxu0 %vm380_vm1, %v13719_v51 }
 0x662   : > { %10286 = vmatmul.msk.f32.gmra.mxu1 %vm380_vm1, %v13491_v40 }
 0x663   : > { %7889 = vst.msk [vmem:[%s13700_s15 + $0x8] sm:$0xff] %vm380_vm1, %v7873_v56  ;;  %v7820_v54 = vadd.f32 %v7776_v60, %v7670_v42  ;;  %10232 = vmatmul.msk.f32.gmra.mxu2 %vm380_vm1, %v13643_v39  ;;  %v13742_v39 = vld [vmem:[#allocation4 + $0xf2] sm:$0xff] }
 0x664   : > { %10250 = vmatmul.msk.f32.gmra.mxu3 %vm380_vm1, %v13635_v14 }
 0x665   : > { %v7839_v41 = vmul.f32 %v13675_v53, %v7820_v54 }
 0x666   : > { %v7479_v59 = vpop.f32.mrf.mxu2  ;;  %v7782_v26 = vpop.f32.mrf.mxu0 }
 0x667   : > { %v7629_v35 = vpop.f32.mrf.mxu3  ;;  %v7858_v45 = vadd.f32 %v13684_v5, %v7839_v41  ;;  %v7521_v29 = vadd.f32 %v7479_v59, %v13489_v20  ;;  %v13734_v23 = vpop.f32.mrf.mxu1  ;;  %v13774_v41 = vld [vmem:[#allocation4 + $0x120] sm:$0xff] }
 0x669   : > { %v7874_v55 = vmax.f32 %v7858_v45, 0.0  ;;  %v7671_v50 = vadd.f32 %v7629_v35, %v7521_v29  ;;  %10269 = vmatmul.msk.f32.gmra.mxu0 %vm380_vm1, %v13736_v0  ;;  %v13780_v45 = vld [vmem:[#allocation4 + $0x10a] sm:$0xff] }
 0x66a   : > { %10287 = vmatmul.msk.f32.gmra.mxu1 %vm380_vm1, %v13503_v31 }
 0x66b   : > { %7890 = vst.msk [vmem:[%s13700_s15 + $0x10] sm:$0xff] %vm380_vm1, %v7874_v55  ;;  %v7821_v52 = vadd.f32 %v7779_v13, %v7671_v50  ;;  %10233 = vmatmul.msk.f32.gmra.mxu2 %vm380_vm1, %v13702_v9 }
 0x66c   : > { %10251 = vmatmul.msk.f32.gmra.mxu3 %vm380_vm1, %v13742_v39 }
 0x66d   : > { %v7840_v20 = vmul.f32 %v13675_v53, %v7821_v52 }
 0x66e   : > { %v7482_v36 = vpop.f32.mrf.mxu2  ;;  %v7785_v60 = vpop.f32.mrf.mxu0 }
 0x66f   : > { %v7632_v48 = vpop.f32.mrf.mxu3  ;;  %v7859_v3 = vadd.f32 %v13684_v5, %v7840_v20  ;;  %v7522_v58 = vadd.f32 %v7482_v36, %v13501_v62  ;;  %v13753_v49 = vpop.f32.mrf.mxu1 }
 0x671   : > { %v7875_v10 = vmax.f32 %v7859_v3, 0.0  ;;  %v7672_v17 = vadd.f32 %v7632_v48, %v7522_v58  ;;  %10270 = vmatmul.msk.f32.gmra.mxu0 %vm380_vm1, %v13755_v21  ;;  %v13793_v48 = vld [vmem:[#allocation4 + $0x128] sm:$0xff] }
 0x672   : > { %10288 = vmatmul.msk.f32.gmra.mxu1 %vm380_vm1, %v13515_v4 }
 0x673   : > { %7891 = vst.msk [vmem:[%s13700_s15 + $0x18] sm:$0xff] %vm380_vm1, %v7875_v10  ;;  %v7822_v43 = vadd.f32 %v7782_v26, %v7672_v17  ;;  %10234 = vmatmul.msk.f32.gmra.mxu2 %vm380_vm1, %v13719_v51 }
 0x674   : > { %10252 = vmatmul.msk.f32.gmra.mxu3 %vm380_vm1, %v13761_v38 }
 0x675   : > { %v7841_v62 = vmul.f32 %v13675_v53, %v7822_v43 }
 0x676   : > { %v7485_v32 = vpop.f32.mrf.mxu2  ;;  %v7788_v42 = vpop.f32.mrf.mxu0 }
 0x677   : > { %v7635_v8 = vpop.f32.mrf.mxu3  ;;  %v7860_v13 = vadd.f32 %v13684_v5, %v7841_v62  ;;  %v7523_v56 = vadd.f32 %v7485_v32, %v13513_v33  ;;  %v13772_v54 = vpop.f32.mrf.mxu1 }
 0x679   : > { %v7876_v59 = vmax.f32 %v7860_v13, 0.0  ;;  %v7673_v35 = vadd.f32 %v7635_v8, %v7523_v56  ;;  %10271 = vmatmul.msk.f32.gmra.mxu0 %vm380_vm1, %v13774_v41  ;;  %v13812_v56 = vld [vmem:[#allocation4 + $0x138] sm:$0xff] }
 0x67a   : > { %10289 = vmatmul.msk.f32.gmra.mxu1 %vm380_vm1, %v13527_v16 }
 0x67b   : > { %7892 = vst.msk [vmem:[%s13700_s15 + $0x20] sm:$0xff] %vm380_vm1, %v7876_v59  ;;  %v7823_v29 = vadd.f32 %v7785_v60, %v7673_v35  ;;  %10235 = vmatmul.msk.f32.gmra.mxu2 %vm380_vm1, %v13736_v0  ;;  %v13799_v60 = vld [vmem:[#allocation4 + $0x112] sm:$0xff]  ;;  %v13818_v35 = vld [vmem:[#allocation4 + $0x122] sm:$0xff] }
 0x67c   : > { %10253 = vmatmul.msk.f32.gmra.mxu3 %vm380_vm1, %v13780_v45 }
 0x67d   : > { %v7842_v33 = vmul.f32 %v13675_v53, %v7823_v29 }
 0x67e   : > { %v7488_v26 = vpop.f32.mrf.mxu2  ;;  %v7791_v20 = vpop.f32.mrf.mxu0 }
 0x67f   : > { %v7638_v55 = vpop.f32.mrf.mxu3  ;;  %v7861_v50 = vadd.f32 %v13684_v5, %v7842_v33  ;;  %v7524_v52 = vadd.f32 %v7488_v26, %v13525_v27  ;;  %v13791_v36 = vpop.f32.mrf.mxu1 }
 0x681   : > { %v7877_v3 = vmax.f32 %v7861_v50, 0.0  ;;  %v7674_v58 = vadd.f32 %v7638_v55, %v7524_v52  ;;  %10272 = vmatmul.msk.f32.gmra.mxu0 %vm380_vm1, %v13793_v48 }
 0x682   : > { %10290 = vmatmul.msk.f32.gmra.mxu1 %vm380_vm1, %v13539_v25 }
 0x683   : > { %7893 = vst.msk [vmem:[%s13700_s15 + $0x28] sm:$0xff] %vm380_vm1, %v7877_v3  ;;  %v7824_v10 = vadd.f32 %v7788_v42, %v7674_v58  ;;  %10236 = vmatmul.msk.f32.gmra.mxu2 %vm380_vm1, %v13755_v21  ;;  %v13831_v58 = vld [vmem:[#allocation4 + $0x140] sm:$0xff] }
 0x684   : > { %10254 = vmatmul.msk.f32.gmra.mxu3 %vm380_vm1, %v13799_v60 }
 0x685   : > { %v7843_v27 = vmul.f32 %v13675_v53, %v7824_v10 }
 0x686   : > { %v7491_v17 = vpop.f32.mrf.mxu2  ;;  %v7794_v8 = vpop.f32.mrf.mxu0 }
 0x687   : > { %v7641_v43 = vpop.f32.mrf.mxu3  ;;  %v7862_v62 = vadd.f32 %v13684_v5, %v7843_v27  ;;  %v7525_v32 = vadd.f32 %v7491_v17, %v13537_v44  ;;  %v13810_v13 = vpop.f32.mrf.mxu1  ;;  %v13837_v27 = vld [vmem:[#allocation4 + $0x12a] sm:$0xff] }
 0x689   : > { %v7878_v42 = vmax.f32 %v7862_v62, 0.0  ;;  %v7675_v59 = vadd.f32 %v7641_v43, %v7525_v32  ;;  %10273 = vmatmul.msk.f32.gmra.mxu0 %vm380_vm1, %v13812_v56 }
 0x68a   : > { %10291 = vmatmul.msk.f32.gmra.mxu1 %vm380_vm1, %v13551_v11 }
 0x68b   : > { %7894 = vst.msk [vmem:[%s13700_s15 + $0x30] sm:$0xff] %vm380_vm1, %v7878_v42  ;;  %v7825_v29 = vadd.f32 %v7791_v20, %v7675_v59  ;;  %10237 = vmatmul.msk.f32.gmra.mxu2 %vm380_vm1, %v13774_v41 }
 0x68c   : > { %10255 = vmatmul.msk.f32.gmra.mxu3 %vm380_vm1, %v13818_v35 }
 0x68d   : > { %v7844_v44 = vmul.f32 %v13675_v53, %v7825_v29 }
 0x68e   : > { %v7494_v33 = vpop.f32.mrf.mxu2  ;;  %v7797_v52 = vpop.f32.mrf.mxu0 }
 0x68f   : > { %v7644_v26 = vpop.f32.mrf.mxu3  ;;  %v7863_v55 = vadd.f32 %v13684_v5, %v7844_v44  ;;  %v7526_v50 = vadd.f32 %v7494_v33, %v13549_v2  ;;  %v13829_v3 = vpop.f32.mrf.mxu1  ;;  %v13850_v44 = vld [vmem:[#allocation4 + $0x150] sm:$0xff] }
 0x691   : > { %v7879_v20 = vmax.f32 %v7863_v55, 0.0  ;;  %v7676_v10 = vadd.f32 %v7644_v26, %v7526_v50  ;;  %10274 = vmatmul.msk.f32.gmra.mxu0 %vm380_vm1, %v13831_v58  ;;  %v13856_v26 = vld [vmem:[#allocation4 + $0x13a] sm:$0xff] }
 0x692   : > { %10292 = vmatmul.msk.f32.gmra.mxu1 %vm380_vm1, %v13564_v28 }
 0x693   : > { %7895 = vst.msk [vmem:[%s13700_s15 + $0x38] sm:$0xff] %vm380_vm1, %v7879_v20  ;;  %v7826_v17 = vadd.f32 %v7794_v8, %v7676_v10  ;;  %10238 = vmatmul.msk.f32.gmra.mxu2 %vm380_vm1, %v13793_v48 }
 0x694   : > { %10256 = vmatmul.msk.f32.gmra.mxu3 %vm380_vm1, %v13837_v27 }
 0x695   : > { %v7845_v2 = vmul.f32 %v13675_v53, %v7826_v17 }
 0x696   : > { %v7497_v43 = vpop.f32.mrf.mxu2  ;;  %v7800_v59 = vpop.f32.mrf.mxu0 }
 0x697   : > { %v7647_v62 = vpop.f32.mrf.mxu3  ;;  %v7864_v32 = vadd.f32 %v13684_v5, %v7845_v2  ;;  %v7527_v42 = vadd.f32 %v7497_v43, %v13562_v34  ;;  %v13848_v29 = vpop.f32.mrf.mxu1 }
 0x698   : > { %14327 = vst [vmem:[#allocation12_spill] sm:$0xff] %v13848_v29 }
 0x699   : > { %v7880_v8 = vmax.f32 %v7864_v32, 0.0  ;;  %v7677_v33 = vadd.f32 %v7647_v62, %v7527_v42  ;;  %10275 = vmatmul.msk.f32.gmra.mxu0 %vm380_vm1, %v13850_v44  ;;  %v13869_v62 = vld [vmem:[#allocation4 + $0x158] sm:$0xff]  ;;  %v13875_v42 = vld [vmem:[#allocation4 + $0x142] sm:$0xff] }
 0x69a   : > { %10293 = vmatmul.msk.f32.gmra.mxu1 %vm380_vm1, %v13577_v37 }
 0x69b   : > { %7896 = vst.msk [vmem:[%s13700_s15 + $0x40] sm:$0xff] %vm380_vm1, %v7880_v8  ;;  %v7827_v55 = vadd.f32 %v7797_v52, %v7677_v33  ;;  %10239 = vmatmul.msk.f32.gmra.mxu2 %vm380_vm1, %v13812_v56 }
 0x69c   : > { %10257 = vmatmul.msk.f32.gmra.mxu3 %vm380_vm1, %v13856_v26 }
 0x69d   : > { %v7846_v34 = vmul.f32 %v13675_v53, %v7827_v55 }
 0x69e   : > { %v7500_v50 = vpop.f32.mrf.mxu2  ;;  %v7803_v2 = vpop.f32.mrf.mxu0 }
 0x69f   : > { %v7650_v20 = vpop.f32.mrf.mxu3  ;;  %v7865_v10 = vadd.f32 %v13684_v5, %v7846_v34  ;;  %v7528_v17 = vadd.f32 %v7500_v50, %v13575_v46  ;;  %v13867_v43 = vpop.f32.mrf.mxu1 }
 0x6a0   : > { %14328 = vst [vmem:[#allocation14_spill] sm:$0xff] %v13867_v43 }
 0x6a1   : > { %v7881_v52 = vmax.f32 %v7865_v10, 0.0  ;;  %v7678_v32 = vadd.f32 %v7650_v20, %v7528_v17  ;;  %10276 = vmatmul.msk.f32.gmra.mxu0 %vm380_vm1, %v13869_v62  ;;  %v13888_v17 = vld [vmem:[#allocation4 + $0x168] sm:$0xff] }
 0x6a2   : > { %10294 = vmatmul.msk.f32.gmra.mxu1 %vm380_vm1, %v13599_v24 }
 0x6a3   : > { %7897 = vst.msk [vmem:[%s13700_s15 + $0x48] sm:$0xff] %vm380_vm1, %v7881_v52  ;;  %v7828_v8 = vadd.f32 %v7800_v59, %v7678_v32  ;;  %10240 = vmatmul.msk.f32.gmra.mxu2 %vm380_vm1, %v13831_v58  ;;  %v13894_v32 = vld [vmem:[#allocation4 + $0x152] sm:$0xff] }
 0x6a4   : > { %10258 = vmatmul.msk.f32.gmra.mxu3 %vm380_vm1, %v13875_v42 }
 0x6a5   : > { %v7847_v46 = vmul.f32 %v13675_v53, %v7828_v8 }
 0x6a6   : > { %v7503_v33 = vpop.f32.mrf.mxu2  ;;  %v7806_v20 = vpop.f32.mrf.mxu0 }
 0x6a7   : > { %v7653_v55 = vpop.f32.mrf.mxu3  ;;  %v7866_v34 = vadd.f32 %v13684_v5, %v7847_v46  ;;  %v7529_v50 = vadd.f32 %v7503_v33, %v13597_v61  ;;  %v13886_v10 = vpop.f32.mrf.mxu1 }
 0x6a8   : > { %14329 = vst [vmem:[#allocation8_spill] sm:$0xff] %v13886_v10 }
 0x6a9   : > { %v7882_v59 = vmax.f32 %v7866_v34, 0.0  ;;  %v7679_v52 = vadd.f32 %v7653_v55, %v7529_v50  ;;  %10277 = vmatmul.msk.f32.gmra.mxu0 %vm380_vm1, %v13888_v17 }
 0x6aa   : > { %10295 = vmatmul.msk.f32.gmra.mxu1 %vm380_vm1, %v13615_v1 }
 0x6ab   : > { %7898 = vst.msk [vmem:[%s13700_s15 + $0x50] sm:$0xff] %vm380_vm1, %v7882_v59  ;;  %v7829_v8 = vadd.f32 %v7803_v2, %v7679_v52  ;;  %10241 = vmatmul.msk.f32.gmra.mxu2 %vm380_vm1, %v13850_v44  ;;  %v13907_v59 = vld [vmem:[#allocation4 + $0x170] sm:$0xff] }
 0x6ac   : > { %10259 = vmatmul.msk.f32.gmra.mxu3 %vm380_vm1, %v13894_v32 }
 0x6ad   : > { %v7848_v61 = vmul.f32 %v13675_v53, %v7829_v8  ;;  %v13913_v8 = vld [vmem:[#allocation4 + $0x15a] sm:$0xff] }
 0x6ae   : > { %v7506_v46 = vpop.f32.mrf.mxu2  ;;  %v7809_v50 = vpop.f32.mrf.mxu0 }
 0x6af   : > { %v7656_v33 = vpop.f32.mrf.mxu3  ;;  %v7867_v55 = vadd.f32 %v13684_v5, %v7848_v61  ;;  %v7530_v34 = vadd.f32 %v7506_v46, %v13611_v15  ;;  %v13905_v10 = vpop.f32.mrf.mxu1 }
 0x6b0   : > { %14330 = vst [vmem:[#allocation11_spill] sm:$0xff] %v13905_v10 }
 0x6b1   : > { %v7883_v2 = vmax.f32 %v7867_v55, 0.0  ;;  %v7680_v52 = vadd.f32 %v7656_v33, %v7530_v34  ;;  %10278 = vmatmul.msk.f32.gmra.mxu0 %vm380_vm1, %v13907_v59 }
 0x6b2   : > { %10296 = vmatmul.msk.f32.gmra.mxu1 %vm380_vm1, %v13637_v30 }
 0x6b3   : > { %7899 = vst.msk [vmem:[%s13700_s15 + $0x58] sm:$0xff] %vm380_vm1, %v7883_v2  ;;  %v7830_v61 = vadd.f32 %v7806_v20, %v7680_v52  ;;  %10242 = vmatmul.msk.f32.gmra.mxu2 %vm380_vm1, %v13869_v62  ;;  %v13926_v2 = vld [vmem:[#allocation4 + $0x180] sm:$0xff] }
 0x6b4   : > { %10260 = vmatmul.msk.f32.gmra.mxu3 %vm380_vm1, %v13913_v8  ;;  %14332 = vst [vmem:[#allocation16_spill] sm:$0xff] %v13926_v2  ;;  %v13928_v20 = vld [vmem:[#allocation4 + $0x181] sm:$0xff] }
 0x6b5   : > { %v7849_v15 = vmul.f32 %v13675_v53, %v7830_v61  ;;  %14333 = vst [vmem:[#allocation17_spill] sm:$0xff] %v13928_v20  ;;  %v13934_v61 = vld [vmem:[#allocation4 + $0x16a] sm:$0xff] }
 0x6b6   : > { %v7509_v46 = vpop.f32.mrf.mxu2  ;;  %v7812_v10 = vpop.f32.mrf.mxu0 }
 0x6b7   : > { %v7659_v33 = vpop.f32.mrf.mxu3  ;;  %v7868_v55 = vadd.f32 %v13684_v5, %v7849_v15  ;;  %v7531_v34 = vadd.f32 %v7509_v46, %v13633_v18  ;;  %v13924_v43 = vpop.f32.mrf.mxu1 }
 0x6b8   : > { %14331 = vst [vmem:[#allocation13_spill] sm:$0xff] %v13924_v43 }
 0x6b9   : > { %v7884_v52 = vmax.f32 %v7868_v55, 0.0  ;;  %v7681_v30 = vadd.f32 %v7659_v33, %v7531_v34  ;;  %10279 = vmatmul.msk.f32.gmra.mxu0 %vm380_vm1, %v13926_v2 }
 0x6ba   : > { %10297 = vmatmul.msk.f32.gmra.mxu1 %vm380_vm1, %v13928_v20 }
 0x6bb   : > { %7900 = vst.msk [vmem:[%s13700_s15 + $0x60] sm:$0xff] %vm380_vm1, %v7884_v52  ;;  %v7831_v18 = vadd.f32 %v7809_v50, %v7681_v30  ;;  %10243 = vmatmul.msk.f32.gmra.mxu2 %vm380_vm1, %v13888_v17  ;;  %v13947_v52 = vld [vmem:[#allocation4 + $0x188] sm:$0xff] }
 0x6bc   : > { %10261 = vmatmul.msk.f32.gmra.mxu3 %vm380_vm1, %v13934_v61  ;;  %14335 = vst [vmem:[#allocation6_spill] sm:$0xff] %v13947_v52  ;;  %v13949_v30 = vld [vmem:[#allocation4 + $0x189] sm:$0xff] }
 0x6bd   : > { %v7850_v15 = vmul.f32 %v13675_v53, %v7831_v18  ;;  %14336 = vst [vmem:[#allocation10_spill] sm:$0xff] %v13949_v30  ;;  %v13955_v18 = vld [vmem:[#allocation4 + $0x172] sm:$0xff] }
 0x6be   : > { %v7512_v46 = vpop.f32.mrf.mxu2  ;;  %v7815_v43 = vpop.f32.mrf.mxu0 }
 0x6bf   : > { %v7662_v33 = vpop.f32.mrf.mxu3  ;;  %v7869_v55 = vadd.f32 %v13684_v5, %v7850_v15  ;;  %v7532_v34 = vadd.f32 %v7512_v46, %v13655_v22  ;;  %v13945_v2 = vpop.f32.mrf.mxu1 }
 0x6c0   : > { %14334 = vst [vmem:[#allocation15_spill] sm:$0xff] %v13945_v2 }
 0x6c1   : > { %v7885_v50 = vmax.f32 %v7869_v55, 0.0  ;;  %v7682_v20 = vadd.f32 %v7662_v33, %v7532_v34  ;;  %10280 = vmatmul.msk.f32.gmra.mxu0 %vm380_vm1, %v13947_v52 }
 0x6c2   : > { %10298 = vmatmul.msk.f32.gmra.mxu1 %vm380_vm1, %v13949_v30 }
 0x6c3   : > { %7901 = vst.msk [vmem:[%s13700_s15 + $0x68] sm:$0xff] %vm380_vm1, %v7885_v50  ;;  %v7832_v22 = vadd.f32 %v7812_v10, %v7682_v20  ;;  %10244 = vmatmul.msk.f32.gmra.mxu2 %vm380_vm1, %v13907_v59 }
 0x6c4   : > { %10262 = vmatmul.msk.f32.gmra.mxu3 %vm380_vm1, %v13955_v18 }
 0x6c5   : > { %v7851_v15 = vmul.f32 %v13675_v53, %v7832_v22 }
 0x6c6   : > { %v7515_v46 = vpop.f32.mrf.mxu2  ;;  %v8405_v2 = vpop.f32.mrf.mxu0 }
 0x6c7   : > { %v7665_v33 = vpop.f32.mrf.mxu3  ;;  %v7870_v55 = vadd.f32 %v13684_v5, %v7851_v15  ;;  %v7533_v34 = vadd.f32 %v7515_v46, %v13667_v6  ;;  %v8554_v52 = vpop.f32.mrf.mxu1 }
 0x6c9   : > { %v7886_v30 = vmax.f32 %v7870_v55, 0.0  ;;  %v7683_v29 = vadd.f32 %v7665_v33, %v7533_v34  ;;  %10337 = vmatmul.msk.f32.vlgmr.msrb.gmra.mxu0 %vm380_vm1, %v13479_v7 }
 0x6ca   : > { %10355 = vmatmul.msk.f32.vlgmr.msrb.gmra.mxu1 %vm380_vm1, %v13742_v39 }
 0x6cb   : > { %7902 = vst.msk [vmem:[%s13700_s15 + $0x70] sm:$0xff] %vm380_vm1, %v7886_v30  ;;  %v7833_v10 = vadd.f32 %v7815_v43, %v7683_v29  ;;  %10301 = vmatmul.msk.f32.vlgmr.msrb.gmra.mxu2 %vm380_vm1, %v13613_v12 }
 0x6cc   : > { %10319 = vmatmul.msk.f32.vlgmr.msrb.gmra.mxu3 %vm380_vm1, %v13702_v9 }
 0x6cd   : > { %v7852_v6 = vmul.f32 %v13675_v53, %v7833_v10 }
 0x6ce   : > { %v8123_v20 = vpop.f32.mrf.mxu2  ;;  %v8408_v15 = vpop.f32.mrf.mxu0 }
 0x6cf   : > { %v8256_v50 = vpop.f32.mrf.mxu3  ;;  %v7871_v22 = vadd.f32 %v13684_v5, %v7852_v6  ;;  %v8124_v7 = vadd.f32 %v8123_v20, %v13657_v57  ;;  %v8557_v46 = vpop.f32.mrf.mxu1 }
 0x6d1   : > { %v7887_v33 = vmax.f32 %v7871_v22, 0.0  ;;  %v8304_v55 = vadd.f32 %v8256_v50, %v8124_v7  ;;  %10338 = vmatmul.msk.f32.gmra.mxu0 %vm380_vm1, %v13491_v40 }
 0x6d2   : > { %10356 = vmatmul.msk.f32.gmra.mxu1 %vm380_vm1, %v13761_v38 }
 0x6d3   : > { %7903 = vst.msk [vmem:[%s13700_s15 + $0x78] sm:$0xff] %vm380_vm1, %v7887_v33  ;;  %v8453_v12 = vadd.f32 %v8405_v2, %v8304_v55  ;;  %10302 = vmatmul.msk.f32.gmra.mxu2 %vm380_vm1, %v13635_v14 }
 0x6d4   : > { %10320 = vmatmul.msk.f32.gmra.mxu3 %vm380_vm1, %v13719_v51 }
 0x6d5   : > { %v13989_v57 = vadd.f32 %v8554_v52, %v8453_v12 }
 0x6d6   : > { %v8126_v9 = vpop.f32.mrf.mxu2  ;;  %v8411_v30 = vpop.f32.mrf.mxu0 }
 0x6d7   : > { %v8259_v29 = vpop.f32.mrf.mxu3  ;;  %v8127_v43 = vadd.f32 %v8126_v9, %v13670_v19  ;;  %v8560_v40 = vpop.f32.mrf.mxu1 }
 0x6d9   : > { %v8305_v34 = vadd.f32 %v8259_v29, %v8127_v43  ;;  %10339 = vmatmul.msk.f32.gmra.mxu0 %vm380_vm1, %v13503_v31 }
 0x6da   : > { %10357 = vmatmul.msk.f32.gmra.mxu1 %vm380_vm1, %v13780_v45 }
 0x6db   : > { %v8454_v2 = vadd.f32 %v8408_v15, %v8305_v34  ;;  %10303 = vmatmul.msk.f32.gmra.mxu2 %vm380_vm1, %v13742_v39 }
 0x6dc   : > { %10321 = vmatmul.msk.f32.gmra.mxu3 %vm380_vm1, %v13736_v0 }
 0x6dd   : > { %v14000_v14 = vadd.f32 %v8557_v46, %v8454_v2 }
 0x6de   : > { %v8129_v51 = vpop.f32.mrf.mxu2  ;;  %v8414_v10 = vpop.f32.mrf.mxu0 }
 0x6df   : > { %v8262_v19 = vpop.f32.mrf.mxu3  ;;  %v8130_v52 = vadd.f32 %v8129_v51, %v13693_v63  ;;  %v8563_v6 = vpop.f32.mrf.mxu1 }
 0x6e1   : > { %v8306_v20 = vadd.f32 %v8262_v19, %v8130_v52  ;;  %10340 = vmatmul.msk.f32.gmra.mxu0 %vm380_vm1, %v13515_v4 }
 0x6e2   : > { %10358 = vmatmul.msk.f32.gmra.mxu1 %vm380_vm1, %v13799_v60 }
 0x6e3   : > { %v8455_v31 = vadd.f32 %v8411_v30, %v8306_v20  ;;  %10304 = vmatmul.msk.f32.gmra.mxu2 %vm380_vm1, %v13761_v38 }
 0x6e4   : > { %10322 = vmatmul.msk.f32.gmra.mxu3 %vm380_vm1, %v13755_v21 }
 0x6e5   : > { %v14011_v0 = vadd.f32 %v8560_v40, %v8455_v31 }
 0x6e6   : > { %v8132_v39 = vpop.f32.mrf.mxu2  ;;  %v8417_v22 = vpop.f32.mrf.mxu0 }
 0x6e7   : > { %v8265_v63 = vpop.f32.mrf.mxu3  ;;  %v8133_v50 = vadd.f32 %v8132_v39, %v13717_v47  ;;  %v8566_v7 = vpop.f32.mrf.mxu1 }
 0x6e9   : > { %v8307_v15 = vadd.f32 %v8265_v63, %v8133_v50  ;;  %10341 = vmatmul.msk.f32.gmra.mxu0 %vm380_vm1, %v13527_v16 }
 0x6ea   : > { %10359 = vmatmul.msk.f32.gmra.mxu1 %vm380_vm1, %v13818_v35 }
 0x6eb   : > { %v8456_v4 = vadd.f32 %v8414_v10, %v8307_v15  ;;  %10305 = vmatmul.msk.f32.gmra.mxu2 %vm380_vm1, %v13780_v45 }
 0x6ec   : > { %10323 = vmatmul.msk.f32.gmra.mxu3 %vm380_vm1, %v13774_v41 }
 0x6ed   : > { %v14022_v21 = vadd.f32 %v8563_v6, %v8456_v4  ;;  %v14337_v4 = vld [vmem:[#allocation12_spill] sm:$0xff] }
 0x6ee   : > { %v8135_v38 = vpop.f32.mrf.mxu2  ;;  %v8420_v33 = vpop.f32.mrf.mxu0 }
 0x6ef   : > { %v8268_v47 = vpop.f32.mrf.mxu3  ;;  %v8136_v46 = vadd.f32 %v8135_v38, %v13734_v23  ;;  %v8569_v55 = vpop.f32.mrf.mxu1 }
 0x6f1   : > { %v8308_v12 = vadd.f32 %v8268_v47, %v8136_v46  ;;  %10342 = vmatmul.msk.f32.gmra.mxu0 %vm380_vm1, %v13539_v25 }
 0x6f2   : > { %10360 = vmatmul.msk.f32.gmra.mxu1 %vm380_vm1, %v13837_v27 }
 0x6f3   : > { %v8457_v16 = vadd.f32 %v8417_v22, %v8308_v12  ;;  %10306 = vmatmul.msk.f32.gmra.mxu2 %vm380_vm1, %v13799_v60 }
 0x6f4   : > { %10324 = vmatmul.msk.f32.gmra.mxu3 %vm380_vm1, %v13793_v48 }
 0x6f5   : > { %v14033_v41 = vadd.f32 %v8566_v7, %v8457_v16  ;;  %v14339_v16 = vld [vmem:[#allocation14_spill] sm:$0xff] }
 0x6f6   : > { %v8138_v45 = vpop.f32.mrf.mxu2  ;;  %v8423_v29 = vpop.f32.mrf.mxu0 }
 0x6f7   : > { %v8271_v23 = vpop.f32.mrf.mxu3  ;;  %v8139_v9 = vadd.f32 %v8138_v45, %v13753_v49  ;;  %v8572_v43 = vpop.f32.mrf.mxu1 }
 0x6f9   : > { %v8309_v30 = vadd.f32 %v8271_v23, %v8139_v9  ;;  %10343 = vmatmul.msk.f32.gmra.mxu0 %vm380_vm1, %v13551_v11 }
 0x6fa   : > { %10361 = vmatmul.msk.f32.gmra.mxu1 %vm380_vm1, %v13856_v26 }
 0x6fb   : > { %v8458_v25 = vadd.f32 %v8420_v33, %v8309_v30  ;;  %10307 = vmatmul.msk.f32.gmra.mxu2 %vm380_vm1, %v13818_v35  ;;  %v14340_v30 = vld [vmem:[#allocation17_spill] sm:$0xff] }
 0x6fc   : > { %10325 = vmatmul.msk.f32.gmra.mxu3 %vm380_vm1, %v13812_v56 }
 0x6fd   : > { %v14044_v48 = vadd.f32 %v8569_v55, %v8458_v25 }
 0x6fe   : > { %v8141_v60 = vpop.f32.mrf.mxu2  ;;  %v8426_v34 = vpop.f32.mrf.mxu0 }
 0x6ff   : > { %v8274_v49 = vpop.f32.mrf.mxu3  ;;  %v8142_v40 = vadd.f32 %v8141_v60, %v13772_v54  ;;  %v8575_v2 = vpop.f32.mrf.mxu1 }
 0x701   : > { %v8310_v51 = vadd.f32 %v8274_v49, %v8142_v40  ;;  %10344 = vmatmul.msk.f32.gmra.mxu0 %vm380_vm1, %v13564_v28  ;;  %v14342_v40 = vld [vmem:[#allocation8_spill] sm:$0xff] }
 0x702   : > { %10362 = vmatmul.msk.f32.gmra.mxu1 %vm380_vm1, %v13875_v42 }
 0x703   : > { %v8459_v11 = vadd.f32 %v8423_v29, %v8310_v51  ;;  %10308 = vmatmul.msk.f32.gmra.mxu2 %vm380_vm1, %v13837_v27  ;;  %v9078_v29 = vld [vmem:[#allocation4 + $0x182] sm:$0xff] }
 0x704   : > { %10326 = vmatmul.msk.f32.gmra.mxu3 %vm380_vm1, %v13831_v58 }
 0x705   : > { %v14055_v56 = vadd.f32 %v8572_v43, %v8459_v11  ;;  %v9079_v11 = vld [vmem:[#allocation4 + $0x18a] sm:$0xff] }
 0x706   : > { %v8144_v35 = vpop.f32.mrf.mxu2  ;;  %v8429_v52 = vpop.f32.mrf.mxu0 }
 0x707   : > { %v8277_v54 = vpop.f32.mrf.mxu3  ;;  %v8145_v19 = vadd.f32 %v8144_v35, %v13791_v36  ;;  %v8578_v10 = vpop.f32.mrf.mxu1 }
 0x709   : > { %v8311_v6 = vadd.f32 %v8277_v54, %v8145_v19  ;;  %10345 = vmatmul.msk.f32.gmra.mxu0 %vm380_vm1, %v13577_v37  ;;  %v14343_v54 = vld [vmem:[#allocation10_spill] sm:$0xff] }
 0x70a   : > { %10363 = vmatmul.msk.f32.gmra.mxu1 %vm380_vm1, %v13894_v32 }
 0x70b   : > { %v8460_v28 = vadd.f32 %v8426_v34, %v8311_v6  ;;  %10309 = vmatmul.msk.f32.gmra.mxu2 %vm380_vm1, %v13856_v26 }
 0x70c   : > { %10327 = vmatmul.msk.f32.gmra.mxu3 %vm380_vm1, %v13850_v44 }
 0x70d   : > { %v14066_v58 = vadd.f32 %v8575_v2, %v8460_v28  ;;  %v8931_v28 = vld [vmem:[#allocation4 + $0x199] sm:$0xff] }
 0x70e   : > { %v8147_v27 = vpop.f32.mrf.mxu2  ;;  %v8432_v31 = vpop.f32.mrf.mxu0 }
 0x70f   : > { %v8280_v36 = vpop.f32.mrf.mxu3  ;;  %v8148_v20 = vadd.f32 %v8147_v27, %v13810_v13  ;;  %v8581_v39 = vpop.f32.mrf.mxu1  ;;  %v9080_v27 = vld [vmem:[#allocation4 + $0x19a] sm:$0xff] }
 0x711   : > { %v8312_v63 = vadd.f32 %v8280_v36, %v8148_v20  ;;  %10346 = vmatmul.msk.f32.gmra.mxu0 %vm380_vm1, %v13599_v24  ;;  %v14345_v36 = vld [vmem:[#allocation11_spill] sm:$0xff] }
 0x712   : > { %10364 = vmatmul.msk.f32.gmra.mxu1 %vm380_vm1, %v13913_v8 }
 0x713   : > { %v8461_v37 = vadd.f32 %v8429_v52, %v8312_v63  ;;  %10310 = vmatmul.msk.f32.gmra.mxu2 %vm380_vm1, %v13875_v42  ;;  %v8782_v63 = vld [vmem:[#allocation4 + $0x198] sm:$0xff] }
 0x714   : > { %10328 = vmatmul.msk.f32.gmra.mxu3 %vm380_vm1, %v13869_v62 }
 0x715   : > { %v14077_v44 = vadd.f32 %v8578_v10, %v8461_v37 }
 0x716   : > { %v8150_v26 = vpop.f32.mrf.mxu2  ;;  %v8435_v22 = vpop.f32.mrf.mxu0 }
 0x717   : > { %v8283_v13 = vpop.f32.mrf.mxu3  ;;  %v8151_v50 = vadd.f32 %v8150_v26, %v13829_v3  ;;  %v8584_v7 = vpop.f32.mrf.mxu1 }
 0x719   : > { %v8313_v15 = vadd.f32 %v8283_v13, %v8151_v50  ;;  %10347 = vmatmul.msk.f32.gmra.mxu0 %vm380_vm1, %v13615_v1  ;;  %v14338_v1 = vld [vmem:[#allocation9_spill] sm:$0xff] }
 0x71a   : > { %10365 = vmatmul.msk.f32.gmra.mxu1 %vm380_vm1, %v13934_v61 }
 0x71b   : > { %v8462_v24 = vadd.f32 %v8432_v31, %v8313_v15  ;;  %10311 = vmatmul.msk.f32.gmra.mxu2 %vm380_vm1, %v13894_v32  ;;  %v14346_v15 = vld [vmem:[#allocation13_spill] sm:$0xff] }
 0x71c   : > { %10329 = vmatmul.msk.f32.gmra.mxu3 %vm380_vm1, %v13888_v17 }
 0x71d   : > { %v14088_v62 = vadd.f32 %v8581_v39, %v8462_v24 }
 0x71e   : > { %v8153_v42 = vpop.f32.mrf.mxu2  ;;  %v8438_v47 = vpop.f32.mrf.mxu0 }
 0x71f   : > { %v8286_v3 = vpop.f32.mrf.mxu3  ;;  %v8154_v38 = vadd.f32 %v8153_v42, %v14337_v4  ;;  %v8587_v46 = vpop.f32.mrf.mxu1  ;;  %v8783_v4 = vld [vmem:[#allocation4 + $0x1a0] sm:$0xff] }
 0x721   : > { %v8314_v33 = vadd.f32 %v8286_v3, %v8154_v38  ;;  %10348 = vmatmul.msk.f32.gmra.mxu0 %vm380_vm1, %v14338_v1 }
 0x722   : > { %10366 = vmatmul.msk.f32.gmra.mxu1 %vm380_vm1, %v13955_v18 }
 0x723   : > { %v8463_v55 = vadd.f32 %v8435_v22, %v8314_v33  ;;  %10312 = vmatmul.msk.f32.gmra.mxu2 %vm380_vm1, %v13913_v8  ;;  %v8932_v22 = vld [vmem:[#allocation4 + $0x1a1] sm:$0xff] }
 0x724   : > { %10330 = vmatmul.msk.f32.gmra.mxu3 %vm380_vm1, %v13907_v59  ;;  %v14341_v59 = vld [vmem:[#allocation16_spill] sm:$0xff] }
 0x725   : > { %v14099_v17 = vadd.f32 %v8584_v7, %v8463_v55  ;;  %v9081_v7 = vld [vmem:[#allocation4 + $0x1a2] sm:$0xff] }
 0x726   : > { %v8156_v32 = vpop.f32.mrf.mxu2  ;;  %v8441_v23 = vpop.f32.mrf.mxu0  ;;  %v14347_v55 = vld [vmem:[#allocation15_spill] sm:$0xff] }
 0x727   : > { %v8289_v12 = vpop.f32.mrf.mxu3  ;;  %v8157_v45 = vadd.f32 %v8156_v32, %v14339_v16  ;;  %v8590_v9 = vpop.f32.mrf.mxu1 }
 0x729   : > { %v8315_v43 = vadd.f32 %v8289_v12, %v8157_v45  ;;  %10349 = vmatmul.msk.f32.gmra.mxu0 %vm380_vm1, %v14340_v30 }
 0x72a   : > { %10367 = vmatmul.msk.f32.gmra.mxu1 %vm380_vm1, %v9078_v29 }
 0x72b   : > { %v8464_v25 = vadd.f32 %v8438_v47, %v8315_v43  ;;  %10313 = vmatmul.msk.f32.gmra.mxu2 %vm380_vm1, %v13934_v61  ;;  %v14344_v61 = vld [vmem:[#allocation6_spill] sm:$0xff] }
 0x72c   : > { %10331 = vmatmul.msk.f32.gmra.mxu3 %vm380_vm1, %v14341_v59 }
 0x72d   : > { %v14109_v8 = vadd.f32 %v8587_v46, %v8464_v25 }
 0x72e   : > { %v8159_v60 = vpop.f32.mrf.mxu2  ;;  %v8444_v2 = vpop.f32.mrf.mxu0 }
 0x72f   : > { %v8292_v49 = vpop.f32.mrf.mxu3  ;;  %v8160_v34 = vadd.f32 %v8159_v60, %v14342_v40  ;;  %v8593_v51 = vpop.f32.mrf.mxu1 }
 0x731   : > { %v8316_v35 = vadd.f32 %v8292_v49, %v8160_v34  ;;  %10350 = vmatmul.msk.f32.gmra.mxu0 %vm380_vm1, %v14343_v54 }
 0x732   : > { %10368 = vmatmul.msk.f32.gmra.mxu1 %vm380_vm1, %v9079_v11 }
 0x733   : > { %v8465_v19 = vadd.f32 %v8441_v23, %v8316_v35  ;;  %10314 = vmatmul.msk.f32.gmra.mxu2 %vm380_vm1, %v13955_v18 }
 0x734   : > { %10332 = vmatmul.msk.f32.gmra.mxu3 %vm380_vm1, %v14344_v61 }
 0x735   : > { %v14119_v52 = vadd.f32 %v8590_v9, %v8465_v19 }
 0x736   : > { %v8162_v10 = vpop.f32.mrf.mxu2  ;;  %v8447_v31 = vpop.f32.mrf.mxu0 }
 0x737   : > { %v8295_v6 = vpop.f32.mrf.mxu3  ;;  %v8163_v20 = vadd.f32 %v8162_v10, %v14345_v36  ;;  %v8596_v39 = vpop.f32.mrf.mxu1 }
 0x739   : > { %v8317_v37 = vadd.f32 %v8295_v6, %v8163_v20  ;;  %10351 = vmatmul.msk.f32.gmra.mxu0 %vm380_vm1, %v8931_v28 }
 0x73a   : > { %10369 = vmatmul.msk.f32.gmra.mxu1 %vm380_vm1, %v9080_v27 }
 0x73b   : > { %v8466_v18 = vadd.f32 %v8444_v2, %v8317_v37  ;;  %10315 = vmatmul.msk.f32.gmra.mxu2 %vm380_vm1, %v9078_v29 }
 0x73c   : > { %10333 = vmatmul.msk.f32.gmra.mxu3 %vm380_vm1, %v8782_v63 }
 0x73d   : > { %v14126_v26 = vadd.f32 %v8593_v51, %v8466_v18 }
 0x73e   : > { %v8165_v13 = vpop.f32.mrf.mxu2  ;;  %v8450_v42 = vpop.f32.mrf.mxu0 }
 0x73f   : > { %v8298_v50 = vpop.f32.mrf.mxu3  ;;  %v8166_v24 = vadd.f32 %v8165_v13, %v14346_v15  ;;  %v8599_v3 = vpop.f32.mrf.mxu1 }
 0x741   : > { %v8318_v38 = vadd.f32 %v8298_v50, %v8166_v24  ;;  %10352 = vmatmul.msk.f32.gmra.mxu0 %vm380_vm1, %v8932_v22 }
 0x742   : > { %10370 = vmatmul.msk.f32.gmra.mxu1 %vm380_vm1, %v9081_v7 }
 0x743   : > { %v8467_v47 = vadd.f32 %v8447_v31, %v8318_v38  ;;  %10316 = vmatmul.msk.f32.gmra.mxu2 %vm380_vm1, %v9079_v11 }
 0x744   : > { %10334 = vmatmul.msk.f32.gmra.mxu3 %vm380_vm1, %v8783_v4 }
 0x745   : > { %v14133_v46 = vadd.f32 %v8596_v39, %v8467_v47 }
 0x746   : > { %v8168_v33 = vpop.f32.mrf.mxu2  ;;  %v9002_v12 = vpop.f32.mrf.mxu0 }
 0x747   : > { %v8301_v1 = vpop.f32.mrf.mxu3  ;;  %v8169_v32 = vadd.f32 %v8168_v33, %v14347_v55  ;;  %v9151_v16 = vpop.f32.mrf.mxu1 }
 0x749   : > { %v8319_v45 = vadd.f32 %v8301_v1, %v8169_v32 }
 0x74b   : > { %v8468_v23 = vadd.f32 %v8450_v42, %v8319_v45 }
 0x74d   : > { %v14136_v9 = vadd.f32 %v8599_v3, %v8468_v23 }
 0x74e   : > { %v8703_v29 = vpop.f32.mrf.mxu2  ;;  %v9005_v25 = vpop.f32.mrf.mxu0 }
 0x74f   : > { %v8853_v43 = vpop.f32.mrf.mxu3  ;;  %v8751_v30 = vadd.f32 %v8703_v29, %v13989_v57  ;;  %v9154_v59 = vpop.f32.mrf.mxu1 }
 0x751   : > { %v8901_v60 = vadd.f32 %v8853_v43, %v8751_v30 }
 0x753   : > { %v9050_v49 = vadd.f32 %v9002_v12, %v8901_v60 }
 0x755   : > { %v9199_v40 = vadd.f32 %v9151_v16, %v9050_v49  ;;  %v14169_v49 = vld [vmem:[%s14240_s9] ss:$0 sm:$0xff] }
 0x756   : > { %v8706_v34 = vpop.f32.mrf.mxu2  ;;  %v9008_v35 = vpop.f32.mrf.mxu0 }
 0x757   : > { %v8856_v2 = vpop.f32.mrf.mxu3  ;;  %v9215_v51 = vmul.f32 %v13675_v53, %v9199_v40  ;;  %v8752_v11 = vadd.f32 %v8706_v34, %v14000_v14  ;;  %v9157_v54 = vpop.f32.mrf.mxu1 }
 0x759   : > { %v9231_v19 = vadd.f32 %v13684_v5, %v9215_v51  ;;  %v8902_v61 = vadd.f32 %v8856_v2, %v8752_v11 }
 0x75b   : > { %v9247_v10 = vmax.f32 %v9231_v19, 0.0  ;;  %v9051_v57 = vadd.f32 %v9005_v25, %v8902_v61 }
 0x75d   : > { %9263 = vst.msk [vmem:[%s13700_s15 + $0x80] sm:$0xff] %vm380_vm1, %v9247_v10  ;;  %v9200_v6 = vadd.f32 %v9154_v59, %v9051_v57  ;;  %v14162_v59 = vld [vmem:[%s14239_s8] ss:$0 sm:$0xff] }
 0x75e   : > { %v8709_v28 = vpop.f32.mrf.mxu2  ;;  %v9011_v31 = vpop.f32.mrf.mxu0 }
 0x75f   : > { %v8859_v27 = vpop.f32.mrf.mxu3  ;;  %v9216_v36 = vmul.f32 %v13675_v53, %v9200_v6  ;;  %v8753_v20 = vadd.f32 %v8709_v28, %v14011_v0  ;;  %v9160_v39 = vpop.f32.mrf.mxu1 }
 0x761   : > { %v9232_v14 = vadd.f32 %v13684_v5, %v9216_v36  ;;  %v8903_v63 = vadd.f32 %v8859_v27, %v8753_v20 }
 0x763   : > { %v9248_v37 = vmax.f32 %v9232_v14, 0.0  ;;  %v9052_v18 = vadd.f32 %v9008_v35, %v8903_v63 }
 0x765   : > { %9264 = vst.msk [vmem:[%s13700_s15 + $0x88] sm:$0xff] %vm380_vm1, %v9248_v37  ;;  %v9201_v13 = vadd.f32 %v9157_v54, %v9052_v18 }
 0x766   : > { %v8712_v50 = vpop.f32.mrf.mxu2  ;;  %v9014_v24 = vpop.f32.mrf.mxu0 }
 0x767   : > { %v8862_v22 = vpop.f32.mrf.mxu3  ;;  %v9217_v7 = vmul.f32 %v13675_v53, %v9201_v13  ;;  %v8754_v15 = vadd.f32 %v8712_v50, %v14022_v21  ;;  %v9163_v42 = vpop.f32.mrf.mxu1 }
 0x769   : > { %v9233_v0 = vadd.f32 %v13684_v5, %v9217_v7  ;;  %v8904_v3 = vadd.f32 %v8862_v22, %v8754_v15 }
 0x76b   : > { %v9249_v4 = vmax.f32 %v9233_v0, 0.0  ;;  %v9053_v38 = vadd.f32 %v9011_v31, %v8904_v3 }
 0x76d   : > { %9265 = vst.msk [vmem:[%s13700_s15 + $0x90] sm:$0xff] %vm380_vm1, %v9249_v4  ;;  %v9202_v47 = vadd.f32 %v9160_v39, %v9053_v38 }
 0x76e   : > { %v8715_v33 = vpop.f32.mrf.mxu2  ;;  %v9017_v12 = vpop.f32.mrf.mxu0 }
 0x76f   : > { %v8865_v1 = vpop.f32.mrf.mxu3  ;;  %v9218_v55 = vmul.f32 %v13675_v53, %v9202_v47  ;;  %v8755_v32 = vadd.f32 %v8715_v33, %v14033_v41  ;;  %v9166_v16 = vpop.f32.mrf.mxu1 }
 0x771   : > { %v9234_v21 = vadd.f32 %v13684_v5, %v9218_v55  ;;  %v8905_v45 = vadd.f32 %v8865_v1, %v8755_v32 }
 0x773   : > { %v9250_v23 = vmax.f32 %v9234_v21, 0.0  ;;  %v9054_v29 = vadd.f32 %v9014_v24, %v8905_v45 }
 0x775   : > { %9266 = vst.msk [vmem:[%s13700_s15 + $0x98] sm:$0xff] %vm380_vm1, %v9250_v23  ;;  %v9203_v43 = vadd.f32 %v9163_v42, %v9054_v29 }
 0x776   : > { %v8718_v30 = vpop.f32.mrf.mxu2  ;;  %v9020_v60 = vpop.f32.mrf.mxu0 }
 0x777   : > { %v8868_v25 = vpop.f32.mrf.mxu3  ;;  %v9219_v53 = vmul.f32 %v14162_v59, %v9203_v43  ;;  %v8756_v41 = vadd.f32 %v8718_v30, %v14044_v48  ;;  %v9169_v5 = vpop.f32.mrf.mxu1 }
 0x779   : > { %v9235_v40 = vadd.f32 %v14169_v49, %v9219_v53  ;;  %v8906_v34 = vadd.f32 %v8868_v25, %v8756_v41 }
 0x77b   : > { %v9251_v2 = vmax.f32 %v9235_v40, 0.0  ;;  %v9055_v51 = vadd.f32 %v9017_v12, %v8906_v34 }
 0x77d   : > { %9267 = vst.msk [vmem:[%s13700_s15 + $0xa0] sm:$0xff] %vm380_vm1, %v9251_v2  ;;  %v9204_v11 = vadd.f32 %v9166_v16, %v9055_v51 }
 0x77e   : > { %v8721_v35 = vpop.f32.mrf.mxu2  ;;  %v9023_v61 = vpop.f32.mrf.mxu0 }
 0x77f   : > { %v8871_v54 = vpop.f32.mrf.mxu3  ;;  %v9220_v48 = vmul.f32 %v14162_v59, %v9204_v11  ;;  %v8757_v19 = vadd.f32 %v8721_v35, %v14055_v56  ;;  %v9172_v10 = vpop.f32.mrf.mxu1 }
 0x781   : > { %v9236_v57 = vadd.f32 %v14169_v49, %v9220_v48  ;;  %v8907_v6 = vadd.f32 %v8871_v54, %v8757_v19 }
 0x783   : > { %v9252_v28 = vmax.f32 %v9236_v57, 0.0  ;;  %v9056_v27 = vadd.f32 %v9020_v60, %v8907_v6 }
 0x785   : > { %9268 = vst.msk [vmem:[%s13700_s15 + $0xa8] sm:$0xff] %vm380_vm1, %v9252_v28  ;;  %v9205_v36 = vadd.f32 %v9169_v5, %v9056_v27 }
 0x786   : > { %v8724_v20 = vpop.f32.mrf.mxu2  ;;  %v9026_v63 = vpop.f32.mrf.mxu0 }
 0x787   : > { %v8874_v31 = vpop.f32.mrf.mxu3  ;;  %v9221_v39 = vmul.f32 %v14162_v59, %v9205_v36  ;;  %v8758_v14 = vadd.f32 %v8724_v20, %v14066_v58  ;;  %v9175_v37 = vpop.f32.mrf.mxu1 }
 0x789   : > { %v9237_v56 = vadd.f32 %v14169_v49, %v9221_v39  ;;  %v8908_v18 = vadd.f32 %v8874_v31, %v8758_v14 }
 0x78b   : > { %v9253_v13 = vmax.f32 %v9237_v56, 0.0  ;;  %v9057_v50 = vadd.f32 %v9023_v61, %v8908_v18 }
 0x78d   : > { %9269 = vst.msk [vmem:[%s13700_s15 + $0xb0] sm:$0xff] %vm380_vm1, %v9253_v13  ;;  %v9206_v22 = vadd.f32 %v9172_v10, %v9057_v50 }
 0x78e   : > { %v8727_v7 = vpop.f32.mrf.mxu2  ;;  %v9029_v0 = vpop.f32.mrf.mxu0 }
 0x78f   : > { %v8877_v15 = vpop.f32.mrf.mxu3  ;;  %v9222_v24 = vmul.f32 %v14162_v59, %v9206_v22  ;;  %v8759_v42 = vadd.f32 %v8727_v7, %v14077_v44  ;;  %v9178_v3 = vpop.f32.mrf.mxu1 }
 0x791   : > { %v9238_v58 = vadd.f32 %v14169_v49, %v9222_v24  ;;  %v8909_v4 = vadd.f32 %v8877_v15, %v8759_v42 }
 0x793   : > { %v9254_v38 = vmax.f32 %v9238_v58, 0.0  ;;  %v9058_v47 = vadd.f32 %v9026_v63, %v8909_v4 }
 0x795   : > { %9270 = vst.msk [vmem:[%s13700_s15 + $0xb8] sm:$0xff] %vm380_vm1, %v9254_v38  ;;  %v9207_v33 = vadd.f32 %v9175_v37, %v9058_v47 }
 0x796   : > { %v8730_v1 = vpop.f32.mrf.mxu2  ;;  %v9032_v16 = vpop.f32.mrf.mxu0 }
 0x797   : > { %v8880_v55 = vpop.f32.mrf.mxu3  ;;  %v9223_v32 = vmul.f32 %v14162_v59, %v9207_v33  ;;  %v8760_v12 = vadd.f32 %v8730_v1, %v14088_v62  ;;  %v9181_v45 = vpop.f32.mrf.mxu1 }
 0x799   : > { %v9239_v44 = vadd.f32 %v14169_v49, %v9223_v32  ;;  %v8910_v21 = vadd.f32 %v8880_v55, %v8760_v12 }
 0x79b   : > { %v9255_v23 = vmax.f32 %v9239_v44, 0.0  ;;  %v9059_v29 = vadd.f32 %v9029_v0, %v8910_v21 }
 0x79d   : > { %9271 = vst.msk [vmem:[%s13700_s15 + $0xc0] sm:$0xff] %vm380_vm1, %v9255_v23  ;;  %v9208_v43 = vadd.f32 %v9178_v3, %v9059_v29 }
 0x79e   : > { %v8733_v30 = vpop.f32.mrf.mxu2  ;;  %v9035_v5 = vpop.f32.mrf.mxu0 }
 0x79f   : > { %v8883_v25 = vpop.f32.mrf.mxu3  ;;  %v9224_v53 = vmul.f32 %v14162_v59, %v9208_v43  ;;  %v8761_v41 = vadd.f32 %v8733_v30, %v14099_v17  ;;  %v9184_v2 = vpop.f32.mrf.mxu1 }
 0x7a1   : > { %v9240_v60 = vadd.f32 %v14169_v49, %v9224_v53  ;;  %v8911_v62 = vadd.f32 %v8883_v25, %v8761_v41 }
 0x7a3   : > { %v9256_v40 = vmax.f32 %v9240_v60, 0.0  ;;  %v9060_v34 = vadd.f32 %v9032_v16, %v8911_v62 }
 0x7a5   : > { %9272 = vst.msk [vmem:[%s13700_s15 + $0xc8] sm:$0xff] %vm380_vm1, %v9256_v40  ;;  %v9209_v51 = vadd.f32 %v9181_v45, %v9060_v34 }
 0x7a6   : > { %v8736_v11 = vpop.f32.mrf.mxu2  ;;  %v9038_v57 = vpop.f32.mrf.mxu0 }
 0x7a7   : > { %v8886_v35 = vpop.f32.mrf.mxu3  ;;  %v9225_v54 = vmul.f32 %v14162_v59, %v9209_v51  ;;  %v8762_v48 = vadd.f32 %v8736_v11, %v14109_v8  ;;  %v9187_v28 = vpop.f32.mrf.mxu1 }
 0x7a9   : > { %v9241_v19 = vadd.f32 %v14169_v49, %v9225_v54  ;;  %v8912_v17 = vadd.f32 %v8886_v35, %v8762_v48 }
 0x7ab   : > { %v9257_v61 = vmax.f32 %v9241_v19, 0.0  ;;  %v9061_v10 = vadd.f32 %v9035_v5, %v8912_v17 }
 0x7ad   : > { %9273 = vst.msk [vmem:[%s13700_s15 + $0xd0] sm:$0xff] %vm380_vm1, %v9257_v61  ;;  %v9210_v6 = vadd.f32 %v9184_v2, %v9061_v10 }
 0x7ae   : > { %v8739_v27 = vpop.f32.mrf.mxu2  ;;  %v9041_v56 = vpop.f32.mrf.mxu0 }
 0x7af   : > { %v8889_v36 = vpop.f32.mrf.mxu3  ;;  %v9226_v20 = vmul.f32 %v14162_v59, %v9210_v6  ;;  %v8763_v31 = vadd.f32 %v8739_v27, %v14119_v52  ;;  %v9190_v7 = vpop.f32.mrf.mxu1 }
 0x7b1   : > { %v9242_v39 = vadd.f32 %v14169_v49, %v9226_v20  ;;  %v8913_v8 = vadd.f32 %v8889_v36, %v8763_v31 }
 0x7b3   : > { %v9258_v14 = vmax.f32 %v9242_v39, 0.0  ;;  %v9062_v63 = vadd.f32 %v9038_v57, %v8913_v8 }
 0x7b5   : > { %9274 = vst.msk [vmem:[%s13700_s15 + $0xd8] sm:$0xff] %vm380_vm1, %v9258_v14  ;;  %v9211_v37 = vadd.f32 %v9187_v28, %v9062_v63 }
 0x7b6   : > { %v8742_v18 = vpop.f32.mrf.mxu2  ;;  %v9044_v3 = vpop.f32.mrf.mxu0 }
 0x7b7   : > { %v8892_v13 = vpop.f32.mrf.mxu3  ;;  %v9227_v50 = vmul.f32 %v14162_v59, %v9211_v37  ;;  %v8764_v22 = vadd.f32 %v8742_v18, %v14126_v26  ;;  %v9193_v33 = vpop.f32.mrf.mxu1 }
 0x7b9   : > { %v9243_v15 = vadd.f32 %v14169_v49, %v9227_v50  ;;  %v8914_v52 = vadd.f32 %v8892_v13, %v8764_v22 }
 0x7bb   : > { %v9259_v24 = vmax.f32 %v9243_v15, 0.0  ;;  %v9063_v42 = vadd.f32 %v9041_v56, %v8914_v52 }
 0x7bd   : > { %9275 = vst.msk [vmem:[%s13700_s15 + $0xe0] sm:$0xff] %vm380_vm1, %v9259_v24  ;;  %v9212_v0 = vadd.f32 %v9190_v7, %v9063_v42 }
 0x7be   : > { %v8745_v58 = vpop.f32.mrf.mxu2  ;;  %v9047_v23 = vpop.f32.mrf.mxu0 }
 0x7bf   : > { %v8895_v4 = vpop.f32.mrf.mxu3  ;;  %v9228_v38 = vmul.f32 %v14162_v59, %v9212_v0  ;;  %v8765_v47 = vadd.f32 %v8745_v58, %v14133_v46  ;;  %v9196_v43 = vpop.f32.mrf.mxu1 }
 0x7c1   : > { %v9244_v26 = vadd.f32 %v14169_v49, %v9228_v38  ;;  %v8915_v1 = vadd.f32 %v8895_v4, %v8765_v47 }
 0x7c3   : > { %v9260_v55 = vmax.f32 %v9244_v26, 0.0  ;;  %v9064_v32 = vadd.f32 %v9044_v3, %v8915_v1 }
 0x7c5   : > { %9276 = vst.msk [vmem:[%s13700_s15 + $0xe8] sm:$0xff] %vm380_vm1, %v9260_v55  ;;  %v9213_v12 = vadd.f32 %v9193_v33, %v9064_v32 }
 0x7c6   : > { %v8748_v16 = vpop.f32.mrf.mxu2 }
 0x7c7   : > { %v8898_v44 = vpop.f32.mrf.mxu3  ;;  %v9229_v21 = vmul.f32 %v14162_v59, %v9213_v12  ;;  %v8766_v45 = vadd.f32 %v8748_v16, %v14136_v9 }
 0x7c9   : > { %v9245_v46 = vadd.f32 %v14169_v49, %v9229_v21  ;;  %v8916_v29 = vadd.f32 %v8898_v44, %v8766_v45 }
 0x7cb   : > { %v9261_v30 = vmax.f32 %v9245_v46, 0.0  ;;  %v9065_v25 = vadd.f32 %v9047_v23, %v8916_v29 }
 0x7cd   : > { %9277 = vst.msk [vmem:[%s13700_s15 + $0xf0] sm:$0xff] %vm380_vm1, %v9261_v30  ;;  %v9214_v53 = vadd.f32 %v9196_v43, %v9065_v25 }
 0x7cf   : > { %v9230_v41 = vmul.f32 %v14162_v59, %v9214_v53 }
 0x7d1   : > { %v9246_v60 = vadd.f32 %v14169_v49, %v9230_v41 }
 0x7d3   : > { %v9262_v62 = vmax.f32 %v9246_v60, 0.0 }
 0x7d5   : > { %9278 = vst.msk [vmem:[%s13700_s15 + $0xf8] sm:$0xff] %vm380_vm1, %v9262_v62 }
 0x7d6 PF: > { %s20_s13 = sadd.s32 1, %s10401_s13  }
 0x7d7   : > { %p17_p4 = scmp.ge.s32.totalorder %s20_s13, 10  }
 0x7d9   :  { %19 = sbr.rel (!%p17_p4) target bundleno = 1 (0x1), region = 135 }

</bundles_post_ra>
